<compile_context>
chip_gen: v7x
topology: tpu7x:2x2x1
jax: 0.10.0
libtpu: 0.0.40
codegen_flags: <defaults>
</compile_context>

<pallas_src>
import functools

import numpy as np
import jax
import jax.numpy as jnp
from jax.experimental import pallas as pl
from jax.experimental.pallas import tpu as pltpu


def _round_up(x, m):
    return (x + m - 1) // m * m


# --------------------------------------------------------------------------- #
# Kernel: online masked logsumexp + head_extractor + bilinear classifier
# --------------------------------------------------------------------------- #
def _relation_head_kernel(h_ref, left_ref, right_ref, ctx_ref,
                          wh_ref, bh_ref, wc_ref, wl_ref, wr_ref, bc_ref,
                          logits_ref, m_ref, s_ref):
    # Per grid step (b, s):
    #   h_ref        (TB, TS, H) f32   hidden-state tile
    #   left/right   (TB, TS, 1) f32   0/1 masks (lane-broadcast over H)
    #   ctx_ref      (TB, H)     f32   pooled output (context)
    #   wh_ref       (H, H)      bf16  head_extractor weight, stored (in, out)
    #   bh_ref       (1, H)      f32
    #   wc/wl/wr_ref (H, LP)     bf16  row-chunks of the bilinear classifier
    #   bc_ref       (1, LP)     f32
    #   logits_ref   (TB, LP)    f32   resident across the sequence axis
    #   m_ref/s_ref  (2*TB, H)   f32   running max / running sum-of-exp scratch
    #                                  (rows [0:TB] = left path, [TB:2TB] = right)
    si = pl.program_id(1)
    tb = ctx_ref.shape[0]

    @pl.when(si == 0)
    def _init():
        m_ref[...] = jnp.full(m_ref.shape, -jnp.inf, dtype=m_ref.dtype)
        s_ref[...] = jnp.zeros(s_ref.shape, dtype=s_ref.dtype)

    h = h_ref[...]                                           # (TB, TS, H) f32

    def _online_lse_update(row_start, mask):
        rows = pl.ds(row_start, tb)
        x = h * mask                                         # (TB, TS, H)
        m_old = m_ref[rows, :]                               # (TB, H)
        m_new = jnp.maximum(m_old, jnp.max(x, axis=1))       # (TB, H)
        alpha = jnp.exp(m_old - m_new)
        s_ref[rows, :] = (alpha * s_ref[rows, :]
                          + jnp.sum(jnp.exp(x - m_new[:, None, :]), axis=1))
        m_ref[rows, :] = m_new

    # Left then right path, sequentially: only one (TB, TS, H) temp live at a time.
    _online_lse_update(0, left_ref[...])
    _online_lse_update(tb, right_ref[...])

    @pl.when(si == pl.num_programs(1) - 1)
    def _finalize():
        lse = m_ref[...] + jnp.log(s_ref[...])               # (2*TB, H) f32
        # Single extractor matmul: one MXU weight push for both left & right reps.
        reps = jnp.dot(lse.astype(jnp.bfloat16), wh_ref[...],
                       preferred_element_type=jnp.float32) + bh_ref[...]
        left_rep = reps[:tb].astype(jnp.bfloat16)
        right_rep = reps[tb:].astype(jnp.bfloat16)
        # bilinear_classifier(concat([context, left, right])) as split matmuls.
        logits_ref[...] = (
            jnp.dot(ctx_ref[...].astype(jnp.bfloat16), wc_ref[...],
                    preferred_element_type=jnp.float32)
            + jnp.dot(left_rep, wl_ref[...], preferred_element_type=jnp.float32)
            + jnp.dot(right_rep, wr_ref[...], preferred_element_type=jnp.float32)
            + bc_ref[...])


def _pick_seq_tile(S, TB, H, tile_budget_bytes=8 << 20):
    """Largest multiple-of-8 divisor of S whose (TB,TS,H) f32 tile fits the budget;
    falls back to TS == S (block equal to full dim is always layout-legal)."""
    bytes_per_pos = TB * H * 4
    max_ts = max(8, tile_budget_bytes // max(bytes_per_pos, 1))
    if S <= max_ts:
        return S
    ts = (max_ts // 8) * 8
    while ts >= 8:
        if S % ts == 0:
            return ts
        ts -= 8
    return S


def relation_head(last_hidden_state, left_ids, right_ids, context,
                  wh_bf16, b_head, wc_bf16, wl_bf16, wr_bf16, bc_pad,
                  num_labels, *, batch_tile=8):
    B, S, H = last_hidden_state.shape
    LP = wc_bf16.shape[1]
    TB = batch_tile
    Bp = _round_up(B, TB)
    TS = _pick_seq_tile(S, TB, H)

    # Sublane-pad the batch so matmul LHS rows and output stores are full
    # 8-row sublane groups (unmasked vst); padded rows are sliced off below.
    if Bp != B:
        pad_b = Bp - B
        last_hidden_state = jnp.pad(last_hidden_state, ((0, pad_b), (0, 0), (0, 0)))
        left_ids = jnp.pad(left_ids, ((0, pad_b), (0, 0)))
        right_ids = jnp.pad(right_ids, ((0, pad_b), (0, 0)))
        context = jnp.pad(context, ((0, pad_b), (0, 0)))

    left3 = left_ids.astype(jnp.float32).reshape(Bp, S, 1)
    right3 = right_ids.astype(jnp.float32).reshape(Bp, S, 1)

    n_b = Bp // TB
    n_s = S // TS

    # Explicit VMEM budget: double-buffered tiles + resident weights + temps.
    weight_bytes = (H * H + 3 * H * LP) * 2 + (H + LP) * 4          # bf16 W, f32 b
    tile_bytes = TB * TS * H * 4 + 2 * TB * TS * 4 + TB * H * 4 + TB * LP * 4
    scratch_bytes = 2 * (2 * TB * H * 4)
    temp_bytes = 2 * TB * TS * H * 4
    budget = 2 * (weight_bytes + tile_bytes) + scratch_bytes + temp_bytes + (4 << 20)
    vmem_limit = int(min(max(budget, 32 << 20), 48 << 20))          # safe on v5e/v6e/v7x

    logits_pad = pl.pallas_call(
        _relation_head_kernel,
        out_shape=jax.ShapeDtypeStruct((Bp, LP), jnp.float32),
        grid=(n_b, n_s),
        in_specs=[
            pl.BlockSpec((TB, TS, H), lambda b, s: (b, s, 0)),   # hidden states
            pl.BlockSpec((TB, TS, 1), lambda b, s: (b, s, 0)),   # left mask
            pl.BlockSpec((TB, TS, 1), lambda b, s: (b, s, 0)),   # right mask
            pl.BlockSpec((TB, H),     lambda b, s: (b, 0)),      # context
            pl.BlockSpec((H, H),      lambda b, s: (0, 0)),      # head_extractor W (bf16)
            pl.BlockSpec((1, H),      lambda b, s: (0, 0)),      # head_extractor b
            pl.BlockSpec((H, LP),     lambda b, s: (0, 0)),      # classifier W (context rows)
            pl.BlockSpec((H, LP),     lambda b, s: (0, 0)),      # classifier W (left rows)
            pl.BlockSpec((H, LP),     lambda b, s: (0, 0)),      # classifier W (right rows)
            pl.BlockSpec((1, LP),     lambda b, s: (0, 0)),      # classifier b (padded)
        ],
        out_specs=pl.BlockSpec((TB, LP), lambda b, s: (b, 0)),
        scratch_shapes=[pltpu.VMEM((2 * TB, H), jnp.float32),    # running max
                        pltpu.VMEM((2 * TB, H), jnp.float32)],   # running sum-of-exp
        compiler_params=pltpu.CompilerParams(
            dimension_semantics=("parallel", "arbitrary"),
            vmem_limit_bytes=vmem_limit),
    )(last_hidden_state, left3, right3, context,
      wh_bf16, b_head, wc_bf16, wl_bf16, wr_bf16, bc_pad)

    return logits_pad[:B, :num_labels]


# --------------------------------------------------------------------------- #
# Module wrapper
# --------------------------------------------------------------------------- #
def init_params(key, vocab_size, hidden_size, num_labels):
    ks = jax.random.split(key, 7)
    H = hidden_size
    L = num_labels
    LP = _round_up(max(L, 1), 128)
    pad = LP - L

    emb = jax.random.normal(ks[0], (vocab_size, H), jnp.float32) * 0.02
    W_head = jax.random.normal(ks[1], (H, H), jnp.float32) * 0.02      # stored (in, out)
    b_head = jax.random.normal(ks[2], (1, H), jnp.float32) * 0.02
    W_tail = jax.random.normal(ks[3], (H, H), jnp.float32) * 0.02      # unused in forward
    b_tail = jax.random.normal(ks[4], (1, H), jnp.float32) * 0.02      # (matches reference)
    W_cls = jax.random.normal(ks[5], (3 * H, L), jnp.float32) * 0.02
    b_cls = jax.random.normal(ks[6], (1, L), jnp.float32) * 0.02

    # Kernel-ready weights: pre-split, lane-padded, bf16 — done ONCE here.
    return {
        "emb": emb,
        "W_head_bf16": W_head.astype(jnp.bfloat16),
        "b_head": b_head,
        "W_tail_bf16": W_tail.astype(jnp.bfloat16),
        "b_tail": b_tail,
        "Wc_bf16": jnp.pad(W_cls[:H], ((0, 0), (0, pad))).astype(jnp.bfloat16),
        "Wl_bf16": jnp.pad(W_cls[H:2 * H], ((0, 0), (0, pad))).astype(jnp.bfloat16),
        "Wr_bf16": jnp.pad(W_cls[2 * H:], ((0, 0), (0, pad))).astype(jnp.bfloat16),
        "b_cls_pad": jnp.pad(b_cls, ((0, 0), (0, pad))),
    }


def bert_relation_forward(params, input_ids, attention_mask=None, labels=None,
                          valid_ids=None, label_mask=None,
                          left_ids=None, right_ids=None, *, num_labels):
    # --- stand-in encoder for self.model(input_ids, attention_mask) ---
    last_hidden_state = params["emb"][input_ids]             # (B, S, H)
    pooled_output = jnp.tanh(last_hidden_state[:, 0])        # stand-in pooler_output
    context = pooled_output                                  # Dropout(0.1) == identity

    logits = relation_head(last_hidden_state, left_ids, right_ids, context,
                           params["W_head_bf16"], params["b_head"],
                           params["Wc_bf16"], params["Wl_bf16"], params["Wr_bf16"],
                           params["b_cls_pad"], num_labels)

    loss = None
    if labels is not None:                                   # BCEWithLogitsLoss (plain JAX)
        x = logits
        y = labels.astype(jnp.float32)
        loss = jnp.mean(jnp.maximum(x, 0.0) - x * y + jnp.log1p(jnp.exp(-jnp.abs(x))))
    # matches: return (loss, output if loss is not None else output)
    return loss, logits


# --------------------------------------------------------------------------- #
if __name__ == "__main__":
    B, S, H, L, VOCAB = 2, 16, 768, 5, 100

    key = jax.random.PRNGKey(0)
    kp, ki, kl, kr = jax.random.split(key, 4)

    params = init_params(kp, VOCAB, H, L)
    input_ids = jax.random.randint(ki, (B, S), 0, VOCAB, dtype=jnp.int32)
    attention_mask = jnp.ones((B, S), jnp.int32)
    left_ids = (jax.random.uniform(kl, (B, S)) < 0.3).astype(jnp.float32)
    right_ids = (jax.random.uniform(kr, (B, S)) < 0.3).astype(jnp.float32)

    fwd = jax.jit(functools.partial(bert_relation_forward, num_labels=L))
    loss, logits = fwd(params, input_ids, attention_mask, None, None, None,
                       left_ids, right_ids)
    jax.block_until_ready(logits)

    # ------------- numpy reference for the Pallas hot path -------------------
    # Uses the stored (bf16-quantized) weights cast back to f32 so the check is
    # apples-to-apples with the kernel's bf16-operand / f32-accumulate matmuls.
    lhs_np = np.asarray(params["emb"])[np.asarray(input_ids)]           # (B, S, H)
    pooled_np = np.tanh(lhs_np[:, 0])

    def np_lse(x, axis):
        m = x.max(axis=axis, keepdims=True)
        return np.log(np.exp(x - m).sum(axis=axis)) + np.squeeze(m, axis=axis)

    Wh = np.asarray(params["W_head_bf16"].astype(jnp.float32))
    bh = np.asarray(params["b_head"])
    Wc = np.asarray(params["Wc_bf16"].astype(jnp.float32))[:, :L]
    Wl = np.asarray(params["Wl_bf16"].astype(jnp.float32))[:, :L]
    Wr = np.asarray(params["Wr_bf16"].astype(jnp.float32))[:, :L]
    bc = np.asarray(params["b_cls_pad"])[:, :L]

    lm = np.asarray(left_ids)[:, :, None]
    rm = np.asarray(right_ids)[:, :, None]
    left_rep = np_lse(lhs_np * lm, 1) @ Wh + bh
    right_rep = np_lse(lhs_np * rm, 1) @ Wh + bh
    logits_ref = pooled_np @ Wc + left_rep @ Wl + right_rep @ Wr + bc   # (B, L)

    assert loss is None
    assert logits.shape == (B, L)
    np.testing.assert_allclose(np.asarray(logits), logits_ref, atol=4e-2, rtol=4e-2)

    print("KERNEL_OK")
</pallas_src>

<mosaic_0001>
module attributes {stable_mosaic.version = 11 : i64} {
  func.func @_relation_head_kernel(%arg0: i32, %arg1: i32, %arg2: memref<8x16x768xf32, #tpu.memory_space<vmem>>, %arg3: memref<8x16x1xf32, #tpu.memory_space<vmem>>, %arg4: memref<8x16x1xf32, #tpu.memory_space<vmem>>, %arg5: memref<8x768xf32, #tpu.memory_space<vmem>>, %arg6: memref<768x768xbf16, #tpu.memory_space<vmem>>, %arg7: memref<1x768xf32, #tpu.memory_space<vmem>>, %arg8: memref<768x128xbf16, #tpu.memory_space<vmem>>, %arg9: memref<768x128xbf16, #tpu.memory_space<vmem>>, %arg10: memref<768x128xbf16, #tpu.memory_space<vmem>>, %arg11: memref<1x128xf32, #tpu.memory_space<vmem>>, %arg12: memref<8x128xf32, #tpu.memory_space<vmem>>, %arg13: memref<16x768xf32, #tpu.memory_space<vmem>>, %arg14: memref<16x768xf32, #tpu.memory_space<vmem>>) attributes {dimension_semantics = [#tpu.dimension_semantics<parallel>, #tpu.dimension_semantics<arbitrary>], iteration_bounds = array<i64: 1, 1>, scalar_prefetch = 0 : i64, scratch_operands = 2 : i64, tpu.core_type = #tpu.core_type<tc>, window_params = [{transform_indices = @transform_0, window_bounds = array<i64: 8, 16, 768>}, {transform_indices = @transform_1, window_bounds = array<i64: 8, 16, 1>}, {transform_indices = @transform_2, window_bounds = array<i64: 8, 16, 1>}, {transform_indices = @transform_3, window_bounds = array<i64: 8, 768>}, {pipeline_mode = #tpu.pipeline_mode<synchronous>, transform_indices = @transform_4, window_bounds = array<i64: 768, 768>}, {pipeline_mode = #tpu.pipeline_mode<synchronous>, transform_indices = @transform_5, window_bounds = array<i64: 1, 768>}, {pipeline_mode = #tpu.pipeline_mode<synchronous>, transform_indices = @transform_6, window_bounds = array<i64: 768, 128>}, {pipeline_mode = #tpu.pipeline_mode<synchronous>, transform_indices = @transform_7, window_bounds = array<i64: 768, 128>}, {pipeline_mode = #tpu.pipeline_mode<synchronous>, transform_indices = @transform_8, window_bounds = array<i64: 768, 128>}, {pipeline_mode = #tpu.pipeline_mode<synchronous>, transform_indices = @transform_9, window_bounds = array<i64: 1, 128>}, {transform_indices = @transform_10, window_bounds = array<i64: 8, 128>}]} {
    %c0_i32 = arith.constant 0 : i32
    %0 = arith.cmpi eq, %arg1, %c0_i32 : i32
    %1 = arith.extui %0 : i1 to i32
    %c0_i32_0 = arith.constant 0 : i32
    %2 = arith.cmpi ne, %1, %c0_i32_0 : i32
    scf.if %2 {
      %cst_29 = arith.constant 0xFF800000 : f32
      %43 = vector.broadcast %cst_29 : f32 to vector<16x768xf32>
      %c0_30 = arith.constant 0 : index
      %c0_31 = arith.constant 0 : index
      %44 = vector.load %arg13[%c0_30, %c0_31] : memref<16x768xf32, #tpu.memory_space<vmem>>, vector<16x768xf32>
      tpu.vector_store %arg13[%c0_30, %c0_31], %43 {strides = array<i32>} : memref<16x768xf32, #tpu.memory_space<vmem>>, vector<16x768xf32>,
      %cst_32 = arith.constant 0.000000e+00 : f32
      %45 = vector.broadcast %cst_32 : f32 to vector<16x768xf32>
      %c0_33 = arith.constant 0 : index
      %c0_34 = arith.constant 0 : index
      %46 = vector.load %arg14[%c0_33, %c0_34] : memref<16x768xf32, #tpu.memory_space<vmem>>, vector<16x768xf32>
      tpu.vector_store %arg14[%c0_33, %c0_34], %45 {strides = array<i32>} : memref<16x768xf32, #tpu.memory_space<vmem>>, vector<16x768xf32>,
    } else {
    }
    %c0 = arith.constant 0 : index
    %c0_1 = arith.constant 0 : index
    %c0_2 = arith.constant 0 : index
    %3 = vector.load %arg2[%c0, %c0_1, %c0_2] : memref<8x16x768xf32, #tpu.memory_space<vmem>>, vector<8x16x768xf32>
    %c0_3 = arith.constant 0 : index
    %c0_4 = arith.constant 0 : index
    %c0_5 = arith.constant 0 : index
    %4 = vector.load %arg3[%c0_3, %c0_4, %c0_5] : memref<8x16x1xf32, #tpu.memory_space<vmem>>, vector<8x16x1xf32>
    %5 = vector.broadcast %4 : vector<8x16x1xf32> to vector<8x16x768xf32>
    %6 = arith.mulf %3, %5 : vector<8x16x768xf32>
    %c0_6 = arith.constant 0 : index
    %c0_7 = arith.constant 0 : index
    %7 = vector.load %arg13[%c0_6, %c0_7] : memref<16x768xf32, #tpu.memory_space<vmem>>, vector<8x768xf32>
    %cst = arith.constant dense<0xFF800000> : vector<8x768xf32>
    %8 = vector.multi_reduction <maximumf>, %6, %cst [1] : vector<8x16x768xf32> to vector<8x768xf32>
    %9 = arith.maximumf %7, %8 : vector<8x768xf32>
    %10 = arith.subf %7, %9 : vector<8x768xf32>
    %11 = math.exp %10 : vector<8x768xf32>
    %c0_8 = arith.constant 0 : index
    %c0_9 = arith.constant 0 : index
    %12 = vector.load %arg14[%c0_8, %c0_9] : memref<16x768xf32, #tpu.memory_space<vmem>>, vector<8x768xf32>
    %13 = arith.mulf %11, %12 : vector<8x768xf32>
    %14 = vector.shape_cast %9 : vector<8x768xf32> to vector<8x1x768xf32>
    %15 = vector.broadcast %14 : vector<8x1x768xf32> to vector<8x16x768xf32>
    %16 = arith.subf %6, %15 : vector<8x16x768xf32>
    %17 = math.exp %16 : vector<8x16x768xf32>
    %cst_10 = arith.constant dense<0.000000e+00> : vector<8x768xf32>
    %18 = vector.multi_reduction <add>, %17, %cst_10 [1] : vector<8x16x768xf32> to vector<8x768xf32>
    %19 = arith.addf %13, %18 : vector<8x768xf32>
    %c0_11 = arith.constant 0 : index
    %c0_12 = arith.constant 0 : index
    %20 = vector.load %arg14[%c0_11, %c0_12] : memref<16x768xf32, #tpu.memory_space<vmem>>, vector<8x768xf32>
    tpu.vector_store %arg14[%c0_11, %c0_12], %19 {strides = array<i32>} : memref<16x768xf32, #tpu.memory_space<vmem>>, vector<8x768xf32>,
    %c0_13 = arith.constant 0 : index
    %c0_14 = arith.constant 0 : index
    %21 = vector.load %arg13[%c0_13, %c0_14] : memref<16x768xf32, #tpu.memory_space<vmem>>, vector<8x768xf32>
    tpu.vector_store %arg13[%c0_13, %c0_14], %9 {strides = array<i32>} : memref<16x768xf32, #tpu.memory_space<vmem>>, vector<8x768xf32>,
    %c0_15 = arith.constant 0 : index
    %c0_16 = arith.constant 0 : index
    %c0_17 = arith.constant 0 : index
    %22 = vector.load %arg4[%c0_15, %c0_16, %c0_17] : memref<8x16x1xf32, #tpu.memory_space<vmem>>, vector<8x16x1xf32>
    %23 = vector.broadcast %22 : vector<8x16x1xf32> to vector<8x16x768xf32>
    %24 = arith.mulf %3, %23 : vector<8x16x768xf32>
    %c8 = arith.constant 8 : index
    %c0_18 = arith.constant 0 : index
    %25 = vector.load %arg13[%c8, %c0_18] : memref<16x768xf32, #tpu.memory_space<vmem>>, vector<8x768xf32>
    %cst_19 = arith.constant dense<0xFF800000> : vector<8x768xf32>
    %26 = vector.multi_reduction <maximumf>, %24, %cst_19 [1] : vector<8x16x768xf32> to vector<8x768xf32>
    %27 = arith.maximumf %25, %26 : vector<8x768xf32>
    %28 = arith.subf %25, %27 : vector<8x768xf32>
    %29 = math.exp %28 : vector<8x768xf32>
    %c8_20 = arith.constant 8 : index
    %c0_21 = arith.constant 0 : index
    %30 = vector.load %arg14[%c8_20, %c0_21] : memref<16x768xf32, #tpu.memory_space<vmem>>, vector<8x768xf32>
    %31 = arith.mulf %29, %30 : vector<8x768xf32>
    %32 = vector.shape_cast %27 : vector<8x768xf32> to vector<8x1x768xf32>
    %33 = vector.broadcast %32 : vector<8x1x768xf32> to vector<8x16x768xf32>
    %34 = arith.subf %24, %33 : vector<8x16x768xf32>
    %35 = math.exp %34 : vector<8x16x768xf32>
    %cst_22 = arith.constant dense<0.000000e+00> : vector<8x768xf32>
    %36 = vector.multi_reduction <add>, %35, %cst_22 [1] : vector<8x16x768xf32> to vector<8x768xf32>
    %37 = arith.addf %31, %36 : vector<8x768xf32>
    %c8_23 = arith.constant 8 : index
    %c0_24 = arith.constant 0 : index
    %38 = vector.load %arg14[%c8_23, %c0_24] : memref<16x768xf32, #tpu.memory_space<vmem>>, vector<8x768xf32>
    tpu.vector_store %arg14[%c8_23, %c0_24], %37 {strides = array<i32>} : memref<16x768xf32, #tpu.memory_space<vmem>>, vector<8x768xf32>,
    %c8_25 = arith.constant 8 : index
    %c0_26 = arith.constant 0 : index
    %39 = vector.load %arg13[%c8_25, %c0_26] : memref<16x768xf32, #tpu.memory_space<vmem>>, vector<8x768xf32>
    tpu.vector_store %arg13[%c8_25, %c0_26], %27 {strides = array<i32>} : memref<16x768xf32, #tpu.memory_space<vmem>>, vector<8x768xf32>,
    %c0_i32_27 = arith.constant 0 : i32
    %40 = arith.cmpi eq, %arg1, %c0_i32_27 : i32
    %41 = arith.extui %40 : i1 to i32
    %c0_i32_28 = arith.constant 0 : i32
    %42 = arith.cmpi ne, %41, %c0_i32_28 : i32
    scf.if %42 {
      %c0_29 = arith.constant 0 : index
      %c0_30 = arith.constant 0 : index
      %43 = vector.load %arg13[%c0_29, %c0_30] : memref<16x768xf32, #tpu.memory_space<vmem>>, vector<16x768xf32>
      %c0_31 = arith.constant 0 : index
      %c0_32 = arith.constant 0 : index
      %44 = vector.load %arg14[%c0_31, %c0_32] : memref<16x768xf32, #tpu.memory_space<vmem>>, vector<16x768xf32>
      %45 = math.log %44 : vector<16x768xf32>
      %46 = arith.addf %43, %45 : vector<16x768xf32>
      %47 = arith.truncf %46 : vector<16x768xf32> to vector<16x768xbf16>
      %c0_33 = arith.constant 0 : index
      %c0_34 = arith.constant 0 : index
      %48 = vector.load %arg6[%c0_33, %c0_34] : memref<768x768xbf16, #tpu.memory_space<vmem>>, vector<768x768xbf16>
      %cst_35 = arith.constant dense<0.000000e+00> : vector<16x768xf32>
      %49 = tpu.matmul %47, %48, %cst_35 {dimension_numbers = #tpu.dot_dimension_numbers<[1], [0], [0], [1], [0, 0, 1, 1], [], []>} : vector<16x768xbf16>, vector<768x768xbf16>, vector<16x768xf32> -> vector<16x768xf32>
      %c0_36 = arith.constant 0 : index
      %c0_37 = arith.constant 0 : index
      %50 = vector.load %arg7[%c0_36, %c0_37] : memref<1x768xf32, #tpu.memory_space<vmem>>, vector<1x768xf32>
      %51 = vector.broadcast %50 : vector<1x768xf32> to vector<16x768xf32>
      %52 = arith.addf %49, %51 : vector<16x768xf32>
      %53 = vector.extract_strided_slice %52 {offsets = [0, 0], sizes = [8, 768], strides = [1, 1]} : vector<16x768xf32> to vector<8x768xf32>
      %54 = arith.truncf %53 : vector<8x768xf32> to vector<8x768xbf16>
      %55 = vector.extract_strided_slice %52 {offsets = [8, 0], sizes = [8, 768], strides = [1, 1]} : vector<16x768xf32> to vector<8x768xf32>
      %56 = arith.truncf %55 : vector<8x768xf32> to vector<8x768xbf16>
      %c0_38 = arith.constant 0 : index
      %c0_39 = arith.constant 0 : index
      %57 = vector.load %arg5[%c0_38, %c0_39] : memref<8x768xf32, #tpu.memory_space<vmem>>, vector<8x768xf32>
      %58 = arith.truncf %57 : vector<8x768xf32> to vector<8x768xbf16>
      %c0_40 = arith.constant 0 : index
      %c0_41 = arith.constant 0 : index
      %59 = vector.load %arg8[%c0_40, %c0_41] : memref<768x128xbf16, #tpu.memory_space<vmem>>, vector<768x128xbf16>
      %cst_42 = arith.constant dense<0.000000e+00> : vector<8x128xf32>
      %60 = tpu.matmul %58, %59, %cst_42 {dimension_numbers = #tpu.dot_dimension_numbers<[1], [0], [0], [1], [0, 0, 1, 1], [], []>} : vector<8x768xbf16>, vector<768x128xbf16>, vector<8x128xf32> -> vector<8x128xf32>
      %c0_43 = arith.constant 0 : index
      %c0_44 = arith.constant 0 : index
      %61 = vector.load %arg9[%c0_43, %c0_44] : memref<768x128xbf16, #tpu.memory_space<vmem>>, vector<768x128xbf16>
      %cst_45 = arith.constant dense<0.000000e+00> : vector<8x128xf32>
      %62 = tpu.matmul %54, %61, %cst_45 {dimension_numbers = #tpu.dot_dimension_numbers<[1], [0], [0], [1], [0, 0, 1, 1], [], []>} : vector<8x768xbf16>, vector<768x128xbf16>, vector<8x128xf32> -> vector<8x128xf32>
      %63 = arith.addf %60, %62 : vector<8x128xf32>
      %c0_46 = arith.constant 0 : index
      %c0_47 = arith.constant 0 : index
      %64 = vector.load %arg10[%c0_46, %c0_47] : memref<768x128xbf16, #tpu.memory_space<vmem>>, vector<768x128xbf16>
      %cst_48 = arith.constant dense<0.000000e+00> : vector<8x128xf32>
      %65 = tpu.matmul %56, %64, %cst_48 {dimension_numbers = #tpu.dot_dimension_numbers<[1], [0], [0], [1], [0, 0, 1, 1], [], []>} : vector<8x768xbf16>, vector<768x128xbf16>, vector<8x128xf32> -> vector<8x128xf32>
      %66 = arith.addf %63, %65 : vector<8x128xf32>
      %c0_49 = arith.constant 0 : index
      %c0_50 = arith.constant 0 : index
      %67 = vector.load %arg11[%c0_49, %c0_50] : memref<1x128xf32, #tpu.memory_space<vmem>>, vector<1x128xf32>
      %68 = vector.broadcast %67 : vector<1x128xf32> to vector<8x128xf32>
      %69 = arith.addf %66, %68 : vector<8x128xf32>
      %c0_51 = arith.constant 0 : index
      %c0_52 = arith.constant 0 : index
      %70 = vector.load %arg12[%c0_51, %c0_52] : memref<8x128xf32, #tpu.memory_space<vmem>>, vector<8x128xf32>
      tpu.vector_store %arg12[%c0_51, %c0_52], %69 {strides = array<i32>} : memref<8x128xf32, #tpu.memory_space<vmem>>, vector<8x128xf32>,
    } else {
    }
    return
  }
  func.func @transform_0(%arg0: i32, %arg1: i32) -> (i32, i32, i32) {
    %c0_i32 = arith.constant 0 : i32
    %c0_i32_0 = arith.constant 0 : i32
    return %arg0, %arg1, %c0_i32 : i32, i32, i32
  }
  func.func @transform_1(%arg0: i32, %arg1: i32) -> (i32, i32, i32) {
    %c0_i32 = arith.constant 0 : i32
    %c0_i32_0 = arith.constant 0 : i32
    return %arg0, %arg1, %c0_i32 : i32, i32, i32
  }
  func.func @transform_2(%arg0: i32, %arg1: i32) -> (i32, i32, i32) {
    %c0_i32 = arith.constant 0 : i32
    %c0_i32_0 = arith.constant 0 : i32
    return %arg0, %arg1, %c0_i32 : i32, i32, i32
  }
  func.func @transform_3(%arg0: i32, %arg1: i32) -> (i32, i32) {
    %c0_i32 = arith.constant 0 : i32
    %c0_i32_0 = arith.constant 0 : i32
    return %arg0, %c0_i32 : i32, i32
  }
  func.func @transform_4(%arg0: i32, %arg1: i32) -> (i32, i32) {
    %c0_i32 = arith.constant 0 : i32
    %c0_i32_0 = arith.constant 0 : i32
    %c0_i32_1 = arith.constant 0 : i32
    return %c0_i32, %c0_i32_0 : i32, i32
  }
  func.func @transform_5(%arg0: i32, %arg1: i32) -> (i32, i32) {
    %c0_i32 = arith.constant 0 : i32
    %c0_i32_0 = arith.constant 0 : i32
    %c0_i32_1 = arith.constant 0 : i32
    return %c0_i32, %c0_i32_0 : i32, i32
  }
  func.func @transform_6(%arg0: i32, %arg1: i32) -> (i32, i32) {
    %c0_i32 = arith.constant 0 : i32
    %c0_i32_0 = arith.constant 0 : i32
    %c0_i32_1 = arith.constant 0 : i32
    return %c0_i32, %c0_i32_0 : i32, i32
  }
  func.func @transform_7(%arg0: i32, %arg1: i32) -> (i32, i32) {
    %c0_i32 = arith.constant 0 : i32
    %c0_i32_0 = arith.constant 0 : i32
    %c0_i32_1 = arith.constant 0 : i32
    return %c0_i32, %c0_i32_0 : i32, i32
  }
  func.func @transform_8(%arg0: i32, %arg1: i32) -> (i32, i32) {
    %c0_i32 = arith.constant 0 : i32
    %c0_i32_0 = arith.constant 0 : i32
    %c0_i32_1 = arith.constant 0 : i32
    return %c0_i32, %c0_i32_0 : i32, i32
  }
  func.func @transform_9(%arg0: i32, %arg1: i32) -> (i32, i32) {
    %c0_i32 = arith.constant 0 : i32
    %c0_i32_0 = arith.constant 0 : i32
    %c0_i32_1 = arith.constant 0 : i32
    return %c0_i32, %c0_i32_0 : i32, i32
  }
  func.func @transform_10(%arg0: i32, %arg1: i32) -> (i32, i32) {
    %c0_i32 = arith.constant 0 : i32
    %c0_i32_0 = arith.constant 0 : i32
    return %arg0, %c0_i32 : i32, i32
  }
}

</mosaic_0001>

<bundles_post_ra>
// kernel: bert_relation_forward.1
= control target key start
LH: loop header
LB: loop body
LE: loop exit
PB: predicated region body
PF: predicated region fallthrough
CT: control target
= control target key end

     0   :  { %15 = vsyncpa [#allocation5], 0  ;;  %s9190_s13 = smov [#allocation4]   ;;  %s14180_s0 = inlined_call_operand.vmem [shape: f32[8,16,768], index: 0, kind: input, shape index: {}]   ;;  %s14181_s1 = inlined_call_operand.vmem [shape: f32[8,16,1], index: 1, kind: input, shape index: {}]   ;;  %s14182_s2 = inlined_call_operand.vmem [shape: f32[8,16,1], index: 2, kind: input, shape index: {}]   ;;  %s14183_s3 = inlined_call_operand.vmem [shape: f32[8,768], index: 3, kind: input, shape index: {}]   ;;  %s14184_s4 = inlined_call_operand.vmem [shape: bf16[768,768], index: 4, kind: input, shape index: {}]   ;;  %s14185_s5 = inlined_call_operand.vmem [shape: f32[1,768], index: 5, kind: input, shape index: {}]   ;;  %s14186_s6 = inlined_call_operand.vmem [shape: bf16[768,128], index: 6, kind: input, shape index: {}]   ;;  %s14187_s7 = inlined_call_operand.vmem [shape: bf16[768,128], index: 7, kind: input, shape index: {}]   ;;  %s14188_s8 = inlined_call_operand.hbm [shape: bf16[768,128], index: 8, kind: input, shape index: {}]   ;;  %s14189_s9 = inlined_call_operand.vmem [shape: f32[1,128], index: 9, kind: input, shape index: {}]   ;;  %s14190_s10 = inlined_call_operand.vmem [shape: f32[8,128], index: 10, kind: output, shape index: {}]  }
   0x1   :  { %s37_s14 = sshll.u32 %s9190_s13, 4  ;;  %s9166_s17 = scalar_lea.hbm %s14188_s8, 6144  ;;  %s38_s14 = int_to_ptr.vmem [resolvable:$true] %s37_s14 }
   0x2   :  { %p9167_p0 = scmp.ne.s32.totalorder %s14188_s8, %s9166_s17  ;;  %p9170_p1 = scmp.lt.u32.totalorder %s9166_s17, %s14188_s8 }
   0x4   :  { %p9172_p2 = pnand %p9170_p1, %p9167_p0 }
   0x6   :  { %9175 = shalt.err (!%p9172_p2)
}
   0x7   :  { %s9176_s22 = scalar_lea.vmem %s38_s14, 6144  ;;  %p9181_p4 = scmp.lt.s32.totalorder %s38_s14, %s38_s14 }
   0x8   :  { %p9177_p3 = scmp.ne.s32.totalorder %s38_s14, %s9176_s22  ;;  %p9182_p5 = scmp.lt.s32.totalorder %s9176_s22, %s9176_s22 }
   0xa   :  { %p9183_p6 = por %p9182_p5, %p9181_p4 }
   0xc   :  { %p9184_p7 = pnand %p9183_p6, %p9177_p3 }
   0xe   :  { %9187 = shalt.err (!%p9184_p7)
}
   0xf   :  { %s9191_s23 = smov 64   ;;  %s9192_s24 = smov 4  }
  0x10   :  { %43 = dma.hbm_to_vmem [thread:$0]  %s14188_s8, 6144, %s38_s14, [#allocation5], %s9191_s23, %s9191_s23, %s9192_s24  }
  0x11   :  { %9188 = dma.done.wait [#allocation5], 6144  }
  0x12   :  { %9189 = vsyncadd [#allocation5], 4294961152  ;;  %v9193_v0 = vmov 0   ;;  %v176_v1 = vld [vmem:[%s14181_s1 + $0x10] sm:$0xff]  ;;  %v174_v2 = vld [vmem:[%s14181_s1] sm:$0xff]  ;;  %vm756_vm0 = vcmask 1041409  }
  0x13   :  { %8157 = vset.pattern.permute.xlu1 %v9193_v0  ;;  %8156 = vset.pattern.permute.xlu0 %v9193_v0  ;;  %v177_v3 = vld [vmem:[%s14181_s1 + $0x18] sm:$0xff]  ;;  %v175_v4 = vld [vmem:[%s14181_s1 + $0x8] sm:$0xff]  ;;  %v1949_v6 = vld [vmem:[%s14182_s2] sm:$0xff]  ;;  %vm758_vm1 = vcmask 1042434   ;;  %vm760_vm2 = vcmask 1043459   ;;  %vm762_vm3 = vcmask 1044484  }
  0x14   :  { %202 = vperm.xlu1 %8157, %v176_v1   ;;  %192 = vperm.xlu0 %8156, %v174_v2   ;;  %v1950_v5 = vld [vmem:[%s14182_s2 + $0x8] sm:$0xff]  ;;  %v1952_v7 = vld [vmem:[%s14182_s2 + $0x18] sm:$0xff]  ;;  %v1951_v8 = vld [vmem:[%s14182_s2 + $0x10] sm:$0xff]  ;;  %vm764_vm4 = vcmask 1045509   ;;  %vm766_vm5 = vcmask 1046534   ;;  %vm768_vm6 = vcmask 1047559  }
  0x15   :  { %v179_v9 = vld [vmem:[%s14181_s1 + $0x28] sm:$0xff]  ;;  %v178_v10 = vld [vmem:[%s14181_s1 + $0x20] sm:$0xff]  ;;  %v181_v13 = vld [vmem:[%s14181_s1 + $0x38] sm:$0xff] }
  0x16   :  { %v1954_v11 = vld [vmem:[%s14182_s2 + $0x28] sm:$0xff]  ;;  %v1953_v12 = vld [vmem:[%s14182_s2 + $0x20] sm:$0xff]  ;;  %v180_v14 = vld [vmem:[%s14181_s1 + $0x30] sm:$0xff] }
  0x17   :  { %v1956_v15 = vld [vmem:[%s14182_s2 + $0x38] sm:$0xff]  ;;  %v1955_v16 = vld [vmem:[%s14182_s2 + $0x30] sm:$0xff]  ;;  %v183_v17 = vld [vmem:[%s14181_s1 + $0x48] sm:$0xff] }
  0x18   :  { %207 = vperm.xlu1 %8157, %v177_v3   ;;  %197 = vperm.xlu0 %8156, %v175_v4   ;;  %v182_v18 = vld [vmem:[%s14181_s1 + $0x40] sm:$0xff]  ;;  %v1958_v19 = vld [vmem:[%s14182_s2 + $0x48] sm:$0xff]  ;;  %v185_v21 = vld [vmem:[%s14181_s1 + $0x58] sm:$0xff] }
  0x19   :  { %v1957_v20 = vld [vmem:[%s14182_s2 + $0x40] sm:$0xff]  ;;  %v184_v22 = vld [vmem:[%s14181_s1 + $0x50] sm:$0xff]  ;;  %v1960_v23 = vld [vmem:[%s14182_s2 + $0x58] sm:$0xff] }
  0x1a   :  { %v1959_v24 = vld [vmem:[%s14182_s2 + $0x50] sm:$0xff]  ;;  %v187_v25 = vld [vmem:[%s14181_s1 + $0x68] sm:$0xff]  ;;  %v186_v26 = vld [vmem:[%s14181_s1 + $0x60] sm:$0xff] }
  0x1b   :  { %v1962_v27 = vld [vmem:[%s14182_s2 + $0x68] sm:$0xff]  ;;  %v1961_v28 = vld [vmem:[%s14182_s2 + $0x60] sm:$0xff]  ;;  %v189_v29 = vld [vmem:[%s14181_s1 + $0x78] sm:$0xff] }
  0x1c   :  { %1972 = vperm.xlu1 %8157, %v1950_v5   ;;  %1967 = vperm.xlu0 %8156, %v1949_v6   ;;  %v188_v30 = vld [vmem:[%s14181_s1 + $0x70] sm:$0xff]  ;;  %v1964_v31 = vld [vmem:[%s14182_s2 + $0x78] sm:$0xff]  ;;  %v9361_v33 = vld [vmem:[%s14180_s0 + $0x60] sm:$0xff] }
  0x1d   :  { %v1963_v32 = vld [vmem:[%s14182_s2 + $0x70] sm:$0xff]  ;;  %v9366_v34 = vld [vmem:[%s14180_s0 + $0x68] sm:$0xff]  ;;  %v9376_v36 = vld [vmem:[%s14180_s0 + $0x78] sm:$0xff] }
  0x1e   :  { %v9371_v35 = vld [vmem:[%s14180_s0 + $0x70] sm:$0xff]  ;;  %v9381_v37 = vld [vmem:[%s14180_s0 + $0x80] sm:$0xff]  ;;  %v9386_v38 = vld [vmem:[%s14180_s0 + $0x88] sm:$0xff] }
  0x1f   :  { %v9391_v39 = vld [vmem:[%s14180_s0] sm:$0xff]  ;;  %v9396_v40 = vld [vmem:[%s14180_s0 + $0x8] sm:$0xff]  ;;  %v9403_v43 = vld [vmem:[%s14180_s0 + $0x90] sm:$0xff] }
  0x20   :  { %1982 = vperm.xlu1 %8157, %v1952_v7   ;;  %1977 = vperm.xlu0 %8156, %v1951_v8   ;;  %v9408_v44 = vld [vmem:[%s14180_s0 + $0x98] sm:$0xff]  ;;  %v9413_v45 = vld [vmem:[%s14180_s0 + $0xa0] sm:$0xff]  ;;  %v9418_v46 = vld [vmem:[%s14180_s0 + $0xa8] sm:$0xff] }
  0x21   :  { %v9423_v47 = vld [vmem:[%s14180_s0 + $0xb0] sm:$0xff]  ;;  %v9428_v48 = vld [vmem:[%s14180_s0 + $0xb8] sm:$0xff]  ;;  %v9455_v55 = vld [vmem:[%s14180_s0 + $0x40] sm:$0xff] }
  0x22   :  { %v9433_v49 = vld [vmem:[%s14180_s0 + $0x30] sm:$0xff]  ;;  %v9438_v50 = vld [vmem:[%s14180_s0 + $0x38] sm:$0xff]  ;;  %v9460_v56 = vld [vmem:[%s14180_s0 + $0x48] sm:$0xff] }
  0x23   :  { %v9491_v3 = vld [vmem:[%s14180_s0 + $0x50] sm:$0xff]  ;;  %v9496_v4 = vld [vmem:[%s14180_s0 + $0x58] sm:$0xff] }
  0x24   :  { %217 = vperm.xlu1 %8157, %v179_v9   ;;  %212 = vperm.xlu0 %8156, %v178_v10  }
  0x28   :  { %1992 = vperm.xlu1 %8157, %v1954_v11   ;;  %1987 = vperm.xlu0 %8156, %v1953_v12  }
  0x2c   :  { %227 = vperm.xlu1 %8157, %v181_v13   ;;  %222 = vperm.xlu0 %8156, %v180_v14  }
  0x30   :  { %2002 = vperm.xlu1 %8157, %v1956_v15   ;;  %1997 = vperm.xlu0 %8156, %v1955_v16  }
  0x34   :  { %237 = vperm.xlu1 %8157, %v183_v17   ;;  %232 = vperm.xlu0 %8156, %v182_v18  }
  0x38   :  { %2012 = vperm.xlu1 %8157, %v1958_v19   ;;  %2007 = vperm.xlu0 %8156, %v1957_v20  }
  0x3c   :  { %247 = vperm.xlu1 %8157, %v185_v21   ;;  %242 = vperm.xlu0 %8156, %v184_v22  }
  0x40   :  { %2022 = vperm.xlu1 %8157, %v1960_v23   ;;  %2017 = vperm.xlu0 %8156, %v1959_v24  }
  0x44   :  { %257 = vperm.xlu1 %8157, %v187_v25   ;;  %252 = vperm.xlu0 %8156, %v186_v26  }
  0x48   :  { %2032 = vperm.xlu1 %8157, %v1962_v27   ;;  %2027 = vperm.xlu0 %8156, %v1961_v28  }
  0x4c   :  { %267 = vperm.xlu1 %8157, %v189_v29   ;;  %262 = vperm.xlu0 %8156, %v188_v30  }
  0x50   :  { %2042 = vperm.xlu1 %8157, %v1964_v31   ;;  %2037 = vperm.xlu0 %8156, %v1963_v32  }
  0x93   :  { %v203_v41 = vpop.permute.xlu1 %202  ;;  %v9398_v42 = vpop.permute.xlu0 %192 }
  0x94   :  { %v9441_v51 = vmul.f32 %v203_v41, %v9361_v33  ;;  %v9444_v52 = vmul.f32 %v203_v41, %v9366_v34  ;;  %v9447_v53 = vmul.f32 %v203_v41, %v9371_v35  ;;  %v9450_v54 = vmul.f32 %v203_v41, %v9376_v36 }
  0x95   :  { %v9463_v57 = vmul.f32 %v203_v41, %v9381_v37  ;;  %v9466_v58 = vmul.f32 %v203_v41, %v9386_v38  ;;  %v9470_v59 = vmul.f32 %v9398_v42, %v9391_v39  ;;  %v9474_v60 = vmul.f32 %v9398_v42, %v9396_v40 }
  0x96   :  { %14597 = vst [vmem:[#allocation7_spill] sm:$0xff] %v9441_v51  ;;  %14598 = vst [vmem:[#allocation8_spill] sm:$0xff] %v9444_v52 }
  0x97   :  { %14599 = vst [vmem:[#allocation9_spill] sm:$0xff] %v9447_v53  ;;  %14600 = vst [vmem:[#allocation10_spill] sm:$0xff] %v9450_v54  ;;  %v208_v61 = vpop.permute.xlu1 %207  ;;  %v198_v62 = vpop.permute.xlu0 %197 }
  0x98   :  { %14601 = vst [vmem:[#allocation11_spill] sm:$0xff] %v9463_v57  ;;  %14602 = vst [vmem:[#allocation12_spill] sm:$0xff] %v9466_v58  ;;  %v9477_v63 = vmul.f32 %v208_v61, %v9403_v43  ;;  %v9480_v0 = vmul.f32 %v208_v61, %v9408_v44  ;;  %v9483_v1 = vmul.f32 %v208_v61, %v9413_v45 }
  0x99   :  { %14603 = vst [vmem:[#allocation13_spill] sm:$0xff] %v9470_v59  ;;  %14604 = vst [vmem:[#allocation14_spill] sm:$0xff] %v9474_v60  ;;  %v9486_v2 = vmul.f32 %v208_v61, %v9418_v46  ;;  %v9499_v5 = vmul.f32 %v208_v61, %v9423_v47  ;;  %v9502_v6 = vmul.f32 %v208_v61, %v9428_v48 }
  0x9a   :  { %14605 = vst [vmem:[#allocation15_spill] sm:$0xff] %v9477_v63  ;;  %14606 = vst [vmem:[#allocation16_spill] sm:$0xff] %v9480_v0  ;;  %v9505_v7 = vmul.f32 %v198_v62, %v9433_v49  ;;  %v9508_v8 = vmul.f32 %v198_v62, %v9438_v50  ;;  %v414_v9 = vmax.f32 %v9441_v51, %v9477_v63 }
  0x9b   :  { %14607 = vst [vmem:[#allocation17_spill] sm:$0xff] %v9483_v1  ;;  %14608 = vst [vmem:[#allocation18_spill] sm:$0xff] %v9486_v2  ;;  %v421_v10 = vmax.f32 %v9444_v52, %v9480_v0  ;;  %v428_v11 = vmax.f32 %v9447_v53, %v9483_v1  ;;  %v435_v12 = vmax.f32 %v9450_v54, %v9486_v2 }
  0x9c   :  { %14609 = vst [vmem:[#allocation19_spill] sm:$0xff] %v9499_v5  ;;  %14610 = vst [vmem:[#allocation20_spill] sm:$0xff] %v9502_v6  ;;  %v442_v13 = vmax.f32 %v9463_v57, %v9499_v5  ;;  %v449_v14 = vmax.f32 %v9466_v58, %v9502_v6  ;;  %v9523_v15 = vmul.f32 %v198_v62, %v9455_v55  ;;  %v415_v17 = vrot.slane %v414_v9, 4 }
  0x9d   :  { %14611 = vst [vmem:[#allocation21_spill] sm:$0xff] %v9505_v7  ;;  %14612 = vst [vmem:[#allocation22_spill] sm:$0xff] %v9508_v8  ;;  %v9526_v16 = vmul.f32 %v198_v62, %v9460_v56  ;;  %v422_v18 = vrot.slane %v421_v10, 4  ;;  %v429_v19 = vrot.slane %v428_v11, 4  ;;  %v436_v20 = vrot.slane %v435_v12, 4 }
  0x9e   :  { %14613 = vst [vmem:[#allocation23_spill] sm:$0xff] %v9523_v15  ;;  %v443_v21 = vrot.slane %v442_v13, 4  ;;  %v450_v22 = vrot.slane %v449_v14, 4  ;;  %v9529_v23 = vmul.f32 %v198_v62, %v9491_v3  ;;  %v9532_v24 = vmul.f32 %v198_v62, %v9496_v4  ;;  %v80_v62 = vld [vmem:[%s14180_s0 + $0x10] sm:$0xff] }
  0x9f   :  { %14614 = vst [vmem:[#allocation24_spill] sm:$0xff] %v9526_v16  ;;  %v416_v25 = vmax.f32 %v414_v9, %v415_v17  ;;  %v423_v26 = vmax.f32 %v421_v10, %v422_v18  ;;  %v430_v27 = vmax.f32 %v428_v11, %v429_v19  ;;  %v437_v28 = vmax.f32 %v435_v12, %v436_v20  ;;  %v81_v9 = vld [vmem:[%s14180_s0 + $0x18] sm:$0xff]  ;;  %v9552_v17 = vld [vmem:[%s14180_s0 + $0x28] sm:$0xff] }
  0xa0   :  { %14615 = vst [vmem:[#allocation25_spill] sm:$0xff] %v9529_v23  ;;  %14616 = vst [vmem:[#allocation26_spill] sm:$0xff] %v9532_v24  ;;  %v444_v29 = vmax.f32 %v442_v13, %v443_v21  ;;  %v451_v30 = vmax.f32 %v449_v14, %v450_v22  ;;  %v372_v31 = vmax.f32 %v9470_v59, %v9505_v7  ;;  %v9547_v14 = vld [vmem:[%s14180_s0 + $0x20] sm:$0xff] }
  0xa1   :  { %v379_v32 = vmax.f32 %v9474_v60, %v9508_v8  ;;  %v417_v41 = vrot.slane %v416_v25, 2  ;;  %v424_v61 = vrot.slane %v423_v26, 2  ;;  %v431_v6 = vrot.slane %v430_v27, 2 }
  0xa2   :  { %v438_v5 = vrot.slane %v437_v28, 2  ;;  %v445_v10 = vrot.slane %v444_v29, 2  ;;  %v452_v11 = vrot.slane %v451_v30, 2  ;;  %v373_v12 = vrot.slane %v372_v31, 4 }
  0xa3   :  { %v380_v13 = vrot.slane %v379_v32, 4  ;;  %v418_v18 = vmax.f32 %v416_v25, %v417_v41  ;;  %v9554_v19 = vmax.f32 %v423_v26, %v424_v61  ;;  %v9556_v20 = vmax.f32 %v430_v27, %v431_v6 }
  0xa4   :  { %v9558_v21 = vmax.f32 %v437_v28, %v438_v5  ;;  %v9560_v22 = vmax.f32 %v444_v29, %v445_v10  ;;  %v9562_v2 = vmax.f32 %v451_v30, %v452_v11  ;;  %v374_v1 = vmax.f32 %v372_v31, %v373_v12 }
  0xa5   :  { %v381_v0 = vmax.f32 %v379_v32, %v380_v13  ;;  %v419_v63 = vrot.slane %v418_v18, 1  ;;  %v9570_v27 = vmul.f32 %v9398_v42, %v80_v62  ;;  %v9573_v28 = vmul.f32 %v9398_v42, %v81_v9 }
  0xa6   :  { %v375_v26 = vrot.slane %v374_v1, 2  ;;  %v9577_v29 = vmul.f32 %v9398_v42, %v9547_v14  ;;  %v9581_v30 = vmul.f32 %v9398_v42, %v9552_v17 }
  0xa7   :  { %v382_v5 = vrot.slane %v381_v0, 2  ;;  %14617 = vst [vmem:[#allocation27_spill] sm:$0xff] %v9570_v27  ;;  %14618 = vst [vmem:[#allocation28_spill] sm:$0xff] %v9573_v28  ;;  %v386_v41 = vmax.f32 %v9570_v27, %v9523_v15  ;;  %v393_v61 = vmax.f32 %v9573_v28, %v9526_v16 }
  0xa8   :  { %14619 = vst [vmem:[#allocation29_spill] sm:$0xff] %v9577_v29  ;;  %14620 = vst [vmem:[#allocation30_spill] sm:$0xff] %v9581_v30  ;;  %v376_v31 = vmax.f32 %v374_v1, %v375_v26  ;;  %v400_v10 = vmax.f32 %v9577_v29, %v9529_v23  ;;  %v407_v11 = vmax.f32 %v9581_v30, %v9532_v24  ;;  %v1973_v26 = vpop.permute.xlu1 %1972 }
  0xa9   :  { %v9583_v32 = vmax.f32 %v381_v0, %v382_v5  ;;  %v387_v42 = vrot.slane %v386_v41, 4  ;;  %v394_v6 = vrot.slane %v393_v61, 4  ;;  %v1968_v5 = vpop.permute.xlu0 %1967  ;;  %v9595_v53 = vmul.f32 %v1973_v26, %v9433_v49 }
  0xaa   :  { %v377_v12 = vrot.slane %v376_v31, 1  ;;  %v401_v1 = vrot.slane %v400_v10, 4  ;;  %v408_v0 = vrot.slane %v407_v11, 4  ;;  %v9598_v52 = vmul.f32 %v1973_v26, %v9438_v50 }
  0xab   :  { %v384_v13 = vrot.slane %v9583_v32, 1  ;;  %v388_v25 = vmax.f32 %v386_v41, %v387_v42  ;;  %v395_v54 = vmax.f32 %v393_v61, %v394_v6  ;;  %14621 = vst [vmem:[#allocation31_spill] sm:$0xff] %v9595_v53  ;;  %v9601_v51 = vmul.f32 %v1973_v26, %v9455_v55 }
  0xac   :  { %v402_v57 = vmax.f32 %v400_v10, %v401_v1  ;;  %v409_v58 = vmax.f32 %v407_v11, %v408_v0  ;;  %14622 = vst [vmem:[#allocation32_spill] sm:$0xff] %v9598_v52  ;;  %v9604_v24 = vmul.f32 %v1968_v5, %v9391_v39  ;;  %v9607_v6 = vmul.f32 %v1973_v26, %v9460_v56 }
  0xad   :  { %14623 = vst [vmem:[#allocation33_spill] sm:$0xff] %v9601_v51  ;;  %v389_v23 = vrot.slane %v388_v25, 2  ;;  %v396_v16 = vrot.slane %v395_v54, 2  ;;  %v9610_v49 = vmul.f32 %v1968_v5, %v9396_v40  ;;  %v9612_v61 = vmul.f32 %v1968_v5, %v80_v62 }
  0xae   :  { %14624 = vst [vmem:[#allocation34_spill] sm:$0xff] %v9604_v24  ;;  %v403_v15 = vrot.slane %v402_v57, 2  ;;  %v410_v41 = vrot.slane %v409_v58, 2  ;;  %14625 = vst [vmem:[#allocation35_spill] sm:$0xff] %v9607_v6  ;;  %v9614_v50 = vmul.f32 %v1968_v5, %v81_v9  ;;  %v420_v55 = vmax.f32 %v418_v18, %v419_v63 }
  0xaf   :  { %14626 = vst [vmem:[#allocation36_spill] sm:$0xff] %v9610_v49  ;;  %14627 = vst [vmem:[#allocation37_spill] sm:$0xff] %v9612_v61  ;;  %v390_v10 = vmax.f32 %v388_v25, %v389_v23  ;;  %v397_v11 = vmax.f32 %v395_v54, %v396_v16  ;;  %v2147_v1 = vmax.f32 %v9604_v24, %v9595_v53 }
  0xb0   :  { %14628 = vst [vmem:[#allocation38_spill] sm:$0xff] %v9614_v50  ;;  %v404_v39 = vmax.f32 %v402_v57, %v403_v15  ;;  %v411_v42 = vmax.f32 %v409_v58, %v410_v41  ;;  %v2154_v0 = vmax.f32 %v9610_v49, %v9598_v52  ;;  %v2161_v56 = vmax.f32 %v9612_v61, %v9601_v51 }
  0xb1   :  { %v378_v40 = vmax.f32 %v376_v31, %v377_v12  ;;  %v391_v8 = vrot.slane %v390_v10, 1  ;;  %v398_v62 = vrot.slane %v397_v11, 1  ;;  %v2148_v9 = vrot.slane %v2147_v1, 4 }
  0xb2   :  { %v405_v7 = vrot.slane %v404_v39, 1  ;;  %v2155_v30 = vrot.slane %v2154_v0, 4  ;;  %v2162_v63 = vrot.slane %v2161_v56, 4  ;;  %v2168_v54 = vmax.f32 %v9614_v50, %v9607_v6 }
  0xb3   :  { %v9625_v57 = vmul.f32 %v1973_v26, %v9491_v3  ;;  %v9628_v58 = vmul.f32 %v1973_v26, %v9496_v4  ;;  %v9631_v15 = vmul.f32 %v1968_v5, %v9547_v14  ;;  %v9634_v16 = vmul.f32 %v1968_v5, %v9552_v17 }
  0xb4   :  { %v412_v23 = vrot.slane %v411_v42, 1  ;;  %v2149_v18 = vmax.f32 %v2147_v1, %v2148_v9  ;;  %v2156_v25 = vmax.f32 %v2154_v0, %v2155_v30  ;;  %v2169_v31 = vrot.slane %v2168_v54, 4 }
  0xb5   :  { %14629 = vst [vmem:[#allocation39_spill] sm:$0xff] %v9625_v57  ;;  %14630 = vst [vmem:[#allocation40_spill] sm:$0xff] %v9628_v58  ;;  %v14633_v12 = vrot.slane %v9554_v19, 1  ;;  %v14634_v3 = vrot.slane %v9556_v20, 1  ;;  %v14635_v26 = vrot.slane %v9558_v21, 1  ;;  %v14636_v17 = vrot.slane %v9560_v22, 1 }
  0xb6   :  { %14631 = vst [vmem:[#allocation41_spill] sm:$0xff] %v9631_v15  ;;  %14632 = vst [vmem:[#allocation42_spill] sm:$0xff] %v9634_v16  ;;  %v2150_v30 = vrot.slane %v2149_v18, 2  ;;  %v2157_v1 = vrot.slane %v2156_v25, 2  ;;  %v2163_v0 = vmax.f32 %v2161_v56, %v2162_v63  ;;  %v2170_v9 = vmax.f32 %v2168_v54, %v2169_v31 }
  0xb7   :  { %v9639_v41 = vmax.f32 %v9554_v19, %v14633_v12  ;;  %v434_v4 = vmax.f32 %v9556_v20, %v14634_v3  ;;  %v441_v14 = vmax.f32 %v9558_v21, %v14635_v26  ;;  %v9650_v5 = vmax.f32 %v9560_v22, %v14636_v17  ;;  %v1983_v22 = vpop.permute.xlu1 %1982 }
  0xb8   :  { %v14637_v19 = vrot.slane %v9562_v2, 1  ;;  %v9658_v20 = vmax.f32 %v9583_v32, %v384_v13  ;;  %v2175_v21 = vmax.f32 %v9631_v15, %v9625_v57  ;;  %v2182_v3 = vmax.f32 %v9634_v16, %v9628_v58  ;;  %v1978_v58 = vpop.permute.xlu0 %1977 }
  0xb9   :  { %v392_v26 = vmax.f32 %v390_v10, %v391_v8  ;;  %v9665_v17 = vsel %vm756_vm0, %v420_v55, %v378_v40  ;;  %v9667_v56 = vmax.f32 %v2149_v18, %v2150_v30  ;;  %v9669_v63 = vmax.f32 %v2156_v25, %v2157_v1 }
  0xba   :  { %v9655_v12 = vmax.f32 %v9562_v2, %v14637_v19  ;;  %v399_v2 = vmax.f32 %v397_v11, %v398_v62  ;;  %v406_v54 = vmax.f32 %v404_v39, %v405_v7  ;;  %v2176_v31 = vrot.slane %v2175_v21, 4 }
  0xbb   :  { %v2183_v32 = vrot.slane %v2182_v3, 4  ;;  %v9671_v13 = vmax.f32 %v411_v42, %v412_v23  ;;  %v2164_v19 = vrot.slane %v2163_v0, 2  ;;  %v2171_v57 = vrot.slane %v2170_v9, 2 }
  0xbc   :  { %v9674_v6 = vmul.f32 %v1983_v22, %v9403_v43  ;;  %v2177_v8 = vmax.f32 %v2175_v21, %v2176_v31  ;;  %v9677_v55 = vmul.f32 %v1983_v22, %v9408_v44  ;;  %v9680_v10 = vmul.f32 %v1983_v22, %v9413_v45 }
  0xbd   :  { %v9683_v11 = vmul.f32 %v1983_v22, %v9418_v46  ;;  %v2184_v42 = vmax.f32 %v2182_v3, %v2183_v32  ;;  %v9688_v40 = vmul.f32 %v1983_v22, %v9423_v47  ;;  %v9691_v62 = vmul.f32 %v1983_v22, %v9428_v48 }
  0xbe   :  { %14638 = vst [vmem:[#allocation43_spill] sm:$0xff] %v9674_v6  ;;  %14639 = vst [vmem:[#allocation44_spill] sm:$0xff] %v9677_v55  ;;  %v2178_v43 = vrot.slane %v2177_v8, 2  ;;  %v9694_v44 = vmul.f32 %v1978_v58, %v9361_v33  ;;  %v9697_v45 = vmul.f32 %v1978_v58, %v9366_v34  ;;  %v9700_v46 = vsel %vm756_vm0, %v434_v4, %v392_v26 }
  0xbf   :  { %14640 = vst [vmem:[#allocation45_spill] sm:$0xff] %v9680_v10  ;;  %14641 = vst [vmem:[#allocation46_spill] sm:$0xff] %v9683_v11  ;;  %v9703_v23 = vmul.f32 %v1978_v58, %v9371_v35  ;;  %v9706_v18 = vmul.f32 %v1978_v58, %v9376_v36  ;;  %v9709_v47 = vmul.f32 %v1978_v58, %v9381_v37  ;;  %v2185_v30 = vrot.slane %v2184_v42, 2 }
  0xc0   :  { %14642 = vst [vmem:[#allocation47_spill] sm:$0xff] %v9688_v40  ;;  %14643 = vst [vmem:[#allocation48_spill] sm:$0xff] %v9691_v62  ;;  %v9712_v48 = vsel %vm756_vm0, %v441_v14, %v399_v2  ;;  %v9714_v33 = vmax.f32 %v2163_v0, %v2164_v19  ;;  %v9717_v34 = vmul.f32 %v1978_v58, %v9386_v38  ;;  %v14657_v53 = vrot.slane %v9667_v56, 1 }
  0xc1   :  { %14644 = vst [vmem:[#allocation49_spill] sm:$0xff] %v9694_v44  ;;  %14645 = vst [vmem:[#allocation50_spill] sm:$0xff] %v9697_v45  ;;  %v2189_v25 = vmax.f32 %v9694_v44, %v9674_v6  ;;  %v2196_v35 = vmax.f32 %v9697_v45, %v9677_v55  ;;  %v2203_v36 = vmax.f32 %v9703_v23, %v9680_v10  ;;  %v213_v10 = vpop.permute.xlu0 %212  ;;  %v9782_v55 = vld [vmem:[%s14180_s0 + $0xd0] sm:$0xff]  ;;  %v9787_v6 = vld [vmem:[%s14180_s0 + $0xd8] sm:$0xff] }
  0xc2   :  { %14646 = vst [vmem:[#allocation51_spill] sm:$0xff] %v9703_v23  ;;  %14647 = vst [vmem:[#allocation52_spill] sm:$0xff] %v9706_v18  ;;  %v2210_v37 = vmax.f32 %v9706_v18, %v9683_v11  ;;  %v2217_v4 = vmax.f32 %v9709_v47, %v9688_v40  ;;  %v9729_v14 = vmax.f32 %v2170_v9, %v2171_v57  ;;  %v2166_v22 = vrot.slane %v9714_v33, 1  ;;  %v9737_v57 = vld [vmem:[%s14180_s0 + $0xf0] sm:$0xff]  ;;  %v9742_v9 = vld [vmem:[%s14180_s0 + $0xf8] sm:$0xff] }
  0xc3   :  { %14648 = vst [vmem:[#allocation53_spill] sm:$0xff] %v9709_v47  ;;  %14649 = vst [vmem:[#allocation54_spill] sm:$0xff] %v9717_v34  ;;  %v2190_v38 = vrot.slane %v2189_v25, 4  ;;  %v2224_v58 = vmax.f32 %v9717_v34, %v9691_v62  ;;  %v2197_v1 = vrot.slane %v2196_v35, 4  ;;  %v2204_v0 = vrot.slane %v2203_v36, 4  ;;  %v9803_v47 = vld [vmem:[%s14180_s0 + $0xe8] sm:$0xff] }
  0xc4   :  { %v2211_v21 = vrot.slane %v2210_v37, 4  ;;  %v2218_v3 = vrot.slane %v2217_v4, 4  ;;  %v2179_v26 = vmax.f32 %v2177_v8, %v2178_v43  ;;  %v2173_v62 = vrot.slane %v9729_v14, 1 }
  0xc5   :  { %v2191_v2 = vmax.f32 %v2189_v25, %v2190_v38  ;;  %v2225_v31 = vrot.slane %v2224_v58, 4  ;;  %v2198_v32 = vmax.f32 %v2196_v35, %v2197_v1  ;;  %v2205_v19 = vmax.f32 %v2203_v36, %v2204_v0  ;;  %v9748_v38 = vld [vmem:[%s14180_s0 + $0xc0] sm:$0xff]  ;;  %v9753_v1 = vld [vmem:[%s14180_s0 + $0xc8] sm:$0xff]  ;;  %v1988_v60 = vpop.permute.xlu0 %1987 }
  0xc6   :  { %v2212_v39 = vmax.f32 %v2210_v37, %v2211_v21  ;;  %v2219_v7 = vmax.f32 %v2217_v4, %v2218_v3  ;;  %v2186_v40 = vmax.f32 %v2184_v42, %v2185_v30  ;;  %v218_v4 = vpop.permute.xlu1 %217  ;;  %v9757_v42 = vsel %vm756_vm0, %v9650_v5, %v406_v54  ;;  %v9762_v21 = vld [vmem:[%s14180_s0 + $0x100] sm:$0xff]  ;;  %v9767_v3 = vld [vmem:[%s14180_s0 + $0x108] sm:$0xff] }
  0xc7   :  { %v2192_v8 = vrot.slane %v2191_v2, 2  ;;  %v2226_v43 = vmax.f32 %v2224_v58, %v2225_v31  ;;  %v2199_v25 = vrot.slane %v2198_v32, 2  ;;  %v2206_v35 = vrot.slane %v2205_v19, 2  ;;  %v9772_v31 = vld [vmem:[%s14180_s0 + $0x110] sm:$0xff] }
  0xc8   :  { %v2213_v36 = vrot.slane %v2212_v39, 2  ;;  %v2220_v37 = vrot.slane %v2219_v7, 2  ;;  %v2180_v30 = vrot.slane %v2179_v26, 1  ;;  %v9806_v18 = vmul.f32 %v213_v10, %v9748_v38 }
  0xc9   :  { %v2193_v58 = vmax.f32 %v2191_v2, %v2192_v8  ;;  %v2227_v0 = vrot.slane %v2226_v43, 2  ;;  %v2200_v5 = vmax.f32 %v2198_v32, %v2199_v25  ;;  %v2207_v54 = vmax.f32 %v2205_v19, %v2206_v35  ;;  %v9777_v8 = vld [vmem:[%s14180_s0 + $0x118] sm:$0xff]  ;;  %v9798_v25 = vld [vmem:[%s14180_s0 + $0xe0] sm:$0xff] }
  0xca   :  { %v2214_v11 = vmax.f32 %v2212_v39, %v2213_v36  ;;  %v2221_v2 = vmax.f32 %v2219_v7, %v2220_v37  ;;  %v2187_v32 = vrot.slane %v2186_v40, 1  ;;  %v9790_v7 = vmul.f32 %v218_v4, %v9737_v57  ;;  %14652 = vst [vmem:[#allocation57_spill] sm:$0xff] %v9806_v18 }
  0xcb   :  { %v2228_v19 = vmax.f32 %v2226_v43, %v2227_v0  ;;  %v9793_v39 = vmul.f32 %v218_v4, %v9742_v9  ;;  %v2194_v35 = vrot.slane %v2193_v58, 1  ;;  %v2201_v36 = vrot.slane %v2200_v5, 1 }
  0xcc   :  { %14650 = vst [vmem:[#allocation55_spill] sm:$0xff] %v9790_v7  ;;  %v2208_v37 = vrot.slane %v2207_v54, 1  ;;  %v2215_v34 = vrot.slane %v2214_v11, 1  ;;  %v2222_v43 = vrot.slane %v2221_v2, 1  ;;  %v9809_v23 = vmul.f32 %v213_v10, %v9753_v1 }
  0xcd   :  { %14651 = vst [vmem:[#allocation56_spill] sm:$0xff] %v9793_v39  ;;  %v2229_v0 = vrot.slane %v2228_v19, 1  ;;  %v9814_v45 = vsel %vm756_vm0, %v9655_v12, %v9671_v13  ;;  %v9817_v44 = vmul.f32 %v218_v4, %v9762_v21  ;;  %v9820_v51 = vmul.f32 %v218_v4, %v9767_v3 }
  0xce   :  { %14653 = vst [vmem:[#allocation58_spill] sm:$0xff] %v9809_v23  ;;  %v9823_v52 = vmul.f32 %v218_v4, %v9772_v31  ;;  %v2153_v16 = vmax.f32 %v9667_v56, %v14657_v53  ;;  %v9829_v15 = vmul.f32 %v218_v4, %v9777_v8  ;;  %v9832_v50 = vmul.f32 %v213_v10, %v9782_v55 }
  0xcf   :  { %14654 = vst [vmem:[#allocation59_spill] sm:$0xff] %v9817_v44  ;;  %14655 = vst [vmem:[#allocation60_spill] sm:$0xff] %v9820_v51  ;;  %v9835_v12 = vmul.f32 %v213_v10, %v9787_v6  ;;  %v14661_v13 = vrot.slane %v9669_v63, 1  ;;  %v2167_v49 = vmax.f32 %v9714_v33, %v2166_v22  ;;  %v2174_v24 = vmax.f32 %v9729_v14, %v2173_v62 }
  0xd0   :  { %14656 = vst [vmem:[#allocation61_spill] sm:$0xff] %v9823_v52  ;;  %14658 = vst [vmem:[#allocation62_spill] sm:$0xff] %v9829_v15  ;;  %v9845_v53 = vmul.f32 %v213_v10, %v9798_v25  ;;  %v9847_v56 = vmax.f32 %v2179_v26, %v2180_v30  ;;  %v9850_v4 = vmul.f32 %v213_v10, %v9803_v47 }
  0xd1   :  { %14659 = vst [vmem:[#allocation63_spill] sm:$0xff] %v9832_v50  ;;  %14660 = vst [vmem:[#allocation64_spill] sm:$0xff] %v9835_v12  ;;  %v9840_v61 = vmax.f32 %v9669_v63, %v14661_v13  ;;  %v456_v29 = vmax.f32 %v9806_v18, %v9790_v7  ;;  %v463_v28 = vmax.f32 %v9809_v23, %v9793_v39 }
  0xd2   :  { %14663 = vst [vmem:[#allocation66_spill] sm:$0xff] %v9845_v53  ;;  %14664 = vst [vmem:[#allocation67_spill] sm:$0xff] %v9850_v4  ;;  %v9856_v63 = vmax.f32 %v2186_v40, %v2187_v32  ;;  %v470_v33 = vmax.f32 %v9832_v50, %v9817_v44  ;;  %v477_v62 = vmax.f32 %v9835_v12, %v9820_v51 }
  0xd3   :  { %14662 = vst [vmem:[#allocation65_spill] sm:$0xff] %v9840_v61  ;;  %v484_v14 = vmax.f32 %v9845_v53, %v9823_v52  ;;  %v2195_v22 = vmax.f32 %v2193_v58, %v2194_v35  ;;  %v457_v10 = vrot.slane %v456_v29, 4  ;;  %v464_v26 = vrot.slane %v463_v28, 4  ;;  %v1993_v52 = vpop.permute.xlu1 %1992 }
  0xd4   :  { %v491_v30 = vmax.f32 %v9850_v4, %v9829_v15  ;;  %v9866_v13 = vmax.f32 %v2200_v5, %v2201_v36  ;;  %v471_v61 = vrot.slane %v470_v33, 4  ;;  %v478_v40 = vrot.slane %v477_v62, 4 }
  0xd5   :  { %v485_v32 = vrot.slane %v484_v14, 4  ;;  %v2209_v39 = vmax.f32 %v2207_v54, %v2208_v37  ;;  %v458_v7 = vmax.f32 %v456_v29, %v457_v10  ;;  %v465_v44 = vmax.f32 %v463_v28, %v464_v26  ;;  %v9955_v10 = vld [vmem:[%s14180_s0 + $0x160] sm:$0xff] }
  0xd6   :  { %14665 = vst [vmem:[#allocation68_spill] sm:$0xff] %v9866_v13  ;;  %v492_v50 = vrot.slane %v491_v30, 4  ;;  %v2216_v23 = vmax.f32 %v2214_v11, %v2215_v34  ;;  %v472_v51 = vmax.f32 %v470_v33, %v471_v61  ;;  %v479_v12 = vmax.f32 %v477_v62, %v478_v40 }
  0xd7   :  { %v486_v18 = vmax.f32 %v484_v14, %v485_v32  ;;  %v2223_v58 = vmax.f32 %v2221_v2, %v2222_v43  ;;  %v2230_v35 = vmax.f32 %v2228_v19, %v2229_v0  ;;  %v459_v53 = vrot.slane %v458_v7, 2  ;;  %v228_v32 = vpop.permute.xlu1 %227 }
  0xd8   :  { %v466_v27 = vrot.slane %v465_v44, 2  ;;  %v473_v15 = vrot.slane %v472_v51, 2  ;;  %v480_v5 = vrot.slane %v479_v12, 2  ;;  %v493_v13 = vmax.f32 %v491_v30, %v492_v50 }
  0xd9   :  { %v487_v36 = vrot.slane %v486_v18, 2  ;;  %v9869_v4 = vsel %vm756_vm0, %v2195_v22, %v2153_v16  ;;  %v460_v29 = vmax.f32 %v458_v7, %v459_v53  ;;  %v9872_v11 = vmul.f32 %v1993_v52, %v9737_v57  ;;  %v9950_v22 = vld [vmem:[%s14180_s0 + $0x158] sm:$0xff] }
  0xda   :  { %v467_v28 = vmax.f32 %v465_v44, %v466_v27  ;;  %v474_v61 = vmax.f32 %v472_v51, %v473_v15  ;;  %v481_v34 = vmax.f32 %v479_v12, %v480_v5  ;;  %v9875_v54 = vmul.f32 %v1993_v52, %v9742_v9 }
  0xdb   :  { %14666 = vst [vmem:[#allocation69_spill] sm:$0xff] %v9872_v11  ;;  %v9878_v2 = vmul.f32 %v1988_v60, %v9748_v38  ;;  %v9881_v19 = vmul.f32 %v1993_v52, %v9762_v21  ;;  %v9884_v50 = vmul.f32 %v1993_v52, %v9767_v3  ;;  %v9887_v16 = vmul.f32 %v1988_v60, %v9753_v1 }
  0xdc   :  { %14667 = vst [vmem:[#allocation70_spill] sm:$0xff] %v9875_v54  ;;  %v9890_v27 = vmul.f32 %v1988_v60, %v9782_v55  ;;  %v461_v51 = vrot.slane %v460_v29, 1  ;;  %v468_v15 = vrot.slane %v467_v28, 1  ;;  %v9892_v44 = vmax.f32 %v486_v18, %v487_v36 }
  0xdd   :  { %14668 = vst [vmem:[#allocation71_spill] sm:$0xff] %v9878_v2  ;;  %14669 = vst [vmem:[#allocation72_spill] sm:$0xff] %v9881_v19  ;;  %v494_v57 = vrot.slane %v493_v13, 2  ;;  %v475_v9 = vrot.slane %v474_v61, 1  ;;  %v482_v38 = vrot.slane %v481_v34, 1  ;;  %v9895_v7 = vmul.f32 %v1993_v52, %v9772_v31 }
  0xde   :  { %14670 = vst [vmem:[#allocation73_spill] sm:$0xff] %v9884_v50  ;;  %14671 = vst [vmem:[#allocation74_spill] sm:$0xff] %v9887_v16  ;;  %v9898_v21 = vmul.f32 %v1988_v60, %v9787_v6  ;;  %v9901_v3 = vmul.f32 %v1993_v52, %v9777_v8  ;;  %v9904_v1 = vmul.f32 %v1988_v60, %v9798_v25 }
  0xdf   :  { %14672 = vst [vmem:[#allocation75_spill] sm:$0xff] %v9890_v27  ;;  %14673 = vst [vmem:[#allocation76_spill] sm:$0xff] %v9895_v7  ;;  %v9907_v55 = vmul.f32 %v1988_v60, %v9803_v47  ;;  %v2231_v18 = vmax.f32 %v9878_v2, %v9872_v11  ;;  %v9912_v37 = vsel %vm756_vm0, %v2209_v39, %v2167_v49  ;;  %v489_v60 = vrot.slane %v9892_v44, 1 }
  0xe0   :  { %14674 = vst [vmem:[#allocation77_spill] sm:$0xff] %v9898_v21  ;;  %14675 = vst [vmem:[#allocation78_spill] sm:$0xff] %v9901_v3  ;;  %v9915_v31 = vsel %vm756_vm0, %v2216_v23, %v2174_v24  ;;  %v2238_v6 = vmax.f32 %v9887_v16, %v9875_v54  ;;  %v2245_v52 = vmax.f32 %v9890_v27, %v9881_v19 }
  0xe1   :  { %14676 = vst [vmem:[#allocation79_spill] sm:$0xff] %v9904_v1  ;;  %14677 = vst [vmem:[#allocation80_spill] sm:$0xff] %v9907_v55  ;;  %v9923_v8 = vsel %vm756_vm0, %v2223_v58, %v9847_v56  ;;  %v9926_v47 = vmax.f32 %v493_v13, %v494_v57  ;;  %v2232_v25 = vrot.slane %v2231_v18, 4  ;;  %v9930_v49 = vsel %vm756_vm0, %v2230_v35, %v9856_v63  ;;  %v9943_v56 = vld [vmem:[%s14180_s0 + $0x150] sm:$0xff]  ;;  %v9961_v58 = vld [vmem:[%s14180_s0 + $0x168] sm:$0xff] }
  0xe2   :  { %v2239_v24 = vrot.slane %v2238_v6, 4  ;;  %v2246_v23 = vrot.slane %v2245_v52, 4  ;;  %v2252_v39 = vmax.f32 %v9898_v21, %v9884_v50  ;;  %v9934_v43 = vmax.f32 %v460_v29, %v461_v51  ;;  %v9966_v35 = vld [vmem:[%s14180_s0 + $0x120] sm:$0xff]  ;;  %v9971_v51 = vld [vmem:[%s14180_s0 + $0x170] sm:$0xff] }
  0xe3   :  { %v2233_v0 = vmax.f32 %v2231_v18, %v2232_v25  ;;  %v2259_v12 = vmax.f32 %v9904_v1, %v9895_v7  ;;  %v2266_v53 = vmax.f32 %v9907_v55, %v9901_v3  ;;  %v9945_v63 = vmax.f32 %v467_v28, %v468_v15  ;;  %v9976_v15 = vld [vmem:[%s14180_s0 + $0x128] sm:$0xff]  ;;  %v223_v25 = vpop.permute.xlu0 %222 }
  0xe4   :  { %v2240_v33 = vmax.f32 %v2238_v6, %v2239_v24  ;;  %v2247_v62 = vmax.f32 %v2245_v52, %v2246_v23  ;;  %v2253_v14 = vrot.slane %v2252_v39, 4  ;;  %v496_v26 = vrot.slane %v9926_v47, 1 }
  0xe5   :  { %v2234_v30 = vrot.slane %v2233_v0, 2  ;;  %v2260_v13 = vrot.slane %v2259_v12, 4  ;;  %v2267_v40 = vrot.slane %v2266_v53, 4  ;;  %v476_v5 = vmax.f32 %v474_v61, %v475_v9 }
  0xe6   :  { %v2241_v36 = vrot.slane %v2240_v33, 2  ;;  %v2248_v29 = vrot.slane %v2247_v62, 2  ;;  %v2254_v28 = vmax.f32 %v2252_v39, %v2253_v14  ;;  %v483_v57 = vmax.f32 %v481_v34, %v482_v38  ;;  %v9984_v39 = vld [vmem:[%s14180_s0 + $0x130] sm:$0xff]  ;;  %v9989_v34 = vld [vmem:[%s14180_s0 + $0x178] sm:$0xff] }
  0xe7   :  { %v2235_v18 = vmax.f32 %v2233_v0, %v2234_v30  ;;  %v2261_v6 = vmax.f32 %v2259_v12, %v2260_v13  ;;  %v2268_v52 = vmax.f32 %v2266_v53, %v2267_v40  ;;  %v9979_v23 = vmul.f32 %v228_v32, %v9943_v56  ;;  %v10000_v12 = vld [vmem:[%s14180_s0 + $0x138] sm:$0xff]  ;;  %v10005_v53 = vld [vmem:[%s14180_s0 + $0x140] sm:$0xff]  ;;  %v10013_v13 = vld [vmem:[%s14180_s0 + $0x148] sm:$0xff] }
  0xe8   :  { %v2242_v24 = vmax.f32 %v2240_v33, %v2241_v36  ;;  %v2249_v61 = vmax.f32 %v2247_v62, %v2248_v29  ;;  %v2255_v9 = vrot.slane %v2254_v28, 2  ;;  %v9992_v38 = vmul.f32 %v228_v32, %v9950_v22 }
  0xe9   :  { %14678 = vst [vmem:[#allocation81_spill] sm:$0xff] %v9979_v23  ;;  %v2262_v14 = vrot.slane %v2261_v6, 2  ;;  %v2269_v3 = vrot.slane %v2268_v52, 2  ;;  %v9995_v0 = vmul.f32 %v228_v32, %v9955_v10  ;;  %v2236_v33 = vrot.slane %v2235_v18, 1 }
  0xea   :  { %14679 = vst [vmem:[#allocation82_spill] sm:$0xff] %v9992_v38  ;;  %v2256_v62 = vmax.f32 %v2254_v28, %v2255_v9  ;;  %v10008_v30 = vmul.f32 %v228_v32, %v9961_v58  ;;  %v10016_v40 = vmul.f32 %v223_v25, %v9966_v35  ;;  %v10019_v29 = vmul.f32 %v228_v32, %v9971_v51 }
  0xeb   :  { %14680 = vst [vmem:[#allocation83_spill] sm:$0xff] %v9995_v0  ;;  %v2263_v36 = vmax.f32 %v2261_v6, %v2262_v14  ;;  %v10022_v7 = vmul.f32 %v223_v25, %v9976_v15  ;;  %v10025_v28 = vmul.f32 %v223_v25, %v9984_v39  ;;  %v2243_v9 = vrot.slane %v2242_v24, 1 }
  0xec   :  { %14681 = vst [vmem:[#allocation84_spill] sm:$0xff] %v10008_v30  ;;  %14682 = vst [vmem:[#allocation85_spill] sm:$0xff] %v10016_v40  ;;  %v2250_v50 = vrot.slane %v2249_v61, 1  ;;  %v2270_v19 = vmax.f32 %v2268_v52, %v2269_v3  ;;  %v10028_v54 = vmul.f32 %v223_v25, %v10000_v12  ;;  %v490_v11 = vmax.f32 %v9892_v44, %v489_v60 }
  0xed   :  { %14683 = vst [vmem:[#allocation86_spill] sm:$0xff] %v10019_v29  ;;  %14684 = vst [vmem:[#allocation87_spill] sm:$0xff] %v10022_v7  ;;  %v2257_v55 = vrot.slane %v2256_v62, 1  ;;  %v2264_v1 = vrot.slane %v2263_v36, 1  ;;  %v10032_v6 = vmul.f32 %v223_v25, %v10005_v53  ;;  %v497_v14 = vmax.f32 %v9926_v47, %v496_v26 }
  0xee   :  { %14685 = vst [vmem:[#allocation88_spill] sm:$0xff] %v10025_v28  ;;  %14686 = vst [vmem:[#allocation89_spill] sm:$0xff] %v10028_v54  ;;  %v10036_v21 = vmul.f32 %v228_v32, %v9989_v34  ;;  %v10039_v27 = vmul.f32 %v223_v25, %v10013_v13  ;;  %v498_v3 = vmax.f32 %v10016_v40, %v9979_v23  ;;  %v2271_v32 = vrot.slane %v2270_v19, 1 }
  0xef   :  { %14687 = vst [vmem:[#allocation90_spill] sm:$0xff] %v10032_v6  ;;  %v10046_v44 = vsel %vm758_vm1, %v9934_v43, %v9665_v17  ;;  %v10050_v60 = vsel %vm758_vm1, %v476_v5, %v9700_v46  ;;  %v505_v47 = vmax.f32 %v10022_v7, %v9992_v38  ;;  %v512_v26 = vmax.f32 %v10025_v28, %v9995_v0 }
  0xf0   :  { %14688 = vst [vmem:[#allocation91_spill] sm:$0xff] %v10036_v21  ;;  %14689 = vst [vmem:[#allocation92_spill] sm:$0xff] %v10039_v27  ;;  %v499_v52 = vrot.slane %v498_v3, 4  ;;  %v519_v25 = vmax.f32 %v10028_v54, %v10008_v30  ;;  %v526_v16 = vmax.f32 %v10032_v6, %v10019_v29  ;;  %v10062_v17 = vsel %vm758_vm1, %v483_v57, %v9712_v48 }
  0xf1   :  { %v2237_v46 = vmax.f32 %v2235_v18, %v2236_v33  ;;  %v506_v43 = vrot.slane %v505_v47, 4  ;;  %v513_v5 = vrot.slane %v512_v26, 4  ;;  %v533_v0 = vmax.f32 %v10039_v27, %v10036_v21 }
  0xf2   :  { %v500_v2 = vmax.f32 %v498_v3, %v499_v52  ;;  %v520_v38 = vrot.slane %v519_v25, 4  ;;  %v527_v23 = vrot.slane %v526_v16, 4  ;;  %v10068_v28 = vsel %vm758_vm1, %v490_v11, %v9757_v42 }
  0xf3   :  { %v2251_v30 = vmax.f32 %v2249_v61, %v2250_v50  ;;  %v507_v54 = vmax.f32 %v505_v47, %v506_v43  ;;  %v514_v29 = vmax.f32 %v512_v26, %v513_v5  ;;  %v534_v57 = vrot.slane %v533_v0, 4  ;;  %v2003_v61 = vpop.permute.xlu1 %2002  ;;  %v1998_v47 = vpop.permute.xlu0 %1997 }
  0xf4   :  { %v501_v6 = vrot.slane %v500_v2, 2  ;;  %v521_v7 = vmax.f32 %v519_v25, %v520_v38  ;;  %v528_v48 = vmax.f32 %v526_v16, %v527_v23  ;;  %v10072_v18 = vsel %vm758_vm1, %v497_v14, %v9814_v45 }
  0xf5   :  { %v10074_v33 = vmax.f32 %v2242_v24, %v2243_v9  ;;  %v508_v3 = vrot.slane %v507_v54, 2  ;;  %v515_v52 = vrot.slane %v514_v29, 2  ;;  %v10078_v21 = vsel %vm758_vm1, %v2237_v46, %v9869_v4 }
  0xf6   :  { %v502_v42 = vmax.f32 %v500_v2, %v501_v6  ;;  %v522_v11 = vrot.slane %v521_v7, 2  ;;  %v535_v50 = vmax.f32 %v533_v0, %v534_v57  ;;  %v2258_v38 = vmax.f32 %v2256_v62, %v2257_v55 }
  0xf7   :  { %14690 = vst [vmem:[#allocation93_spill] sm:$0xff] %v10074_v33  ;;  %v2265_v16 = vmax.f32 %v2263_v36, %v2264_v1  ;;  %v10082_v23 = vsel %vm758_vm1, %v2251_v30, %v9912_v37  ;;  %v509_v45 = vmax.f32 %v507_v54, %v508_v3  ;;  %v2272_v24 = vmax.f32 %v2270_v19, %v2271_v32 }
  0xf8   :  { %v516_v9 = vmax.f32 %v514_v29, %v515_v52  ;;  %v523_v14 = vmax.f32 %v521_v7, %v522_v11  ;;  %v529_v26 = vrot.slane %v528_v48, 2  ;;  %v503_v25 = vrot.slane %v502_v42, 1 }
  0xf9   :  { %v10085_v4 = vmul.f32 %v2003_v61, %v9943_v56  ;;  %v10088_v2 = vmul.f32 %v2003_v61, %v9950_v22  ;;  %v10091_v0 = vmul.f32 %v1998_v47, %v9966_v35  ;;  %v510_v1 = vrot.slane %v509_v45, 1 }
  0xfa   :  { %v536_v55 = vrot.slane %v535_v50, 2  ;;  %v10094_v37 = vmul.f32 %v2003_v61, %v9955_v10  ;;  %v10097_v54 = vmul.f32 %v1998_v47, %v9976_v15  ;;  %v10100_v19 = vmul.f32 %v2003_v61, %v9961_v58 }
  0xfb   :  { %14691 = vst [vmem:[#allocation94_spill] sm:$0xff] %v10085_v4  ;;  %14692 = vst [vmem:[#allocation95_spill] sm:$0xff] %v10088_v2  ;;  %v10103_v7 = vmul.f32 %v2003_v61, %v9971_v51  ;;  %v10106_v56 = vmul.f32 %v1998_v47, %v9984_v39  ;;  %v10109_v22 = vmul.f32 %v1998_v47, %v10000_v12  ;;  %v517_v35 = vrot.slane %v516_v9, 1 }
  0xfc   :  { %14693 = vst [vmem:[#allocation96_spill] sm:$0xff] %v10091_v0  ;;  %14694 = vst [vmem:[#allocation97_spill] sm:$0xff] %v10094_v37  ;;  %v524_v62 = vrot.slane %v523_v14, 1  ;;  %v530_v10 = vmax.f32 %v528_v48, %v529_v26  ;;  %v10112_v30 = vmul.f32 %v2003_v61, %v9989_v34  ;;  %v10116_v15 = vsel %vm758_vm1, %v2258_v38, %v9915_v31  ;;  %v10147_v61 = vld [vmem:[%s14180_s0 + $0x1b0] sm:$0xff] }
  0xfd   :  { %14695 = vst [vmem:[#allocation98_spill] sm:$0xff] %v10097_v54  ;;  %14696 = vst [vmem:[#allocation99_spill] sm:$0xff] %v10100_v19  ;;  %v10119_v58 = vmul.f32 %v1998_v47, %v10005_v53  ;;  %v10122_v51 = vmul.f32 %v1998_v47, %v10013_v13  ;;  %v2273_v39 = vmax.f32 %v10091_v0, %v10085_v4 }
  0xfe   :  { %14697 = vst [vmem:[#allocation100_spill] sm:$0xff] %v10103_v7  ;;  %14698 = vst [vmem:[#allocation101_spill] sm:$0xff] %v10106_v56  ;;  %v10128_v12 = vsel %vm758_vm1, %v2265_v16, %v9923_v8  ;;  %v10132_v34 = vsel %vm758_vm1, %v2272_v24, %v9930_v49  ;;  %v537_v36 = vmax.f32 %v535_v50, %v536_v55  ;;  %v531_v32 = vrot.slane %v530_v10, 1 }
  0xff   :  { %14699 = vst [vmem:[#allocation102_spill] sm:$0xff] %v10109_v22  ;;  %14700 = vst [vmem:[#allocation103_spill] sm:$0xff] %v10112_v30  ;;  %v2280_v31 = vmax.f32 %v10097_v54, %v10088_v2  ;;  %v2274_v53 = vrot.slane %v2273_v39, 4  ;;  %v2287_v13 = vmax.f32 %v10106_v56, %v10094_v37  ;;  %v2294_v29 = vmax.f32 %v10109_v22, %v10100_v19 }
 0x100   :  { %14701 = vst [vmem:[#allocation104_spill] sm:$0xff] %v10119_v58  ;;  %14702 = vst [vmem:[#allocation105_spill] sm:$0xff] %v10122_v51  ;;  %v2301_v6 = vmax.f32 %v10119_v58, %v10103_v7  ;;  %v504_v8 = vmax.f32 %v502_v42, %v503_v25  ;;  %v2308_v49 = vmax.f32 %v10122_v51, %v10112_v30  ;;  %v538_v52 = vrot.slane %v537_v36, 1  ;;  %v10152_v42 = vld [vmem:[%s14180_s0 + $0x1b8] sm:$0xff]  ;;  %v10235_v7 = vld [vmem:[%s14180_s0 + $0x1a0] sm:$0xff] }
 0x101   :  { %v2281_v46 = vrot.slane %v2280_v31, 4  ;;  %v2275_v43 = vmax.f32 %v2273_v39, %v2274_v53  ;;  %v2288_v5 = vrot.slane %v2287_v13, 4  ;;  %v2295_v48 = vrot.slane %v2294_v29, 4  ;;  %v238_v39 = vpop.permute.xlu1 %237  ;;  %v10252_v51 = vld [vmem:[%s14180_s0 + $0x1a8] sm:$0xff] }
 0x102   :  { %v2302_v57 = vrot.slane %v2301_v6, 4  ;;  %v518_v3 = vmax.f32 %v516_v9, %v517_v35  ;;  %v2309_v50 = vrot.slane %v2308_v49, 4  ;;  %v10157_v9 = vld [vmem:[%s14180_s0 + $0x1c0] sm:$0xff]  ;;  %v10159_v26 = vmax.f32 %v509_v45, %v510_v1  ;;  %v233_v45 = vpop.permute.xlu0 %232 }
 0x103   :  { %v2282_v11 = vmax.f32 %v2280_v31, %v2281_v46  ;;  %v2276_v47 = vrot.slane %v2275_v43, 2  ;;  %v2289_v38 = vmax.f32 %v2287_v13, %v2288_v5  ;;  %v2296_v16 = vmax.f32 %v2294_v29, %v2295_v48  ;;  %v10166_v31 = vld [vmem:[%s14180_s0 + $0x180] sm:$0xff]  ;;  %v10171_v46 = vld [vmem:[%s14180_s0 + $0x1c8] sm:$0xff]  ;;  %v10199_v5 = vld [vmem:[%s14180_s0 + $0x1d8] sm:$0xff] }
 0x104   :  { %v2303_v24 = vmax.f32 %v2301_v6, %v2302_v57  ;;  %14703 = vst [vmem:[#allocation106_spill] sm:$0xff] %v10159_v26  ;;  %v525_v25 = vmax.f32 %v523_v14, %v524_v62  ;;  %v10161_v55 = vmax.f32 %v530_v10, %v531_v32  ;;  %v2310_v35 = vmax.f32 %v2308_v49, %v2309_v50  ;;  %v10176_v14 = vld [vmem:[%s14180_s0 + $0x188] sm:$0xff]  ;;  %v8158_v1 = vld [vmem:[%s14184_s4 + $0x4] ss:$24 sps:$4 sm:$0xff]  }
 0x105   :  { %v2277_v53 = vmax.f32 %v2275_v43, %v2276_v47  ;;  %v2283_v13 = vrot.slane %v2282_v11, 2  ;;  %v2290_v29 = vrot.slane %v2289_v38, 2  ;;  %v2297_v6 = vrot.slane %v2296_v16, 2  ;;  %v10194_v43 = vld [vmem:[%s14180_s0 + $0x1d0] sm:$0xff]  ;;  %5546 = vmatprep.subr.bf16.mxu0 %v8158_v1  ;;  %v8163_v50 = vld [vmem:[%s14184_s4 + $0x8] ss:$24 sps:$4 sm:$0xff]  }
 0x106   :  { %v10181_v62 = vmax.f32 %v537_v36, %v538_v52  ;;  %v10185_v10 = vsel %vm760_vm2, %v504_v8, %v10046_v44  ;;  %v10189_v32 = vsel %vm760_vm2, %v518_v3, %v10050_v60  ;;  %v2304_v49 = vrot.slane %v2303_v24, 2  ;;  %v10204_v44 = vld [vmem:[%s14180_s0 + $0x190] sm:$0xff]  ;;  %v8160_v60 = vld [vmem:[%s14184_s4 + $0xc] ss:$24 sps:$4 sm:$0xff]   ;;  %v8162_v36 = vld [vmem:[%s14184_s4] ss:$24 sps:$4 sm:$0xff]  }
 0x107   :  { %v2311_v8 = vrot.slane %v2310_v35, 2  ;;  %v10213_v48 = vmul.f32 %v238_v39, %v10147_v61  ;;  %v10216_v57 = vmul.f32 %v238_v39, %v10152_v42  ;;  %v10219_v3 = vmul.f32 %v238_v39, %v10157_v9  ;;  %v10224_v52 = vld [vmem:[%s14180_s0 + $0x198] sm:$0xff]  ;;  %v8164_v47 = vld [vmem:[%s14184_s4 + $0x34] ss:$24 sps:$4 sm:$0xff]   ;;  %5675 = vmatprep.subr.bf16.mxu1 %v8160_v60  ;;  %5547 = vmatpush1.bf16.msra.mxu0 %v8162_v36 }
 0x108   :  { %v2291_v30 = vmax.f32 %v2289_v38, %v2290_v29  ;;  %v10238_v19 = vmul.f32 %v233_v45, %v10166_v31  ;;  %v10241_v37 = vmul.f32 %v233_v45, %v10176_v14  ;;  %v8166_v1 = vld [vmem:[%s14184_s4 + $0x3c] ss:$24 sps:$4 sm:$0xff]   ;;  %v8168_v38 = vld [vmem:[%s14184_s4 + $0x30] ss:$24 sps:$4 sm:$0xff]   ;;  %v2278_v29 = vrot.slane %v2277_v53, 1  ;;  %5676 = vmatpush1.bf16.msra.mxu1 %v8163_v50  ;;  %5548 = vmatprep.subr.bf16.mxu0 %v8164_v47 }
 0x109   :  { %14704 = vst [vmem:[#allocation107_spill] sm:$0xff] %v10213_v48  ;;  %14705 = vst [vmem:[#allocation108_spill] sm:$0xff] %v10216_v57  ;;  %v2284_v2 = vmax.f32 %v2282_v11, %v2283_v13  ;;  %v2298_v4 = vmax.f32 %v2296_v16, %v2297_v6  ;;  %v10255_v58 = vmul.f32 %v233_v45, %v10204_v44  ;;  %v8169_v60 = vld [vmem:[%s14184_s4 + $0x38] ss:$24 sps:$4 sm:$0xff]   ;;  %5677 = vmatprep.subr.bf16.mxu1 %v8166_v1  ;;  %v8170_v6 = vld [vmem:[%s14184_s4 + $0x64] ss:$24 sps:$4 sm:$0xff]  }
 0x10a   :  { %14706 = vst [vmem:[#allocation109_spill] sm:$0xff] %v10219_v3  ;;  %14707 = vst [vmem:[#allocation110_spill] sm:$0xff] %v10238_v19  ;;  %v10262_v36 = vsel %vm760_vm2, %v525_v25, %v10062_v17  ;;  %v2305_v11 = vmax.f32 %v2303_v24, %v2304_v49  ;;  %v10265_v16 = vmul.f32 %v238_v39, %v10171_v46  ;;  %v8172_v50 = vld [vmem:[%s14184_s4 + $0x6c] ss:$24 sps:$4 sm:$0xff]   ;;  %v2292_v49 = vrot.slane %v2291_v30, 1 }
 0x10b   :  { %14708 = vst [vmem:[#allocation111_spill] sm:$0xff] %v10241_v37  ;;  %14709 = vst [vmem:[#allocation112_spill] sm:$0xff] %v10255_v58  ;;  %v10268_v13 = vmul.f32 %v233_v45, %v10224_v52  ;;  %v2312_v47 = vmax.f32 %v2310_v35, %v2311_v8  ;;  %v10277_v17 = vmul.f32 %v238_v39, %v10194_v43  ;;  %5549 = vmatpush1.bf16.msra.mxu0 %v8168_v38  ;;  %v8174_v35 = vld [vmem:[%s14184_s4 + $0x60] ss:$24 sps:$4 sm:$0xff]  }
 0x10c   :  { %14710 = vst [vmem:[#allocation113_spill] sm:$0xff] %v10265_v16  ;;  %v10280_v24 = vmul.f32 %v238_v39, %v10199_v5  ;;  %v10283_v25 = vmul.f32 %v233_v45, %v10235_v7  ;;  %v10286_v1 = vmul.f32 %v233_v45, %v10252_v51  ;;  %v540_v22 = vmax.f32 %v10238_v19, %v10213_v48  ;;  %v8175_v45 = vld [vmem:[%s14184_s4 + $0x68] ss:$24 sps:$4 sm:$0xff]   ;;  %v8176_v48 = vld [vmem:[%s14184_s4 + $0x94] ss:$24 sps:$4 sm:$0xff]  }
 0x10d   :  { %14711 = vst [vmem:[#allocation114_spill] sm:$0xff] %v10268_v13  ;;  %14712 = vst [vmem:[#allocation115_spill] sm:$0xff] %v10277_v17  ;;  %v547_v56 = vmax.f32 %v10241_v37, %v10216_v57  ;;  %v2279_v39 = vmax.f32 %v2277_v53, %v2278_v29  ;;  %v2285_v8 = vrot.slane %v2284_v2, 1  ;;  %v2299_v54 = vrot.slane %v2298_v4, 1  ;;  %5678 = vmatpush1.bf16.msra.mxu1 %v8169_v60  ;;  %v8178_v29 = vld [vmem:[%s14184_s4 + $0x9c] ss:$24 sps:$4 sm:$0xff]  }
 0x10e   :  { %14713 = vst [vmem:[#allocation116_spill] sm:$0xff] %v10280_v24  ;;  %14714 = vst [vmem:[#allocation117_spill] sm:$0xff] %v10283_v25  ;;  %v554_v0 = vmax.f32 %v10255_v58, %v10219_v3  ;;  %v2306_v38 = vrot.slane %v2305_v11, 1  ;;  %v541_v19 = vrot.slane %v540_v22, 4  ;;  %v561_v53 = vmax.f32 %v10268_v13, %v10265_v16  ;;  %5550 = vmatprep.subr.bf16.mxu0 %v8170_v6  ;;  %v8180_v6 = vld [vmem:[%s14184_s4 + $0x90] ss:$24 sps:$4 sm:$0xff]  }
 0x10f   :  { %14715 = vst [vmem:[#allocation118_spill] sm:$0xff] %v10286_v1  ;;  %v548_v33 = vrot.slane %v547_v56, 4  ;;  %5679 = vmatprep.subr.bf16.mxu1 %v8172_v50  ;;  %v2313_v60 = vrot.slane %v2312_v47, 1  ;;  %v568_v57 = vmax.f32 %v10283_v25, %v10277_v17  ;;  %v575_v58 = vmax.f32 %v10286_v1, %v10280_v24  ;;  %5551 = vmatpush1.bf16.msra.mxu0 %v8174_v35  ;;  %v8181_v17 = vld [vmem:[%s14184_s4 + $0x98] ss:$24 sps:$4 sm:$0xff]  }
 0x110   :  { %v555_v3 = vrot.slane %v554_v0, 4  ;;  %v2293_v37 = vmax.f32 %v2291_v30, %v2292_v49  ;;  %v542_v27 = vmax.f32 %v540_v22, %v541_v19  ;;  %v562_v59 = vrot.slane %v561_v53, 4  ;;  %5552 = vmatprep.subr.bf16.mxu0 %v8176_v48  ;;  %v2013_v49 = vpop.permute.xlu1 %2012 }
 0x111   :  { %v549_v40 = vmax.f32 %v547_v56, %v548_v33  ;;  %v2300_v50 = vmax.f32 %v2298_v4, %v2299_v54  ;;  %v569_v13 = vrot.slane %v568_v57, 4  ;;  %v576_v26 = vrot.slane %v575_v58, 4  ;;  %5680 = vmatpush1.bf16.msra.mxu1 %v8175_v45  ;;  %v8182_v33 = vld [vmem:[%s14184_s4 + $0xc4] ss:$24 sps:$4 sm:$0xff]  }
 0x112   :  { %v556_v16 = vmax.f32 %v554_v0, %v555_v3  ;;  %v10324_v19 = vsel %vm760_vm2, %v10161_v55, %v10068_v28  ;;  %v10329_v4 = vsel %vm760_vm2, %v10181_v62, %v10072_v18  ;;  %v543_v0 = vrot.slane %v542_v27, 2  ;;  %5681 = vmatprep.subr.bf16.mxu1 %v8178_v29  ;;  %v8184_v56 = vld [vmem:[%s14184_s4 + $0xcc] ss:$24 sps:$4 sm:$0xff]   ;;  %v2008_v28 = vpop.permute.xlu0 %2007  ;;  %v8186_v62 = vld [vmem:[%s14184_s4 + $0xc0] ss:$24 sps:$4 sm:$0xff]  }
 0x113   :  { %v563_v54 = vmax.f32 %v561_v53, %v562_v59  ;;  %v10334_v22 = vmax.f32 %v2284_v2, %v2285_v8  ;;  %v550_v30 = vrot.slane %v549_v40, 2  ;;  %v570_v48 = vmax.f32 %v568_v57, %v569_v13  ;;  %5553 = vmatpush1.bf16.msra.mxu0 %v8180_v6  ;;  %v8196_v29 = vld [vmem:[%s14184_s4 + $0x12c] ss:$24 sps:$4 sm:$0xff]  }
 0x114   :  { %v577_v3 = vmax.f32 %v575_v58, %v576_v26  ;;  %v2307_v55 = vmax.f32 %v2305_v11, %v2306_v38  ;;  %v10336_v35 = vmax.f32 %v2312_v47, %v2313_v60  ;;  %v10340_v18 = vsel %vm760_vm2, %v2279_v39, %v10078_v21  ;;  %5554 = vmatprep.subr.bf16.mxu0 %v8182_v33  ;;  %v8187_v21 = vld [vmem:[%s14184_s4 + $0xc8] ss:$24 sps:$4 sm:$0xff]   ;;  %v8188_v11 = vld [vmem:[%s14184_s4 + $0xf4] ss:$24 sps:$4 sm:$0xff]  }
 0x115   :  { %14716 = vst [vmem:[#allocation119_spill] sm:$0xff] %v10334_v22  ;;  %v557_v59 = vrot.slane %v556_v16, 2  ;;  %v10347_v2 = vsel %vm760_vm2, %v2293_v37, %v10082_v23  ;;  %v10351_v58 = vsel %vm760_vm2, %v2300_v50, %v10116_v15  ;;  %v544_v26 = vmax.f32 %v542_v27, %v543_v0  ;;  %5682 = vmatpush1.bf16.msra.mxu1 %v8181_v17  ;;  %v8190_v15 = vld [vmem:[%s14184_s4 + $0xfc] ss:$24 sps:$4 sm:$0xff]  }
 0x116   :  { %v564_v57 = vrot.slane %v563_v54, 2  ;;  %v10360_v13 = vmul.f32 %v2013_v49, %v10147_v61  ;;  %v10363_v23 = vmul.f32 %v2013_v49, %v10152_v42  ;;  %v10366_v37 = vmul.f32 %v2013_v49, %v10157_v9  ;;  %5683 = vmatprep.subr.bf16.mxu1 %v8184_v56  ;;  %v243_v24 = vpop.permute.xlu0 %242 }
 0x117   :  { %v10369_v27 = vmul.f32 %v2008_v28, %v10166_v31  ;;  %v10374_v47 = vmax.f32 %v549_v40, %v550_v30  ;;  %v571_v17 = vrot.slane %v570_v48, 2  ;;  %v578_v39 = vrot.slane %v577_v3, 2  ;;  %5555 = vmatpush1.bf16.msra.mxu0 %v8186_v62  ;;  %v8192_v40 = vld [vmem:[%s14184_s4 + $0xf0] ss:$24 sps:$4 sm:$0xff]  }
 0x118   :  { %14717 = vst [vmem:[#allocation120_spill] sm:$0xff] %v10360_v13  ;;  %14718 = vst [vmem:[#allocation121_spill] sm:$0xff] %v10363_v23  ;;  %v10377_v61 = vmul.f32 %v2008_v28, %v10176_v14  ;;  %v558_v42 = vmax.f32 %v556_v16, %v557_v59  ;;  %v10380_v9 = vmul.f32 %v2013_v49, %v10171_v46  ;;  %v545_v45 = vrot.slane %v544_v26, 1 }
 0x119   :  { %14719 = vst [vmem:[#allocation122_spill] sm:$0xff] %v10366_v37  ;;  %14720 = vst [vmem:[#allocation123_spill] sm:$0xff] %v10369_v27  ;;  %v10383_v31 = vmul.f32 %v2008_v28, %v10204_v44  ;;  %v10386_v8 = vmul.f32 %v2008_v28, %v10224_v52  ;;  %v10391_v38 = vmax.f32 %v563_v54, %v564_v57  ;;  %5684 = vmatpush1.bf16.msra.mxu1 %v8187_v21  ;;  %v8193_v44 = vld [vmem:[%s14184_s4 + $0xf8] ss:$24 sps:$4 sm:$0xff]   ;;  %v8194_v52 = vld [vmem:[%s14184_s4 + $0x124] ss:$24 sps:$4 sm:$0xff]  }
 0x11a   :  { %14721 = vst [vmem:[#allocation124_spill] sm:$0xff] %v10377_v61  ;;  %14722 = vst [vmem:[#allocation125_spill] sm:$0xff] %v10380_v9  ;;  %v10394_v14 = vmul.f32 %v2013_v49, %v10194_v43  ;;  %v10397_v46 = vmul.f32 %v2008_v28, %v10235_v7  ;;  %5556 = vmatprep.subr.bf16.mxu0 %v8188_v11  ;;  %v10407_v16 = vsel %vm760_vm2, %v2307_v55, %v10128_v12  ;;  %v8198_v54 = vld [vmem:[%s14184_s4 + $0x120] ss:$24 sps:$4 sm:$0xff]   ;;  %v8202_v57 = vld [vmem:[%s14184_s4 + $0x15c] ss:$24 sps:$4 sm:$0xff]  }
 0x11b   :  { %14723 = vst [vmem:[#allocation126_spill] sm:$0xff] %v10383_v31  ;;  %14724 = vst [vmem:[#allocation127_spill] sm:$0xff] %v10386_v8  ;;  %v10410_v43 = vmul.f32 %v2013_v49, %v10199_v5  ;;  %v10413_v7 = vmul.f32 %v2008_v28, %v10252_v51  ;;  %v2315_v53 = vmax.f32 %v10369_v27, %v10360_v13  ;;  %5685 = vmatprep.subr.bf16.mxu1 %v8190_v15  ;;  %v8199_v49 = vld [vmem:[%s14184_s4 + $0x128] ss:$24 sps:$4 sm:$0xff]   ;;  %v8200_v28 = vld [vmem:[%s14184_s4 + $0x154] ss:$24 sps:$4 sm:$0xff]  }
 0x11c   :  { %14725 = vst [vmem:[#allocation128_spill] sm:$0xff] %v10394_v14  ;;  %14726 = vst [vmem:[#allocation129_spill] sm:$0xff] %v10397_v46  ;;  %v552_v60 = vrot.slane %v10374_v47, 1  ;;  %v10421_v6 = vmax.f32 %v570_v48, %v571_v17  ;;  %v10423_v12 = vmax.f32 %v577_v3, %v578_v39  ;;  %v2322_v5 = vmax.f32 %v10377_v61, %v10363_v23  ;;  %v8217_v13 = vld [vmem:[%s14184_s4 + $0x1b8] ss:$24 sps:$4 sm:$0xff]  }
 0x11d   :  { %14727 = vst [vmem:[#allocation130_spill] sm:$0xff] %v10410_v43  ;;  %14728 = vst [vmem:[#allocation131_spill] sm:$0xff] %v10413_v7  ;;  %v559_v50 = vrot.slane %v558_v42, 1  ;;  %v2316_v51 = vrot.slane %v2315_v53, 4  ;;  %v2329_v33 = vmax.f32 %v10383_v31, %v10366_v37  ;;  %v2336_v0 = vmax.f32 %v10386_v8, %v10380_v9  ;;  %5557 = vmatpush1.bf16.msra.mxu0 %v8192_v40 }
 0x11e   :  { %v546_v56 = vmax.f32 %v544_v26, %v545_v45  ;;  %v566_v30 = vrot.slane %v10391_v38, 1  ;;  %v2323_v48 = vrot.slane %v2322_v5, 4  ;;  %v2343_v3 = vmax.f32 %v10397_v46, %v10394_v14  ;;  %5686 = vmatpush1.bf16.msra.mxu1 %v8193_v44  ;;  %5558 = vmatprep.subr.bf16.mxu0 %v8194_v52  ;;  %v10453_v52 = vld [vmem:[%s14180_s0 + $0x210] sm:$0xff]  ;;  %v8220_v46 = vld [vmem:[%s14184_s4 + $0x1ec] ss:$24 sps:$4 sm:$0xff]  }
 0x11f   :  { %v2317_v55 = vmax.f32 %v2315_v53, %v2316_v51  ;;  %v2330_v59 = vrot.slane %v2329_v33, 4  ;;  %v2337_v62 = vrot.slane %v2336_v0, 4  ;;  %v2350_v26 = vmax.f32 %v10413_v7, %v10410_v43  ;;  %5687 = vmatprep.subr.bf16.mxu1 %v8196_v29  ;;  %v10458_v53 = vld [vmem:[%s14180_s0 + $0x218] sm:$0xff]  ;;  %v8204_v29 = vld [vmem:[%s14184_s4 + $0x150] ss:$24 sps:$4 sm:$0xff]  }
 0x120   :  { %v573_v21 = vrot.slane %v10421_v6, 1  ;;  %v580_v11 = vrot.slane %v10423_v12, 1  ;;  %v2324_v15 = vmax.f32 %v2322_v5, %v2323_v48  ;;  %v2344_v17 = vrot.slane %v2343_v3, 4  ;;  %v10471_v48 = vld [vmem:[%s14180_s0 + $0x220] sm:$0xff]  ;;  %v10515_v7 = vld [vmem:[%s14180_s0 + $0x230] sm:$0xff] }
 0x121   :  { %v2318_v39 = vrot.slane %v2317_v55, 2  ;;  %v2331_v40 = vmax.f32 %v2329_v33, %v2330_v59  ;;  %v2338_v45 = vmax.f32 %v2336_v0, %v2337_v62  ;;  %v2351_v44 = vrot.slane %v2350_v26, 4  ;;  %5559 = vmatpush1.bf16.msra.mxu0 %v8198_v54  ;;  %v10476_v54 = vld [vmem:[%s14180_s0 + $0x228] sm:$0xff]  ;;  %v10481_v59 = vld [vmem:[%s14180_s0 + $0x1e0] sm:$0xff] }
 0x122   :  { %v10466_v5 = vsel %vm760_vm2, %v10336_v35, %v10132_v34  ;;  %v560_v51 = vmax.f32 %v558_v42, %v559_v50  ;;  %v2325_v33 = vrot.slane %v2324_v15, 2  ;;  %v2345_v0 = vmax.f32 %v2343_v3, %v2344_v17  ;;  %5688 = vmatpush1.bf16.msra.mxu1 %v8199_v49  ;;  %5560 = vmatprep.subr.bf16.mxu0 %v8200_v28  ;;  %v8205_v34 = vld [vmem:[%s14184_s4 + $0x158] ss:$24 sps:$4 sm:$0xff]   ;;  %v8206_v35 = vld [vmem:[%s14184_s4 + $0x184] ss:$24 sps:$4 sm:$0xff]   ;;  %v248_v17 = vpop.permute.xlu1 %247  ;;  %v10495_v49 = vld [vmem:[%s14180_s0 + $0x1e8] sm:$0xff] }
 0x123   :  { %v10490_v42 = vmax.f32 %v10374_v47, %v552_v60  ;;  %v2319_v50 = vmax.f32 %v2317_v55, %v2318_v39  ;;  %v2332_v3 = vrot.slane %v2331_v40, 2  ;;  %v2339_v62 = vrot.slane %v2338_v45, 2  ;;  %v10500_v28 = vld [vmem:[%s14180_s0 + $0x1f0] sm:$0xff]  ;;  %5689 = vmatprep.subr.bf16.mxu1 %v8202_v57  ;;  %v8208_v47 = vld [vmem:[%s14184_s4 + $0x18c] ss:$24 sps:$4 sm:$0xff]   ;;  %v10520_v57 = vld [vmem:[%s14180_s0 + $0x238] sm:$0xff] }
 0x124   :  { %v567_v60 = vmax.f32 %v10391_v38, %v566_v30  ;;  %v10508_v55 = vsel %vm762_vm3, %v546_v56, %v10185_v10  ;;  %v10510_v39 = vmax.f32 %v2324_v15, %v2325_v33  ;;  %v2352_v43 = vmax.f32 %v2350_v26, %v2351_v44  ;;  %v8210_v38 = vld [vmem:[%s14184_s4 + $0x180] ss:$24 sps:$4 sm:$0xff]   ;;  %v8212_v33 = vld [vmem:[%s14184_s4 + $0x1b4] ss:$24 sps:$4 sm:$0xff]  }
 0x125   :  { %v8211_v10 = vld [vmem:[%s14184_s4 + $0x188] ss:$24 sps:$4 sm:$0xff]   ;;  %v574_v56 = vmax.f32 %v10421_v6, %v573_v21  ;;  %v581_v30 = vmax.f32 %v10423_v12, %v580_v11  ;;  %v10530_v26 = vmax.f32 %v2331_v40, %v2332_v3  ;;  %v10532_v15 = vmax.f32 %v2338_v45, %v2339_v62  ;;  %v10537_v44 = vld [vmem:[%s14180_s0 + $0x1f8] sm:$0xff]  ;;  %5561 = vmatpush1.bf16.msra.mxu0 %v8204_v29 }
 0x126   :  { %v10544_v1 = vsel %vm762_vm3, %v560_v51, %v10189_v32  ;;  %v2346_v6 = vrot.slane %v2345_v0, 2  ;;  %v10547_v12 = vmul.f32 %v248_v17, %v10453_v52  ;;  %v10550_v21 = vmul.f32 %v248_v17, %v10458_v53  ;;  %v10555_v11 = vld [vmem:[%s14180_s0 + $0x200] sm:$0xff]  ;;  %5690 = vmatpush1.bf16.msra.mxu1 %v8205_v34  ;;  %5562 = vmatprep.subr.bf16.mxu0 %v8206_v35  ;;  %v8214_v40 = vld [vmem:[%s14184_s4 + $0x1bc] ss:$24 sps:$4 sm:$0xff]   ;;  %v10569_v51 = vld [vmem:[%s14180_s0 + $0x208] sm:$0xff] }
 0x127   :  { %v2320_v32 = vrot.slane %v2319_v50, 1  ;;  %v10561_v45 = vmul.f32 %v248_v17, %v10471_v48  ;;  %v10564_v29 = vmul.f32 %v248_v17, %v10476_v54  ;;  %v10572_v3 = vmul.f32 %v243_v24, %v10481_v59  ;;  %5691 = vmatprep.subr.bf16.mxu1 %v8208_v47  ;;  %v8216_v34 = vld [vmem:[%s14184_s4 + $0x1b0] ss:$24 sps:$4 sm:$0xff]   ;;  %v8218_v47 = vld [vmem:[%s14184_s4 + $0x1e4] ss:$24 sps:$4 sm:$0xff]  }
 0x128   :  { %14729 = vst [vmem:[#allocation132_spill] sm:$0xff] %v10547_v12  ;;  %14730 = vst [vmem:[#allocation133_spill] sm:$0xff] %v10550_v21  ;;  %v2327_v35 = vrot.slane %v10510_v39, 1  ;;  %v2353_v62 = vrot.slane %v2352_v43, 2  ;;  %v10579_v9 = vmul.f32 %v243_v24, %v10495_v49  ;;  %v10582_v8 = vmul.f32 %v243_v24, %v10500_v28 }
 0x129   :  { %14731 = vst [vmem:[#allocation134_spill] sm:$0xff] %v10561_v45  ;;  %14732 = vst [vmem:[#allocation135_spill] sm:$0xff] %v10564_v29  ;;  %v2334_v27 = vrot.slane %v10530_v26, 1  ;;  %v2341_v14 = vrot.slane %v10532_v15, 1  ;;  %v10593_v37 = vmul.f32 %v248_v17, %v10515_v7  ;;  %v10596_v23 = vmul.f32 %v248_v17, %v10520_v57  ;;  %5563 = vmatpush1.bf16.msra.mxu0 %v8210_v38 }
 0x12a   :  { %14733 = vst [vmem:[#allocation136_spill] sm:$0xff] %v10572_v3  ;;  %14734 = vst [vmem:[#allocation137_spill] sm:$0xff] %v10579_v9  ;;  %v10601_v31 = vmax.f32 %v2345_v0, %v2346_v6  ;;  %v10604_v61 = vmul.f32 %v243_v24, %v10537_v44  ;;  %v10607_v22 = vmul.f32 %v243_v24, %v10555_v11  ;;  %5692 = vmatpush1.bf16.msra.mxu1 %v8211_v10 }
 0x12b   :  { %14735 = vst [vmem:[#allocation138_spill] sm:$0xff] %v10582_v8  ;;  %14736 = vst [vmem:[#allocation139_spill] sm:$0xff] %v10593_v37  ;;  %v10610_v25 = vmul.f32 %v243_v24, %v10569_v51  ;;  %v10614_v17 = vsel %vm762_vm3, %v567_v60, %v10262_v36  ;;  %v10618_v38 = vsel %vm762_vm3, %v574_v56, %v10324_v19  ;;  %5564 = vmatprep.subr.bf16.mxu0 %v8212_v33  ;;  %v8222_v24 = vld [vmem:[%s14184_s4 + $0x1e0] ss:$24 sps:$4 sm:$0xff]   ;;  %v8224_v56 = vld [vmem:[%s14184_s4 + $0x214] ss:$24 sps:$4 sm:$0xff]  }
 0x12c   :  { %14737 = vst [vmem:[#allocation140_spill] sm:$0xff] %v10596_v23  ;;  %14738 = vst [vmem:[#allocation141_spill] sm:$0xff] %v10604_v61  ;;  %v10622_v0 = vsel %vm762_vm3, %v581_v30, %v10329_v4  ;;  %v582_v6 = vmax.f32 %v10572_v3, %v10547_v12  ;;  %v2321_v10 = vmax.f32 %v2319_v50, %v2320_v32  ;;  %5693 = vmatprep.subr.bf16.mxu1 %v8214_v40  ;;  %v8223_v4 = vld [vmem:[%s14184_s4 + $0x1e8] ss:$24 sps:$4 sm:$0xff]   ;;  %v8226_v40 = vld [vmem:[%s14184_s4 + $0x21c] ss:$24 sps:$4 sm:$0xff]  }
 0x12d   :  { %14739 = vst [vmem:[#allocation142_spill] sm:$0xff] %v10607_v22  ;;  %14740 = vst [vmem:[#allocation143_spill] sm:$0xff] %v10610_v25  ;;  %v589_v36 = vmax.f32 %v10579_v9, %v10550_v21  ;;  %v596_v19 = vmax.f32 %v10582_v8, %v10561_v45  ;;  %v603_v60 = vmax.f32 %v10604_v61, %v10564_v29  ;;  %5565 = vmatpush1.bf16.msra.mxu0 %v8216_v34  ;;  %v8228_v34 = vld [vmem:[%s14184_s4 + $0x210] ss:$24 sps:$4 sm:$0xff]  }
 0x12e   :  { %v10641_v30 = vmax.f32 %v2352_v43, %v2353_v62  ;;  %v583_v50 = vrot.slane %v582_v6, 4  ;;  %v610_v33 = vmax.f32 %v10607_v22, %v10593_v37  ;;  %v617_v32 = vmax.f32 %v10610_v25, %v10596_v23  ;;  %5694 = vmatpush1.bf16.msra.mxu1 %v8217_v13  ;;  %5566 = vmatprep.subr.bf16.mxu0 %v8218_v47  ;;  %v2023_v47 = vpop.permute.xlu1 %2022 }
 0x12f   :  { %v2348_v29 = vrot.slane %v10601_v31, 1  ;;  %v590_v61 = vrot.slane %v589_v36, 4  ;;  %v597_v12 = vrot.slane %v596_v19, 4  ;;  %v604_v3 = vrot.slane %v603_v60, 4  ;;  %5695 = vmatprep.subr.bf16.mxu1 %v8220_v46  ;;  %v8230_v46 = vld [vmem:[%s14184_s4 + $0x244] ss:$24 sps:$4 sm:$0xff]  }
 0x130   :  { %v10652_v43 = vmax.f32 %v10510_v39, %v2327_v35  ;;  %v584_v62 = vmax.f32 %v582_v6, %v583_v50  ;;  %v611_v37 = vrot.slane %v610_v33, 4  ;;  %v618_v45 = vrot.slane %v617_v32, 4  ;;  %v8229_v39 = vld [vmem:[%s14184_s4 + $0x218] ss:$24 sps:$4 sm:$0xff]  }
 0x131   :  { %v10658_v23 = vmax.f32 %v10530_v26, %v2334_v27  ;;  %v10661_v25 = vmax.f32 %v10532_v15, %v2341_v14  ;;  %v598_v21 = vmax.f32 %v596_v19, %v597_v12  ;;  %v605_v13 = vmax.f32 %v603_v60, %v604_v3  ;;  %5567 = vmatpush1.bf16.msra.mxu0 %v8222_v24  ;;  %v2018_v3 = vpop.permute.xlu0 %2017  ;;  %v8232_v19 = vld [vmem:[%s14184_s4 + $0x24c] ss:$24 sps:$4 sm:$0xff]  }
 0x132   :  { %14741 = vst [vmem:[#allocation144_spill] sm:$0xff] %v10652_v43  ;;  %v2355_v35 = vrot.slane %v10641_v30, 1  ;;  %v585_v6 = vrot.slane %v584_v62, 2  ;;  %v612_v50 = vmax.f32 %v610_v33, %v611_v37  ;;  %v619_v27 = vmax.f32 %v617_v32, %v618_v45  ;;  %5696 = vmatpush1.bf16.msra.mxu1 %v8223_v4  ;;  %5568 = vmatprep.subr.bf16.mxu0 %v8224_v56 }
 0x133   :  { %v10672_v14 = vsel %vm762_vm3, %v2321_v10, %v10340_v18  ;;  %v591_v26 = vmax.f32 %v589_v36, %v590_v61  ;;  %v599_v15 = vrot.slane %v598_v21, 2  ;;  %v606_v12 = vrot.slane %v605_v13, 2  ;;  %5697 = vmatprep.subr.bf16.mxu1 %v8226_v40  ;;  %v8234_v18 = vld [vmem:[%s14184_s4 + $0x240] ss:$24 sps:$4 sm:$0xff]  }
 0x134   :  { %v10677_v60 = vmax.f32 %v584_v62, %v585_v6  ;;  %v613_v43 = vrot.slane %v612_v50, 2  ;;  %v10680_v37 = vmul.f32 %v2023_v47, %v10453_v52  ;;  %v10683_v45 = vmul.f32 %v2023_v47, %v10458_v53  ;;  %v8235_v52 = vld [vmem:[%s14184_s4 + $0x248] ss:$24 sps:$4 sm:$0xff]  }
 0x135   :  { %v600_v61 = vmax.f32 %v598_v21, %v599_v15  ;;  %v10688_v24 = vmax.f32 %v605_v13, %v606_v12  ;;  %v10691_v10 = vmul.f32 %v2023_v47, %v10471_v48  ;;  %v10694_v36 = vmul.f32 %v2023_v47, %v10476_v54  ;;  %5569 = vmatpush1.bf16.msra.mxu0 %v8228_v34  ;;  %v8236_v48 = vld [vmem:[%s14184_s4 + $0x274] ss:$24 sps:$4 sm:$0xff]   ;;  %v8240_v13 = vld [vmem:[%s14184_s4 + $0x270] ss:$24 sps:$4 sm:$0xff]  }
 0x136   :  { %14742 = vst [vmem:[#allocation145_spill] sm:$0xff] %v10680_v37  ;;  %14743 = vst [vmem:[#allocation146_spill] sm:$0xff] %v10683_v45  ;;  %v10699_v53 = vmax.f32 %v612_v50, %v613_v43  ;;  %v620_v4 = vrot.slane %v619_v27, 2  ;;  %v10702_v56 = vmul.f32 %v2018_v3, %v10481_v59  ;;  %v10705_v21 = vmul.f32 %v2018_v3, %v10495_v49  ;;  %v8238_v54 = vld [vmem:[%s14184_s4 + $0x27c] ss:$24 sps:$4 sm:$0xff]  }
 0x137   :  { %14744 = vst [vmem:[#allocation147_spill] sm:$0xff] %v10691_v10  ;;  %14745 = vst [vmem:[#allocation148_spill] sm:$0xff] %v10694_v36  ;;  %v587_v33 = vrot.slane %v10677_v60, 1  ;;  %v592_v32 = vrot.slane %v591_v26, 2  ;;  %v601_v40 = vrot.slane %v600_v61, 1  ;;  %v10715_v43 = vmul.f32 %v2018_v3, %v10500_v28  ;;  %5698 = vmatpush1.bf16.msra.mxu1 %v8229_v39  ;;  %5570 = vmatprep.subr.bf16.mxu0 %v8230_v46 }
 0x138   :  { %14746 = vst [vmem:[#allocation149_spill] sm:$0xff] %v10702_v56  ;;  %14747 = vst [vmem:[#allocation150_spill] sm:$0xff] %v10705_v21  ;;  %v2349_v59 = vmax.f32 %v10601_v31, %v2348_v29  ;;  %v608_v49 = vrot.slane %v10688_v24, 1  ;;  %v615_v62 = vrot.slane %v10699_v53, 1  ;;  %v10721_v34 = vmul.f32 %v2018_v3, %v10537_v44  ;;  %5699 = vmatprep.subr.bf16.mxu1 %v8232_v19  ;;  %v8241_v44 = vld [vmem:[%s14184_s4 + $0x278] ss:$24 sps:$4 sm:$0xff]  }
 0x139   :  { %14748 = vst [vmem:[#allocation151_spill] sm:$0xff] %v10715_v43  ;;  %v10727_v28 = vmul.f32 %v2023_v47, %v10515_v7  ;;  %v10730_v39 = vmul.f32 %v2023_v47, %v10520_v57  ;;  %v10733_v31 = vmul.f32 %v2018_v3, %v10555_v11  ;;  %v10736_v29 = vmul.f32 %v2018_v3, %v10569_v51  ;;  %v8242_v46 = vld [vmem:[%s14184_s4 + $0x2a4] ss:$24 sps:$4 sm:$0xff]  }
 0x13a   :  { %14749 = vst [vmem:[#allocation152_spill] sm:$0xff] %v10721_v34  ;;  %v2356_v7 = vmax.f32 %v10641_v30, %v2355_v35  ;;  %v621_v6 = vmax.f32 %v619_v27, %v620_v4  ;;  %v2357_v57 = vmax.f32 %v10702_v56, %v10680_v37  ;;  %v2364_v11 = vmax.f32 %v10705_v21, %v10683_v45  ;;  %v8244_v51 = vld [vmem:[%s14184_s4 + $0x2ac] ss:$24 sps:$4 sm:$0xff]  }
 0x13b   :  { %14750 = vst [vmem:[#allocation153_spill] sm:$0xff] %v10727_v28  ;;  %14751 = vst [vmem:[#allocation154_spill] sm:$0xff] %v10730_v39  ;;  %5571 = vmatpush1.bf16.msra.mxu0 %v8234_v18  ;;  %v10755_v47 = vsel %vm762_vm3, %v10658_v23, %v10347_v2  ;;  %v10760_v30 = vsel %vm762_vm3, %v10661_v25, %v10351_v58  ;;  %v2371_v35 = vmax.f32 %v10715_v43, %v10691_v10 }
 0x13c   :  { %14752 = vst [vmem:[#allocation155_spill] sm:$0xff] %v10733_v31  ;;  %14753 = vst [vmem:[#allocation156_spill] sm:$0xff] %v10736_v29  ;;  %v2378_v50 = vmax.f32 %v10721_v34, %v10694_v36  ;;  %5700 = vmatpush1.bf16.msra.mxu1 %v8235_v52  ;;  %v10768_v27 = vsel %vm762_vm3, %v2349_v59, %v10407_v16  ;;  %v10770_v15 = vmax.f32 %v591_v26, %v592_v32  ;;  %v8246_v16 = vld [vmem:[%s14184_s4 + $0x2a0] ss:$24 sps:$4 sm:$0xff]  }
 0x13d   :  { %v2358_v2 = vrot.slane %v2357_v57, 4  ;;  %v2365_v23 = vrot.slane %v2364_v11, 4  ;;  %5572 = vmatprep.subr.bf16.mxu0 %v8236_v48  ;;  %5701 = vmatprep.subr.bf16.mxu1 %v8238_v54  ;;  %v2372_v12 = vrot.slane %v2371_v35, 4  ;;  %v2385_v58 = vmax.f32 %v10733_v31, %v10727_v28  ;;  %v8247_v59 = vld [vmem:[%s14184_s4 + $0x2a8] ss:$24 sps:$4 sm:$0xff]  }
 0x13e   :  { %v2379_v25 = vrot.slane %v2378_v50, 4  ;;  %v2392_v3 = vmax.f32 %v10736_v29, %v10730_v39  ;;  %v602_v19 = vmax.f32 %v600_v61, %v601_v40  ;;  %v622_v18 = vrot.slane %v621_v6, 1  ;;  %v8248_v61 = vld [vmem:[%s14184_s4 + $0x2d4] ss:$24 sps:$4 sm:$0xff]   ;;  %v10880_v29 = vld [vmem:[%s14180_s0 + $0x260] sm:$0xff] }
 0x13f   :  { %v2359_v52 = vmax.f32 %v2357_v57, %v2358_v2  ;;  %v2366_v4 = vmax.f32 %v2364_v11, %v2365_v23  ;;  %5573 = vmatpush1.bf16.msra.mxu0 %v8240_v13  ;;  %v2373_v26 = vmax.f32 %v2371_v35, %v2372_v12  ;;  %v2386_v54 = vrot.slane %v2385_v58, 4  ;;  %v258_v23 = vpop.permute.xlu1 %257  ;;  %v151_v39 = vld [vmem:[%s14180_s0 + $0x248] sm:$0xff] }
 0x140   :  { %v2380_v48 = vmax.f32 %v2378_v50, %v2379_v25  ;;  %v2393_v32 = vrot.slane %v2392_v3, 4  ;;  %5702 = vmatpush1.bf16.msra.mxu1 %v8241_v44  ;;  %5574 = vmatprep.subr.bf16.mxu0 %v8242_v46  ;;  %v10787_v40 = vsel %vm762_vm3, %v2356_v7, %v10466_v5  ;;  %v609_v57 = vmax.f32 %v10688_v24, %v608_v49  ;;  %v8250_v44 = vld [vmem:[%s14184_s4 + $0x2dc] ss:$24 sps:$4 sm:$0xff]   ;;  %v253_v49 = vpop.permute.xlu0 %252  ;;  %v10807_v7 = vld [vmem:[%s14180_s0 + $0x240] sm:$0xff] }
 0x141   :  { %v2360_v11 = vrot.slane %v2359_v52, 2  ;;  %5703 = vmatprep.subr.bf16.mxu1 %v8244_v51  ;;  %v2374_v46 = vrot.slane %v2373_v26, 2  ;;  %v2387_v50 = vmax.f32 %v2385_v58, %v2386_v54  ;;  %v10797_v5 = vld [vmem:[%s14180_s0 + $0x270] sm:$0xff]  ;;  %v10802_v24 = vld [vmem:[%s14180_s0 + $0x278] sm:$0xff]  ;;  %v10812_v51 = vmax.f32 %v10677_v60, %v587_v33  ;;  %v10823_v54 = vld [vmem:[%s14180_s0 + $0x288] sm:$0xff] }
 0x142   :  { %v2381_v35 = vrot.slane %v2380_v48, 2  ;;  %v2394_v2 = vmax.f32 %v2392_v3, %v2393_v32  ;;  %v616_v12 = vmax.f32 %v10699_v53, %v615_v62  ;;  %v623_v25 = vmax.f32 %v621_v6, %v622_v18  ;;  %v10818_v3 = vld [vmem:[%s14180_s0 + $0x280] sm:$0xff]  ;;  %v8252_v60 = vld [vmem:[%s14184_s4 + $0x2d0] ss:$24 sps:$4 sm:$0xff]   ;;  %v10857_v32 = vld [vmem:[%s14180_s0 + $0x298] sm:$0xff] }
 0x143   :  { %v2367_v58 = vrot.slane %v2366_v4, 2  ;;  %5575 = vmatpush1.bf16.msra.mxu0 %v8246_v16  ;;  %v10830_v53 = vsel %vm764_vm4, %v602_v19, %v10544_v1  ;;  %v2375_v33 = vmax.f32 %v2373_v26, %v2374_v46  ;;  %v2388_v62 = vrot.slane %v2387_v50, 2  ;;  %v10835_v18 = vld [vmem:[%s14180_s0 + $0x250] sm:$0xff]  ;;  %v10840_v16 = vld [vmem:[%s14180_s0 + $0x258] sm:$0xff] }
 0x144   :  { %v2395_v6 = vrot.slane %v2394_v2, 2  ;;  %5704 = vmatpush1.bf16.msra.mxu1 %v8247_v59  ;;  %5576 = vmatprep.subr.bf16.mxu0 %v8248_v61  ;;  %v8253_v1 = vld [vmem:[%s14184_s4 + $0x2d8] ss:$24 sps:$4 sm:$0xff]   ;;  %v10847_v19 = vsel %vm764_vm4, %v609_v57, %v10614_v17  ;;  %v10860_v59 = vmul.f32 %v258_v23, %v10797_v5  ;;  %v10863_v61 = vmul.f32 %v258_v23, %v10802_v24 }
 0x145   :  { %v10852_v26 = vld [vmem:[%s14180_s0 + $0x290] sm:$0xff]  ;;  %v10866_v46 = vmul.f32 %v253_v49, %v10807_v7  ;;  %5705 = vmatprep.subr.bf16.mxu1 %v8250_v44  ;;  %v2361_v17 = vmax.f32 %v2359_v52, %v2360_v11  ;;  %v2382_v57 = vmax.f32 %v2380_v48, %v2381_v35  ;;  %v10869_v13 = vmul.f32 %v258_v23, %v10818_v3  ;;  %v10885_v52 = vld [vmem:[%s14180_s0 + $0x268] sm:$0xff] }
 0x146   :  { %14754 = vst [vmem:[#allocation157_spill] sm:$0xff] %v10860_v59  ;;  %14755 = vst [vmem:[#allocation158_spill] sm:$0xff] %v10863_v61  ;;  %v10872_v28 = vmul.f32 %v258_v23, %v10823_v54  ;;  %v10887_v48 = vmax.f32 %v2366_v4, %v2367_v58  ;;  %v2389_v11 = vmax.f32 %v2387_v50, %v2388_v62  ;;  %v2376_v36 = vrot.slane %v2375_v33, 1 }
 0x147   :  { %14756 = vst [vmem:[#allocation159_spill] sm:$0xff] %v10866_v46  ;;  %14757 = vst [vmem:[#allocation160_spill] sm:$0xff] %v10869_v13  ;;  %v10890_v44 = vmul.f32 %v253_v49, %v10835_v18  ;;  %v10893_v35 = vmul.f32 %v253_v49, %v10840_v16  ;;  %5577 = vmatpush1.bf16.msra.mxu0 %v8252_v60  ;;  %v2396_v34 = vmax.f32 %v2394_v2, %v2395_v6 }
 0x148   :  { %14758 = vst [vmem:[#allocation161_spill] sm:$0xff] %v10872_v28  ;;  %v10896_v37 = vmul.f32 %v258_v23, %v10852_v26  ;;  %v10899_v56 = vmul.f32 %v258_v23, %v10857_v32  ;;  %5706 = vmatpush1.bf16.msra.mxu1 %v8253_v1  ;;  %v10901_v10 = vmul.f32 %v253_v49, %v151_v39  ;;  %v2362_v60 = vrot.slane %v2361_v17, 1 }
 0x149   :  { %14759 = vst [vmem:[#allocation162_spill] sm:$0xff] %v10890_v44  ;;  %14760 = vst [vmem:[#allocation163_spill] sm:$0xff] %v10893_v35  ;;  %v10904_v4 = vmul.f32 %v253_v49, %v10880_v29  ;;  %v10907_v50 = vmul.f32 %v253_v49, %v10885_v52  ;;  %v624_v58 = vmax.f32 %v10866_v46, %v10860_v59  ;;  %v2383_v62 = vrot.slane %v2382_v57, 1 }
 0x14a   :  { %14761 = vst [vmem:[#allocation164_spill] sm:$0xff] %v10896_v37  ;;  %14762 = vst [vmem:[#allocation165_spill] sm:$0xff] %v10899_v56  ;;  %v10913_v2 = vsel %vm764_vm4, %v616_v12, %v10618_v38  ;;  %v10917_v23 = vsel %vm764_vm4, %v623_v25, %v10622_v0  ;;  %v2390_v6 = vrot.slane %v2389_v11, 1  ;;  %v638_v45 = vmax.f32 %v10890_v44, %v10869_v13 }
 0x14b   :  { %14763 = vst [vmem:[#allocation166_spill] sm:$0xff] %v10901_v10  ;;  %14764 = vst [vmem:[#allocation167_spill] sm:$0xff] %v10904_v4  ;;  %v625_v1 = vrot.slane %v624_v58, 4  ;;  %v645_v49 = vmax.f32 %v10893_v35, %v10872_v28  ;;  %v2377_v31 = vmax.f32 %v2375_v33, %v2376_v36  ;;  %v2397_v59 = vrot.slane %v2396_v34, 1  ;;  %v2033_v36 = vpop.permute.xlu1 %2032 }
 0x14c   :  { %14765 = vst [vmem:[#allocation168_spill] sm:$0xff] %v10907_v50  ;;  %v652_v38 = vmax.f32 %v10904_v4, %v10896_v37  ;;  %v659_v12 = vmax.f32 %v10907_v50, %v10899_v56  ;;  %v631_v25 = vmax.f32 %v10901_v10, %v10863_v61  ;;  %v639_v46 = vrot.slane %v638_v45, 4  ;;  %v2028_v61 = vpop.permute.xlu0 %2027 }
 0x14d   :  { %v646_v43 = vrot.slane %v645_v49, 4  ;;  %v10930_v21 = vmax.f32 %v2361_v17, %v2362_v60  ;;  %v626_v13 = vmax.f32 %v624_v58, %v625_v1  ;;  %v2384_v33 = vmax.f32 %v2382_v57, %v2383_v62 }
 0x14e   :  { %v653_v44 = vrot.slane %v652_v38, 4  ;;  %v660_v28 = vrot.slane %v659_v12, 4  ;;  %v10932_v35 = vmax.f32 %v2389_v11, %v2390_v6  ;;  %v640_v37 = vmax.f32 %v638_v45, %v639_v46 }
 0x14f   :  { %14766 = vst [vmem:[#allocation169_spill] sm:$0xff] %v10930_v21  ;;  %v647_v4 = vmax.f32 %v645_v49, %v646_v43  ;;  %v2398_v22 = vmax.f32 %v2396_v34, %v2397_v59  ;;  %v10936_v0 = vsel %vm764_vm4, %v2377_v31, %v10755_v47  ;;  %v632_v10 = vrot.slane %v631_v25, 4 }
 0x150   :  { %v654_v56 = vmax.f32 %v652_v38, %v653_v44  ;;  %v661_v50 = vmax.f32 %v659_v12, %v660_v28  ;;  %v641_v17 = vrot.slane %v640_v37, 2  ;;  %v10939_v58 = vmul.f32 %v2033_v36, %v10797_v5 }
 0x151   :  { %v648_v60 = vrot.slane %v647_v4, 2  ;;  %v627_v1 = vrot.slane %v626_v13, 2  ;;  %v10942_v45 = vmul.f32 %v2033_v36, %v10802_v24  ;;  %v10945_v34 = vmul.f32 %v2033_v36, %v10818_v3 }
 0x152   :  { %14767 = vst [vmem:[#allocation170_spill] sm:$0xff] %v10939_v58  ;;  %v655_v57 = vrot.slane %v654_v56, 2  ;;  %v662_v11 = vrot.slane %v661_v50, 2  ;;  %v642_v43 = vmax.f32 %v640_v37, %v641_v17  ;;  %v10948_v31 = vmul.f32 %v2033_v36, %v10823_v54  ;;  %v268_v17 = vpop.permute.xlu1 %267 }
 0x153   :  { %14768 = vst [vmem:[#allocation171_spill] sm:$0xff] %v10942_v45  ;;  %14769 = vst [vmem:[#allocation172_spill] sm:$0xff] %v10945_v34  ;;  %v10951_v28 = vmul.f32 %v2028_v61, %v10807_v7  ;;  %v649_v47 = vmax.f32 %v647_v4, %v648_v60  ;;  %v10953_v5 = vmul.f32 %v2028_v61, %v151_v39 }
 0x154   :  { %14770 = vst [vmem:[#allocation173_spill] sm:$0xff] %v10948_v31  ;;  %v656_v59 = vmax.f32 %v654_v56, %v655_v57  ;;  %v10956_v46 = vmul.f32 %v2028_v61, %v10835_v18  ;;  %v10960_v24 = vsel %vm764_vm4, %v2384_v33, %v10760_v30  ;;  %v633_v37 = vmax.f32 %v631_v25, %v632_v10 }
 0x155   :  { %14771 = vst [vmem:[#allocation174_spill] sm:$0xff] %v10951_v28  ;;  %14772 = vst [vmem:[#allocation175_spill] sm:$0xff] %v10953_v5  ;;  %v663_v3 = vmax.f32 %v661_v50, %v662_v11  ;;  %v10963_v54 = vmul.f32 %v2028_v61, %v10840_v16  ;;  %v628_v44 = vmax.f32 %v626_v13, %v627_v1  ;;  %v643_v7 = vrot.slane %v642_v43, 1 }
 0x156   :  { %14773 = vst [vmem:[#allocation176_spill] sm:$0xff] %v10956_v46  ;;  %v10966_v4 = vmul.f32 %v2033_v36, %v10852_v26  ;;  %v10969_v56 = vmul.f32 %v2033_v36, %v10857_v32  ;;  %v10972_v39 = vmul.f32 %v2028_v61, %v10880_v29  ;;  %v10975_v30 = vmul.f32 %v2028_v61, %v10885_v52 }
 0x157   :  { %14774 = vst [vmem:[#allocation177_spill] sm:$0xff] %v10963_v54  ;;  %v2399_v10 = vmax.f32 %v10951_v28, %v10939_v58  ;;  %v2406_v18 = vmax.f32 %v10953_v5, %v10942_v45  ;;  %v650_v13 = vrot.slane %v649_v47, 1  ;;  %v657_v16 = vrot.slane %v656_v59, 1 }
 0x158   :  { %14775 = vst [vmem:[#allocation178_spill] sm:$0xff] %v10966_v4  ;;  %14776 = vst [vmem:[#allocation179_spill] sm:$0xff] %v10969_v56  ;;  %v2413_v26 = vmax.f32 %v10956_v46, %v10945_v34  ;;  %v2420_v32 = vmax.f32 %v10963_v54, %v10948_v31  ;;  %v634_v50 = vrot.slane %v633_v37, 2  ;;  %v664_v29 = vrot.slane %v663_v3, 1 }
 0x159   :  { %14777 = vst [vmem:[#allocation180_spill] sm:$0xff] %v10972_v39  ;;  %14778 = vst [vmem:[#allocation181_spill] sm:$0xff] %v10975_v30  ;;  %v2400_v62 = vrot.slane %v2399_v10, 4  ;;  %v2407_v6 = vrot.slane %v2406_v18, 4  ;;  %v629_v61 = vrot.slane %v628_v44, 1  ;;  %v644_v52 = vmax.f32 %v642_v43, %v643_v7 }
 0x15a   :  { %v2414_v49 = vrot.slane %v2413_v26, 4  ;;  %v2421_v38 = vrot.slane %v2420_v32, 4  ;;  %v2427_v36 = vmax.f32 %v10972_v39, %v10966_v4  ;;  %v2434_v33 = vmax.f32 %v10975_v30, %v10969_v56 }
 0x15b   :  { %v2401_v12 = vmax.f32 %v2399_v10, %v2400_v62  ;;  %v2408_v25 = vmax.f32 %v2406_v18, %v2407_v6  ;;  %v651_v60 = vmax.f32 %v649_v47, %v650_v13  ;;  %v658_v1 = vmax.f32 %v656_v59, %v657_v16  ;;  %v168_v47 = vld [vmem:[%s14180_s0 + $0x2d0] sm:$0xff]  ;;  %v263_v62 = vpop.permute.xlu0 %262 }
 0x15c   :  { %v2415_v57 = vmax.f32 %v2413_v26, %v2414_v49  ;;  %v2422_v11 = vmax.f32 %v2420_v32, %v2421_v38  ;;  %v665_v34 = vmax.f32 %v663_v3, %v664_v29  ;;  %v2428_v31 = vrot.slane %v2427_v36, 4  ;;  %v172_v26 = vld [vmem:[%s14180_s0 + $0x2f0] sm:$0xff]  ;;  %v11033_v29 = vpop.permute.xlu1 %2042 }
 0x15d   :  { %v2402_v46 = vrot.slane %v2401_v12, 2  ;;  %v2435_v54 = vrot.slane %v2434_v33, 4  ;;  %v10992_v43 = vsel %vm764_vm4, %v10932_v35, %v10768_v27  ;;  %v10996_v7 = vsel %vm764_vm4, %v2398_v22, %v10787_v40  ;;  %v169_v27 = vld [vmem:[%s14180_s0 + $0x2d8] sm:$0xff]  ;;  %v170_v22 = vld [vmem:[%s14180_s0 + $0x2e0] sm:$0xff]  ;;  %v171_v40 = vld [vmem:[%s14180_s0 + $0x2e8] sm:$0xff] }
 0x15e   :  { %v2416_v10 = vrot.slane %v2415_v57, 2  ;;  %v2423_v18 = vrot.slane %v2422_v11, 2  ;;  %v11001_v59 = vmax.f32 %v633_v37, %v634_v50  ;;  %v2409_v13 = vrot.slane %v2408_v25, 2 }
 0x15f   :  { %v2403_v3 = vmax.f32 %v2401_v12, %v2402_v46  ;;  %v2429_v16 = vmax.f32 %v2427_v36, %v2428_v31  ;;  %v11012_v35 = vmax.f32 %v628_v44, %v629_v61  ;;  %v11016_v37 = vsel %vm766_vm5, %v644_v52, %v10830_v53  ;;  %v164_v36 = vld [vmem:[%s14180_s0 + $0x2b0] sm:$0xff]  ;;  %v2038_v5 = vpop.permute.xlu0 %2037 }
 0x160   :  { %v2417_v46 = vmax.f32 %v2415_v57, %v2416_v10  ;;  %v2436_v31 = vmax.f32 %v2434_v33, %v2435_v54  ;;  %v11023_v32 = vsel %vm766_vm5, %v651_v60, %v10847_v19  ;;  %v11027_v50 = vsel %vm766_vm5, %v658_v1, %v10913_v2  ;;  %v11038_v54 = vld [vmem:[%s14180_s0 + $0x2f8] sm:$0xff]  ;;  %v11067_v60 = vld [vmem:[%s14180_s0 + $0x2c0] sm:$0xff]  ;;  %v11078_v10 = vld [vmem:[%s14180_s0 + $0x2c8] sm:$0xff] }
 0x161   :  { %v11031_v44 = vsel %vm766_vm5, %v665_v34, %v10917_v23  ;;  %v2424_v53 = vmax.f32 %v2422_v11, %v2423_v18  ;;  %v11040_v6 = vmul.f32 %v268_v17, %v168_v47  ;;  %v11042_v19 = vmul.f32 %v268_v17, %v169_v27  ;;  %v162_v23 = vld [vmem:[%s14180_s0 + $0x2a0] sm:$0xff]  ;;  %v163_v34 = vld [vmem:[%s14180_s0 + $0x2a8] sm:$0xff]  ;;  %v165_v33 = vld [vmem:[%s14180_s0 + $0x2b8] sm:$0xff] }
 0x162   :  { %v11044_v61 = vmul.f32 %v268_v17, %v170_v22  ;;  %v11046_v2 = vmul.f32 %v268_v17, %v171_v40  ;;  %v2404_v52 = vrot.slane %v2403_v3, 1  ;;  %v11054_v49 = vmax.f32 %v2408_v25, %v2409_v13 }
 0x163   :  { %14779 = vst [vmem:[#allocation182_spill] sm:$0xff] %v11040_v6  ;;  %14780 = vst [vmem:[#allocation183_spill] sm:$0xff] %v11042_v19  ;;  %v2430_v38 = vrot.slane %v2429_v16, 2  ;;  %v11056_v12 = vmul.f32 %v268_v17, %v172_v26  ;;  %v2418_v1 = vrot.slane %v2417_v46, 1  ;;  %v2437_v57 = vrot.slane %v2436_v31, 2 }
 0x164   :  { %14781 = vst [vmem:[#allocation184_spill] sm:$0xff] %v11044_v61  ;;  %14782 = vst [vmem:[#allocation185_spill] sm:$0xff] %v11046_v2  ;;  %v11070_v25 = vmul.f32 %v268_v17, %v11038_v54  ;;  %v11073_v11 = vmul.f32 %v11033_v29, %v168_v47  ;;  %v2425_v18 = vrot.slane %v2424_v53, 1  ;;  %v11081_v13 = vmul.f32 %v11033_v29, %v169_v27 }
 0x165   :  { %14783 = vst [vmem:[#allocation186_spill] sm:$0xff] %v11056_v12  ;;  %v11084_v4 = vmul.f32 %v11033_v29, %v170_v22  ;;  %v11086_v39 = vmul.f32 %v263_v62, %v162_v23  ;;  %v11088_v56 = vmul.f32 %v263_v62, %v163_v34  ;;  %v11090_v17 = vmul.f32 %v263_v62, %v164_v36 }
 0x166   :  { %14784 = vst [vmem:[#allocation187_spill] sm:$0xff] %v11070_v25  ;;  %14785 = vst [vmem:[#allocation188_spill] sm:$0xff] %v11073_v11  ;;  %v11092_v47 = vmul.f32 %v263_v62, %v165_v33  ;;  %v11095_v30 = vmul.f32 %v263_v62, %v11067_v60  ;;  %v11097_v58 = vmax.f32 %v2403_v3, %v2404_v52 }
 0x167   :  { %14786 = vst [vmem:[#allocation189_spill] sm:$0xff] %v11081_v13  ;;  %14787 = vst [vmem:[#allocation190_spill] sm:$0xff] %v11084_v4  ;;  %v11099_v28 = vmax.f32 %v2429_v16, %v2430_v38  ;;  %v11102_v27 = vmul.f32 %v263_v62, %v11078_v10  ;;  %v666_v22 = vmax.f32 %v11086_v39, %v11040_v6 }
 0x168   :  { %14788 = vst [vmem:[#allocation191_spill] sm:$0xff] %v11086_v39  ;;  %14789 = vst [vmem:[#allocation192_spill] sm:$0xff] %v11088_v56  ;;  %v11106_v45 = vmax.f32 %v2436_v31, %v2437_v57  ;;  %v680_v8 = vmax.f32 %v11090_v17, %v11044_v61  ;;  %v687_v9 = vmax.f32 %v11092_v47, %v11046_v2 }
 0x169   :  { %14790 = vst [vmem:[#allocation193_spill] sm:$0xff] %v11090_v17  ;;  %14791 = vst [vmem:[#allocation194_spill] sm:$0xff] %v11092_v47  ;;  %v694_v3 = vmax.f32 %v11095_v30, %v11056_v12  ;;  %v11114_v16 = vmax.f32 %v2417_v46, %v2418_v1  ;;  %v11117_v62 = vmul.f32 %v11033_v29, %v171_v40  ;;  %v667_v52 = vrot.slane %v666_v22, 4 }
 0x16a   :  { %14792 = vst [vmem:[#allocation195_spill] sm:$0xff] %v11095_v30  ;;  %14793 = vst [vmem:[#allocation196_spill] sm:$0xff] %v11097_v58  ;;  %v701_v31 = vmax.f32 %v11102_v27, %v11070_v25  ;;  %v673_v38 = vmax.f32 %v11088_v56, %v11042_v19  ;;  %v681_v57 = vrot.slane %v680_v8, 4  ;;  %v688_v61 = vrot.slane %v687_v9, 4 }
 0x16b   :  { %14794 = vst [vmem:[#allocation197_spill] sm:$0xff] %v11102_v27  ;;  %14795 = vst [vmem:[#allocation198_spill] sm:$0xff] %v11117_v62  ;;  %v695_v17 = vrot.slane %v694_v3, 4  ;;  %v668_v6 = vmax.f32 %v666_v22, %v667_v52  ;;  %v11123_v47 = vmul.f32 %v2038_v5, %v162_v23  ;;  %v11125_v12 = vmul.f32 %v2038_v5, %v163_v34 }
 0x16c   :  { %v702_v2 = vrot.slane %v701_v31, 4  ;;  %v682_v46 = vmax.f32 %v680_v8, %v681_v57  ;;  %v689_v1 = vmax.f32 %v687_v9, %v688_v61  ;;  %v11127_v30 = vmul.f32 %v2038_v5, %v164_v36 }
 0x16d   :  { %14796 = vst [vmem:[#allocation199_spill] sm:$0xff] %v11123_v47  ;;  %14797 = vst [vmem:[#allocation200_spill] sm:$0xff] %v11125_v12  ;;  %v696_v40 = vmax.f32 %v694_v3, %v695_v17  ;;  %v11129_v39 = vmax.f32 %v2424_v53, %v2425_v18  ;;  %v11132_v25 = vmul.f32 %v11033_v29, %v172_v26  ;;  %v669_v27 = vrot.slane %v668_v6, 2 }
 0x16e   :  { %14798 = vst [vmem:[#allocation201_spill] sm:$0xff] %v11127_v30  ;;  %v703_v58 = vmax.f32 %v701_v31, %v702_v2  ;;  %v674_v19 = vrot.slane %v673_v38, 4  ;;  %v683_v56 = vrot.slane %v682_v46, 2  ;;  %v690_v22 = vrot.slane %v689_v1, 2 }
 0x16f   :  { %14799 = vst [vmem:[#allocation202_spill] sm:$0xff] %v11132_v25  ;;  %v697_v52 = vrot.slane %v696_v40, 2  ;;  %v11134_v21 = vmul.f32 %v2038_v5, %v165_v33  ;;  %v2441_v9 = vmax.f32 %v11123_v47, %v11073_v11  ;;  %v2448_v8 = vmax.f32 %v11125_v12, %v11081_v13 }
 0x170   :  { %v704_v23 = vrot.slane %v703_v58, 2  ;;  %v684_v53 = vmax.f32 %v682_v46, %v683_v56  ;;  %v691_v61 = vmax.f32 %v689_v1, %v690_v22  ;;  %v2455_v26 = vmax.f32 %v11127_v30, %v11084_v4 }
 0x171   :  { %14800 = vst [vmem:[#allocation203_spill] sm:$0xff] %v11134_v21  ;;  %v698_v34 = vmax.f32 %v696_v40, %v697_v52  ;;  %v670_v2 = vmax.f32 %v668_v6, %v669_v27  ;;  %v2442_v18 = vrot.slane %v2441_v9, 4  ;;  %v2449_v17 = vrot.slane %v2448_v8, 4 }
 0x172   :  { %v705_v36 = vmax.f32 %v703_v58, %v704_v23  ;;  %v2432_v3 = vrot.slane %v11099_v28, 1  ;;  %v11145_v33 = vmul.f32 %v11033_v29, %v11038_v54  ;;  %v2456_v57 = vrot.slane %v2455_v26, 4 }
 0x173   :  { %v699_v31 = vrot.slane %v698_v34, 1  ;;  %v2439_v11 = vrot.slane %v11106_v45, 1  ;;  %v685_v56 = vrot.slane %v684_v53, 1  ;;  %v2443_v1 = vmax.f32 %v2441_v9, %v2442_v18 }
 0x174   :  { %14801 = vst [vmem:[#allocation204_spill] sm:$0xff] %v11145_v33  ;;  %v706_v46 = vrot.slane %v705_v36, 1  ;;  %v692_v40 = vrot.slane %v691_v61, 1  ;;  %v11149_v22 = vmul.f32 %v2038_v5, %v11067_v60  ;;  %v2450_v58 = vmax.f32 %v2448_v8, %v2449_v17 }
 0x175   :  { %v2457_v6 = vmax.f32 %v2455_v26, %v2456_v57  ;;  %v671_v27 = vrot.slane %v670_v2, 1  ;;  %v675_v52 = vmax.f32 %v673_v38, %v674_v19  ;;  %v11152_v23 = vmul.f32 %v2038_v5, %v11078_v10 }
 0x176   :  { %14802 = vst [vmem:[#allocation205_spill] sm:$0xff] %v11149_v22  ;;  %v2462_v29 = vmax.f32 %v11134_v21, %v11117_v62  ;;  %v700_v54 = vmax.f32 %v698_v34, %v699_v31  ;;  %v707_v4 = vmax.f32 %v705_v36, %v706_v46  ;;  %v2444_v30 = vrot.slane %v2443_v1, 2 }
 0x177   :  { %14803 = vst [vmem:[#allocation206_spill] sm:$0xff] %v11152_v23  ;;  %v11157_v9 = vmax.f32 %v11099_v28, %v2432_v3  ;;  %v686_v18 = vmax.f32 %v684_v53, %v685_v56  ;;  %v2458_v60 = vrot.slane %v2457_v6, 2  ;;  %v11160_v8 = vmax.f32 %v11106_v45, %v2439_v11 }
 0x178   :  { %v2463_v47 = vrot.slane %v2462_v29, 4  ;;  %v693_v19 = vmax.f32 %v691_v61, %v692_v40  ;;  %v2451_v38 = vrot.slane %v2450_v58, 2  ;;  %v2469_v5 = vmax.f32 %v11149_v22, %v11132_v25 }
 0x179   :  { %v672_v10 = vmax.f32 %v670_v2, %v671_v27  ;;  %v676_v26 = vrot.slane %v675_v52, 2  ;;  %v2476_v34 = vmax.f32 %v11152_v23, %v11145_v33  ;;  %v11168_v28 = vsel %vm768_vm6, %v700_v54, %v11027_v50 }
 0x17a   :  { %v2464_v17 = vmax.f32 %v2462_v29, %v2463_v47  ;;  %14804 = vst [vmem:[#allocation207_spill] sm:$0xff] %v11168_v28  ;;  %v11172_v53 = vsel %vm768_vm6, %v707_v4, %v11031_v44  ;;  %v2445_v45 = vmax.f32 %v2443_v1, %v2444_v30  ;;  %v2470_v11 = vrot.slane %v2469_v5, 4 }
 0x17b   :  { %14805 = vst [vmem:[#allocation208_spill] sm:$0xff] %v11172_v53  ;;  %v11176_v61 = vsel %vm768_vm6, %v686_v18, %v11016_v37  ;;  %v2459_v2 = vmax.f32 %v2457_v6, %v2458_v60  ;;  %v2477_v47 = vrot.slane %v2476_v34, 4  ;;  %v11180_v3 = vsel %vm768_vm6, %v693_v19, %v11023_v32 }
 0x17c   :  { %14806 = vst [vmem:[#allocation209_spill] sm:$0xff] %v11176_v61  ;;  %v2465_v36 = vrot.slane %v2464_v17, 2  ;;  %14807 = vst [vmem:[#allocation210_spill] sm:$0xff] %v11180_v3  ;;  %v11182_v31 = vmax.f32 %v2450_v58, %v2451_v38  ;;  %v2471_v50 = vmax.f32 %v2469_v5, %v2470_v11  ;;  %v636_v57 = vrot.slane %v11001_v59, 1 }
 0x17d   :  { %v857_v4 = vcombine.low %v11168_v28, %v11172_v53  ;;  %v2478_v44 = vmax.f32 %v2476_v34, %v2477_v47  ;;  %v677_v56 = vmax.f32 %v675_v52, %v676_v26  ;;  %v858_v37 = vcombine.high %v11168_v28, %v11172_v53 }
 0x17e   :  { %v2466_v30 = vmax.f32 %v2464_v17, %v2465_v36  ;;  %v2446_v46 = vrot.slane %v2445_v45, 1  ;;  %v2472_v1 = vrot.slane %v2471_v50, 2  ;;  %v2550_v32 = vsel %vm766_vm5, %v11114_v16, %v10936_v0 }
 0x17f   :  { %v2460_v40 = vrot.slane %v2459_v2, 1  ;;  %v2479_v58 = vrot.slane %v2478_v44, 2  ;;  %v14808_v6 = vrot.slane %v10770_v15, 1  ;;  %v678_v29 = vrot.slane %v677_v56, 1 }
 0x180   :  { %v2473_v54 = vmax.f32 %v2471_v50, %v2472_v1  ;;  %v637_v18 = vmax.f32 %v11001_v59, %v636_v57  ;;  %v765_v52 = vsel %vm764_vm4, %v10812_v51, %v10508_v55  ;;  %v770_v60 = vsel %vm756_vm0, %v9639_v41, %v9658_v20 }
 0x181   :  { %v595_v27 = vmax.f32 %v10770_v15, %v14808_v6  ;;  %v2467_v19 = vrot.slane %v2466_v30, 1  ;;  %v2480_v0 = vmax.f32 %v2478_v44, %v2479_v58  ;;  %v679_v16 = vmax.f32 %v677_v56, %v678_v29  ;;  %v14809_v15 = vld [vmem:[#allocation106_spill] sm:$0xff] }
 0x182   :  { %v771_v38 = vsel %vm758_vm1, %v9945_v63, %v770_v60  ;;  %v2474_v5 = vrot.slane %v2473_v54, 1  ;;  %v862_v17 = vlaneseq  ;;  %v767_v34 = vsel %vm766_vm5, %v11012_v35, %v765_v52 }
 0x183   :  { %v772_v26 = vsel %vm760_vm2, %v14809_v15, %v771_v38  ;;  %v2481_v59 = vrot.slane %v2480_v0, 1  ;;  %v9194_v51 = vmov 1966171168   ;;  %v2461_v20 = vmax.f32 %v2459_v2, %v2460_v40 }
 0x184   :  { %v773_v55 = vsel %vm762_vm3, %v10490_v42, %v772_v26  ;;  %v860_v41 = vunpack.c.l.s4 %v9194_v51  ;;  %v11211_v11 = vsel %vm768_vm6, %v672_v10, %v767_v34  ;;  %v863_v36 = vshrl.u32 %v862_v17, 7 }
 0x185   :  { %14810 = vst [vmem:[#allocation106_spill] sm:$0xff] %v11211_v11  ;;  %v774_v63 = vsel %vm764_vm4, %v595_v27, %v773_v55  ;;  %v2468_v47 = vmax.f32 %v2466_v30, %v2467_v19  ;;  %v2475_v50 = vmax.f32 %v2473_v54, %v2474_v5  ;;  %v2557_v35 = vsel %vm766_vm5, %v11129_v39, %v10960_v24 }
 0x186   :  { %v775_v57 = vsel %vm766_vm5, %v637_v18, %v774_v63  ;;  %v861_v44 = vunpack.c.0.s8 %v860_v41  ;;  %v855_v2 = vcombine.low %v11176_v61, %v11180_v3  ;;  %v856_v10 = vcombine.high %v11176_v61, %v11180_v3 }
 0x187   :  { %v11219_v42 = vsel %vm768_vm6, %v679_v16, %v775_v57  ;;  %v2482_v56 = vmax.f32 %v2480_v0, %v2481_v59  ;;  %v11230_v58 = vmax.f32 %v2445_v45, %v2446_v46  ;;  %v2564_v24 = vsel %vm766_vm5, %v11157_v9, %v10992_v43 }
 0x188   :  { %14811 = vst [vmem:[#allocation211_spill] sm:$0xff] %v11219_v42  ;;  %v818_v30 = vsub.f32 -inf, %v11219_v42  ;;  %v853_v1 = vcombine.low %v11211_v11, %v11219_v42  ;;  %v854_v40 = vcombine.high %v11211_v11, %v11219_v42  ;;  %v2571_v39 = vsel %vm766_vm5, %v11160_v8, %v10996_v7  ;;  %v14896_v11 = vld [vmem:[#allocation117_spill] sm:$0xff] }
 0x189   :  { %14812 = vst [vmem:[#allocation212_spill] sm:$0xff] %v11230_v58  ;;  %v11238_v6 = vsub.s32 %v861_v44, %v863_v36  ;;  %v11241_v27 = vsel %vm768_vm6, %v2461_v20, %v2550_v32  ;;  %v11244_v29 = vsel %vm768_vm6, %v2468_v47, %v2557_v35  ;;  %v11247_v54 = vsel %vm768_vm6, %v2475_v50, %v2564_v24 }
 0x18a   :  { %14814 = vst [vmem:[#allocation214_spill] sm:$0xff] %v11241_v27  ;;  %14815 = vst [vmem:[#allocation215_spill] sm:$0xff] %v11244_v29  ;;  %v825_v45 = vmul.f32 1.442695, %v818_v30  ;;  %v11254_v8 = vsel %vm768_vm6, %v2482_v56, %v2571_v39  ;;  %v14818_v5 = vrot.slane %v10887_v48, 1  ;;  %v2411_v26 = vrot.slane %v11054_v49, 1 }
 0x18b   :  { %14813 = vst [vmem:[#allocation213_spill] sm:$0xff] %v11238_v6  ;;  %14816 = vst [vmem:[#allocation216_spill] sm:$0xff] %v11247_v54  ;;  %v865_v46 = vrot.slane %v853_v1, %v11238_v6  ;;  %v872_v43 = vrot.slane %v854_v40, %v11238_v6  ;;  %v879_v9 = vrot.slane %v855_v2, %v11238_v6  ;;  %v11273_v41 = vsub.s32 1, %v863_v36  ;;  %v14828_v39 = vld [vmem:[#allocation169_spill] sm:$0xff] }
 0x18c   :  { %v886_v7 = vrot.slane %v856_v10, %v11238_v6  ;;  %14817 = vst [vmem:[#allocation217_spill] sm:$0xff] %v11254_v8  ;;  %8734 = vpow2.f32 %v825_v45  ;;  %v893_v32 = vrot.slane %v857_v4, %v11238_v6  ;;  %v900_v18 = vrot.slane %v858_v37, %v11238_v6  ;;  %v14903_v29 = vld [vmem:[#allocation133_spill] sm:$0xff] }
 0x18d   :  { %v901_v52 = vcombine.low %v865_v46, %v879_v9  ;;  %v902_v60 = vcombine.high %v865_v46, %v879_v9  ;;  %v11261_v15 = vmax.f32 %v10887_v48, %v14818_v5  ;;  %v11267_v37 = vsub.s32 0, %v863_v36  ;;  %14821 = vst [vmem:[#allocation220_spill] sm:$0xff] %v11273_v41 }
 0x18e   :  { %v903_v19 = vcombine.low %v872_v43, %v886_v7  ;;  %v904_v0 = vcombine.high %v872_v43, %v886_v7  ;;  %v905_v16 = vcombine.high %v893_v32, %v893_v32  ;;  %v906_v38 = vcombine.high %v900_v18, %v900_v18 }
 0x18f   :  { %14819 = vst [vmem:[#allocation218_spill] sm:$0xff] %v11261_v15  ;;  %v913_v17 = vrot.slane %v901_v52, %v11238_v6  ;;  %v927_v59 = vrot.slane %v902_v60, %v11238_v6  ;;  %v941_v4 = vrot.slane %v893_v32, %v11238_v6  ;;  %14820 = vst [vmem:[#allocation219_spill] sm:$0xff] %v11267_v37  ;;  %v11280_v57 = vsub.s32 2, %v863_v36  ;;  %v14900_v15 = vld [vmem:[#allocation137_spill] sm:$0xff] }
 0x190   :  { %v920_v55 = vrot.slane %v903_v19, %v11238_v6  ;;  %v955_v51 = vrot.slane %v905_v16, %v11238_v6  ;;  %v934_v20 = vrot.slane %v904_v0, %v11238_v6  ;;  %v962_v63 = vrot.slane %v906_v38, %v11238_v6 }
 0x191   :  { %v963_v47 = vcombine.low %v913_v17, %v941_v4  ;;  %v948_v50 = vrot.slane %v900_v18, %v11238_v6  ;;  %14822 = vst [vmem:[#allocation221_spill] sm:$0xff] %v11280_v57  ;;  %v11282_v44 = vsub.s32 3, %v863_v36  ;;  %v11284_v35 = vsub.s32 4, %v863_v36  ;;  %v14899_v6 = vld [vmem:[#allocation115_spill] sm:$0xff] }
 0x192   :  { %v967_v2 = vcombine.low %v927_v59, %v955_v51  ;;  %v11286_v10 = vsub.s32 5, %v863_v36  ;;  %v11289_v56 = vmax.f32 %v11054_v49, %v2411_v26  ;;  %v964_v1 = vcombine.high %v913_v17, %v941_v4 }
 0x193   :  { %14823 = vst [vmem:[#allocation222_spill] sm:$0xff] %v11282_v44  ;;  %14824 = vst [vmem:[#allocation223_spill] sm:$0xff] %v11284_v35  ;;  %v965_v40 = vcombine.low %v920_v55, %v948_v50  ;;  %v11292_v24 = vcombine.high %v920_v55, %v948_v50  ;;  %v11297_v45 = vsel %vm764_vm4, %v14828_v39, %v10672_v14 }
 0x194   :  { %14825 = vst [vmem:[#allocation224_spill] sm:$0xff] %v11286_v10  ;;  %14826 = vst [vmem:[#allocation225_spill] sm:$0xff] %v11289_v56  ;;  %v968_v46 = vcombine.high %v927_v59, %v955_v51  ;;  %v969_v43 = vcombine.low %v934_v20, %v962_v63  ;;  %v11299_v9 = vcombine.high %v934_v20, %v962_v63 }
 0x195   :  { %14827 = vst [vmem:[#allocation226_spill] sm:$0xff] %v11292_v24  ;;  %14829 = vst [vmem:[#allocation169_spill] sm:$0xff] %v11297_v45  ;;  %v11302_v36 = vrot.slane %v963_v47, %v11267_v37  ;;  %v11305_v7 = vrot.slane %v963_v47, %v11273_v41  ;;  %v11308_v32 = vrot.slane %v963_v47, %v11280_v57 }
 0x196   :  { %14830 = vst [vmem:[#allocation227_spill] sm:$0xff] %v11299_v9  ;;  %v8735_v49 = vpop.eup %8734  ;;  %v11311_v18 = vrot.slane %v963_v47, %v11282_v44  ;;  %v11314_v14 = vrot.slane %v963_v47, %v11284_v35  ;;  %v11317_v52 = vrot.slane %v963_v47, %v11286_v10  ;;  %v11320_v60 = vrot.slane %v967_v2, %v11267_v37 }
 0x197   :  { %v11323_v19 = vrot.slane %v967_v2, %v11273_v41  ;;  %v11326_v0 = vrot.slane %v967_v2, %v11280_v57  ;;  %v11329_v16 = vrot.slane %v967_v2, %v11282_v44  ;;  %v11332_v38 = vrot.slane %v967_v2, %v11284_v35 }
 0x198   :  { %v11335_v5 = vrot.slane %v967_v2, %v11286_v10  ;;  %v11338_v26 = vrot.slane %v964_v1, %v11267_v37  ;;  %v11340_v17 = vmul.f32 0.0, %v8735_v49  ;;  %v11343_v59 = vrot.slane %v964_v1, %v11273_v41 }
 0x199   :  { %v11346_v4 = vrot.slane %v964_v1, %v11280_v57  ;;  %v11349_v55 = vrot.slane %v964_v1, %v11282_v44  ;;  %v11352_v51 = vrot.slane %v964_v1, %v11284_v35  ;;  %v11355_v20 = vrot.slane %v964_v1, %v11286_v10 }
 0x19a   :  { %14831 = vst [vmem:[#allocation228_spill] sm:$0xff] %v11340_v17  ;;  %v11358_v63 = vrot.slane %v968_v46, %v11267_v37  ;;  %v11361_v47 = vrot.slane %v968_v46, %v11273_v41  ;;  %v11364_v50 = vrot.slane %v968_v46, %v11280_v57  ;;  %v11367_v2 = vrot.slane %v968_v46, %v11282_v44  ;;  %v14860_v17 = vld [vmem:[#allocation9_spill] sm:$0xff] }
 0x19b   :  { %v11370_v39 = vrot.slane %v968_v46, %v11284_v35  ;;  %v11373_v49 = vrot.slane %v968_v46, %v11286_v10  ;;  %v11376_v1 = vrot.slane %v965_v40, %v11267_v37  ;;  %v11379_v48 = vrot.slane %v965_v40, %v11273_v41 }
 0x19c   :  { %14832 = vst [vmem:[#allocation229_spill] sm:$0xff] %v11367_v2  ;;  %v11382_v34 = vrot.slane %v965_v40, %v11280_v57  ;;  %v11385_v30 = vrot.slane %v965_v40, %v11282_v44  ;;  %v11388_v28 = vrot.slane %v965_v40, %v11284_v35  ;;  %v11391_v25 = vrot.slane %v965_v40, %v11286_v10 }
 0x19d   :  { %14833 = vst [vmem:[#allocation230_spill] sm:$0xff] %v11373_v49  ;;  %14834 = vst [vmem:[#allocation231_spill] sm:$0xff] %v11376_v1  ;;  %v11394_v46 = vrot.slane %v969_v43, %v11267_v37  ;;  %v11397_v22 = vrot.slane %v969_v43, %v11273_v41  ;;  %v11400_v33 = vrot.slane %v969_v43, %v11280_v57  ;;  %v14906_v37 = vld [vmem:[#allocation166_spill] sm:$0xff] }
 0x19e   :  { %14835 = vst [vmem:[#allocation232_spill] sm:$0xff] %v11385_v30  ;;  %14836 = vst [vmem:[#allocation233_spill] sm:$0xff] %v11391_v25  ;;  %v11403_v23 = vrot.slane %v969_v43, %v11282_v44  ;;  %v11406_v53 = vrot.slane %v969_v43, %v11284_v35  ;;  %v11409_v61 = vrot.slane %v969_v43, %v11286_v10  ;;  %v14861_v10 = vld [vmem:[#allocation10_spill] sm:$0xff]  ;;  %v14863_v44 = vld [vmem:[#allocation12_spill] sm:$0xff] }
 0x19f   :  { %14837 = vst [vmem:[#allocation234_spill] sm:$0xff] %v11394_v46  ;;  %14838 = vst [vmem:[#allocation235_spill] sm:$0xff] %v11400_v33  ;;  %v11413_v40 = vrot.slane %v11292_v24, %v11273_v41  ;;  %v11417_v25 = vrot.slane %v11292_v24, %v11280_v57  ;;  %v11421_v62 = vrot.slane %v11292_v24, %v11284_v35  ;;  %v14849_v46 = vld [vmem:[#allocation28_spill] sm:$0xff]  ;;  %v14850_v24 = vld [vmem:[#allocation29_spill] sm:$0xff] }
 0x1a0   :  { %14839 = vst [vmem:[#allocation236_spill] sm:$0xff] %v11403_v23  ;;  %14840 = vst [vmem:[#allocation237_spill] sm:$0xff] %v11406_v53  ;;  %v11425_v21 = vrot.slane %v11299_v9, %v11273_v41  ;;  %v11429_v43 = vrot.slane %v11299_v9, %v11280_v57  ;;  %v14846_v23 = vld [vmem:[#allocation13_spill] sm:$0xff]  ;;  %v1214_v1 = vsub.f32 %v14849_v46, %v11311_v18 }
 0x1a1   :  { %14841 = vst [vmem:[#allocation238_spill] sm:$0xff] %v11409_v61  ;;  %14842 = vst [vmem:[#allocation239_spill] sm:$0xff] %v11417_v25  ;;  %v11433_v61 = vrot.slane %v11299_v9, %v11284_v35  ;;  %v1211_v30 = vsub.f32 %v14846_v23, %v11302_v36  ;;  %v14847_v25 = vld [vmem:[#allocation14_spill] sm:$0xff]  ;;  %v1215_v13 = vsub.f32 %v14850_v24, %v11314_v14  ;;  %v14856_v46 = vld [vmem:[#allocation25_spill] sm:$0xff] }
 0x1a2   :  { %14843 = vst [vmem:[#allocation240_spill] sm:$0xff] %v11421_v62  ;;  %14844 = vst [vmem:[#allocation241_spill] sm:$0xff] %v11429_v43  ;;  %v1212_v3 = vsub.f32 %v14847_v25, %v11305_v7  ;;  %v14848_v62 = vld [vmem:[#allocation27_spill] sm:$0xff]  ;;  %v14851_v43 = vld [vmem:[#allocation30_spill] sm:$0xff]  ;;  %v1313_v49 = vmul.f32 1.442695, %v1214_v1 }
 0x1a3   :  { %14845 = vst [vmem:[#allocation242_spill] sm:$0xff] %v11433_v61  ;;  %v1213_v42 = vsub.f32 %v14848_v62, %v11308_v32  ;;  %v1216_v12 = vsub.f32 %v14851_v43, %v11317_v52  ;;  %v14852_v61 = vld [vmem:[#allocation21_spill] sm:$0xff]  ;;  %v14853_v23 = vld [vmem:[#allocation22_spill] sm:$0xff]  ;;  %v14854_v25 = vld [vmem:[#allocation23_spill] sm:$0xff]  ;;  %v1307_v2 = vmul.f32 1.442695, %v1211_v30 }
 0x1a4   :  { %v1217_v9 = vsub.f32 %v14852_v61, %v11302_v36  ;;  %v14855_v62 = vld [vmem:[#allocation24_spill] sm:$0xff]  ;;  %v14857_v24 = vld [vmem:[#allocation26_spill] sm:$0xff]  ;;  %v14858_v43 = vld [vmem:[#allocation7_spill] sm:$0xff]  ;;  %v1309_v56 = vmul.f32 1.442695, %v1212_v3  ;;  %v14908_v8 = vsub.f32 %v14853_v23, %v11305_v7  ;;  %v14913_v7 = vsub.f32 %v14856_v46, %v11314_v14 }
 0x1a5   :  { %v14859_v61 = vld [vmem:[#allocation8_spill] sm:$0xff]  ;;  %v14862_v35 = vld [vmem:[#allocation11_spill] sm:$0xff]  ;;  %v1311_v41 = vmul.f32 1.442695, %v1213_v42  ;;  %8736 = vpow2.f32 %v1307_v2  ;;  %v1315_v45 = vmul.f32 1.442695, %v1215_v13  ;;  %v14912_v57 = vsub.f32 %v14855_v62, %v11311_v18 }
 0x1a6   :  { %8738 = vpow2.f32 %v1309_v56  ;;  %v1317_v54 = vmul.f32 1.442695, %v1216_v12  ;;  %v1319_v36 = vmul.f32 1.442695, %v1217_v9  ;;  %v14907_v13 = vld [vmem:[#allocation158_spill] sm:$0xff]  ;;  %v14909_v12 = vld [vmem:[#allocation192_spill] sm:$0xff]  ;;  %v14918_v14 = vsub.f32 %v14860_v17, %v11326_v0 }
 0x1a7   :  { %8740 = vpow2.f32 %v1311_v41  ;;  %v1321_v56 = vmul.f32 1.442695, %v14908_v8  ;;  %v14910_v42 = vld [vmem:[#allocation183_spill] sm:$0xff]  ;;  %v14911_v41 = vsub.f32 %v14854_v25, %v11308_v32  ;;  %v1327_v8 = vmul.f32 1.442695, %v14913_v7  ;;  %v14924_v7 = vld [vmem:[#allocation16_spill] sm:$0xff] }
 0x1a8   :  { %8742 = vpow2.f32 %v1313_v49  ;;  %v1325_v49 = vmul.f32 1.442695, %v14912_v57  ;;  %v14914_v23 = vrot.slane %v11182_v31, 1  ;;  %v14917_v57 = vsub.f32 %v14859_v61, %v11323_v19  ;;  %v14922_v61 = vld [vmem:[#allocation15_spill] sm:$0xff]  ;;  %v15016_v3 = vld [vmem:[#allocation169_spill] sm:$0xff] }
 0x1a9   :  { %8744 = vpow2.f32 %v1315_v45  ;;  %v1323_v9 = vmul.f32 1.442695, %v14911_v41  ;;  %v14915_v45 = vsub.f32 %v14857_v24, %v11317_v52  ;;  %v1335_v62 = vmul.f32 1.442695, %v14918_v14  ;;  %v14930_v14 = vld [vmem:[#allocation19_spill] sm:$0xff] }
 0x1aa   :  { %8746 = vpow2.f32 %v1317_v54  ;;  %v11578_v30 = vmax.f32 %v11182_v31, %v14914_v23  ;;  %v14916_v54 = vsub.f32 %v14858_v43, %v11320_v60  ;;  %v1333_v18 = vmul.f32 1.442695, %v14917_v57 }
 0x1ab   :  { %8748 = vpow2.f32 %v1319_v36  ;;  %v1329_v32 = vmul.f32 1.442695, %v14915_v45  ;;  %v14919_v31 = vsub.f32 %v14861_v10, %v11329_v16  ;;  %v14920_v52 = vsub.f32 %v14862_v35, %v11332_v38  ;;  %v14926_v10 = vld [vmem:[#allocation17_spill] sm:$0xff]  ;;  %v14928_v35 = vld [vmem:[#allocation18_spill] sm:$0xff] }
 0x1ac   :  { %v1331_v25 = vmul.f32 1.442695, %v14916_v54  ;;  %8750 = vpow2.f32 %v1321_v56  ;;  %v14921_v43 = vsub.f32 %v14863_v44, %v11335_v5  ;;  %v14923_v56 = vsub.f32 %v14922_v61, %v11320_v60  ;;  %v14933_v60 = vld [vmem:[#allocation20_spill] sm:$0xff] }
 0x1ad   :  { %v1337_v46 = vmul.f32 1.442695, %v14919_v31  ;;  %v1339_v24 = vmul.f32 1.442695, %v14920_v52  ;;  %8752 = vpow2.f32 %v1323_v9  ;;  %v14925_v17 = vsub.f32 %v14924_v7, %v11323_v19 }
 0x1ae   :  { %v1341_v36 = vmul.f32 1.442695, %v14921_v43  ;;  %v1343_v41 = vmul.f32 1.442695, %v14923_v56  ;;  %8754 = vpow2.f32 %v1325_v49  ;;  %v14927_v45 = vsub.f32 %v14926_v10, %v11326_v0  ;;  %v14935_v49 = vld [vmem:[#allocation57_spill] sm:$0xff]  ;;  %v14937_v56 = vld [vmem:[#allocation58_spill] sm:$0xff] }
 0x1af   :  { %v1345_v23 = vmul.f32 1.442695, %v14925_v17  ;;  %v14929_v9 = vsub.f32 %v14928_v35, %v11329_v16  ;;  %v14931_v44 = vsub.f32 %v14930_v14, %v11332_v38  ;;  %v11616_v52 = vpop.eup %8736  ;;  %8756 = vpow2.f32 %v1327_v8  ;;  %v14939_v17 = vld [vmem:[#allocation63_spill] sm:$0xff] }
 0x1b0   :  { %v1347_v54 = vmul.f32 1.442695, %v14927_v45  ;;  %14932 = vst [vmem:[#allocation13_spill] sm:$0xff] %v11616_v52  ;;  %v14934_v19 = vsub.f32 %v14933_v60, %v11335_v5  ;;  %v14936_v0 = vsub.f32 %v14935_v49, %v11338_v26  ;;  %v14938_v16 = vsub.f32 %v14937_v56, %v11343_v59  ;;  %v8739_v38 = vpop.eup %8738  ;;  %v14941_v5 = vld [vmem:[#allocation64_spill] sm:$0xff] }
 0x1b1   :  { %v1349_v57 = vmul.f32 1.442695, %v14929_v9  ;;  %v1351_v31 = vmul.f32 1.442695, %v14931_v44  ;;  %8758 = vpow2.f32 %v1329_v32  ;;  %v14940_v8 = vsub.f32 %v14939_v17, %v11346_v4  ;;  %v14943_v9 = vld [vmem:[#allocation66_spill] sm:$0xff]  ;;  %v11648_v60 = vpop.eup %8740  ;;  %v14950_v17 = vld [vmem:[#allocation56_spill] sm:$0xff] }
 0x1b2   :  { %v11621_v43 = vmul.f32 1.442695, %v14934_v19  ;;  %v11626_v61 = vmul.f32 1.442695, %v14936_v0  ;;  %v11631_v7 = vmul.f32 1.442695, %v14938_v16  ;;  %v14942_v45 = vsub.f32 %v14941_v5, %v11349_v55 }
 0x1b3   :  { %v11636_v10 = vmul.f32 1.442695, %v14940_v8  ;;  %v14944_v14 = vsub.f32 %v14943_v9, %v11352_v51  ;;  %14945 = vst [vmem:[#allocation14_spill] sm:$0xff] %v11648_v60  ;;  %8760 = vpow2.f32 %v1331_v25  ;;  %v14946_v19 = vld [vmem:[#allocation67_spill] sm:$0xff]  ;;  %v14951_v8 = vsub.f32 %v14950_v17, %v11343_v59  ;;  %v14960_v17 = vld [vmem:[#allocation62_spill] sm:$0xff] }
 0x1b4   :  { %v11641_v35 = vmul.f32 1.442695, %v14942_v45  ;;  %v14947_v32 = vsub.f32 %v14946_v19, %v11355_v20  ;;  %v14948_v0 = vld [vmem:[#allocation55_spill] sm:$0xff]  ;;  %v11665_v45 = vpop.eup %8742  ;;  %8762 = vpow2.f32 %v1333_v18  ;;  %v14955_v19 = vld [vmem:[#allocation60_spill] sm:$0xff]  ;;  %v14961_v18 = vsub.f32 %v14960_v17, %v11355_v20  ;;  %v14970_v20 = vld [vmem:[#allocation89_spill] sm:$0xff] }
 0x1b5   :  { %v11646_v44 = vmul.f32 1.442695, %v14944_v14  ;;  %v14949_v56 = vsub.f32 %v14948_v0, %v11338_v26  ;;  %v11663_v5 = vmul.f32 1.442695, %v14951_v8  ;;  %14952 = vst [vmem:[#allocation27_spill] sm:$0xff] %v11665_v45  ;;  %v14953_v9 = vld [vmem:[#allocation59_spill] sm:$0xff]  ;;  %v11682_v59 = vpop.eup %8744  ;;  %8764 = vpow2.f32 %v1335_v62 }
 0x1b6   :  { %v11653_v49 = vmul.f32 1.442695, %v14947_v32  ;;  %v14954_v25 = vsub.f32 %v14953_v9, %v11346_v4  ;;  %v14956_v32 = vsub.f32 %v14955_v19, %v11349_v55  ;;  %v14957_v26 = vld [vmem:[#allocation61_spill] sm:$0xff]  ;;  %14959 = vst [vmem:[#allocation28_spill] sm:$0xff] %v11682_v59  ;;  %v11687_v8 = vmul.f32 1.442695, %v14961_v18 }
 0x1b7   :  { %v11658_v16 = vmul.f32 1.442695, %v14949_v56  ;;  %v14958_v0 = vsub.f32 %v14957_v26, %v11352_v51  ;;  %v14962_v4 = vld [vmem:[#allocation85_spill] sm:$0xff]  ;;  %v14965_v55 = vld [vmem:[#allocation87_spill] sm:$0xff]  ;;  %v11699_v51 = vpop.eup %8746  ;;  %8766 = vpow2.f32 %v1337_v46  ;;  %v14968_v26 = vld [vmem:[#allocation88_spill] sm:$0xff] }
 0x1b8   :  { %v11670_v14 = vmul.f32 1.442695, %v14954_v25  ;;  %v11675_v27 = vmul.f32 1.442695, %v14956_v32  ;;  %v14963_v9 = vsub.f32 %v14962_v4, %v11358_v63  ;;  %v14966_v19 = vsub.f32 %v14965_v55, %v11361_v47  ;;  %14967 = vst [vmem:[#allocation30_spill] sm:$0xff] %v11699_v51  ;;  %v14971_v17 = vld [vmem:[#allocation229_spill] sm:$0xff]  ;;  %v11716_v55 = vpop.eup %8748 }
 0x1b9   :  { %v11680_v56 = vmul.f32 1.442695, %v14958_v0  ;;  %v14969_v62 = vsub.f32 %v14968_v26, %v11364_v50  ;;  %v14972_v18 = vsub.f32 %v14970_v20, %v14971_v17  ;;  %v14974_v4 = vld [vmem:[#allocation90_spill] sm:$0xff]  ;;  %14976 = vst [vmem:[#allocation22_spill] sm:$0xff] %v11716_v55  ;;  %8768 = vpow2.f32 %v1339_v24  ;;  %v14981_v26 = vld [vmem:[#allocation81_spill] sm:$0xff] }
 0x1ba   :  { %v11692_v25 = vmul.f32 1.442695, %v14963_v9  ;;  %v11697_v32 = vmul.f32 1.442695, %v14966_v19  ;;  %v14975_v9 = vsub.f32 %v14974_v4, %v11370_v39  ;;  %v14977_v19 = vld [vmem:[#allocation92_spill] sm:$0xff]  ;;  %v14978_v46 = vld [vmem:[#allocation230_spill] sm:$0xff]  ;;  %v8751_v4 = vpop.eup %8750  ;;  %8770 = vpow2.f32 %v1341_v36 }
 0x1bb   :  { %v11704_v0 = vmul.f32 1.442695, %v14969_v62  ;;  %v11709_v58 = vmul.f32 1.442695, %v14972_v18  ;;  %v14979_v59 = vsub.f32 %v14977_v19, %v14978_v46  ;;  %v14982_v62 = vsub.f32 %v14981_v26, %v11358_v63  ;;  %v14984_v20 = vld [vmem:[#allocation82_spill] sm:$0xff]  ;;  %v14988_v19 = vld [vmem:[#allocation84_spill] sm:$0xff] }
 0x1bc   :  { %14964 = vst [vmem:[#allocation29_spill] sm:$0xff] %v11692_v25  ;;  %v11714_v2 = vmul.f32 1.442695, %v14975_v9  ;;  %v14985_v18 = vsub.f32 %v14984_v20, %v11361_v47  ;;  %v14986_v9 = vld [vmem:[#allocation83_spill] sm:$0xff]  ;;  %v14991_v63 = vld [vmem:[#allocation86_spill] sm:$0xff]  ;;  %v11748_v47 = vpop.eup %8752  ;;  %8772 = vpow2.f32 %v1343_v41  ;;  %v15002_v41 = vsub.f32 %v14896_v11, %v11388_v28  ;;  %v15010_v11 = vld [vmem:[#allocation109_spill] sm:$0xff] }
 0x1bd   :  { %14973 = vst [vmem:[#allocation21_spill] sm:$0xff] %v11709_v58  ;;  %v11721_v1 = vmul.f32 1.442695, %v14979_v59  ;;  %v11726_v53 = vmul.f32 1.442695, %v14982_v62  ;;  %v14987_v24 = vsub.f32 %v14986_v9, %v11364_v50  ;;  %v14989_v59 = vsub.f32 %v14988_v19, %v14971_v17  ;;  %14993 = vst [vmem:[#allocation26_spill] sm:$0xff] %v11748_v47  ;;  %v11760_v19 = vpop.eup %8754 }
 0x1be   :  { %v11731_v51 = vmul.f32 1.442695, %v14985_v18  ;;  %v14992_v26 = vsub.f32 %v14991_v63, %v11370_v39  ;;  %v14994_v20 = vld [vmem:[#allocation91_spill] sm:$0xff]  ;;  %v1506_v17 = vadd.f32 %v8751_v4, %v8739_v38  ;;  %14999 = vst [vmem:[#allocation8_spill] sm:$0xff] %v11760_v19  ;;  %8774 = vpow2.f32 %v1345_v23  ;;  %v15000_v39 = vld [vmem:[#allocation112_spill] sm:$0xff] }
 0x1bf   :  { %14980 = vst [vmem:[#allocation23_spill] sm:$0xff] %v11721_v1  ;;  %14983 = vst [vmem:[#allocation24_spill] sm:$0xff] %v11726_v53  ;;  %v11736_v60 = vmul.f32 1.442695, %v14987_v24  ;;  %v11741_v1 = vmul.f32 1.442695, %v14989_v59  ;;  %v14995_v36 = vsub.f32 %v14994_v20, %v14978_v46  ;;  %v15001_v59 = vsub.f32 %v15000_v39, %v11382_v34 }
 0x1c0   :  { %v11746_v62 = vmul.f32 1.442695, %v14992_v26  ;;  %v14997_v50 = vld [vmem:[#allocation111_spill] sm:$0xff]  ;;  %v11770_v46 = vmul.f32 1.442695, %v15002_v41  ;;  %v15003_v26 = vld [vmem:[#allocation65_spill] sm:$0xff]  ;;  %8776 = vpow2.f32 %v1347_v54  ;;  %v15011_v41 = vsub.f32 %v15010_v11, %v11382_v34 }
 0x1c1   :  { %14990 = vst [vmem:[#allocation25_spill] sm:$0xff] %v11741_v1  ;;  %v11753_v18 = vmul.f32 1.442695, %v14995_v36  ;;  %v14998_v9 = vsub.f32 %v14997_v50, %v11379_v48  ;;  %v11765_v63 = vmul.f32 1.442695, %v15001_v59  ;;  %v15004_v20 = vld [vmem:[#allocation68_spill] sm:$0xff]  ;;  %v11775_v50 = vpop.eup %8756  ;;  %8778 = vpow2.f32 %v1349_v57 }
 0x1c2   :  { %v2538_v36 = vsel %vm756_vm0, %v15004_v20, %v15003_v26  ;;  %15005 = vst [vmem:[#allocation9_spill] sm:$0xff] %v11775_v50  ;;  %v15006_v38 = vld [vmem:[#allocation108_spill] sm:$0xff]  ;;  %v15008_v39 = vld [vmem:[#allocation93_spill] sm:$0xff]  ;;  %v11789_v47 = vmul.f32 1.442695, %v15011_v41  ;;  %v15012_v26 = vld [vmem:[#allocation119_spill] sm:$0xff]  ;;  %8780 = vpow2.f32 %v1351_v31 }
 0x1c3   :  { %14996 = vst [vmem:[#allocation7_spill] sm:$0xff] %v11753_v18  ;;  %v11758_v24 = vmul.f32 1.442695, %v14998_v9  ;;  %v15007_v23 = vsub.f32 %v15006_v38, %v11379_v48  ;;  %v1507_v9 = vrot.slane %v1506_v17, 4  ;;  %v2539_v59 = vsel %vm758_vm1, %v15008_v39, %v2538_v36  ;;  %v11784_v18 = vpop.eup %8758  ;;  %v15013_v20 = vld [vmem:[#allocation215_spill] sm:$0xff]  ;;  %v15014_v50 = vld [vmem:[#allocation214_spill] sm:$0xff] }
 0x1c4   :  { %15009 = vst [vmem:[#allocation10_spill] sm:$0xff] %v11784_v18  ;;  %v2540_v54 = vsel %vm760_vm2, %v15012_v26, %v2539_v59  ;;  %v2623_v48 = vcombine.low %v15014_v50, %v15013_v20  ;;  %v11795_v38 = vpop.eup %8760  ;;  %v15017_v36 = vld [vmem:[#allocation196_spill] sm:$0xff]  ;;  %8782 = vpow2.f32 %v11621_v43  ;;  %v15021_v41 = vld [vmem:[#allocation218_spill] sm:$0xff]  ;;  %v2624_v31 = vcombine.high %v15014_v50, %v15013_v20 }
 0x1c5   :  { %v11780_v4 = vmul.f32 1.442695, %v15007_v23  ;;  %15015 = vst [vmem:[#allocation11_spill] sm:$0xff] %v11795_v38  ;;  %v1508_v23 = vadd.f32 %v1507_v9, %v1506_v17  ;;  %v2536_v39 = vsel %vm766_vm5, %v15017_v36, %v15016_v3  ;;  %v15018_v57 = vld [vmem:[#allocation144_spill] sm:$0xff]  ;;  %v8763_v34 = vpop.eup %8762  ;;  %8784 = vpow2.f32 %v11626_v61  ;;  %v15025_v36 = vld [vmem:[#allocation225_spill] sm:$0xff] }
 0x1c6   :  { %v2541_v18 = vsel %vm762_vm3, %v15018_v57, %v2540_v54  ;;  %v15019_v11 = vld [vmem:[#allocation212_spill] sm:$0xff]  ;;  %v11811_v17 = vpop.eup %8764  ;;  %v15023_v3 = vsub.f32 %v14899_v6, %v11388_v28  ;;  %v15024_v43 = vsub.f32 %v14900_v15, %v11397_v22  ;;  %8786 = vpow2.f32 %v11631_v7  ;;  %v15029_v6 = vld [vmem:[#allocation213_spill] sm:$0xff] }
 0x1c7   :  { %v11805_v59 = vsel %vm768_vm6, %v15019_v11, %v2536_v39  ;;  %v2542_v26 = vsel %vm764_vm4, %v15021_v41, %v2541_v18  ;;  %15022 = vst [vmem:[#allocation117_spill] sm:$0xff] %v11811_v17  ;;  %v11826_v39 = vpop.eup %8766  ;;  %v15027_v61 = vsub.f32 %v14903_v29, %v11397_v22  ;;  %v2647_v15 = vrot.slane %v2623_v48, %v15029_v6  ;;  %v15031_v7 = vld [vmem:[#allocation216_spill] sm:$0xff] }
 0x1c8   :  { %15020 = vst [vmem:[#allocation12_spill] sm:$0xff] %v11805_v59  ;;  %v11817_v9 = vmul.f32 1.442695, %v15023_v3  ;;  %v11822_v54 = vmul.f32 1.442695, %v15024_v43  ;;  %v2543_v18 = vsel %vm766_vm5, %v15025_v36, %v2542_v26  ;;  %15026 = vst [vmem:[#allocation115_spill] sm:$0xff] %v11826_v39  ;;  %v11839_v11 = vpop.eup %8768  ;;  %8788 = vpow2.f32 %v11636_v10 }
 0x1c9   :  { %v11832_v57 = vmul.f32 1.442695, %v15027_v61  ;;  %v11836_v28 = vsel %vm768_vm6, %v11578_v30, %v2543_v18  ;;  %15030 = vst [vmem:[#allocation133_spill] sm:$0xff] %v11839_v11  ;;  %v1509_v41 = vrot.slane %v1508_v23, 2  ;;  %v15032_v3 = vld [vmem:[#allocation217_spill] sm:$0xff]  ;;  %v11848_v43 = vpop.eup %8770  ;;  %8790 = vpow2.f32 %v11641_v35 }
 0x1ca   :  { %15028 = vst [vmem:[#allocation137_spill] sm:$0xff] %v11836_v28  ;;  %v2621_v26 = vcombine.low %v11805_v59, %v11836_v28  ;;  %v15033_v22 = vcombine.low %v15031_v7, %v15032_v3  ;;  %15034 = vst [vmem:[#allocation166_spill] sm:$0xff] %v11848_v43  ;;  %v2622_v30 = vcombine.high %v11805_v59, %v11836_v28  ;;  %v11858_v18 = vpop.eup %8772  ;;  %8792 = vpow2.f32 %v11646_v44  ;;  %v8259_v1 = vld [vmem:[%s14184_s4 + $0x30c] ss:$24 sps:$4 sm:$0xff]  }
 0x1cb   :  { %v2654_v48 = vrot.slane %v2624_v31, %v15029_v6  ;;  %v15035_v10 = vcombine.high %v15031_v7, %v15032_v3  ;;  %15036 = vst [vmem:[#allocation158_spill] sm:$0xff] %v11858_v18  ;;  %v15037_v61 = vsub.f32 %v14906_v37, %v11413_v40  ;;  %v15038_v35 = vsub.f32 %v14907_v13, %v11413_v40  ;;  %v8775_v43 = vpop.eup %8774  ;;  %v15097_v18 = vld [vmem:[#allocation39_spill] sm:$0xff] }
 0x1cc   :  { %v2661_v29 = vrot.slane %v15033_v22, %v15029_v6  ;;  %v2633_v31 = vrot.slane %v2621_v26, %v15029_v6  ;;  %8794 = vpow2.f32 %v11653_v49  ;;  %v15040_v37 = vsub.f32 %v14910_v42, %v11425_v21  ;;  %v11884_v40 = vpop.eup %8776  ;;  %5718 = vmatprep.subr.bf16.mxu1 %v8259_v1 }
 0x1cd   :  { %v2668_v36 = vrot.slane %v15035_v10, %v15029_v6  ;;  %v11864_v22 = vmul.f32 1.442695, %v15037_v61  ;;  %v11869_v11 = vmul.f32 1.442695, %v15038_v35  ;;  %v15039_v10 = vsub.f32 %v14909_v12, %v11425_v21  ;;  %15041 = vst [vmem:[#allocation192_spill] sm:$0xff] %v11884_v40  ;;  %v11887_v49 = vpop.eup %8778 }
 0x1ce   :  { %v11881_v44 = vmul.f32 1.442695, %v15040_v37  ;;  %v2640_v61 = vrot.slane %v2622_v30, %v15029_v6  ;;  %8796 = vpow2.f32 %v11658_v16  ;;  %v1510_v13 = vadd.f32 %v1509_v41, %v1508_v23  ;;  %15042 = vst [vmem:[#allocation183_spill] sm:$0xff] %v11887_v49  ;;  %v11890_v50 = vpop.eup %8780 }
 0x1cf   :  { %v11876_v7 = vmul.f32 1.442695, %v15039_v10  ;;  %v1548_v26 = vadd.f32 %v8775_v43, %v8763_v34  ;;  %v2669_v35 = vcombine.low %v2633_v31, %v2647_v15  ;;  %8798 = vpow2.f32 %v11663_v5  ;;  %15043 = vst [vmem:[#allocation15_spill] sm:$0xff] %v11890_v50  ;;  %v11894_v37 = vpop.eup %8782 }
 0x1d0   :  { %v2671_v12 = vcombine.low %v2640_v61, %v2654_v48  ;;  %v2673_v10 = vcombine.high %v2661_v29, %v2661_v29  ;;  %v2674_v3 = vcombine.high %v2668_v36, %v2668_v36  ;;  %8800 = vpow2.f32 %v11670_v14  ;;  %15044 = vst [vmem:[#allocation16_spill] sm:$0xff] %v11894_v37  ;;  %v11899_v34 = vpop.eup %8784  ;;  %v15046_v14 = vld [vmem:[#allocation106_spill] sm:$0xff] }
 0x1d1   :  { %v1549_v21 = vrot.slane %v1548_v26, 4  ;;  %v2586_v42 = vsub.f32 -inf, %v11836_v28  ;;  %v2670_v30 = vcombine.high %v2633_v31, %v2647_v15  ;;  %8802 = vpow2.f32 %v11675_v27  ;;  %15045 = vst [vmem:[#allocation17_spill] sm:$0xff] %v11899_v34  ;;  %v8787_v40 = vpop.eup %8786 }
 0x1d2   :  { %v2672_v16 = vcombine.high %v2640_v61, %v2654_v48  ;;  %v2681_v23 = vrot.slane %v2669_v35, %v15029_v6  ;;  %v2709_v5 = vrot.slane %v2661_v29, %v15029_v6  ;;  %8804 = vpow2.f32 %v11680_v56  ;;  %v11907_v31 = vpop.eup %8788 }
 0x1d3   :  { %v1511_v41 = vrot.slane %v1510_v13, 1  ;;  %v1550_v43 = vadd.f32 %v1549_v21, %v1548_v26  ;;  %v817_v50 = vsub.f32 -inf, %v15046_v14  ;;  %8806 = vpow2.f32 %v11687_v8  ;;  %15047 = vst [vmem:[#allocation18_spill] sm:$0xff] %v11907_v31  ;;  %v11913_v26 = vpop.eup %8790 }
 0x1d4   :  { %v2688_v15 = vrot.slane %v2671_v12, %v15029_v6  ;;  %v2716_v27 = vrot.slane %v2668_v36, %v15029_v6  ;;  %v2723_v48 = vrot.slane %v2673_v10, %v15029_v6  ;;  %8808 = vpow2.f32 %v11697_v32  ;;  %15048 = vst [vmem:[#allocation19_spill] sm:$0xff] %v11913_v26  ;;  %v11918_v12 = vpop.eup %8792 }
 0x1d5   :  { %v1551_v29 = vrot.slane %v1550_v43, 2  ;;  %v11910_v61 = vmul.f32 1.442695, %v2586_v42  ;;  %v2695_v56 = vrot.slane %v2670_v30, %v15029_v6  ;;  %8810 = vpow2.f32 %v11704_v0  ;;  %15049 = vst [vmem:[#allocation20_spill] sm:$0xff] %v11918_v12  ;;  %v15062_v12 = vld [vmem:[#allocation224_spill] sm:$0xff] }
 0x1d6   :  { %v2702_v8 = vrot.slane %v2672_v16, %v15029_v6  ;;  %v2730_v35 = vrot.slane %v2674_v3, %v15029_v6  ;;  %v2731_v36 = vcombine.low %v2681_v23, %v2709_v5  ;;  %8812 = vpow2.f32 %v11714_v2  ;;  %v11923_v42 = vpop.eup %8794 }
 0x1d7   :  { %v1512_v10 = vadd.f32 %v1511_v41, %v1510_v13  ;;  %v1552_v32 = vadd.f32 %v1551_v29, %v1550_v43  ;;  %v11921_v21 = vmul.f32 1.442695, %v817_v50  ;;  %15051 = vst [vmem:[#allocation58_spill] sm:$0xff] %v11923_v42  ;;  %8814 = vpow2.f32 %v11731_v51  ;;  %v15055_v51 = vld [vmem:[#allocation219_spill] sm:$0xff] }
 0x1d8   :  { %v2732_v30 = vcombine.high %v2681_v23, %v2709_v5  ;;  %v11926_v37 = vcombine.low %v2688_v15, %v2716_v27  ;;  %v11928_v0 = vcombine.high %v2688_v15, %v2716_v27  ;;  %v11930_v16 = vpop.eup %8796  ;;  %8816 = vpow2.f32 %v11736_v60  ;;  %v15057_v15 = vld [vmem:[#allocation220_spill] sm:$0xff]  ;;  %v15058_v27 = vld [vmem:[#allocation221_spill] sm:$0xff] }
 0x1d9   :  { %15050 = vst [vmem:[#allocation57_spill] sm:$0xff] %v11921_v21  ;;  %15053 = vst [vmem:[#allocation64_spill] sm:$0xff] %v11930_v16  ;;  %v1553_v6 = vrot.slane %v1552_v32, 1  ;;  %v2735_v3 = vcombine.low %v2695_v56, %v2723_v48  ;;  %v2736_v2 = vcombine.high %v2695_v56, %v2723_v48  ;;  %v8799_v13 = vpop.eup %8798  ;;  %8818 = vpow2.f32 %v11746_v62  ;;  %v15060_v62 = vld [vmem:[#allocation222_spill] sm:$0xff] }
 0x1da   :  { %15052 = vst [vmem:[#allocation63_spill] sm:$0xff] %v11928_v0  ;;  %v11934_v50 = vcombine.low %v2702_v8, %v2730_v35  ;;  %v11936_v41 = vcombine.high %v2702_v8, %v2730_v35  ;;  %v11939_v23 = vrot.slane %v2731_v36, %v15055_v51  ;;  %v11941_v5 = vpop.eup %8800  ;;  %8820 = vpow2.f32 %v11758_v24  ;;  %v15061_v8 = vld [vmem:[#allocation223_spill] sm:$0xff] }
 0x1db   :  { %15056 = vst [vmem:[#allocation67_spill] sm:$0xff] %v11941_v5  ;;  %v1590_v43 = vadd.f32 %v8799_v13, %v8787_v40  ;;  %v11945_v60 = vrot.slane %v2731_v36, %v15057_v15  ;;  %v11948_v48 = vrot.slane %v2731_v36, %v15058_v27  ;;  %v11950_v29 = vpop.eup %8802  ;;  %8822 = vpow2.f32 %v11765_v63 }
 0x1dc   :  { %15054 = vst [vmem:[#allocation66_spill] sm:$0xff] %v11936_v41  ;;  %15059 = vst [vmem:[#allocation55_spill] sm:$0xff] %v11950_v29  ;;  %v11954_v56 = vrot.slane %v2731_v36, %v15060_v62  ;;  %v11957_v35 = vrot.slane %v2731_v36, %v15061_v8  ;;  %v11960_v42 = vrot.slane %v2731_v36, %v15062_v12  ;;  %v11962_v24 = vpop.eup %8804  ;;  %8824 = vpow2.f32 %v11770_v46 }
 0x1dd   :  { %15063 = vst [vmem:[#allocation56_spill] sm:$0xff] %v11962_v24  ;;  %v1554_v40 = vadd.f32 %v1553_v6, %v1552_v32  ;;  %v1591_v13 = vrot.slane %v1590_v43, 4  ;;  %v11966_v5 = vrot.slane %v2735_v3, %v15055_v51  ;;  %v11968_v31 = vpop.eup %8806  ;;  %8826 = vpow2.f32 %v11780_v4 }
 0x1de   :  { %15064 = vst [vmem:[#allocation59_spill] sm:$0xff] %v11968_v31  ;;  %v11972_v63 = vrot.slane %v2735_v3, %v15057_v15  ;;  %v11975_v17 = vrot.slane %v2735_v3, %v15058_v27  ;;  %v11978_v36 = vrot.slane %v2735_v3, %v15060_v62  ;;  %v8809_v24 = vpop.eup %8808  ;;  %8828 = vpow2.f32 %v11789_v47 }
 0x1df   :  { %v1592_v46 = vadd.f32 %v1591_v13, %v1590_v43  ;;  %v11982_v32 = vrot.slane %v2735_v3, %v15061_v8  ;;  %v11985_v6 = vrot.slane %v2735_v3, %v15062_v12  ;;  %v11987_v4 = vpop.eup %8810  ;;  %8830 = vpow2.f32 %v11817_v9 }
 0x1e0   :  { %15065 = vst [vmem:[#allocation60_spill] sm:$0xff] %v11987_v4  ;;  %v11991_v31 = vrot.slane %v2732_v30, %v15055_v51  ;;  %v11994_v33 = vrot.slane %v2732_v30, %v15057_v15  ;;  %v11997_v14 = vrot.slane %v2732_v30, %v15058_v27  ;;  %v11999_v47 = vpop.eup %8812  ;;  %8832 = vpow2.f32 %v11822_v54 }
 0x1e1   :  { %15066 = vst [vmem:[#allocation61_spill] sm:$0xff] %v11999_v47  ;;  %v1593_v43 = vrot.slane %v1592_v46, 2  ;;  %v1890_v3 = vsel %vm756_vm0, %v1554_v40, %v1512_v10  ;;  %v12004_v13 = vrot.slane %v2732_v30, %v15060_v62  ;;  %v8815_v9 = vpop.eup %8814  ;;  %8834 = vpow2.f32 %v11832_v57 }
 0x1e2   :  { %v12008_v4 = vrot.slane %v2732_v30, %v15061_v8  ;;  %v12011_v20 = vrot.slane %v2732_v30, %v15062_v12  ;;  %v12014_v29 = vrot.slane %v2736_v2, %v15055_v51  ;;  %v12016_v47 = vpop.eup %8816  ;;  %8836 = vpow2.f32 %v11864_v22 }
 0x1e3   :  { %15067 = vst [vmem:[#allocation62_spill] sm:$0xff] %v12016_v47  ;;  %v1594_v54 = vadd.f32 %v1593_v43, %v1592_v46  ;;  %v1632_v10 = vadd.f32 %v8815_v9, %v8809_v24  ;;  %v12020_v40 = vrot.slane %v2736_v2, %v15057_v15  ;;  %v12022_v26 = vpop.eup %8818  ;;  %8838 = vpow2.f32 %v11869_v11 }
 0x1e4   :  { %15068 = vst [vmem:[#allocation85_spill] sm:$0xff] %v12022_v26  ;;  %v12026_v57 = vrot.slane %v2736_v2, %v15058_v27  ;;  %v12029_v30 = vrot.slane %v2736_v2, %v15060_v62  ;;  %v12032_v28 = vrot.slane %v2736_v2, %v15061_v8  ;;  %v8821_v47 = vpop.eup %8820  ;;  %8840 = vpow2.f32 %v11876_v7 }
 0x1e5   :  { %v1595_v22 = vrot.slane %v1594_v54, 1  ;;  %v1633_v24 = vrot.slane %v1632_v10, 4  ;;  %v12036_v46 = vrot.slane %v2736_v2, %v15062_v12  ;;  %v12038_v43 = vpop.eup %8822  ;;  %8842 = vpow2.f32 %v11881_v44  ;;  %v8256_v2 = vld [vmem:[%s14184_s4 + $0x304] ss:$24 sps:$4 sm:$0xff]  }
 0x1e6   :  { %15069 = vst [vmem:[#allocation87_spill] sm:$0xff] %v12038_v43  ;;  %v12043_v11 = vrot.slane %v11926_v37, %v15055_v51  ;;  %v12047_v9 = vrot.slane %v11926_v37, %v15057_v15  ;;  %v12051_v7 = vrot.slane %v11926_v37, %v15058_v27  ;;  %v12056_v26 = vpop.eup %8824  ;;  %v12060_v44 = vrot.slane %v11926_v37, %v15060_v62 }
 0x1e7   :  { %15071 = vst [vmem:[#allocation89_spill] sm:$0xff] %v12056_v26  ;;  %v1634_v43 = vadd.f32 %v1633_v24, %v1632_v10  ;;  %v12064_v49 = vrot.slane %v11926_v37, %v15061_v8  ;;  %v12068_v39 = vrot.slane %v11926_v37, %v15062_v12  ;;  %v8827_v19 = vpop.eup %8826  ;;  %v1596_v45 = vadd.f32 %v1595_v22, %v1594_v54 }
 0x1e8   :  { %15070 = vst [vmem:[#allocation88_spill] sm:$0xff] %v12043_v11  ;;  %15072 = vst [vmem:[#allocation229_spill] sm:$0xff] %v12060_v44  ;;  %v12075_v10 = vrot.slane %v11934_v50, %v15055_v51  ;;  %v12079_v24 = vrot.slane %v11934_v50, %v15057_v15  ;;  %v12083_v26 = vrot.slane %v11934_v50, %v15058_v27  ;;  %5589 = vmatprep.subr.bf16.mxu0 %v8256_v2  ;;  %v12085_v37 = vpop.eup %8828 }
 0x1e9   :  { %15073 = vst [vmem:[#allocation90_spill] sm:$0xff] %v12064_v49  ;;  %15074 = vst [vmem:[#allocation92_spill] sm:$0xff] %v12068_v39  ;;  %v1635_v39 = vrot.slane %v1634_v43, 2  ;;  %v1674_v44 = vadd.f32 %v8827_v19, %v8821_v47  ;;  %v12089_v54 = vrot.slane %v11934_v50, %v15060_v62  ;;  %v12093_v22 = vrot.slane %v11934_v50, %v15061_v8  ;;  %v12095_v58 = vpop.eup %8830  ;;  %v15089_v62 = vld [vmem:[#allocation37_spill] sm:$0xff] }
 0x1ea   :  { %15075 = vst [vmem:[#allocation230_spill] sm:$0xff] %v12075_v10  ;;  %15076 = vst [vmem:[#allocation81_spill] sm:$0xff] %v12083_v26  ;;  %8844 = vpow2.f32 %v11910_v61  ;;  %v12100_v2 = vrot.slane %v11934_v50, %v15062_v12  ;;  %v12104_v19 = vrot.slane %v11928_v0, %v15057_v15  ;;  %v12108_v47 = vrot.slane %v11928_v0, %v15058_v27  ;;  %v15164_v26 = vld [vmem:[#allocation33_spill] sm:$0xff] }
 0x1eb   :  { %15077 = vst [vmem:[#allocation82_spill] sm:$0xff] %v12085_v37  ;;  %15078 = vst [vmem:[#allocation83_spill] sm:$0xff] %v12089_v54  ;;  %v8833_v37 = vpop.eup %8832  ;;  %v1636_v54 = vadd.f32 %v1635_v39, %v1634_v43  ;;  %v1675_v53 = vrot.slane %v1674_v44, 4  ;;  %v12112_v1 = vrot.slane %v11928_v0, %v15061_v8  ;;  %v12116_v61 = vrot.slane %v11936_v41, %v15057_v15  ;;  %v15087_v39 = vld [vmem:[#allocation34_spill] sm:$0xff]  ;;  %v15088_v15 = vld [vmem:[#allocation36_spill] sm:$0xff] }
 0x1ec   :  { %15079 = vst [vmem:[#allocation84_spill] sm:$0xff] %v12093_v22  ;;  %15080 = vst [vmem:[#allocation86_spill] sm:$0xff] %v12095_v58  ;;  %v8835_v50 = vpop.eup %8834  ;;  %v1891_v58 = vsel %vm758_vm1, %v1596_v45, %v1890_v3  ;;  %v12125_v12 = vrot.slane %v11936_v41, %v15061_v8  ;;  %v15091_v8 = vld [vmem:[#allocation41_spill] sm:$0xff] }
 0x1ed   :  { %15081 = vst [vmem:[#allocation91_spill] sm:$0xff] %v12100_v2  ;;  %15082 = vst [vmem:[#allocation111_spill] sm:$0xff] %v12108_v47  ;;  %v12121_v2 = vrot.slane %v11936_v41, %v15058_v27  ;;  %v8837_v47 = vpop.eup %8836  ;;  %v1716_v25 = vadd.f32 %v8835_v50, %v8833_v37  ;;  %v1637_v10 = vrot.slane %v1636_v54, 1  ;;  %v15090_v27 = vld [vmem:[#allocation38_spill] sm:$0xff] }
 0x1ee   :  { %15083 = vst [vmem:[#allocation112_spill] sm:$0xff] %v12112_v1  ;;  %15084 = vst [vmem:[#allocation65_spill] sm:$0xff] %v12116_v61  ;;  %v1676_v1 = vadd.f32 %v1675_v53, %v1674_v44  ;;  %v8839_v3 = vpop.eup %8838 }
 0x1ef   :  { %15085 = vst [vmem:[#allocation68_spill] sm:$0xff] %v12121_v2  ;;  %15086 = vst [vmem:[#allocation108_spill] sm:$0xff] %v12125_v12  ;;  %v8841_v41 = vpop.eup %8840  ;;  %v1717_v44 = vrot.slane %v1716_v25, 4  ;;  %v1758_v37 = vadd.f32 %v8839_v3, %v8837_v47  ;;  %v1638_v3 = vadd.f32 %v1637_v10, %v1636_v54 }
 0x1f0   :  { %v1677_v53 = vrot.slane %v1676_v1, 2  ;;  %v8843_v0 = vpop.eup %8842 }
 0x1f1   :  { %v1718_v55 = vadd.f32 %v1717_v44, %v1716_v25  ;;  %v1759_v52 = vrot.slane %v1758_v37, 4  ;;  %v1800_v47 = vadd.f32 %v8843_v0, %v8841_v41  ;;  %v1892_v43 = vsel %vm760_vm2, %v1638_v3, %v1891_v58  ;;  %v15106_v25 = vld [vmem:[#allocation44_spill] sm:$0xff]  ;;  %v15107_v41 = vld [vmem:[#allocation45_spill] sm:$0xff]  ;;  %v15112_v0 = vld [vmem:[#allocation71_spill] sm:$0xff] }
 0x1f2   :  { %v1678_v38 = vadd.f32 %v1677_v53, %v1676_v1  ;;  %v15104_v53 = vld [vmem:[#allocation54_spill] sm:$0xff]  ;;  %v15121_v44 = vld [vmem:[#allocation73_spill] sm:$0xff] }
 0x1f3   :  { %v1719_v61 = vrot.slane %v1718_v55, 2  ;;  %v1760_v12 = vadd.f32 %v1759_v52, %v1758_v37  ;;  %v1801_v34 = vrot.slane %v1800_v47, 4  ;;  %v15105_v37 = vld [vmem:[#allocation43_spill] sm:$0xff]  ;;  %v15127_v58 = vld [vmem:[#allocation102_spill] sm:$0xff] }
 0x1f4   :  { %v1679_v16 = vrot.slane %v1678_v38, 1  ;;  %v8845_v11 = vpop.eup %8844 }
 0x1f5   :  { %v1720_v59 = vadd.f32 %v1719_v61, %v1718_v55  ;;  %v1761_v51 = vrot.slane %v1760_v12, 2  ;;  %v1802_v2 = vadd.f32 %v1801_v34, %v1800_v47  ;;  %v12170_v21 = vmul.f32 0.0, %v8845_v11  ;;  %v15109_v34 = vld [vmem:[#allocation46_spill] sm:$0xff]  ;;  %v15111_v61 = vld [vmem:[#allocation48_spill] sm:$0xff] }
 0x1f6   :  { %v1680_v52 = vadd.f32 %v1679_v16, %v1678_v38  ;;  %v15116_v16 = vld [vmem:[#allocation79_spill] sm:$0xff] }
 0x1f7   :  { %v1721_v50 = vrot.slane %v1720_v59, 1  ;;  %v1762_v54 = vadd.f32 %v1761_v51, %v1760_v12  ;;  %v1803_v10 = vrot.slane %v1802_v2, 2  ;;  %15108 = vst [vmem:[#allocation93_spill] sm:$0xff] %v12170_v21  ;;  %v15131_v12 = vld [vmem:[#allocation228_spill] sm:$0xff]  ;;  %v15139_v51 = vld [vmem:[#allocation129_spill] sm:$0xff] }
 0x1f8   :  { %v1893_v55 = vsel %vm762_vm3, %v1680_v52, %v1892_v43  ;;  %v15146_v52 = vsub.f32 %v15089_v62, %v11948_v48  ;;  %v15152_v62 = vsub.f32 %v15091_v8, %v11957_v35  ;;  %v15160_v8 = vld [vmem:[#allocation32_spill] sm:$0xff] }
 0x1f9   :  { %v1722_v3 = vadd.f32 %v1721_v50, %v1720_v59  ;;  %v1763_v1 = vrot.slane %v1762_v54, 1  ;;  %v1804_v45 = vadd.f32 %v1803_v10, %v1802_v2  ;;  %v15117_v2 = vld [vmem:[#allocation80_spill] sm:$0xff]  ;;  %v15157_v10 = vld [vmem:[#allocation65_spill] sm:$0xff] }
 0x1fa   :  { %v3079_v43 = vmul.f32 1.442695, %v15146_v52  ;;  %v3083_v52 = vmul.f32 1.442695, %v15152_v62  ;;  %v15161_v62 = vsub.f32 %v15160_v8, %v11945_v60 }
 0x1fb   :  { %v1764_v38 = vadd.f32 %v1763_v1, %v1762_v54  ;;  %v1805_v47 = vrot.slane %v1804_v45, 1  ;;  %v1894_v59 = vsel %vm764_vm4, %v1722_v3, %v1893_v55  ;;  %v15130_v3 = vld [vmem:[#allocation94_spill] sm:$0xff] }
 0x1fd   :  { %v1806_v21 = vadd.f32 %v1805_v47, %v1804_v45  ;;  %v1895_v1 = vsel %vm766_vm5, %v1764_v38, %v1894_v59  ;;  %v15142_v59 = vsub.f32 %v15087_v39, %v11939_v23  ;;  %v15149_v47 = vsub.f32 %v15090_v27, %v11954_v56  ;;  %v15155_v27 = vld [vmem:[#allocation42_spill] sm:$0xff]  ;;  %v15162_v45 = vld [vmem:[#allocation31_spill] sm:$0xff] }
 0x1fe   :  { %v15163_v39 = vsub.f32 %v15162_v45, %v11939_v23 }
 0x1ff   :  { %v1896_v38 = vsel %vm768_vm6, %v1806_v21, %v1895_v1  ;;  %v3075_v1 = vmul.f32 1.442695, %v15142_v59  ;;  %v3081_v50 = vmul.f32 1.442695, %v15149_v47  ;;  %v15153_v21 = vld [vmem:[#allocation175_spill] sm:$0xff] }
 0x200   :  { %v1932_v54 = vadd.f32 %v1896_v38, %v15131_v12  ;;  %v15138_v12 = vld [vmem:[#allocation126_spill] sm:$0xff]  ;;  %v15145_v38 = vsub.f32 %v15088_v15, %v11945_v60  ;;  %v3089_v15 = vmul.f32 1.442695, %v15161_v62  ;;  %v15166_v59 = vld [vmem:[#allocation35_spill] sm:$0xff]  ;;  %v15169_v60 = vld [vmem:[#allocation40_spill] sm:$0xff] }
 0x201   :  { %v15167_v55 = vsub.f32 %v15166_v59, %v11954_v56  ;;  %v15171_v62 = vld [vmem:[#allocation49_spill] sm:$0xff]  ;;  %v15175_v56 = vld [vmem:[#allocation51_spill] sm:$0xff] }
 0x202   :  { %v3077_v11 = vmul.f32 1.442695, %v15145_v38  ;;  %8846 = vlog2.f32 %v1932_v54  ;;  %v15156_v54 = vsub.f32 %v15155_v27, %v11960_v42  ;;  %v15165_v27 = vsub.f32 %v15164_v26, %v11948_v48  ;;  %v15173_v26 = vld [vmem:[#allocation50_spill] sm:$0xff] }
 0x203   :  { %8848 = vpow2.f32 %v3075_v1  ;;  %v15159_v1 = vld [vmem:[#allocation189_spill] sm:$0xff]  ;;  %v3093_v22 = vmul.f32 1.442695, %v15167_v55  ;;  %v15172_v23 = vsub.f32 %v15171_v62, %v11966_v5  ;;  %v15174_v48 = vsub.f32 %v15173_v26, %v11972_v63 }
 0x204   :  { %8850 = vpow2.f32 %v3077_v11  ;;  %v3085_v47 = vmul.f32 1.442695, %v15156_v54  ;;  %v3087_v11 = vmul.f32 1.442695, %v15163_v39  ;;  %v3091_v54 = vmul.f32 1.442695, %v15165_v27 }
 0x205   :  { %8852 = vpow2.f32 %v3079_v43  ;;  %v15168_v43 = vsub.f32 %v15097_v18, %v11957_v35  ;;  %v3099_v45 = vmul.f32 1.442695, %v15172_v23  ;;  %v3101_v39 = vmul.f32 1.442695, %v15174_v48 }
 0x206   :  { %8854 = vpow2.f32 %v3081_v50  ;;  %v15170_v50 = vsub.f32 %v15169_v60, %v11960_v42  ;;  %v15176_v55 = vsub.f32 %v15175_v56, %v11975_v17  ;;  %v15179_v42 = vld [vmem:[#allocation53_spill] sm:$0xff]  ;;  %v15183_v23 = vsub.f32 %v15106_v25, %v11972_v63 }
 0x207   :  { %8856 = vpow2.f32 %v3083_v52  ;;  %v3095_v38 = vmul.f32 1.442695, %v15168_v43  ;;  %v15177_v52 = vld [vmem:[#allocation52_spill] sm:$0xff]  ;;  %v15180_v27 = vsub.f32 %v15179_v42, %v11982_v32  ;;  %v15185_v56 = vsub.f32 %v15109_v34, %v11978_v36 }
 0x208   :  { %v3097_v8 = vmul.f32 1.442695, %v15170_v50  ;;  %8858 = vpow2.f32 %v3085_v47  ;;  %v3103_v59 = vmul.f32 1.442695, %v15176_v55  ;;  %v15178_v18 = vsub.f32 %v15177_v52, %v11978_v36  ;;  %v15186_v55 = vld [vmem:[#allocation47_spill] sm:$0xff]  ;;  %v15191_v36 = vld [vmem:[#allocation74_spill] sm:$0xff] }
 0x209   :  { %8860 = vpow2.f32 %v3089_v15  ;;  %v3107_v43 = vmul.f32 1.442695, %v15180_v27  ;;  %v15181_v47 = vsub.f32 %v15104_v53, %v11985_v6  ;;  %v15182_v50 = vsub.f32 %v15105_v37, %v11966_v5 }
 0x20a   :  { %v3105_v35 = vmul.f32 1.442695, %v15178_v18  ;;  %8862 = vpow2.f32 %v3087_v11  ;;  %v3113_v26 = vmul.f32 1.442695, %v15183_v23  ;;  %v15184_v15 = vsub.f32 %v15107_v41, %v11975_v17  ;;  %v15201_v23 = vld [vmem:[#allocation69_spill] sm:$0xff] }
 0x20b   :  { %v3109_v60 = vmul.f32 1.442695, %v15181_v47  ;;  %v12318_v62 = vmul.f32 1.442695, %v15182_v50  ;;  %v12331_v53 = vmul.f32 1.442695, %v15185_v56  ;;  %8864 = vpow2.f32 %v3091_v54 }
 0x20c   :  { %v12326_v48 = vmul.f32 1.442695, %v15184_v15  ;;  %v15187_v5 = vsub.f32 %v15186_v55, %v11982_v32  ;;  %v15188_v63 = vsub.f32 %v15111_v61, %v11985_v6  ;;  %v15190_v17 = vsub.f32 %v15112_v0, %v11991_v31  ;;  %v8847_v11 = vpop.eup %8846  ;;  %v15193_v32 = vld [vmem:[#allocation75_spill] sm:$0xff]  ;;  %v15195_v6 = vld [vmem:[#allocation77_spill] sm:$0xff] }
 0x20d   :  { %8866 = vpow2.f32 %v3093_v22  ;;  %v15192_v34 = vsub.f32 %v15191_v36, %v11994_v33  ;;  %v15194_v52 = vsub.f32 %v15193_v32, %v11997_v14  ;;  %v15196_v61 = vsub.f32 %v15195_v6, %v12004_v13  ;;  %v12363_v0 = vpop.eup %8848  ;;  %v15209_v32 = vld [vmem:[#allocation76_spill] sm:$0xff] }
 0x20e   :  { %v12336_v37 = vmul.f32 1.442695, %v15187_v5  ;;  %v12341_v25 = vmul.f32 1.442695, %v15188_v63  ;;  %v12346_v41 = vmul.f32 1.442695, %v15190_v17  ;;  %8868 = vpow2.f32 %v3095_v38  ;;  %v8851_v55 = vpop.eup %8850 }
 0x20f   :  { %v12351_v54 = vmul.f32 1.442695, %v15192_v34  ;;  %v12356_v18 = vmul.f32 1.442695, %v15194_v52  ;;  %v12361_v42 = vmul.f32 1.442695, %v15196_v61  ;;  %v15197_v22 = vsub.f32 %v15116_v16, %v12008_v4 }
 0x210   :  { %15189 = vst [vmem:[#allocation109_spill] sm:$0xff] %v12341_v25  ;;  %v15199_v47 = vsub.f32 %v15117_v2, %v12011_v20  ;;  %v15202_v15 = vsub.f32 %v15201_v23, %v11991_v31  ;;  %8870 = vpow2.f32 %v3097_v8  ;;  %v15203_v5 = vld [vmem:[#allocation70_spill] sm:$0xff]  ;;  %v15205_v16 = vld [vmem:[#allocation72_spill] sm:$0xff]  ;;  %v15207_v2 = vsub.f32 %v15121_v44, %v12004_v13  ;;  %v12395_v31 = vpop.eup %8852 }
 0x211   :  { %v12368_v27 = vmul.f32 1.442695, %v15197_v22  ;;  %v15204_v38 = vsub.f32 %v15203_v5, %v11994_v33  ;;  %v15206_v17 = vsub.f32 %v15205_v16, %v11997_v14  ;;  %15208 = vst [vmem:[#allocation196_spill] sm:$0xff] %v12395_v31  ;;  %8872 = vpow2.f32 %v3099_v45  ;;  %v15212_v33 = vld [vmem:[#allocation78_spill] sm:$0xff]  ;;  %v15215_v14 = vld [vmem:[#allocation96_spill] sm:$0xff]  ;;  %v12412_v13 = vpop.eup %8854 }
 0x212   :  { %v12373_v50 = vmul.f32 1.442695, %v15199_v47  ;;  %v12378_v56 = vmul.f32 1.442695, %v15202_v15  ;;  %v12393_v34 = vmul.f32 1.442695, %v15207_v2  ;;  %v15210_v8 = vsub.f32 %v15209_v32, %v12008_v4  ;;  %v12429_v16 = vpop.eup %8856 }
 0x213   :  { %15198 = vst [vmem:[#allocation119_spill] sm:$0xff] %v12368_v27  ;;  %v12383_v63 = vmul.f32 1.442695, %v15204_v38  ;;  %v12388_v36 = vmul.f32 1.442695, %v15206_v17  ;;  %v15213_v6 = vsub.f32 %v15212_v33, %v12011_v20  ;;  %v15216_v22 = vsub.f32 %v15215_v14, %v12014_v29  ;;  %15217 = vst [vmem:[#allocation218_spill] sm:$0xff] %v12412_v13 }
 0x214   :  { %15200 = vst [vmem:[#allocation169_spill] sm:$0xff] %v12373_v50  ;;  %v12400_v52 = vmul.f32 1.442695, %v15210_v8  ;;  %8874 = vpow2.f32 %v3101_v39  ;;  %v15218_v44 = vld [vmem:[#allocation98_spill] sm:$0xff]  ;;  %v15220_v4 = vld [vmem:[#allocation101_spill] sm:$0xff]  ;;  %v15222_v20 = vsub.f32 %v15127_v58, %v12029_v30  ;;  %15223 = vst [vmem:[#allocation225_spill] sm:$0xff] %v12429_v16  ;;  %v12446_v58 = vpop.eup %8858 }
 0x215   :  { %v12405_v61 = vmul.f32 1.442695, %v15213_v6  ;;  %v12410_v47 = vmul.f32 1.442695, %v15216_v22  ;;  %v15219_v45 = vsub.f32 %v15218_v44, %v12020_v40  ;;  %v15221_v15 = vsub.f32 %v15220_v4, %v12026_v57  ;;  %v15224_v17 = vld [vmem:[#allocation104_spill] sm:$0xff]  ;;  %v15227_v32 = vld [vmem:[#allocation105_spill] sm:$0xff] }
 0x216   :  { %15211 = vst [vmem:[#allocation144_spill] sm:$0xff] %v12400_v52  ;;  %v12427_v38 = vmul.f32 1.442695, %v15222_v20  ;;  %8876 = vpow2.f32 %v3103_v59  ;;  %v15225_v39 = vsub.f32 %v15224_v17, %v12032_v28  ;;  %v15228_v8 = vsub.f32 %v15227_v32, %v12036_v46  ;;  %15231 = vst [vmem:[#allocation36_spill] sm:$0xff] %v12446_v58  ;;  %v15232_v22 = vld [vmem:[#allocation95_spill] sm:$0xff]  ;;  %v15278_v58 = vld [vmem:[#allocation157_spill] sm:$0xff] }
 0x217   :  { %15214 = vst [vmem:[#allocation212_spill] sm:$0xff] %v12405_v61  ;;  %v12417_v23 = vmul.f32 1.442695, %v15219_v45  ;;  %v12422_v5 = vmul.f32 1.442695, %v15221_v15  ;;  %v15230_v6 = vsub.f32 %v15130_v3, %v12014_v29  ;;  %8878 = vpow2.f32 %v3105_v35  ;;  %v15234_v45 = vld [vmem:[#allocation97_spill] sm:$0xff]  ;;  %v8861_v29 = vpop.eup %8860 }
 0x218   :  { %v12434_v2 = vmul.f32 1.442695, %v15225_v39  ;;  %v12439_v33 = vmul.f32 1.442695, %v15228_v8  ;;  %v15233_v59 = vsub.f32 %v15232_v22, %v12020_v40  ;;  %v15235_v4 = vsub.f32 %v15234_v45, %v12026_v57  ;;  %v15236_v20 = vld [vmem:[#allocation99_spill] sm:$0xff]  ;;  %v15239_v3 = vld [vmem:[#allocation100_spill] sm:$0xff] }
 0x219   :  { %v12444_v14 = vmul.f32 1.442695, %v15230_v6  ;;  %v15237_v17 = vsub.f32 %v15236_v20, %v12029_v30  ;;  %8880 = vpow2.f32 %v3107_v43  ;;  %v15240_v35 = vsub.f32 %v15239_v3, %v12032_v28  ;;  %v15242_v40 = vld [vmem:[#allocation103_spill] sm:$0xff]  ;;  %v15245_v57 = vld [vmem:[#allocation124_spill] sm:$0xff]  ;;  %v12478_v30 = vpop.eup %8862 }
 0x21a   :  { %15226 = vst [vmem:[#allocation213_spill] sm:$0xff] %v12434_v2  ;;  %15229 = vst [vmem:[#allocation34_spill] sm:$0xff] %v12439_v33  ;;  %v12451_v44 = vmul.f32 1.442695, %v15233_v59  ;;  %v12456_v15 = vmul.f32 1.442695, %v15235_v4  ;;  %v15243_v8 = vsub.f32 %v15242_v40, %v12036_v46  ;;  %v15246_v22 = vsub.f32 %v15245_v57, %v12047_v9  ;;  %v12490_v20 = vpop.eup %8864 }
 0x21b   :  { %v12461_v39 = vmul.f32 1.442695, %v15237_v17  ;;  %v12466_v32 = vmul.f32 1.442695, %v15240_v35  ;;  %8882 = vpow2.f32 %v3109_v60  ;;  %v15247_v43 = vsub.f32 %v15138_v12, %v12051_v7  ;;  %15250 = vst [vmem:[#allocation54_spill] sm:$0xff] %v12490_v20  ;;  %v15251_v17 = vld [vmem:[#allocation121_spill] sm:$0xff] }
 0x21c   :  { %v12471_v6 = vmul.f32 1.442695, %v15243_v8  ;;  %v12476_v59 = vmul.f32 1.442695, %v15246_v22  ;;  %v15248_v28 = vsub.f32 %v15139_v51, %v12064_v49  ;;  %v3274_v46 = vadd.f32 %v8861_v29, %v8851_v55  ;;  %v15253_v60 = vld [vmem:[#allocation122_spill] sm:$0xff]  ;;  %v12507_v22 = vpop.eup %8866  ;;  %v15268_v16 = vld [vmem:[#allocation231_spill] sm:$0xff] }
 0x21d   :  { %15238 = vst [vmem:[#allocation37_spill] sm:$0xff] %v12461_v39  ;;  %15241 = vst [vmem:[#allocation38_spill] sm:$0xff] %v12466_v32  ;;  %v12483_v45 = vmul.f32 1.442695, %v15247_v43  ;;  %8884 = vpow2.f32 %v3113_v26  ;;  %v15252_v3 = vsub.f32 %v15251_v17, %v12047_v9  ;;  %v15254_v40 = vsub.f32 %v15253_v60, %v12051_v7  ;;  %v15255_v8 = vld [vmem:[#allocation150_spill] sm:$0xff]  ;;  %v12521_v60 = vpop.eup %8868  ;;  %v15287_v61 = vld [vmem:[#allocation11_spill] sm:$0xff] }
 0x21e   :  { %15244 = vst [vmem:[#allocation41_spill] sm:$0xff] %v12471_v6  ;;  %v12488_v4 = vmul.f32 1.442695, %v15248_v28  ;;  %v15256_v57 = vsub.f32 %v15255_v8, %v12079_v24  ;;  %15257 = vst [vmem:[#allocation43_spill] sm:$0xff] %v12507_v22  ;;  %v15258_v55 = vld [vmem:[#allocation146_spill] sm:$0xff]  ;;  %v15260_v9 = vsub.f32 %v15153_v21, %v12104_v19  ;;  %v3275_v7 = vrot.slane %v3274_v46, 4  ;;  %v12531_v21 = vpop.eup %8870 }
 0x21f   :  { %v12495_v35 = vmul.f32 1.442695, %v15252_v3  ;;  %v12500_v12 = vmul.f32 1.442695, %v15254_v40  ;;  %v15259_v26 = vsub.f32 %v15258_v55, %v12079_v24  ;;  %v15261_v28 = vld [vmem:[#allocation219_spill] sm:$0xff]  ;;  %v15262_v17 = vld [vmem:[#allocation226_spill] sm:$0xff]  ;;  %8886 = vpow2.f32 %v12318_v62  ;;  %v12538_v2 = vpop.eup %8872 }
 0x220   :  { %15249 = vst [vmem:[#allocation39_spill] sm:$0xff] %v12488_v4  ;;  %v12505_v51 = vmul.f32 1.442695, %v15256_v57  ;;  %v12517_v43 = vmul.f32 1.442695, %v15260_v9  ;;  %v1118_v3 = vrot.slane %v15262_v17, %v15261_v28  ;;  %15263 = vst [vmem:[#allocation44_spill] sm:$0xff] %v12521_v60  ;;  %8888 = vpow2.f32 %v12326_v48  ;;  %v8875_v52 = vpop.eup %8874 }
 0x221   :  { %v12512_v29 = vmul.f32 1.442695, %v15259_v26  ;;  %v15264_v40 = vld [vmem:[#allocation171_spill] sm:$0xff]  ;;  %v3747_v24 = vmul.f32 0.6931472, %v8847_v11  ;;  %15267 = vst [vmem:[#allocation45_spill] sm:$0xff] %v12531_v21  ;;  %v3276_v9 = vadd.f32 %v3275_v7, %v3274_v46  ;;  %8890 = vpow2.f32 %v12331_v53 }
 0x222   :  { %v15265_v8 = vsub.f32 %v15264_v40, %v12104_v19  ;;  %v15266_v55 = vld [vmem:[#allocation227_spill] sm:$0xff]  ;;  %v15269_v4 = vld [vmem:[#allocation110_spill] sm:$0xff]  ;;  %v15271_v19 = vld [vmem:[#allocation200_spill] sm:$0xff]  ;;  %v1289_v6 = vsub.f32 %v15278_v58, %v1118_v3  ;;  %8892 = vpow2.f32 %v12336_v37 }
 0x223   :  { %v1142_v26 = vrot.slane %v15266_v55, %v15261_v28  ;;  %v1259_v32 = vsub.f32 %v15269_v4, %v15268_v16  ;;  %v15270_v60 = vld [vmem:[#allocation107_spill] sm:$0xff]  ;;  %v15272_v11 = vsub.f32 %v15271_v19, %v15157_v10  ;;  %v15274_v46 = vld [vmem:[#allocation234_spill] sm:$0xff]  ;;  %v15275_v7 = vld [vmem:[#allocation136_spill] sm:$0xff]  ;;  %v3277_v27 = vrot.slane %v3276_v9, 2  ;;  %v12557_v19 = vpop.eup %8876 }
 0x224   :  { %v12527_v57 = vmul.f32 1.442695, %v15265_v8  ;;  %v1265_v62 = vsub.f32 %v15270_v60, %v15268_v16  ;;  %v15273_v8 = vsub.f32 %v15159_v1, %v15157_v10  ;;  %v1271_v4 = vsub.f32 %v15275_v7, %v15274_v46  ;;  %v15276_v16 = vld [vmem:[#allocation132_spill] sm:$0xff]  ;;  %v15277_v21 = vld [vmem:[#allocation159_spill] sm:$0xff]  ;;  %15279 = vst [vmem:[#allocation46_spill] sm:$0xff] %v12557_v19  ;;  %v15282_v33 = vld [vmem:[#allocation182_spill] sm:$0xff]  ;;  %v12565_v49 = vpop.eup %8878 }
 0x225   :  { %v12544_v40 = vmul.f32 1.442695, %v15272_v11  ;;  %v1277_v60 = vsub.f32 %v15276_v16, %v15274_v46  ;;  %v1283_v53 = vsub.f32 %v15277_v21, %v1118_v3  ;;  %v15280_v11 = vld [vmem:[#allocation211_spill] sm:$0xff]  ;;  %v1301_v7 = vsub.f32 %v15282_v33, %v1142_v26  ;;  %15283 = vst [vmem:[#allocation48_spill] sm:$0xff] %v12565_v49  ;;  %v12572_v58 = vpop.eup %8880  ;;  %v15285_v37 = vld [vmem:[#allocation13_spill] sm:$0xff]  ;;  %v15298_v49 = vld [vmem:[#allocation88_spill] sm:$0xff] }
 0x226   :  { %v12549_v48 = vmul.f32 1.442695, %v15273_v8  ;;  %v12561_v10 = vadd.f32 %v3747_v24, %v15280_v11  ;;  %v15281_v1 = vld [vmem:[#allocation191_spill] sm:$0xff]  ;;  %8894 = vpow2.f32 %v12346_v41  ;;  %v3278_v46 = vadd.f32 %v3277_v27, %v3276_v9  ;;  %15284 = vst [vmem:[#allocation71_spill] sm:$0xff] %v12572_v58  ;;  %v15286_v24 = vld [vmem:[#allocation22_spill] sm:$0xff]  ;;  %v15289_v33 = vld [vmem:[#allocation17_spill] sm:$0xff]  ;;  %v12582_v19 = vpop.eup %8882 }
 0x227   :  { %v1295_v8 = vsub.f32 %v15281_v1, %v1142_v26  ;;  %v12568_v16 = vmul.f32 1.442695, %v1259_v32  ;;  %v12570_v21 = vmul.f32 1.442695, %v1265_v62  ;;  %v12574_v3 = vmul.f32 1.442695, %v1271_v4  ;;  %v8885_v9 = vpop.eup %8884 }
 0x228   :  { %v1499_v11 = vadd.f32 %v15286_v24, %v15285_v37  ;;  %v15288_v1 = vld [vmem:[#allocation158_spill] sm:$0xff]  ;;  %v15290_v26 = vld [vmem:[#allocation64_spill] sm:$0xff]  ;;  %15291 = vst [vmem:[#allocation79_spill] sm:$0xff] %v12582_v19  ;;  %8896 = vpow2.f32 %v12351_v54  ;;  %v12585_v41 = vmul.f32 1.442695, %v1277_v60  ;;  %v3316_v24 = vadd.f32 %v8885_v9, %v8875_v52  ;;  %v15294_v52 = vld [vmem:[#allocation63_spill] sm:$0xff] }
 0x229   :  { %v1541_v50 = vadd.f32 %v15288_v1, %v15287_v61  ;;  %v1583_v25 = vadd.f32 %v15290_v26, %v15289_v33  ;;  %v12587_v27 = vmul.f32 1.442695, %v1283_v53  ;;  %v12589_v32 = vmul.f32 1.442695, %v1289_v6  ;;  %v15292_v33 = vld [vmem:[#allocation12_spill] sm:$0xff]  ;;  %v12595_v58 = vpop.eup %8886  ;;  %v15299_v22 = vld [vmem:[#allocation123_spill] sm:$0xff] }
 0x22a   :  { %8898 = vpow2.f32 %v12356_v18  ;;  %v1500_v62 = vrot.slane %v1499_v11, 4  ;;  %v3279_v61 = vrot.slane %v3278_v46, 1  ;;  %v12592_v1 = vmul.f32 1.442695, %v1295_v8  ;;  %v12598_v53 = vpop.eup %8888 }
 0x22b   :  { %v1542_v4 = vrot.slane %v1541_v50, 4  ;;  %v1584_v37 = vrot.slane %v1583_v25, 4  ;;  %v2585_v26 = vsub.f32 -inf, %v15292_v33  ;;  %8900 = vpow2.f32 %v12383_v63  ;;  %15293 = vst [vmem:[#allocation80_spill] sm:$0xff] %v12598_v53  ;;  %v12605_v9 = vpop.eup %8890  ;;  %v15306_v33 = vld [vmem:[#allocation170_spill] sm:$0xff] }
 0x22c   :  { %v1501_v54 = vadd.f32 %v1500_v62, %v1499_v11  ;;  %8902 = vpow2.f32 %v12361_v42  ;;  %v3317_v18 = vrot.slane %v3316_v24, 4  ;;  %v12601_v19 = vmul.f32 1.442695, %v1301_v7  ;;  %15295 = vst [vmem:[#allocation73_spill] sm:$0xff] %v12605_v9  ;;  %v12611_v42 = vpop.eup %8892 }
 0x22d   :  { %v1543_v60 = vadd.f32 %v1542_v4, %v1541_v50  ;;  %v1585_v6 = vadd.f32 %v1584_v37, %v1583_v25  ;;  %v2886_v8 = vrot.slane %v15294_v52, %v15261_v28  ;;  %8904 = vpow2.f32 %v12378_v56  ;;  %15296 = vst [vmem:[#allocation102_spill] sm:$0xff] %v12611_v42  ;;  %v15297_v37 = vld [vmem:[#allocation66_spill] sm:$0xff] }
 0x22e   :  { %v1502_v20 = vrot.slane %v1501_v54, 2  ;;  %8906 = vpow2.f32 %v12388_v36  ;;  %v3280_v25 = vadd.f32 %v3279_v61, %v3278_v46  ;;  %v3318_v50 = vadd.f32 %v3317_v18, %v3316_v24  ;;  %v15300_v36 = vld [vmem:[#allocation120_spill] sm:$0xff]  ;;  %v15303_v18 = vld [vmem:[#allocation145_spill] sm:$0xff] }
 0x22f   :  { %v1544_v31 = vrot.slane %v1543_v60, 2  ;;  %v1586_v63 = vrot.slane %v1585_v6, 2  ;;  %v12609_v11 = vmul.f32 1.442695, %v2585_v26  ;;  %v2910_v53 = vrot.slane %v15297_v37, %v15261_v28 }
 0x230   :  { %v1503_v7 = vadd.f32 %v1502_v20, %v1501_v54  ;;  %v8895_v9 = vpop.eup %8894  ;;  %8908 = vpow2.f32 %v12393_v34  ;;  %v3319_v56 = vrot.slane %v3318_v50, 2  ;;  %v3027_v13 = vsub.f32 %v15299_v22, %v15298_v49  ;;  %v15301_v54 = vld [vmem:[#allocation230_spill] sm:$0xff] }
 0x231   :  { %v1545_v62 = vadd.f32 %v1544_v31, %v1543_v60  ;;  %v1587_v4 = vadd.f32 %v1586_v63, %v1585_v6  ;;  %v3033_v46 = vsub.f32 %v15300_v36, %v15298_v49  ;;  %8910 = vpow2.f32 %v12417_v23  ;;  %v15302_v60 = vld [vmem:[#allocation149_spill] sm:$0xff]  ;;  %v15304_v63 = vld [vmem:[#allocation174_spill] sm:$0xff] }
 0x232   :  { %v1504_v61 = vrot.slane %v1503_v7, 1  ;;  %v8897_v31 = vpop.eup %8896  ;;  %v3320_v26 = vadd.f32 %v3319_v56, %v3318_v50  ;;  %v3039_v6 = vsub.f32 %v15302_v60, %v15301_v54  ;;  %v3045_v34 = vsub.f32 %v15303_v18, %v15301_v54  ;;  %v15307_v56 = vld [vmem:[#allocation199_spill] sm:$0xff]  ;;  %v15308_v18 = vld [vmem:[#allocation188_spill] sm:$0xff] }
 0x233   :  { %v1546_v24 = vrot.slane %v1545_v62, 1  ;;  %v1588_v20 = vrot.slane %v1587_v4, 1  ;;  %v3051_v28 = vsub.f32 %v15304_v63, %v2886_v8  ;;  %8912 = vpow2.f32 %v12451_v44 }
 0x234   :  { %v12626_v42 = vpop.eup %8898  ;;  %v1505_v49 = vadd.f32 %v1504_v61, %v1503_v7  ;;  %8914 = vpow2.f32 %v12422_v5  ;;  %v3321_v36 = vrot.slane %v3320_v26, 1  ;;  %v3057_v50 = vsub.f32 %v15306_v33, %v2886_v8 }
 0x235   :  { %15305 = vst [vmem:[#allocation94_spill] sm:$0xff] %v12626_v42  ;;  %v1547_v22 = vadd.f32 %v1546_v24, %v1545_v62  ;;  %v1589_v23 = vadd.f32 %v1588_v20, %v1587_v4  ;;  %v3063_v39 = vsub.f32 %v15307_v56, %v2910_v53  ;;  %v8901_v60 = vpop.eup %8900  ;;  %8916 = vpow2.f32 %v12456_v15 }
 0x236   :  { %v3069_v63 = vsub.f32 %v15308_v18, %v2910_v53  ;;  %v12635_v42 = vmul.f32 1.442695, %v3027_v13  ;;  %v12637_v44 = vpop.eup %8902  ;;  %8918 = vpow2.f32 %v12476_v59  ;;  %v3322_v7 = vadd.f32 %v3321_v36, %v3320_v26 }
 0x237   :  { %v1883_v54 = vsel %vm756_vm0, %v1547_v22, %v1505_v49  ;;  %v3358_v5 = vadd.f32 %v8901_v60, %v8897_v31  ;;  %v8905_v33 = vpop.eup %8904  ;;  %8920 = vpow2.f32 %v12483_v45  ;;  %v12644_v8 = vmul.f32 1.442695, %v3033_v46  ;;  %v15310_v22 = vld [vmem:[#allocation222_spill] sm:$0xff] }
 0x238   :  { %v12641_v62 = vsel %vm758_vm1, %v1589_v23, %v1883_v54  ;;  %v12646_v15 = vmul.f32 1.442695, %v3039_v6  ;;  %v12648_v4 = vmul.f32 1.442695, %v3045_v34  ;;  %v12650_v13 = vpop.eup %8906  ;;  %v3658_v61 = vsel %vm756_vm0, %v3322_v7, %v3280_v25  ;;  %v15313_v7 = vld [vmem:[#allocation114_spill] sm:$0xff] }
 0x239   :  { %v3359_v53 = vrot.slane %v3358_v5, 4  ;;  %v12653_v59 = vmul.f32 1.442695, %v3051_v28  ;;  %v12655_v24 = vmul.f32 1.442695, %v3057_v50  ;;  %8922 = vpow2.f32 %v12495_v35  ;;  %v15309_v28 = vld [vmem:[#allocation210_spill] sm:$0xff] }
 0x23a   :  { %v12658_v20 = vmul.f32 1.442695, %v3063_v39  ;;  %v3267_v45 = vadd.f32 %v12478_v30, %v12363_v0  ;;  %v3309_v46 = vadd.f32 %v12595_v58, %v12538_v2  ;;  %v12664_v31 = vpop.eup %8908  ;;  %v12666_v6 = vmul.f32 1.442695, %v3069_v63 }
 0x23b   :  { %v3360_v26 = vadd.f32 %v3359_v53, %v3358_v5  ;;  %v3351_v25 = vadd.f32 %v8905_v33, %v8895_v9  ;;  %v820_v34 = vsub.f32 -inf, %v15309_v28  ;;  %v8911_v49 = vpop.eup %8910  ;;  %8924 = vpow2.f32 %v12500_v12 }
 0x23c   :  { %v3268_v35 = vrot.slane %v3267_v45, 4  ;;  %v3310_v39 = vrot.slane %v3309_v46, 4  ;;  %v12672_v23 = vrot.slane %v15262_v17, %v15310_v22  ;;  %8926 = vpow2.f32 %v12505_v51  ;;  %v15319_v17 = vld [vmem:[#allocation141_spill] sm:$0xff] }
 0x23d   :  { %v3361_v0 = vrot.slane %v3360_v26, 2  ;;  %v3352_v2 = vrot.slane %v3351_v25, 4  ;;  %v12675_v30 = vmul.f32 1.442695, %v820_v34  ;;  %v8913_v58 = vpop.eup %8912  ;;  %8928 = vpow2.f32 %v12512_v29  ;;  %v15312_v29 = vld [vmem:[#allocation232_spill] sm:$0xff] }
 0x23e   :  { %v3269_v9 = vadd.f32 %v3268_v35, %v3267_v45  ;;  %v3311_v36 = vadd.f32 %v3310_v39, %v3309_v46  ;;  %v12680_v12 = vrot.slane %v15266_v55, %v15310_v22  ;;  %v12682_v50 = vpop.eup %8914  ;;  %8930 = vpow2.f32 %v12517_v43  ;;  %v15316_v39 = vld [vmem:[#allocation57_spill] sm:$0xff]  ;;  %v15318_v55 = vld [vmem:[#allocation236_spill] sm:$0xff] }
 0x23f   :  { %v3362_v56 = vadd.f32 %v3361_v0, %v3360_v26  ;;  %v3400_v60 = vadd.f32 %v8913_v58, %v8911_v49  ;;  %v3353_v51 = vadd.f32 %v3352_v2, %v3351_v25  ;;  %v12685_v54 = vpop.eup %8916  ;;  %8932 = vpow2.f32 %v12527_v57  ;;  %v15315_v25 = vld [vmem:[#allocation113_spill] sm:$0xff] }
 0x240   :  { %15311 = vst [vmem:[#allocation228_spill] sm:$0xff] %v12685_v54  ;;  %v3270_v18 = vrot.slane %v3269_v9, 2  ;;  %v3312_v63 = vrot.slane %v3311_v36, 2  ;;  %v1262_v5 = vsub.f32 %v15313_v7, %v15312_v29  ;;  %v8919_v33 = vpop.eup %8918  ;;  %8934 = vpow2.f32 %v12544_v40  ;;  %v15317_v58 = vld [vmem:[#allocation29_spill] sm:$0xff] }
 0x241   :  { %v3363_v53 = vrot.slane %v3362_v56, 1  ;;  %v3401_v45 = vrot.slane %v3400_v60, 4  ;;  %v3354_v46 = vrot.slane %v3353_v51, 2  ;;  %v12691_v34 = vpop.eup %8920  ;;  %8936 = vpow2.f32 %v12549_v48 }
 0x242   :  { %15314 = vst [vmem:[#allocation126_spill] sm:$0xff] %v12691_v34  ;;  %v3271_v43 = vadd.f32 %v3270_v18, %v3269_v9  ;;  %v3313_v26 = vadd.f32 %v3312_v63, %v3311_v36  ;;  %v1268_v57 = vsub.f32 %v15315_v25, %v15312_v29  ;;  %8938 = vpow2.f32 %v15316_v39  ;;  %v15320_v36 = vld [vmem:[#allocation24_spill] sm:$0xff]  ;;  %v15322_v25 = vld [vmem:[#allocation163_spill] sm:$0xff] }
 0x243   :  { %v3364_v49 = vadd.f32 %v3363_v53, %v3362_v56  ;;  %v3402_v35 = vadd.f32 %v3401_v45, %v3400_v60  ;;  %v3355_v0 = vadd.f32 %v3354_v46, %v3353_v51  ;;  %v8923_v2 = vpop.eup %8922  ;;  %8940 = vpow2.f32 %v15317_v58 }
 0x244   :  { %v3272_v40 = vrot.slane %v3271_v43, 1  ;;  %v3314_v7 = vrot.slane %v3313_v26, 1  ;;  %v1274_v34 = vsub.f32 %v15319_v17, %v15318_v55  ;;  %v3442_v48 = vadd.f32 %v8923_v2, %v8919_v33  ;;  %v15321_v17 = vld [vmem:[#allocation135_spill] sm:$0xff] }
 0x245   :  { %v3403_v54 = vrot.slane %v3402_v35, 2  ;;  %v3659_v9 = vsel %vm758_vm1, %v3364_v49, %v3658_v61  ;;  %8942 = vpow2.f32 %v15320_v36  ;;  %v12702_v18 = vpop.eup %8924  ;;  %v3356_v51 = vrot.slane %v3355_v0, 1 }
 0x246   :  { %8944 = vpow2.f32 %v12568_v16  ;;  %v3273_v56 = vadd.f32 %v3272_v40, %v3271_v43  ;;  %v3315_v60 = vadd.f32 %v3314_v7, %v3313_v26  ;;  %v8927_v63 = vpop.eup %8926  ;;  %v3443_v53 = vrot.slane %v3442_v48, 4 }
 0x247   :  { %v3404_v29 = vadd.f32 %v3403_v54, %v3402_v35  ;;  %8946 = vpow2.f32 %v12570_v21  ;;  %v1280_v45 = vsub.f32 %v15321_v17, %v15318_v55  ;;  %v8929_v33 = vpop.eup %8928  ;;  %v3357_v61 = vadd.f32 %v3356_v51, %v3355_v0  ;;  %v15323_v21 = vld [vmem:[#allocation161_spill] sm:$0xff]  ;;  %v15324_v35 = vld [vmem:[#allocation194_spill] sm:$0xff] }
 0x248   :  { %8948 = vpow2.f32 %v12574_v3  ;;  %v3651_v46 = vsel %vm756_vm0, %v3315_v60, %v3273_v56  ;;  %v1286_v16 = vsub.f32 %v15322_v25, %v12672_v23  ;;  %v8931_v43 = vpop.eup %8930  ;;  %v3444_v49 = vadd.f32 %v3443_v53, %v3442_v48 }
 0x249   :  { %v3405_v26 = vrot.slane %v3404_v29, 1  ;;  %v3484_v39 = vadd.f32 %v8929_v33, %v8927_v63  ;;  %8950 = vpow2.f32 %v12585_v41  ;;  %v8933_v54 = vpop.eup %8932  ;;  %v12715_v55 = vsel %vm758_vm1, %v3357_v61, %v3651_v46  ;;  %v15325_v41 = vld [vmem:[#allocation185_spill] sm:$0xff] }
 0x24a   :  { %8952 = vpow2.f32 %v12587_v27  ;;  %v1292_v3 = vsub.f32 %v15323_v21, %v12672_v23  ;;  %v1298_v0 = vsub.f32 %v15324_v35, %v12680_v12  ;;  %v8935_v2 = vpop.eup %8934  ;;  %v3445_v40 = vrot.slane %v3444_v49, 2 }
 0x24b   :  { %v3406_v58 = vadd.f32 %v3405_v26, %v3404_v29  ;;  %v3485_v7 = vrot.slane %v3484_v39, 4  ;;  %v3526_v48 = vadd.f32 %v8933_v54, %v8931_v43  ;;  %v8937_v36 = vpop.eup %8936  ;;  %8954 = vpow2.f32 %v12589_v32 }
 0x24c   :  { %v1304_v27 = vsub.f32 %v15325_v41, %v12680_v12  ;;  %v12724_v56 = vmul.f32 1.442695, %v1262_v5  ;;  %v12726_v60 = vmul.f32 1.442695, %v1268_v57  ;;  %v8939_v51 = vpop.eup %8938  ;;  %v3446_v23 = vadd.f32 %v3445_v40, %v3444_v49  ;;  %v15331_v41 = vld [vmem:[#allocation115_spill] sm:$0xff] }
 0x24d   :  { %v3486_v63 = vadd.f32 %v3485_v7, %v3484_v39  ;;  %v3527_v53 = vrot.slane %v3526_v48, 4  ;;  %v3568_v17 = vadd.f32 %v8937_v36, %v8935_v2  ;;  %v8941_v33 = vpop.eup %8940  ;;  %v3660_v29 = vsel %vm760_vm2, %v3406_v58, %v3659_v9 }
 0x24e   :  { %v12729_v61 = vmul.f32 0.0, %v8939_v51  ;;  %8956 = vpow2.f32 %v12592_v1  ;;  %v12732_v32 = vmul.f32 1.442695, %v1274_v34  ;;  %v3447_v25 = vrot.slane %v3446_v23, 1 }
 0x24f   :  { %v8943_v46 = vpop.eup %8942  ;;  %v3487_v5 = vrot.slane %v3486_v63, 2  ;;  %v3528_v43 = vadd.f32 %v3527_v53, %v3526_v48  ;;  %v3569_v57 = vrot.slane %v3568_v17, 4  ;;  %8958 = vpow2.f32 %v12601_v19 }
 0x250   :  { %v8945_v26 = vpop.eup %8944  ;;  %v1625_v49 = vadd.f32 %v8943_v46, %v8941_v33  ;;  %v12735_v39 = vmul.f32 1.442695, %v1280_v45  ;;  %v12737_v54 = vmul.f32 1.442695, %v1286_v16  ;;  %v3448_v21 = vadd.f32 %v3447_v25, %v3446_v23 }
 0x251   :  { %v8947_v9 = vpop.eup %8946  ;;  %v3488_v2 = vadd.f32 %v3487_v5, %v3486_v63  ;;  %v3529_v58 = vrot.slane %v3528_v43, 2  ;;  %v3570_v1 = vadd.f32 %v3569_v57, %v3568_v17  ;;  %8960 = vpow2.f32 %v12609_v11 }
 0x252   :  { %v8949_v34 = vpop.eup %8948  ;;  %v1626_v40 = vrot.slane %v1625_v49, 4  ;;  %v1667_v7 = vadd.f32 %v8947_v9, %v8945_v26  ;;  %v12740_v48 = vmul.f32 1.442695, %v1292_v3  ;;  %v3661_v45 = vsel %vm762_vm3, %v3448_v21, %v3660_v29 }
 0x253   :  { %v8951_v36 = vpop.eup %8950  ;;  %v3489_v51 = vrot.slane %v3488_v2, 1  ;;  %v3530_v19 = vadd.f32 %v3529_v58, %v3528_v43  ;;  %v3571_v53 = vrot.slane %v3570_v1, 2  ;;  %8962 = vpow2.f32 %v12410_v47 }
 0x254   :  { %v8953_v16 = vpop.eup %8952  ;;  %v1627_v33 = vadd.f32 %v1626_v40, %v1625_v49  ;;  %v1668_v46 = vrot.slane %v1667_v7, 4  ;;  %v1709_v23 = vadd.f32 %v8951_v36, %v8949_v34  ;;  %8964 = vpow2.f32 %v12444_v14 }
 0x255   :  { %v3490_v63 = vadd.f32 %v3489_v51, %v3488_v2  ;;  %v3531_v17 = vrot.slane %v3530_v19, 1  ;;  %v3572_v25 = vadd.f32 %v3571_v53, %v3570_v1  ;;  %v8955_v11 = vpop.eup %8954  ;;  %8966 = vpow2.f32 %v12635_v42 }
 0x256   :  { %v1628_v3 = vrot.slane %v1627_v33, 2  ;;  %v1669_v5 = vadd.f32 %v1668_v46, %v1667_v7  ;;  %v1710_v57 = vrot.slane %v1709_v23, 4  ;;  %v1751_v49 = vadd.f32 %v8955_v11, %v8953_v16 }
 0x257   :  { %v3532_v43 = vadd.f32 %v3531_v17, %v3530_v19  ;;  %v3573_v26 = vrot.slane %v3572_v25, 1  ;;  %v3662_v29 = vsel %vm764_vm4, %v3490_v63, %v3661_v45  ;;  %8968 = vpow2.f32 %v12644_v8  ;;  %v15326_v8 = vld [vmem:[#allocation93_spill] sm:$0xff] }
 0x258   :  { %v8957_v9 = vpop.eup %8956  ;;  %v1629_v21 = vadd.f32 %v1628_v3, %v1627_v33  ;;  %v1670_v58 = vrot.slane %v1669_v5, 2  ;;  %v1711_v47 = vadd.f32 %v1710_v57, %v1709_v23  ;;  %v1752_v1 = vrot.slane %v1751_v49, 4 }
 0x259   :  { %v3574_v2 = vadd.f32 %v3573_v26, %v3572_v25  ;;  %v3663_v14 = vsel %vm766_vm5, %v3532_v43, %v3662_v29  ;;  %8970 = vpow2.f32 %v12646_v15  ;;  %v8959_v34 = vpop.eup %8958  ;;  %v12763_v57 = vmul.f32 1.442695, %v1298_v0 }
 0x25a   :  { %v1630_v40 = vrot.slane %v1629_v21, 1  ;;  %v1671_v42 = vadd.f32 %v1670_v58, %v1669_v5  ;;  %v1712_v7 = vrot.slane %v1711_v47, 2  ;;  %8972 = vpow2.f32 %v12648_v4  ;;  %v15328_v58 = vld [vmem:[#allocation27_spill] sm:$0xff] }
 0x25b   :  { %v3664_v36 = vsel %vm768_vm6, %v3574_v2, %v3663_v14  ;;  %v1753_v51 = vadd.f32 %v1752_v1, %v1751_v49  ;;  %v1793_v19 = vadd.f32 %v8959_v34, %v8957_v9  ;;  %8974 = vpow2.f32 %v12653_v59  ;;  %v8961_v53 = vpop.eup %8960 }
 0x25c   :  { %v3700_v45 = vadd.f32 %v3664_v36, %v15326_v8  ;;  %v1631_v16 = vadd.f32 %v1630_v40, %v1629_v21  ;;  %v1672_v33 = vrot.slane %v1671_v42, 1  ;;  %v1713_v46 = vadd.f32 %v1712_v7, %v1711_v47  ;;  %v15327_v21 = vld [vmem:[#allocation21_spill] sm:$0xff]  ;;  %v15329_v47 = vld [vmem:[#allocation8_spill] sm:$0xff] }
 0x25d   :  { %v1754_v23 = vrot.slane %v1753_v51, 2  ;;  %v1794_v15 = vrot.slane %v1793_v19, 4  ;;  %v12754_v63 = vmul.f32 0.0, %v8961_v53  ;;  %8976 = vpow2.f32 %v12655_v24  ;;  %v8963_v17 = vpop.eup %8962  ;;  %v15330_v40 = vld [vmem:[#allocation25_spill] sm:$0xff] }
 0x25e   :  { %8978 = vlog2.f32 %v3700_v45  ;;  %v1673_v4 = vadd.f32 %v1672_v33, %v1671_v42  ;;  %v1714_v25 = vrot.slane %v1713_v46, 1  ;;  %v1885_v11 = vsel %vm760_vm2, %v1631_v16, %v12641_v62  ;;  %v8965_v59 = vpop.eup %8964 }
 0x25f   :  { %v1755_v3 = vadd.f32 %v1754_v23, %v1753_v51  ;;  %v1795_v5 = vadd.f32 %v1794_v15, %v1793_v19  ;;  %8980 = vpow2.f32 %v12658_v20  ;;  %v8967_v43 = vpop.eup %8966  ;;  %v3393_v29 = vadd.f32 %v8965_v59, %v8963_v17 }
 0x260   :  { %v1715_v26 = vadd.f32 %v1714_v25, %v1713_v46  ;;  %v1886_v24 = vsel %vm762_vm3, %v1673_v4, %v1885_v11  ;;  %8982 = vpow2.f32 %v12666_v6  ;;  %v12771_v62 = vmul.f32 1.442695, %v1304_v27  ;;  %v15332_v27 = vld [vmem:[#allocation183_spill] sm:$0xff] }
 0x261   :  { %v1756_v49 = vrot.slane %v1755_v3, 1  ;;  %v1796_v9 = vrot.slane %v1795_v5, 2  ;;  %8984 = vpow2.f32 %v12675_v30  ;;  %v8969_v20 = vpop.eup %8968  ;;  %v3394_v0 = vrot.slane %v3393_v29, 4 }
 0x262   :  { %v1887_v35 = vsel %vm764_vm4, %v1715_v26, %v1886_v24  ;;  %8986 = vpow2.f32 %v15327_v21  ;;  %v1520_v2 = vadd.f32 %v15329_v47, %v15328_v58  ;;  %v3435_v34 = vadd.f32 %v8969_v20, %v8967_v43 }
 0x263   :  { %v8971_v6 = vpop.eup %8970  ;;  %v1757_v14 = vadd.f32 %v1756_v49, %v1755_v3  ;;  %v1797_v1 = vadd.f32 %v1796_v9, %v1795_v5  ;;  %8988 = vpow2.f32 %v15330_v40  ;;  %v3395_v42 = vadd.f32 %v3394_v0, %v3393_v29  ;;  %v15333_v9 = vld [vmem:[#allocation137_spill] sm:$0xff] }
 0x264   :  { %v8973_v30 = vpop.eup %8972  ;;  %8990 = vpow2.f32 %v12724_v56  ;;  %v1521_v12 = vrot.slane %v1520_v2, 4  ;;  %v1562_v7 = vadd.f32 %v15332_v27, %v15331_v41  ;;  %v3436_v53 = vrot.slane %v3435_v34, 4 }
 0x265   :  { %v8975_v36 = vpop.eup %8974  ;;  %v1798_v51 = vrot.slane %v1797_v1, 1  ;;  %v1888_v19 = vsel %vm766_vm5, %v1757_v14, %v1887_v35  ;;  %v3477_v8 = vadd.f32 %v8973_v30, %v8971_v6  ;;  %v3396_v45 = vrot.slane %v3395_v42, 2 }
 0x266   :  { %8992 = vpow2.f32 %v12726_v60  ;;  %v1522_v16 = vadd.f32 %v1521_v12, %v1520_v2  ;;  %v1563_v33 = vrot.slane %v1562_v7, 4  ;;  %v3437_v15 = vadd.f32 %v3436_v53, %v3435_v34 }
 0x267   :  { %v8977_v46 = vpop.eup %8976  ;;  %v1799_v23 = vadd.f32 %v1798_v51, %v1797_v1  ;;  %v3478_v17 = vrot.slane %v3477_v8, 4  ;;  %8994 = vpow2.f32 %v12732_v32  ;;  %v3397_v4 = vadd.f32 %v3396_v45, %v3395_v42  ;;  %v15334_v45 = vld [vmem:[#allocation19_spill] sm:$0xff] }
 0x268   :  { %v8979_v56 = vpop.eup %8978  ;;  %v3519_v25 = vadd.f32 %v8977_v46, %v8975_v36  ;;  %8996 = vpow2.f32 %v12735_v39  ;;  %v1523_v11 = vrot.slane %v1522_v16, 2  ;;  %v3438_v43 = vrot.slane %v3437_v15, 2 }
 0x269   :  { %v8981_v59 = vpop.eup %8980  ;;  %v3759_v3 = vmul.f32 0.6931472, %v8979_v56  ;;  %v1889_v5 = vsel %vm768_vm6, %v1799_v23, %v1888_v19  ;;  %v3479_v60 = vadd.f32 %v3478_v17, %v3477_v8  ;;  %v3398_v29 = vrot.slane %v3397_v4, 1 }
 0x26a   :  { %v8983_v26 = vpop.eup %8982  ;;  %v1931_v24 = vadd.f32 %v1889_v5, %v12729_v61  ;;  %v3520_v49 = vrot.slane %v3519_v25, 4  ;;  %8998 = vpow2.f32 %v12737_v54  ;;  %v3439_v35 = vadd.f32 %v3438_v43, %v3437_v15 }
 0x26b   :  { %v8985_v32 = vpop.eup %8984  ;;  %v3775_v20 = vadd.f32 %v3759_v3, %v15333_v9  ;;  %v3480_v0 = vrot.slane %v3479_v60, 2  ;;  %v3561_v39 = vadd.f32 %v8983_v26, %v8981_v59  ;;  %v3399_v58 = vadd.f32 %v3398_v29, %v3397_v4 }
 0x26c   :  { %v8987_v21 = vpop.eup %8986  ;;  %v3521_v47 = vadd.f32 %v3520_v49, %v3519_v25  ;;  %9000 = vlog2.f32 %v1931_v24  ;;  %v12789_v2 = vmul.f32 0.0, %v8985_v32  ;;  %v3440_v61 = vrot.slane %v3439_v35, 1  ;;  %v15336_v24 = vld [vmem:[#allocation215_spill] sm:$0xff] }
 0x26d   :  { %v8989_v6 = vpop.eup %8988  ;;  %v12792_v14 = vpack.c.bf16 %v3775_v20, %v12561_v10  ;;  %v3481_v1 = vadd.f32 %v3480_v0, %v3479_v60  ;;  %v3562_v34 = vrot.slane %v3561_v39, 4  ;;  %v3653_v30 = vsel %vm760_vm2, %v3399_v58, %v12715_v55 }
 0x26e   :  { %v8991_v54 = vpop.eup %8990  ;;  %v3522_v40 = vrot.slane %v3521_v47, 2  ;;  %9002 = vpow2.f32 %v12740_v48  ;;  %v1524_v42 = vadd.f32 %v1523_v11, %v1522_v16  ;;  %v3441_v12 = vadd.f32 %v3440_v61, %v3439_v35  ;;  %v15335_v16 = vld [vmem:[#allocation55_spill] sm:$0xff] }
 0x26f   :  { %5578 = vmatprep.mubr.bf16.mxu0 %v12792_v14  ;;  %5707 = vmatprep.mubr.bf16.mxu1 %v12792_v14  ;;  %v3482_v41 = vrot.slane %v3481_v1, 1  ;;  %v3563_v27 = vadd.f32 %v3562_v34, %v3561_v39  ;;  %9004 = vpow2.f32 %v12763_v57  ;;  %v1564_v19 = vadd.f32 %v1563_v33, %v1562_v7 }
 0x270   :  { %v8993_v10 = vpop.eup %8992  ;;  %v3523_v36 = vadd.f32 %v3522_v40, %v3521_v47  ;;  %9006 = vpow2.f32 %v12771_v62  ;;  %v1525_v51 = vrot.slane %v1524_v42, 1  ;;  %v3654_v48 = vsel %vm762_vm3, %v3441_v12, %v3653_v30  ;;  %v15337_v30 = vld [vmem:[#allocation106_spill] sm:$0xff] }
 0x271   :  { %v8995_v53 = vpop.eup %8994  ;;  %v3483_v55 = vadd.f32 %v3482_v41, %v3481_v1  ;;  %v3564_v8 = vrot.slane %v3563_v27, 2  ;;  %v1604_v46 = vadd.f32 %v15335_v16, %v15334_v45  ;;  %v1565_v56 = vrot.slane %v1564_v19, 2 }
 0x272   :  { %v8997_v23 = vpop.eup %8996  ;;  %v3524_v15 = vrot.slane %v3523_v36, 1  ;;  %v1526_v17 = vadd.f32 %v1525_v51, %v1524_v42  ;;  %v1646_v4 = vadd.f32 %v8989_v6, %v8987_v21  ;;  %v1688_v62 = vadd.f32 %v8993_v10, %v8991_v54 }
 0x273   :  { %v3565_v57 = vadd.f32 %v3564_v8, %v3563_v27  ;;  %v3655_v25 = vsel %vm764_vm4, %v3483_v55, %v3654_v48  ;;  %v1605_v11 = vrot.slane %v1604_v46, 4  ;;  %v1566_v33 = vadd.f32 %v1565_v56, %v1564_v19 }
 0x274   :  { %v8999_v59 = vpop.eup %8998  ;;  %v3525_v7 = vadd.f32 %v3524_v15, %v3523_v36  ;;  %v1647_v3 = vrot.slane %v1646_v4, 4  ;;  %v1730_v5 = vadd.f32 %v8997_v23, %v8995_v53  ;;  %v1689_v26 = vrot.slane %v1688_v62, 4 }
 0x275   :  { %v3566_v43 = vrot.slane %v3565_v57, 1  ;;  %v1606_v60 = vadd.f32 %v1605_v11, %v1604_v46  ;;  %v2588_v29 = vsub.f32 -inf, %v15336_v24  ;;  %v1567_v9 = vrot.slane %v1566_v33, 1 }
 0x276   :  { %v9001_v49 = vpop.eup %9000  ;;  %v3656_v32 = vsel %vm766_vm5, %v3525_v7, %v3655_v25  ;;  %v1648_v20 = vadd.f32 %v1647_v3, %v1646_v4  ;;  %v1731_v35 = vrot.slane %v1730_v5, 4  ;;  %v1690_v58 = vadd.f32 %v1689_v26, %v1688_v62 }
 0x277   :  { %v3567_v0 = vadd.f32 %v3566_v43, %v3565_v57  ;;  %v3745_v39 = vmul.f32 0.6931472, %v9001_v49  ;;  %v1607_v21 = vrot.slane %v1606_v60, 2  ;;  %v1568_v6 = vadd.f32 %v1567_v9, %v1566_v33  ;;  %v15339_v43 = vld [vmem:[#allocation127_spill] sm:$0xff]  ;;  %v15340_v49 = vld [vmem:[#allocation125_spill] sm:$0xff] }
 0x278   :  { %v9003_v47 = vpop.eup %9002  ;;  %v1649_v61 = vrot.slane %v1648_v20, 2  ;;  %v1732_v1 = vadd.f32 %v1731_v35, %v1730_v5  ;;  %v2597_v34 = vmul.f32 1.442695, %v2588_v29  ;;  %v1691_v41 = vrot.slane %v1690_v58, 2  ;;  %v15338_v5 = vld [vmem:[#allocation229_spill] sm:$0xff]  ;;  %v15341_v9 = vld [vmem:[#allocation83_spill] sm:$0xff] }
 0x279   :  { %v9005_v54 = vpop.eup %9004  ;;  %v3657_v40 = vsel %vm768_vm6, %v3567_v0, %v3656_v32  ;;  %v12809_v42 = vadd.f32 %v3745_v39, %v15337_v30  ;;  %v1608_v12 = vadd.f32 %v1607_v21, %v1606_v60  ;;  %v1772_v19 = vadd.f32 %v9003_v47, %v8999_v59  ;;  %v15343_v21 = vld [vmem:[#allocation148_spill] sm:$0xff]  ;;  %v15344_v47 = vld [vmem:[#allocation177_spill] sm:$0xff]  ;;  %v15347_v30 = vld [vmem:[#allocation198_spill] sm:$0xff] }
 0x27a   :  { %v9007_v27 = vpop.eup %9006  ;;  %v3699_v10 = vadd.f32 %v3657_v40, %v12754_v63  ;;  %v1650_v36 = vadd.f32 %v1649_v61, %v1648_v20  ;;  %v1733_v51 = vrot.slane %v1732_v1, 2  ;;  %v1692_v55 = vadd.f32 %v1691_v41, %v1690_v58  ;;  %v15342_v20 = vld [vmem:[#allocation152_spill] sm:$0xff] }
 0x27b   :  { %v1609_v53 = vrot.slane %v1608_v12, 1  ;;  %v1814_v8 = vadd.f32 %v9007_v27, %v9005_v54  ;;  %v1904_v48 = vsel %vm756_vm0, %v1568_v6, %v1526_v17  ;;  %v1773_v46 = vrot.slane %v1772_v19, 4  ;;  %v15346_v54 = vld [vmem:[#allocation203_spill] sm:$0xff] }
 0x27c   :  { %9008 = vlog2.f32 %v3699_v10  ;;  %v1651_v45 = vrot.slane %v1650_v36, 1  ;;  %v1734_v16 = vadd.f32 %v1733_v51, %v1732_v1  ;;  %v1693_v15 = vrot.slane %v1692_v55, 1  ;;  %v15345_v1 = vld [vmem:[#allocation173_spill] sm:$0xff] }
 0x27d   :  { %v1610_v23 = vadd.f32 %v1609_v53, %v1608_v12  ;;  %v1815_v56 = vrot.slane %v1814_v8, 4  ;;  %9010 = vpow2.f32 %v2597_v34  ;;  %v1774_v25 = vadd.f32 %v1773_v46, %v1772_v19  ;;  %v15348_v51 = vld [vmem:[#allocation37_spill] sm:$0xff] }
 0x27e   :  { %v1652_v4 = vadd.f32 %v1651_v45, %v1650_v36  ;;  %v1735_v57 = vrot.slane %v1734_v16, 1  ;;  %v2898_v63 = vrot.slane %v15294_v52, %v15310_v22  ;;  %v1694_v11 = vadd.f32 %v1693_v15, %v1692_v55 }
 0x27f   :  { %v1816_v62 = vadd.f32 %v1815_v56, %v1814_v8  ;;  %v1905_v59 = vsel %vm758_vm1, %v1610_v23, %v1904_v48  ;;  %v2922_v17 = vrot.slane %v15297_v37, %v15310_v22  ;;  %v1775_v33 = vrot.slane %v1774_v25, 2 }
 0x280   :  { %v1736_v7 = vadd.f32 %v1735_v57, %v1734_v16  ;;  %v1906_v3 = vsel %vm760_vm2, %v1652_v4, %v1905_v59  ;;  %v3030_v60 = vsub.f32 %v15339_v43, %v15338_v5  ;;  %v3036_v32 = vsub.f32 %v15340_v49, %v15338_v5  ;;  %v15349_v57 = vld [vmem:[#allocation12_spill] sm:$0xff]  ;;  %v15353_v5 = vld [vmem:[#allocation73_spill] sm:$0xff] }
 0x281   :  { %v1817_v26 = vrot.slane %v1816_v62, 2  ;;  %v1907_v29 = vsel %vm762_vm3, %v1694_v11, %v1906_v3  ;;  %v3042_v35 = vsub.f32 %v15342_v20, %v15341_v9  ;;  %v1776_v0 = vadd.f32 %v1775_v33, %v1774_v25  ;;  %v15350_v11 = vld [vmem:[#allocation218_spill] sm:$0xff]  ;;  %v15352_v3 = vld [vmem:[#allocation48_spill] sm:$0xff] }
 0x282   :  { %v1908_v39 = vsel %vm764_vm4, %v1736_v7, %v1907_v29  ;;  %v3048_v58 = vsub.f32 %v15343_v21, %v15341_v9  ;;  %v3054_v6 = vsub.f32 %v15344_v47, %v2898_v63  ;;  %v3060_v34 = vsub.f32 %v15345_v1, %v2898_v63  ;;  %v8257_v7 = vld [vmem:[%s14184_s4 + $0x308] ss:$24 sps:$4 sm:$0xff]   ;;  %v8262_v49 = vld [vmem:[%s14184_s4 + $0x334] ss:$24 sps:$4 sm:$0xff]  }
 0x283   :  { %v1818_v61 = vadd.f32 %v1817_v26, %v1816_v62  ;;  %v3066_v40 = vsub.f32 %v15346_v54, %v2922_v17  ;;  %v3072_v12 = vsub.f32 %v15347_v30, %v2922_v17  ;;  %v1777_v41 = vrot.slane %v1776_v0, 1  ;;  %v15351_v62 = vld [vmem:[#allocation43_spill] sm:$0xff]  ;;  %v15357_v21 = vld [vmem:[#allocation160_spill] sm:$0xff]  ;;  %v15359_v30 = vld [vmem:[#allocation193_spill] sm:$0xff] }
 0x284   :  { %9012 = vpow2.f32 %v12427_v38  ;;  %v3177_v27 = vmul.f32 1.442695, %v3030_v60  ;;  %v3189_v10 = vmul.f32 1.442695, %v3036_v32  ;;  %v3201_v19 = vmul.f32 1.442695, %v3042_v35 }
 0x285   :  { %v1819_v36 = vrot.slane %v1818_v61, 1  ;;  %9014 = vpow2.f32 %v15348_v51  ;;  %v3213_v53 = vmul.f32 1.442695, %v3048_v58  ;;  %v1778_v8 = vadd.f32 %v1777_v41, %v1776_v0  ;;  %v8254_v17 = vld [vmem:[%s14184_s4 + $0x300] ss:$24 sps:$4 sm:$0xff]   ;;  %v15354_v32 = vld [vmem:[#allocation209_spill] sm:$0xff] }
 0x286   :  { %v9009_v55 = vpop.eup %9008  ;;  %9016 = vpow2.f32 %v3177_v27  ;;  %v3225_v48 = vmul.f32 1.442695, %v3054_v6  ;;  %v3237_v45 = vmul.f32 1.442695, %v3060_v34  ;;  %v3249_v15 = vmul.f32 1.442695, %v3066_v40 }
 0x287   :  { %v9011_v16 = vpop.eup %9010  ;;  %v3757_v46 = vmul.f32 0.6931472, %v9009_v55  ;;  %v1820_v23 = vadd.f32 %v1819_v36, %v1818_v61  ;;  %9018 = vpow2.f32 %v3189_v10  ;;  %v1909_v56 = vsel %vm766_vm5, %v1778_v8, %v1908_v39  ;;  %v15355_v0 = vld [vmem:[#allocation239_spill] sm:$0xff]  ;;  %v8260_v1 = vld [vmem:[%s14184_s4 + $0x330] ss:$24 sps:$4 sm:$0xff]  }
 0x288   :  { %v12836_v38 = vmul.f32 0.0, %v9011_v16  ;;  %9020 = vpow2.f32 %v3201_v19  ;;  %v3261_v4 = vmul.f32 1.442695, %v3072_v12  ;;  %v3288_v59 = vadd.f32 %v15351_v62, %v15350_v11  ;;  %v8263_v34 = vld [vmem:[%s14184_s4 + $0x338] ss:$24 sps:$4 sm:$0xff]   ;;  %v15360_v36 = vld [vmem:[#allocation184_spill] sm:$0xff] }
 0x289   :  { %v3774_v25 = vadd.f32 %v3757_v46, %v15349_v57  ;;  %v1910_v63 = vsel %vm768_vm6, %v1820_v23, %v1909_v56  ;;  %9022 = vpow2.f32 %v3213_v53  ;;  %v3330_v43 = vadd.f32 %v15353_v5, %v15352_v3  ;;  %v8268_v54 = vld [vmem:[%s14184_s4 + $0x364] ss:$24 sps:$4 sm:$0xff]   ;;  %v15358_v40 = vld [vmem:[#allocation241_spill] sm:$0xff]  ;;  %v8266_v23 = vld [vmem:[%s14184_s4 + $0x360] ss:$24 sps:$4 sm:$0xff]  }
 0x28a   :  { %v1934_v33 = vadd.f32 %v1910_v63, %v12789_v2  ;;  %9024 = vpow2.f32 %v3225_v48  ;;  %v3372_v60 = vadd.f32 %v12664_v31, %v12637_v44  ;;  %v3289_v29 = vrot.slane %v3288_v59, 4  ;;  %v8265_v2 = vld [vmem:[%s14184_s4 + $0x33c] ss:$24 sps:$4 sm:$0xff]   ;;  %v8271_v10 = vld [vmem:[%s14184_s4 + $0x36c] ss:$24 sps:$4 sm:$0xff]  }
 0x28b   :  { %v12854_v26 = vpack.c.bf16 %v3774_v25, %v12809_v42  ;;  %9026 = vpow2.f32 %v3237_v45  ;;  %v819_v9 = vsub.f32 -inf, %v15354_v32  ;;  %v3331_v20 = vrot.slane %v3330_v43, 4  ;;  %v15356_v44 = vld [vmem:[#allocation162_spill] sm:$0xff]  ;;  %v15362_v53 = vld [vmem:[#allocation235_spill] sm:$0xff]  ;;  %v8274_v5 = vld [vmem:[%s14184_s4 + $0x394] ss:$24 sps:$4 sm:$0xff]  }
 0x28c   :  { %9028 = vpow2.f32 %v3249_v15  ;;  %v3373_v35 = vrot.slane %v3372_v60, 4  ;;  %v1285_v31 = vsub.f32 %v15356_v44, %v15355_v0  ;;  %v3290_v42 = vadd.f32 %v3289_v29, %v3288_v59  ;;  %v15361_v19 = vld [vmem:[#allocation138_spill] sm:$0xff]  ;;  %v8269_v63 = vld [vmem:[%s14184_s4 + $0x368] ss:$24 sps:$4 sm:$0xff]  }
 0x28d   :  { %5579 = vmatmul.mubr.bf16.vlgmr.msra.gmra.mrb[0].mxu0 %v12854_v26  ;;  %5708 = vmatmul.mubr.bf16.vlgmr.msra.gmra.mrb[0].mxu1 %v12854_v26  ;;  %9030 = vpow2.f32 %v3261_v4  ;;  %v827_v39 = vmul.f32 1.442695, %v819_v9  ;;  %v1291_v58 = vsub.f32 %v15357_v21, %v15355_v0  ;;  %v3332_v6 = vadd.f32 %v3331_v20, %v3330_v43  ;;  %v15364_v15 = vld [vmem:[#allocation134_spill] sm:$0xff] }
 0x28e   :  { %v9013_v47 = vpop.eup %9012  ;;  %5590 = vmatpush1.bf16.msra.mxu0 %v8254_v17  ;;  %5719 = vmatpush1.bf16.msra.mxu1 %v8257_v7  ;;  %v3374_v61 = vadd.f32 %v3373_v35, %v3372_v60  ;;  %9032 = vlog2.f32 %v1934_v33  ;;  %v1297_v12 = vsub.f32 %v15359_v30, %v15358_v40  ;;  %v3291_v27 = vrot.slane %v3290_v42, 2  ;;  %v8277_v43 = vld [vmem:[%s14184_s4 + $0x39c] ss:$24 sps:$4 sm:$0xff]   ;;  %v8275_v30 = vld [vmem:[%s14184_s4 + $0x398] ss:$24 sps:$4 sm:$0xff]  }
 0x28f   :  { %v9015_v41 = vpop.eup %9014  ;;  %5591 = vmatprep.subr.bf16.mxu0 %v8262_v49  ;;  %5720 = vmatprep.subr.bf16.mxu1 %v8265_v2  ;;  %9034 = vpow2.f32 %v827_v39  ;;  %v1303_v51 = vsub.f32 %v15360_v36, %v15358_v40  ;;  %v15363_v55 = vsub.f32 %v15361_v19, %v15362_v53  ;;  %v3333_v45 = vrot.slane %v3332_v6, 2  ;;  %v15366_v21 = vld [vmem:[#allocation14_spill] sm:$0xff]  ;;  %v8272_v40 = vld [vmem:[%s14184_s4 + $0x390] ss:$24 sps:$4 sm:$0xff]   ;;  %v8283_v36 = vld [vmem:[%s14184_s4 + $0x3cc] ss:$24 sps:$4 sm:$0xff]  }
 0x290   :  { %v9017_v48 = vpop.eup %9016  ;;  %v3375_v16 = vrot.slane %v3374_v61, 2  ;;  %v3414_v46 = vadd.f32 %v9015_v41, %v9013_v47  ;;  %v15365_v56 = vsub.f32 %v15364_v15, %v15362_v53  ;;  %v3292_v25 = vadd.f32 %v3291_v27, %v3290_v42 }
 0x291   :  { %v1431_v8 = vmul.f32 1.442695, %v15363_v55  ;;  %v9019_v57 = vpop.eup %9018  ;;  %v1455_v11 = vmul.f32 1.442695, %v1285_v31  ;;  %v1467_v62 = vmul.f32 1.442695, %v1291_v58  ;;  %v3334_v17 = vadd.f32 %v3333_v45, %v3332_v6 }
 0x292   :  { %v1443_v4 = vmul.f32 1.442695, %v15365_v56  ;;  %v9021_v59 = vpop.eup %9020  ;;  %v3376_v7 = vadd.f32 %v3375_v16, %v3374_v61  ;;  %v3415_v33 = vrot.slane %v3414_v46, 4  ;;  %v3456_v3 = vadd.f32 %v9019_v57, %v9017_v48  ;;  %5592 = vmatpush1.bf16.msra.mxu0 %v8260_v1  ;;  %5721 = vmatpush1.bf16.msra.mxu1 %v8263_v34  ;;  %v15367_v58 = vld [vmem:[#allocation26_spill] sm:$0xff] }
 0x293   :  { %9036 = vpow2.f32 %v1431_v8  ;;  %v9023_v60 = vpop.eup %9022  ;;  %v3293_v29 = vrot.slane %v3292_v25, 1  ;;  %5593 = vmatprep.subr.bf16.mxu0 %v8268_v54  ;;  %5722 = vmatprep.subr.bf16.mxu1 %v8271_v10  ;;  %v1479_v49 = vmul.f32 1.442695, %v1297_v12  ;;  %v1491_v2 = vmul.f32 1.442695, %v1303_v51 }
 0x294   :  { %9038 = vpow2.f32 %v1443_v4  ;;  %v9025_v9 = vpop.eup %9024  ;;  %v3335_v20 = vrot.slane %v3334_v17, 1  ;;  %v3377_v35 = vrot.slane %v3376_v7, 1  ;;  %v3416_v0 = vadd.f32 %v3415_v33, %v3414_v46  ;;  %v8280_v10 = vld [vmem:[%s14184_s4 + $0x3c4] ss:$24 sps:$4 sm:$0xff]   ;;  %v8278_v56 = vld [vmem:[%s14184_s4 + $0x3c0] ss:$24 sps:$4 sm:$0xff]  }
 0x295   :  { %v3457_v44 = vrot.slane %v3456_v3, 4  ;;  %v9027_v31 = vpop.eup %9026  ;;  %v3294_v42 = vadd.f32 %v3293_v29, %v3292_v25  ;;  %v3498_v39 = vadd.f32 %v9023_v60, %v9021_v59  ;;  %9040 = vpow2.f32 %v1455_v11  ;;  %v8286_v33 = vld [vmem:[%s14184_s4 + $0x3f4] ss:$24 sps:$4 sm:$0xff]  }
 0x296   :  { %v1513_v47 = vadd.f32 %v15367_v58, %v15366_v21  ;;  %v9029_v6 = vpop.eup %9028  ;;  %v3336_v61 = vadd.f32 %v3335_v20, %v3334_v17  ;;  %v3378_v1 = vadd.f32 %v3377_v35, %v3376_v7  ;;  %v3417_v34 = vrot.slane %v3416_v0, 2  ;;  %5594 = vmatpush1.bf16.msra.mxu0 %v8266_v23  ;;  %5723 = vmatpush1.bf16.msra.mxu1 %v8269_v63  ;;  %v8281_v63 = vld [vmem:[%s14184_s4 + $0x3c8] ss:$24 sps:$4 sm:$0xff]   ;;  %v15370_v58 = vld [vmem:[#allocation18_spill] sm:$0xff] }
 0x297   :  { %v3458_v54 = vadd.f32 %v3457_v44, %v3456_v3  ;;  %v9031_v12 = vpop.eup %9030  ;;  %v3499_v41 = vrot.slane %v3498_v39, 4  ;;  %v3540_v27 = vadd.f32 %v9027_v31, %v9025_v9  ;;  %5595 = vmatprep.subr.bf16.mxu0 %v8274_v5  ;;  %5724 = vmatprep.subr.bf16.mxu1 %v8277_v43  ;;  %9042 = vpow2.f32 %v1467_v62  ;;  %v8289_v3 = vld [vmem:[%s14184_s4 + $0x3fc] ss:$24 sps:$4 sm:$0xff]   ;;  %v15369_v44 = vld [vmem:[#allocation192_spill] sm:$0xff] }
 0x298   :  { %v1514_v51 = vrot.slane %v1513_v47, 4  ;;  %v9033_v19 = vpop.eup %9032  ;;  %v3418_v53 = vadd.f32 %v3417_v34, %v3416_v0  ;;  %v3582_v8 = vadd.f32 %v9031_v12, %v9029_v6  ;;  %v3672_v48 = vsel %vm756_vm0, %v3336_v61, %v3294_v42  ;;  %v15368_v0 = vld [vmem:[#allocation117_spill] sm:$0xff]  ;;  %v15371_v6 = vld [vmem:[#allocation67_spill] sm:$0xff] }
 0x299   :  { %v3459_v55 = vrot.slane %v3458_v54, 2  ;;  %v9035_v45 = vpop.eup %9034  ;;  %v3500_v16 = vadd.f32 %v3499_v41, %v3498_v39  ;;  %v3541_v46 = vrot.slane %v3540_v27, 4  ;;  %v3673_v23 = vsel %vm758_vm1, %v3378_v1, %v3672_v48 }
 0x29a   :  { %v3751_v15 = vmul.f32 0.6931472, %v9033_v19  ;;  %v3419_v4 = vrot.slane %v3418_v53, 1  ;;  %v3583_v25 = vrot.slane %v3582_v8, 4  ;;  %5596 = vmatpush1.bf16.msra.mxu0 %v8272_v40  ;;  %5725 = vmatpush1.bf16.msra.mxu1 %v8275_v30  ;;  %v12925_v11 = vmul.f32 0.0, %v9035_v45 }
 0x29b   :  { %v3460_v57 = vadd.f32 %v3459_v55, %v3458_v54  ;;  %v3501_v59 = vrot.slane %v3500_v16, 2  ;;  %v3542_v17 = vadd.f32 %v3541_v46, %v3540_v27  ;;  %5597 = vmatprep.subr.bf16.mxu0 %v8280_v10  ;;  %5726 = vmatprep.subr.bf16.mxu1 %v8283_v36  ;;  %9044 = vpow2.f32 %v1479_v49  ;;  %v8287_v49 = vld [vmem:[%s14184_s4 + $0x3f8] ss:$24 sps:$4 sm:$0xff]   ;;  %v8295_v54 = vld [vmem:[%s14184_s4 + $0x42c] ss:$24 sps:$4 sm:$0xff]  }
 0x29c   :  { %v12930_v7 = vadd.f32 %v3751_v15, %v15309_v28  ;;  %v3420_v5 = vadd.f32 %v3419_v4, %v3418_v53  ;;  %v3584_v60 = vadd.f32 %v3583_v25, %v3582_v8  ;;  %9046 = vpow2.f32 %v1491_v2  ;;  %v8284_v28 = vld [vmem:[%s14184_s4 + $0x3f0] ss:$24 sps:$4 sm:$0xff]   ;;  %v8292_v2 = vld [vmem:[%s14184_s4 + $0x424] ss:$24 sps:$4 sm:$0xff]  }
 0x29d   :  { %v12927_v62 = vpop.eup %9036  ;;  %v3461_v43 = vrot.slane %v3460_v57, 1  ;;  %v3502_v9 = vadd.f32 %v3501_v59, %v3500_v16  ;;  %v3543_v20 = vrot.slane %v3542_v17, 2  ;;  %v1515_v35 = vadd.f32 %v1514_v51, %v1513_v47  ;;  %v15372_v10 = vld [vmem:[#allocation60_spill] sm:$0xff]  ;;  %v15373_v36 = vld [vmem:[#allocation62_spill] sm:$0xff] }
 0x29e   :  { %v9039_v29 = vpop.eup %9038  ;;  %v1555_v31 = vadd.f32 %v15369_v44, %v15368_v0  ;;  %v3585_v39 = vrot.slane %v3584_v60, 2  ;;  %v3674_v21 = vsel %vm760_vm2, %v3420_v5, %v3673_v23  ;;  %5598 = vmatpush1.bf16.msra.mxu0 %v8278_v56  ;;  %5727 = vmatpush1.bf16.msra.mxu1 %v8281_v63  ;;  %v1597_v47 = vadd.f32 %v15371_v6, %v15370_v58  ;;  %v8290_v16 = vld [vmem:[%s14184_s4 + $0x420] ss:$24 sps:$4 sm:$0xff]   ;;  %v8298_v59 = vld [vmem:[%s14184_s4 + $0x454] ss:$24 sps:$4 sm:$0xff]  }
 0x29f   :  { %v3462_v42 = vadd.f32 %v3461_v43, %v3460_v57  ;;  %v9041_v61 = vpop.eup %9040  ;;  %v3503_v1 = vrot.slane %v3502_v9, 1  ;;  %v3544_v34 = vadd.f32 %v3543_v20, %v3542_v17  ;;  %5599 = vmatprep.subr.bf16.mxu0 %v8286_v33  ;;  %5728 = vmatprep.subr.bf16.mxu1 %v8289_v3  ;;  %v1516_v40 = vrot.slane %v1515_v35, 2  ;;  %v8293_v46 = vld [vmem:[%s14184_s4 + $0x428] ss:$24 sps:$4 sm:$0xff]   ;;  %v15375_v4 = vld [vmem:[#allocation82_spill] sm:$0xff] }
 0x2a0   :  { %v1556_v30 = vrot.slane %v1555_v31, 4  ;;  %v3586_v12 = vadd.f32 %v3585_v39, %v3584_v60  ;;  %v1598_v27 = vrot.slane %v1597_v47, 4  ;;  %v1639_v51 = vadd.f32 %v15373_v36, %v15372_v10  ;;  %v15374_v56 = vld [vmem:[#allocation87_spill] sm:$0xff]  ;;  %v8301_v17 = vld [vmem:[%s14184_s4 + $0x45c] ss:$24 sps:$4 sm:$0xff]  }
 0x2a1   :  { %v3675_v41 = vsel %vm762_vm3, %v3462_v42, %v3674_v21  ;;  %v9043_v19 = vpop.eup %9042  ;;  %v3504_v53 = vadd.f32 %v3503_v1, %v3502_v9  ;;  %v3545_v55 = vrot.slane %v3544_v34, 1  ;;  %v1517_v8 = vadd.f32 %v1516_v40, %v1515_v35  ;;  %v8296_v39 = vld [vmem:[%s14184_s4 + $0x450] ss:$24 sps:$4 sm:$0xff]   ;;  %v8302_v10 = vld [vmem:[%s14184_s4 + $0x480] ss:$24 sps:$4 sm:$0xff]  }
 0x2a2   :  { %v1557_v48 = vadd.f32 %v1556_v30, %v1555_v31  ;;  %v3587_v45 = vrot.slane %v3586_v12, 1  ;;  %5600 = vmatpush1.bf16.msra.mxu0 %v8284_v28  ;;  %5729 = vmatpush1.bf16.msra.mxu1 %v8287_v49  ;;  %v1599_v23 = vadd.f32 %v1598_v27, %v1597_v47  ;;  %v1640_v15 = vrot.slane %v1639_v51, 4  ;;  %v8299_v21 = vld [vmem:[%s14184_s4 + $0x458] ss:$24 sps:$4 sm:$0xff]   ;;  %v8305_v36 = vld [vmem:[%s14184_s4 + $0x488] ss:$24 sps:$4 sm:$0xff]  }
 0x2a3   :  { %v1681_v57 = vadd.f32 %v15375_v4, %v15374_v56  ;;  %v3546_v25 = vadd.f32 %v3545_v55, %v3544_v34  ;;  %v3676_v63 = vsel %vm764_vm4, %v3504_v53, %v3675_v41  ;;  %5601 = vmatprep.subr.bf16.mxu0 %v8292_v2  ;;  %5730 = vmatprep.subr.bf16.mxu1 %v8295_v54  ;;  %v1518_v33 = vrot.slane %v1517_v8, 1  ;;  %v8310_v55 = vld [vmem:[%s14184_s4 + $0x4b4] ss:$24 sps:$4 sm:$0xff]  }
 0x2a4   :  { %v1558_v3 = vrot.slane %v1557_v48, 2  ;;  %v3588_v5 = vadd.f32 %v3587_v45, %v3586_v12  ;;  %v1600_v43 = vrot.slane %v1599_v23, 2  ;;  %v1641_v60 = vadd.f32 %v1640_v15, %v1639_v51 }
 0x2a5   :  { %v1682_v9 = vrot.slane %v1681_v57, 4  ;;  %v9045_v20 = vpop.eup %9044  ;;  %v3677_v28 = vsel %vm766_vm5, %v3546_v25, %v3676_v63  ;;  %v1519_v35 = vadd.f32 %v1518_v33, %v1517_v8  ;;  %v1723_v44 = vadd.f32 %v9039_v29, %v12927_v62  ;;  %v8304_v62 = vld [vmem:[%s14184_s4 + $0x484] ss:$24 sps:$4 sm:$0xff]   ;;  %v15378_v33 = vld [vmem:[#allocation176_spill] sm:$0xff] }
 0x2a6   :  { %v1559_v0 = vadd.f32 %v1558_v3, %v1557_v48  ;;  %v9047_v31 = vpop.eup %9046  ;;  %v3678_v42 = vsel %vm768_vm6, %v3588_v5, %v3677_v28  ;;  %5602 = vmatpush1.bf16.msra.mxu0 %v8290_v16  ;;  %5731 = vmatpush1.bf16.msra.mxu1 %v8293_v46  ;;  %v1601_v49 = vadd.f32 %v1600_v43, %v1599_v23  ;;  %v1642_v2 = vrot.slane %v1641_v60, 2  ;;  %v8307_v29 = vld [vmem:[%s14184_s4 + $0x48c] ss:$24 sps:$4 sm:$0xff]   ;;  %v8313_v8 = vld [vmem:[%s14184_s4 + $0x4bc] ss:$24 sps:$4 sm:$0xff]  }
 0x2a7   :  { %v1683_v58 = vadd.f32 %v1682_v9, %v1681_v57  ;;  %v3702_v6 = vadd.f32 %v3678_v42, %v12836_v38  ;;  %5603 = vmatprep.subr.bf16.mxu0 %v8298_v59  ;;  %5732 = vmatprep.subr.bf16.mxu1 %v8301_v17  ;;  %v1724_v1 = vrot.slane %v1723_v44, 4  ;;  %v1765_v34 = vadd.f32 %v9043_v19, %v9041_v61  ;;  %v15376_v46 = vld [vmem:[#allocation214_spill] sm:$0xff]  ;;  %v15377_v17 = vld [vmem:[#allocation111_spill] sm:$0xff]  ;;  %v8308_v5 = vld [vmem:[%s14184_s4 + $0x4b0] ss:$24 sps:$4 sm:$0xff]  }
 0x2a8   :  { %v1560_v47 = vrot.slane %v1559_v0, 1  ;;  %v1602_v54 = vrot.slane %v1601_v49, 1  ;;  %v1643_v40 = vadd.f32 %v1642_v2, %v1641_v60  ;;  %v1807_v12 = vadd.f32 %v9047_v31, %v9045_v20  ;;  %v8311_v43 = vld [vmem:[%s14184_s4 + $0x4b8] ss:$24 sps:$4 sm:$0xff]   ;;  %v15379_v28 = vld [vmem:[#allocation172_spill] sm:$0xff] }
 0x2a9   :  { %v1684_v30 = vrot.slane %v1683_v58, 2  ;;  %9048 = vlog2.f32 %v3702_v6  ;;  %v1725_v38 = vadd.f32 %v1724_v1, %v1723_v44  ;;  %v1766_v27 = vrot.slane %v1765_v34, 4  ;;  %v8319_v44 = vld [vmem:[%s14184_s4 + $0x4ec] ss:$24 sps:$4 sm:$0xff]   ;;  %v8314_v2 = vld [vmem:[%s14184_s4 + $0x4e0] ss:$24 sps:$4 sm:$0xff]  }
 0x2aa   :  { %v1561_v41 = vadd.f32 %v1560_v47, %v1559_v0  ;;  %5604 = vmatpush1.bf16.msra.mxu0 %v8296_v39  ;;  %5733 = vmatpush1.bf16.msra.mxu1 %v8299_v21  ;;  %v1603_v51 = vadd.f32 %v1602_v54, %v1601_v49  ;;  %v1644_v61 = vrot.slane %v1643_v40, 1  ;;  %v1808_v53 = vrot.slane %v1807_v12, 4  ;;  %v8316_v0 = vld [vmem:[%s14184_s4 + $0x4e4] ss:$24 sps:$4 sm:$0xff]   ;;  %v15380_v39 = vld [vmem:[#allocation68_spill] sm:$0xff]  ;;  %v15381_v21 = vld [vmem:[#allocation201_spill] sm:$0xff] }
 0x2ab   :  { %v1685_v19 = vadd.f32 %v1684_v30, %v1683_v58  ;;  %5605 = vmatprep.subr.bf16.mxu0 %v8304_v62  ;;  %5734 = vmatprep.subr.bf16.mxu1 %v8307_v29  ;;  %v1726_v48 = vrot.slane %v1725_v38, 2  ;;  %v1767_v45 = vadd.f32 %v1766_v27, %v1765_v34  ;;  %v2587_v23 = vsub.f32 -inf, %v15376_v46  ;;  %v8317_v58 = vld [vmem:[%s14184_s4 + $0x4e8] ss:$24 sps:$4 sm:$0xff]   ;;  %v15382_v29 = vld [vmem:[#allocation190_spill] sm:$0xff]  ;;  %v15384_v34 = vld [vmem:[#allocation81_spill] sm:$0xff] }
 0x2ac   :  { %v1897_v16 = vsel %vm756_vm0, %v1561_v41, %v1519_v35  ;;  %v1645_v15 = vadd.f32 %v1644_v61, %v1643_v40  ;;  %v1809_v4 = vadd.f32 %v1808_v53, %v1807_v12  ;;  %v3053_v3 = vsub.f32 %v15378_v33, %v15377_v17  ;;  %v15383_v1 = vld [vmem:[#allocation151_spill] sm:$0xff]  ;;  %v8322_v53 = vld [vmem:[%s14184_s4 + $0x514] ss:$24 sps:$4 sm:$0xff]  }
 0x2ad   :  { %v1686_v56 = vrot.slane %v1685_v19, 1  ;;  %v1898_v57 = vsel %vm758_vm1, %v1603_v51, %v1897_v16  ;;  %v1727_v25 = vadd.f32 %v1726_v48, %v1725_v38  ;;  %v1768_v63 = vrot.slane %v1767_v45, 2  ;;  %v15386_v41 = vld [vmem:[#allocation147_spill] sm:$0xff] }
 0x2ae   :  { %v2595_v59 = vmul.f32 1.442695, %v2587_v23  ;;  %5606 = vmatpush1.bf16.msra.mxu0 %v8302_v10  ;;  %5735 = vmatpush1.bf16.msra.mxu1 %v8305_v36  ;;  %v1810_v9 = vrot.slane %v1809_v4, 2  ;;  %v1899_v20 = vsel %vm760_vm2, %v1645_v15, %v1898_v57  ;;  %v3059_v35 = vsub.f32 %v15379_v28, %v15377_v17  ;;  %v15388_v15 = vld [vmem:[#allocation196_spill] sm:$0xff]  ;;  %v15392_v17 = vld [vmem:[#allocation94_spill] sm:$0xff] }
 0x2af   :  { %v1687_v60 = vadd.f32 %v1686_v56, %v1685_v19  ;;  %5607 = vmatprep.subr.bf16.mxu0 %v8310_v55  ;;  %5736 = vmatprep.subr.bf16.mxu1 %v8313_v8  ;;  %v1728_v31 = vrot.slane %v1727_v25, 1  ;;  %v1769_v42 = vadd.f32 %v1768_v63, %v1767_v45  ;;  %v3065_v49 = vsub.f32 %v15381_v21, %v15380_v39  ;;  %v8325_v55 = vld [vmem:[%s14184_s4 + $0x51c] ss:$24 sps:$4 sm:$0xff]   ;;  %v15391_v63 = vld [vmem:[#allocation80_spill] sm:$0xff] }
 0x2b0   :  { %9050 = vpow2.f32 %v2595_v59  ;;  %v1811_v6 = vadd.f32 %v1810_v9, %v1809_v4  ;;  %v3071_v47 = vsub.f32 %v15382_v29, %v15380_v39  ;;  %v15385_v54 = vsub.f32 %v15383_v1, %v15384_v34  ;;  %v15389_v56 = vld [vmem:[#allocation54_spill] sm:$0xff]  ;;  %v8329_v1 = vld [vmem:[%s14184_s4 + $0x548] ss:$24 sps:$4 sm:$0xff]  }
 0x2b1   :  { %v1900_v62 = vsel %vm762_vm3, %v1687_v60, %v1899_v20  ;;  %v1729_v30 = vadd.f32 %v1728_v31, %v1727_v25  ;;  %v1770_v12 = vrot.slane %v1769_v42, 1  ;;  %v15387_v38 = vsub.f32 %v15386_v41, %v15384_v34  ;;  %v15390_v25 = vld [vmem:[#allocation46_spill] sm:$0xff]  ;;  %v8320_v60 = vld [vmem:[%s14184_s4 + $0x510] ss:$24 sps:$4 sm:$0xff]   ;;  %v8334_v41 = vld [vmem:[%s14184_s4 + $0x574] ss:$24 sps:$4 sm:$0xff]  }
 0x2b2   :  { %v3199_v40 = vmul.f32 1.442695, %v15385_v54  ;;  %v3223_v10 = vmul.f32 1.442695, %v3053_v3  ;;  %5608 = vmatpush1.bf16.msra.mxu0 %v8308_v5  ;;  %5737 = vmatpush1.bf16.msra.mxu1 %v8311_v43  ;;  %v1812_v36 = vrot.slane %v1811_v6, 1  ;;  %v3281_v4 = vadd.f32 %v15389_v56, %v15388_v15  ;;  %v15393_v31 = vld [vmem:[#allocation228_spill] sm:$0xff] }
 0x2b3   :  { %v3211_v27 = vmul.f32 1.442695, %v15387_v38  ;;  %v3235_v51 = vmul.f32 1.442695, %v3059_v35  ;;  %v3247_v61 = vmul.f32 1.442695, %v3065_v49  ;;  %v9049_v19 = vpop.eup %9048  ;;  %5609 = vmatprep.subr.bf16.mxu0 %v8316_v0  ;;  %5738 = vmatprep.subr.bf16.mxu1 %v8319_v44  ;;  %v1771_v8 = vadd.f32 %v1770_v12, %v1769_v42 }
 0x2b4   :  { %9052 = vpow2.f32 %v3199_v40  ;;  %v1901_v48 = vsel %vm764_vm4, %v1729_v30, %v1900_v62  ;;  %v3259_v45 = vmul.f32 1.442695, %v3071_v47  ;;  %v3763_v16 = vmul.f32 0.6931472, %v9049_v19  ;;  %v8323_v9 = vld [vmem:[%s14184_s4 + $0x518] ss:$24 sps:$4 sm:$0xff]  }
 0x2b5   :  { %9054 = vpow2.f32 %v3211_v27  ;;  %v1813_v23 = vadd.f32 %v1812_v36, %v1811_v6  ;;  %v1902_v57 = vsel %vm766_vm5, %v1771_v8, %v1901_v48  ;;  %v3323_v59 = vadd.f32 %v15391_v63, %v15390_v25  ;;  %v8328_v35 = vld [vmem:[%s14184_s4 + $0x544] ss:$24 sps:$4 sm:$0xff]   ;;  %v15395_v49 = vld [vmem:[#allocation109_spill] sm:$0xff]  ;;  %v8326_v62 = vld [vmem:[%s14184_s4 + $0x540] ss:$24 sps:$4 sm:$0xff]  }
 0x2b6   :  { %9056 = vpow2.f32 %v3223_v10  ;;  %v3365_v33 = vadd.f32 %v12650_v13, %v15392_v17  ;;  %v3777_v3 = vadd.f32 %v3763_v16, %v15336_v24  ;;  %5610 = vmatpush1.bf16.msra.mxu0 %v8314_v2  ;;  %5739 = vmatpush1.bf16.msra.mxu1 %v8317_v58  ;;  %v3282_v43 = vrot.slane %v3281_v4, 4  ;;  %v8331_v0 = vld [vmem:[%s14184_s4 + $0x54c] ss:$24 sps:$4 sm:$0xff]   ;;  %v15394_v39 = vld [vmem:[#allocation126_spill] sm:$0xff]  ;;  %v8332_v56 = vld [vmem:[%s14184_s4 + $0x570] ss:$24 sps:$4 sm:$0xff]  }
 0x2b7   :  { %9058 = vpow2.f32 %v3235_v51  ;;  %v1903_v5 = vsel %vm768_vm6, %v1813_v23, %v1902_v57  ;;  %5611 = vmatprep.subr.bf16.mxu0 %v8322_v53  ;;  %5740 = vmatprep.subr.bf16.mxu1 %v8325_v55  ;;  %v3324_v24 = vrot.slane %v3323_v59, 4  ;;  %v3407_v42 = vadd.f32 %v15393_v31, %v12682_v50  ;;  %v15396_v58 = vld [vmem:[#allocation208_spill] sm:$0xff]  ;;  %v8337_v38 = vld [vmem:[%s14184_s4 + $0x57c] ss:$24 sps:$4 sm:$0xff]   ;;  %v15399_v55 = vld [vmem:[#allocation23_spill] sm:$0xff] }
 0x2b8   :  { %9060 = vpow2.f32 %v3247_v61  ;;  %v1933_v13 = vadd.f32 %v1903_v5, %v12925_v11  ;;  %v3366_v20 = vrot.slane %v3365_v33, 4  ;;  %v13062_v28 = vpack.c.bf16 %v3777_v3, %v12930_v7  ;;  %v15398_v12 = vld [vmem:[#allocation212_spill] sm:$0xff]  ;;  %v8340_v3 = vld [vmem:[%s14184_s4 + $0x5a4] ss:$24 sps:$4 sm:$0xff]  }
 0x2b9   :  { %9062 = vpow2.f32 %v3259_v45  ;;  %v3283_v44 = vadd.f32 %v3282_v43, %v3281_v4  ;;  %v3449_v11 = vadd.f32 %v12702_v18, %v15394_v39  ;;  %v3325_v7 = vadd.f32 %v3324_v24, %v3323_v59  ;;  %v15397_v18 = vld [vmem:[#allocation169_spill] sm:$0xff]  ;;  %v15400_v63 = vld [vmem:[#allocation224_spill] sm:$0xff]  ;;  %v15401_v59 = vld [vmem:[#allocation226_spill] sm:$0xff] }
 0x2ba   :  { %v9051_v21 = vpop.eup %9050  ;;  %9064 = vpow2.f32 %v15395_v49  ;;  %v3367_v2 = vadd.f32 %v3366_v20, %v3365_v33  ;;  %v822_v6 = vsub.f32 -inf, %v15396_v58  ;;  %5621 = vmatprep.mubr.bf16.mxu0 %v13062_v28  ;;  %5750 = vmatprep.mubr.bf16.mxu1 %v13062_v28  ;;  %v3408_v50 = vrot.slane %v3407_v42, 4  ;;  %v8335_v4 = vld [vmem:[%s14184_s4 + $0x578] ss:$24 sps:$4 sm:$0xff]   ;;  %v8343_v5 = vld [vmem:[%s14184_s4 + $0x5ac] ss:$24 sps:$4 sm:$0xff]  }
 0x2bb   :  { %v3284_v29 = vrot.slane %v3283_v44, 2  ;;  %v3450_v47 = vrot.slane %v3449_v11, 4  ;;  %9066 = vlog2.f32 %v1933_v13  ;;  %5612 = vmatpush1.bf16.msra.mxu0 %v8320_v60  ;;  %5741 = vmatpush1.bf16.msra.mxu1 %v8323_v9  ;;  %v3326_v34 = vrot.slane %v3325_v7, 2 }
 0x2bc   :  { %9068 = vpow2.f32 %v15397_v18  ;;  %v3368_v54 = vrot.slane %v3367_v2, 2  ;;  %v833_v40 = vmul.f32 1.442695, %v822_v6  ;;  %5613 = vmatprep.subr.bf16.mxu0 %v8328_v35  ;;  %5742 = vmatprep.subr.bf16.mxu1 %v8331_v0  ;;  %v3409_v10 = vadd.f32 %v3408_v50, %v3407_v42  ;;  %v15404_v50 = vld [vmem:[#allocation118_spill] sm:$0xff]  ;;  %v15405_v18 = vld [vmem:[#allocation116_spill] sm:$0xff] }
 0x2bd   :  { %9070 = vpow2.f32 %v15398_v12  ;;  %v3285_v27 = vadd.f32 %v3284_v29, %v3283_v44  ;;  %v3451_v36 = vadd.f32 %v3450_v47, %v3449_v11  ;;  %v13092_v61 = vmul.f32 0.0, %v9051_v21  ;;  %v15402_v44 = vld [vmem:[#allocation227_spill] sm:$0xff]  ;;  %v15403_v29 = vld [vmem:[#allocation233_spill] sm:$0xff] }
 0x2be   :  { %v9053_v30 = vpop.eup %9052  ;;  %v3327_v19 = vadd.f32 %v3326_v34, %v3325_v7  ;;  %v3369_v53 = vadd.f32 %v3368_v54, %v3367_v2  ;;  %9072 = vpow2.f32 %v15399_v55  ;;  %v3410_v45 = vrot.slane %v3409_v10, 2  ;;  %v8338_v7 = vld [vmem:[%s14184_s4 + $0x5a0] ss:$24 sps:$4 sm:$0xff]   ;;  %v8346_v54 = vld [vmem:[%s14184_s4 + $0x5d4] ss:$24 sps:$4 sm:$0xff]  }
 0x2bf   :  { %v9055_v51 = vpop.eup %9054  ;;  %v3286_v48 = vrot.slane %v3285_v27, 1  ;;  %v3452_v16 = vrot.slane %v3451_v36, 2  ;;  %5614 = vmatpush1.bf16.msra.mxu0 %v8326_v62  ;;  %5743 = vmatpush1.bf16.msra.mxu1 %v8329_v1  ;;  %9074 = vpow2.f32 %v833_v40  ;;  %v13103_v17 = vrot.slane %v15401_v59, %v15400_v63  ;;  %v8341_v2 = vld [vmem:[%s14184_s4 + $0x5a8] ss:$24 sps:$4 sm:$0xff]   ;;  %v8349_v40 = vld [vmem:[%s14184_s4 + $0x5dc] ss:$24 sps:$4 sm:$0xff]  }
 0x2c0   :  { %v9057_v8 = vpop.eup %9056  ;;  %v3491_v23 = vadd.f32 %v9055_v51, %v9053_v30  ;;  %v3328_v57 = vrot.slane %v3327_v19, 1  ;;  %v3370_v25 = vrot.slane %v3369_v53, 1  ;;  %5615 = vmatprep.subr.bf16.mxu0 %v8334_v41  ;;  %5744 = vmatprep.subr.bf16.mxu1 %v8337_v38  ;;  %v3411_v60 = vadd.f32 %v3410_v45, %v3409_v10  ;;  %v15406_v38 = vld [vmem:[#allocation238_spill] sm:$0xff]  ;;  %v15408_v55 = vld [vmem:[#allocation140_spill] sm:$0xff] }
 0x2c1   :  { %v9059_v15 = vpop.eup %9058  ;;  %v3287_v43 = vadd.f32 %v3286_v48, %v3285_v27  ;;  %v3453_v9 = vadd.f32 %v3452_v16, %v3451_v36  ;;  %v13113_v31 = vrot.slane %v15402_v44, %v15400_v63  ;;  %v1264_v47 = vsub.f32 %v15404_v50, %v15403_v29  ;;  %v15407_v27 = vld [vmem:[#allocation143_spill] sm:$0xff]  ;;  %v8344_v45 = vld [vmem:[%s14184_s4 + $0x5d0] ss:$24 sps:$4 sm:$0xff]  }
 0x2c2   :  { %v9061_v33 = vpop.eup %9060  ;;  %v3492_v13 = vrot.slane %v3491_v23, 4  ;;  %v3329_v20 = vadd.f32 %v3328_v57, %v3327_v19  ;;  %v3371_v35 = vadd.f32 %v3370_v25, %v3369_v53  ;;  %v3533_v0 = vadd.f32 %v9059_v15, %v9057_v8  ;;  %v8347_v25 = vld [vmem:[%s14184_s4 + $0x5d8] ss:$24 sps:$4 sm:$0xff]  }
 0x2c3   :  { %v9063_v24 = vpop.eup %9062  ;;  %v3412_v42 = vrot.slane %v3411_v60, 1  ;;  %v3454_v39 = vrot.slane %v3453_v9, 1  ;;  %5616 = vmatpush1.bf16.msra.mxu0 %v8332_v56  ;;  %5745 = vmatpush1.bf16.msra.mxu1 %v8335_v4  ;;  %v1270_v1 = vsub.f32 %v15405_v18, %v15403_v29  ;;  %v1276_v10 = vsub.f32 %v15407_v27, %v15406_v38  ;;  %v15409_v56 = vld [vmem:[#allocation168_spill] sm:$0xff] }
 0x2c4   :  { %v3493_v11 = vadd.f32 %v3492_v13, %v3491_v23  ;;  %v3575_v21 = vadd.f32 %v9063_v24, %v9061_v33  ;;  %v13115_v49 = vpop.eup %9064  ;;  %v3534_v6 = vrot.slane %v3533_v0, 4  ;;  %v3665_v62 = vsel %vm756_vm0, %v3329_v20, %v3287_v43  ;;  %5617 = vmatprep.subr.bf16.mxu0 %v8340_v3  ;;  %5746 = vmatprep.subr.bf16.mxu1 %v8343_v5  ;;  %v15410_v5 = vld [vmem:[#allocation165_spill] sm:$0xff]  ;;  %v8352_v13 = vld [vmem:[%s14184_s4 + $0x604] ss:$24 sps:$4 sm:$0xff]  }
 0x2c5   :  { %v9067_v34 = vpop.eup %9066  ;;  %v3413_v30 = vadd.f32 %v3412_v42, %v3411_v60  ;;  %v3455_v51 = vadd.f32 %v3454_v39, %v3453_v9  ;;  %v3666_v53 = vsel %vm758_vm1, %v3371_v35, %v3665_v62  ;;  %v1282_v8 = vsub.f32 %v15408_v55, %v15406_v38  ;;  %v8355_v24 = vld [vmem:[%s14184_s4 + $0x60c] ss:$24 sps:$4 sm:$0xff]   ;;  %v15411_v20 = vld [vmem:[#allocation197_spill] sm:$0xff] }
 0x2c6   :  { %v3494_v12 = vrot.slane %v3493_v11, 2  ;;  %v3576_v41 = vrot.slane %v3575_v21, 4  ;;  %v13136_v36 = vpop.eup %9068  ;;  %v3535_v19 = vadd.f32 %v3534_v6, %v3533_v0  ;;  %v1288_v4 = vsub.f32 %v15409_v56, %v13103_v17  ;;  %v15412_v0 = vld [vmem:[#allocation7_spill] sm:$0xff] }
 0x2c7   :  { %v13141_v48 = vpop.eup %9070  ;;  %v3667_v15 = vsel %vm760_vm2, %v3413_v30, %v3666_v53  ;;  %5618 = vmatpush1.bf16.msra.mxu0 %v8338_v7  ;;  %5747 = vmatpush1.bf16.msra.mxu1 %v8341_v2  ;;  %v3749_v3 = vmul.f32 0.6931472, %v9067_v34  ;;  %v1294_v43 = vsub.f32 %v15410_v5, %v13103_v17  ;;  %v1300_v35 = vsub.f32 %v15411_v20, %v13113_v31  ;;  %v15413_v2 = vld [vmem:[#allocation187_spill] sm:$0xff]  ;;  %v15415_v30 = vld [vmem:[#allocation10_spill] sm:$0xff] }
 0x2c8   :  { %v3495_v16 = vadd.f32 %v3494_v12, %v3493_v11  ;;  %v3577_v23 = vadd.f32 %v3576_v41, %v3575_v21  ;;  %v13149_v57 = vpop.eup %9072  ;;  %v3536_v59 = vrot.slane %v3535_v19, 2  ;;  %v3668_v33 = vsel %vm762_vm3, %v3455_v51, %v3667_v15  ;;  %5619 = vmatprep.subr.bf16.mxu0 %v8346_v54  ;;  %5748 = vmatprep.subr.bf16.mxu1 %v8349_v40  ;;  %v15414_v40 = vld [vmem:[#allocation30_spill] sm:$0xff]  ;;  %v15417_v41 = vld [vmem:[#allocation16_spill] sm:$0xff] }
 0x2c9   :  { %9076 = vpow2.f32 %v15412_v0  ;;  %v13166_v44 = vpop.eup %9074  ;;  %v1413_v42 = vmul.f32 1.442695, %v1264_v47  ;;  %v1425_v39 = vmul.f32 1.442695, %v1270_v1  ;;  %v1437_v11 = vmul.f32 1.442695, %v1276_v10 }
 0x2ca   :  { %v3496_v60 = vrot.slane %v3495_v16, 1  ;;  %v3578_v9 = vrot.slane %v3577_v23, 2  ;;  %v3537_v17 = vadd.f32 %v3536_v59, %v3535_v19  ;;  %v1306_v6 = vsub.f32 %v15413_v2, %v13113_v31  ;;  %v15416_v31 = vld [vmem:[#allocation166_spill] sm:$0xff]  ;;  %v15419_v19 = vld [vmem:[#allocation59_spill] sm:$0xff] }
 0x2cb   :  { %v1449_v62 = vmul.f32 1.442695, %v1282_v8  ;;  %5620 = vmatpush1.bf16.msra.mxu0 %v8344_v45  ;;  %5749 = vmatpush1.bf16.msra.mxu1 %v8347_v25  ;;  %9078 = vpow2.f32 %v1413_v42  ;;  %v1461_v50 = vmul.f32 1.442695, %v1288_v4  ;;  %v1473_v18 = vmul.f32 1.442695, %v1294_v43 }
 0x2cc   :  { %v3497_v21 = vadd.f32 %v3496_v60, %v3495_v16  ;;  %v3579_v7 = vadd.f32 %v3578_v9, %v3577_v23  ;;  %v3538_v29 = vrot.slane %v3537_v17, 1  ;;  %5632 = vmatprep.subr.bf16.mxu0 %v8352_v13  ;;  %5761 = vmatprep.subr.bf16.mxu1 %v8355_v24  ;;  %9080 = vpow2.f32 %v1425_v39  ;;  %v15418_v51 = vld [vmem:[#allocation58_spill] sm:$0xff]  ;;  %v15420_v16 = vld [vmem:[#allocation128_spill] sm:$0xff] }
 0x2cd   :  { %v1485_v47 = vmul.f32 1.442695, %v1300_v35  ;;  %9082 = vpow2.f32 %v1437_v11  ;;  %v1534_v12 = vadd.f32 %v15415_v30, %v15414_v40  ;;  %v1576_v38 = vadd.f32 %v15417_v41, %v15416_v31  ;;  %v15421_v23 = vld [vmem:[#allocation90_spill] sm:$0xff] }
 0x2ce   :  { %v3580_v34 = vrot.slane %v3579_v7, 1  ;;  %v3669_v54 = vsel %vm764_vm4, %v3497_v21, %v3668_v33  ;;  %v3539_v1 = vadd.f32 %v3538_v29, %v3537_v17  ;;  %9084 = vpow2.f32 %v1449_v62  ;;  %v15426_v2 = vld [vmem:[#allocation130_spill] sm:$0xff] }
 0x2cf   :  { %v1497_v10 = vmul.f32 1.442695, %v1306_v6  ;;  %v1618_v53 = vadd.f32 %v15419_v19, %v15418_v51  ;;  %9086 = vpow2.f32 %v1461_v50  ;;  %v1535_v8 = vrot.slane %v1534_v12, 4  ;;  %v15428_v50 = vld [vmem:[#allocation156_spill] sm:$0xff]  ;;  %v15432_v51 = vld [vmem:[#allocation206_spill] sm:$0xff] }
 0x2d0   :  { %v3581_v27 = vadd.f32 %v3580_v34, %v3579_v7  ;;  %v3670_v55 = vsel %vm766_vm5, %v3539_v1, %v3669_v54  ;;  %v1577_v45 = vrot.slane %v1576_v38, 4  ;;  %v15422_v15 = vsub.f32 %v15420_v16, %v15421_v23  ;;  %v15429_v34 = vld [vmem:[#allocation154_spill] sm:$0xff] }
 0x2d1   :  { %9088 = vpow2.f32 %v1473_v18  ;;  %v1619_v25 = vrot.slane %v1618_v53, 4  ;;  %v1536_v33 = vadd.f32 %v1535_v8, %v1534_v12  ;;  %v13186_v60 = vadd.f32 %v3749_v3, %v15354_v32  ;;  %v15424_v32 = vld [vmem:[#allocation92_spill] sm:$0xff]  ;;  %v15425_v3 = vld [vmem:[#allocation131_spill] sm:$0xff] }
 0x2d2   :  { %v13181_v56 = vmul.f32 1.442695, %v15422_v15  ;;  %v3671_v4 = vsel %vm768_vm6, %v3581_v27, %v3670_v55  ;;  %9090 = vpow2.f32 %v1485_v47  ;;  %v1578_v5 = vadd.f32 %v1577_v45, %v1576_v38  ;;  %v15431_v27 = vld [vmem:[#allocation179_spill] sm:$0xff] }
 0x2d3   :  { %v3701_v59 = vadd.f32 %v3671_v4, %v13092_v61  ;;  %v9077_v43 = vpop.eup %9076  ;;  %9092 = vpow2.f32 %v1497_v10  ;;  %v1620_v9 = vadd.f32 %v1619_v25, %v1618_v53  ;;  %v13190_v13 = vrot.slane %v15294_v52, %v15400_v63  ;;  %v15423_v61 = vld [vmem:[#allocation217_spill] sm:$0xff]  ;;  %v15433_v53 = vld [vmem:[#allocation34_spill] sm:$0xff] }
 0x2d4   :  { %v1537_v24 = vrot.slane %v1536_v33, 2  ;;  %v1579_v20 = vrot.slane %v1578_v5, 2  ;;  %v1660_v35 = vadd.f32 %v9077_v43, %v13149_v57  ;;  %v2590_v17 = vsub.f32 -inf, %v15423_v61  ;;  %v15427_v57 = vld [vmem:[#allocation91_spill] sm:$0xff] }
 0x2d5   :  { %9094 = vlog2.f32 %v3701_v59  ;;  %v1621_v0 = vrot.slane %v1620_v9, 2  ;;  %v13196_v42 = vrot.slane %v15297_v37, %v15400_v63  ;;  %v3032_v39 = vsub.f32 %v15425_v3, %v15424_v32  ;;  %v9079_v11 = vpop.eup %9078  ;;  %v15430_v37 = vld [vmem:[#allocation181_spill] sm:$0xff] }
 0x2d6   :  { %v1538_v21 = vadd.f32 %v1537_v24, %v1536_v33  ;;  %v1580_v7 = vadd.f32 %v1579_v20, %v1578_v5  ;;  %v1661_v52 = vrot.slane %v1660_v35, 4  ;;  %v3038_v6 = vsub.f32 %v15426_v2, %v15424_v32  ;;  %v9081_v62 = vpop.eup %9080  ;;  %v15434_v59 = vld [vmem:[#allocation41_spill] sm:$0xff] }
 0x2d7   :  { %v1622_v29 = vadd.f32 %v1621_v0, %v1620_v9  ;;  %v3044_v18 = vsub.f32 %v15428_v50, %v15427_v57  ;;  %v3050_v54 = vsub.f32 %v15429_v34, %v15427_v57  ;;  %v3056_v47 = vsub.f32 %v15430_v37, %v13190_v13  ;;  %v9083_v1 = vpop.eup %9082 }
 0x2d8   :  { %v1539_v40 = vrot.slane %v1538_v21, 1  ;;  %v1581_v30 = vrot.slane %v1580_v7, 1  ;;  %v1662_v12 = vadd.f32 %v1661_v52, %v1660_v35  ;;  %v1702_v31 = vadd.f32 %v9081_v62, %v9079_v11  ;;  %v9085_v41 = vpop.eup %9084 }
 0x2d9   :  { %v1623_v38 = vrot.slane %v1622_v29, 1  ;;  %v3062_v10 = vsub.f32 %v15431_v27, %v13190_v13  ;;  %v3068_v19 = vsub.f32 %v15432_v51, %v13196_v42  ;;  %9096 = vpow2.f32 %v15433_v53  ;;  %v9087_v55 = vpop.eup %9086 }
 0x2da   :  { %v1540_v8 = vadd.f32 %v1539_v40, %v1538_v21  ;;  %v1582_v45 = vadd.f32 %v1581_v30, %v1580_v7  ;;  %v1663_v16 = vrot.slane %v1662_v12, 2  ;;  %v1703_v23 = vrot.slane %v1702_v31, 4  ;;  %v15435_v40 = vld [vmem:[#allocation204_spill] sm:$0xff] }
 0x2db   :  { %v9089_v15 = vpop.eup %9088  ;;  %v1624_v4 = vadd.f32 %v1623_v38, %v1622_v29  ;;  %v1744_v25 = vadd.f32 %v9085_v41, %v9083_v1  ;;  %9098 = vpow2.f32 %v15434_v59  ;;  %v3181_v33 = vmul.f32 1.442695, %v3032_v39  ;;  %v8350_v1 = vld [vmem:[%s14184_s4 + $0x600] ss:$24 sps:$4 sm:$0xff]  }
 0x2dc   :  { %v9091_v5 = vpop.eup %9090  ;;  %v1664_v43 = vadd.f32 %v1663_v16, %v1662_v12  ;;  %v1704_v9 = vadd.f32 %v1703_v23, %v1702_v31  ;;  %v1786_v13 = vadd.f32 %v9089_v15, %v9087_v55  ;;  %v1918_v24 = vsel %vm756_vm0, %v1582_v45, %v1540_v8  ;;  %v8353_v12 = vld [vmem:[%s14184_s4 + $0x608] ss:$24 sps:$4 sm:$0xff]   ;;  %v8361_v8 = vld [vmem:[%s14184_s4 + $0x63c] ss:$24 sps:$4 sm:$0xff]  }
 0x2dd   :  { %v9093_v20 = vpop.eup %9092  ;;  %v1745_v35 = vrot.slane %v1744_v25, 4  ;;  %v1919_v0 = vsel %vm758_vm1, %v1624_v4, %v1918_v24  ;;  %9100 = vpow2.f32 %v3181_v33  ;;  %v3193_v32 = vmul.f32 1.442695, %v3038_v6 }
 0x2de   :  { %v1665_v11 = vrot.slane %v1664_v43, 1  ;;  %v1705_v21 = vrot.slane %v1704_v9, 2  ;;  %v1787_v7 = vrot.slane %v1786_v13, 4  ;;  %v1828_v52 = vadd.f32 %v9093_v20, %v9091_v5  ;;  %v8359_v5 = vld [vmem:[%s14184_s4 + $0x638] ss:$24 sps:$4 sm:$0xff]   ;;  %v15438_v20 = vld [vmem:[#allocation79_spill] sm:$0xff] }
 0x2df   :  { %v9095_v3 = vpop.eup %9094  ;;  %v1746_v62 = vadd.f32 %v1745_v35, %v1744_v25  ;;  %9102 = vpow2.f32 %v3193_v32  ;;  %v3205_v39 = vmul.f32 1.442695, %v3044_v18  ;;  %v3074_v30 = vsub.f32 %v15435_v40, %v13196_v42  ;;  %v8367_v32 = vld [vmem:[%s14184_s4 + $0x66c] ss:$24 sps:$4 sm:$0xff]  }
 0x2e0   :  { %v3761_v2 = vmul.f32 0.6931472, %v9095_v3  ;;  %v1666_v29 = vadd.f32 %v1665_v11, %v1664_v43  ;;  %v1706_v57 = vadd.f32 %v1705_v21, %v1704_v9  ;;  %v1788_v50 = vadd.f32 %v1787_v7, %v1786_v13  ;;  %v15437_v13 = vld [vmem:[#allocation45_spill] sm:$0xff] }
 0x2e1   :  { %v1829_v34 = vrot.slane %v1828_v52, 4  ;;  %v1747_v6 = vrot.slane %v1746_v62, 2  ;;  %9104 = vpow2.f32 %v3205_v39  ;;  %v3217_v42 = vmul.f32 1.442695, %v3050_v54  ;;  %v8370_v40 = vld [vmem:[%s14184_s4 + $0x694] ss:$24 sps:$4 sm:$0xff]  }
 0x2e2   :  { %v3776_v37 = vadd.f32 %v3761_v2, %v15376_v46  ;;  %v1707_v18 = vrot.slane %v1706_v57, 1  ;;  %v1789_v31 = vrot.slane %v1788_v50, 2  ;;  %v1920_v38 = vsel %vm760_vm2, %v1666_v29, %v1919_v0  ;;  %v8358_v46 = vld [vmem:[%s14184_s4 + $0x634] ss:$24 sps:$4 sm:$0xff]   ;;  %v8364_v0 = vld [vmem:[%s14184_s4 + $0x664] ss:$24 sps:$4 sm:$0xff]  }
 0x2e3   :  { %v1830_v41 = vadd.f32 %v1829_v34, %v1828_v52  ;;  %v9097_v27 = vpop.eup %9096  ;;  %v1748_v53 = vadd.f32 %v1747_v6, %v1746_v62  ;;  %v3229_v55 = vmul.f32 1.442695, %v3056_v47  ;;  %v3241_v15 = vmul.f32 1.442695, %v3062_v10  ;;  %v8356_v10 = vld [vmem:[%s14184_s4 + $0x630] ss:$24 sps:$4 sm:$0xff]  }
 0x2e4   :  { %v13230_v51 = vpack.c.bf16 %v3776_v37, %v13186_v60  ;;  %v1708_v45 = vadd.f32 %v1707_v18, %v1706_v57  ;;  %v1790_v16 = vadd.f32 %v1789_v31, %v1788_v50  ;;  %9106 = vpow2.f32 %v3217_v42  ;;  %v15439_v62 = vld [vmem:[#allocation119_spill] sm:$0xff] }
 0x2e5   :  { %v1831_v23 = vrot.slane %v1830_v41, 2  ;;  %v9099_v4 = vpop.eup %9098  ;;  %v1749_v25 = vrot.slane %v1748_v53, 1  ;;  %v3253_v60 = vmul.f32 1.442695, %v3068_v19  ;;  %v3265_v59 = vmul.f32 1.442695, %v3074_v30 }
 0x2e6   :  { %5622 = vmatmul.mubr.bf16.vlgmr.msra.gmra.mrb[0].mxu0 %v13230_v51  ;;  %5751 = vmatmul.mubr.bf16.vlgmr.msra.gmra.mrb[0].mxu1 %v13230_v51  ;;  %v1791_v54 = vrot.slane %v1790_v16, 1  ;;  %v1921_v33 = vsel %vm762_vm3, %v1708_v45, %v1920_v38  ;;  %9108 = vpow2.f32 %v3229_v55  ;;  %v15436_v19 = vld [vmem:[#allocation36_spill] sm:$0xff]  ;;  %v3344_v35 = vadd.f32 %v13115_v49, %v15438_v20  ;;  %v8362_v50 = vld [vmem:[%s14184_s4 + $0x660] ss:$24 sps:$4 sm:$0xff]   ;;  %v8373_v30 = vld [vmem:[%s14184_s4 + $0x69c] ss:$24 sps:$4 sm:$0xff]  }
 0x2e7   :  { %5633 = vmatpush1.bf16.msra.mxu0 %v8350_v1  ;;  %v1832_v47 = vadd.f32 %v1831_v23, %v1830_v41  ;;  %5762 = vmatpush1.bf16.msra.mxu1 %v8353_v12  ;;  %v9101_v43 = vpop.eup %9100  ;;  %v1750_v9 = vadd.f32 %v1749_v25, %v1748_v53  ;;  %9110 = vpow2.f32 %v3241_v15  ;;  %v3302_v24 = vadd.f32 %v15437_v13, %v15436_v19  ;;  %v15440_v12 = vld [vmem:[#allocation144_spill] sm:$0xff]  ;;  %v8371_v45 = vld [vmem:[%s14184_s4 + $0x698] ss:$24 sps:$4 sm:$0xff]  }
 0x2e8   :  { %5634 = vmatprep.subr.bf16.mxu0 %v8358_v46  ;;  %5763 = vmatprep.subr.bf16.mxu1 %v8361_v8  ;;  %v1792_v3 = vadd.f32 %v1791_v54, %v1790_v16  ;;  %9112 = vpow2.f32 %v3253_v60  ;;  %v3386_v21 = vadd.f32 %v13141_v48, %v13136_v36  ;;  %v3345_v2 = vrot.slane %v3344_v35, 4  ;;  %v8365_v36 = vld [vmem:[%s14184_s4 + $0x668] ss:$24 sps:$4 sm:$0xff]   ;;  %v8379_v54 = vld [vmem:[%s14184_s4 + $0x6cc] ss:$24 sps:$4 sm:$0xff]  }
 0x2e9   :  { %v1833_v11 = vrot.slane %v1832_v47, 1  ;;  %v9103_v7 = vpop.eup %9102  ;;  %v1922_v52 = vsel %vm764_vm4, %v1750_v9, %v1921_v33  ;;  %9114 = vpow2.f32 %v3265_v59  ;;  %v3303_v49 = vrot.slane %v3302_v24, 4  ;;  %v8368_v8 = vld [vmem:[%s14184_s4 + $0x690] ss:$24 sps:$4 sm:$0xff]   ;;  %v15442_v16 = vld [vmem:[#allocation167_spill] sm:$0xff] }
 0x2ea   :  { %9116 = vpow2.f32 %v15439_v62  ;;  %v1923_v39 = vsel %vm766_vm5, %v1792_v3, %v1922_v52  ;;  %v3387_v29 = vrot.slane %v3386_v21, 4  ;;  %v3428_v57 = vadd.f32 %v9099_v4, %v9097_v27  ;;  %v8376_v59 = vld [vmem:[%s14184_s4 + $0x6c4] ss:$24 sps:$4 sm:$0xff]  }
 0x2eb   :  { %5635 = vmatpush1.bf16.msra.mxu0 %v8356_v10  ;;  %5764 = vmatpush1.bf16.msra.mxu1 %v8359_v5  ;;  %v9105_v48 = vpop.eup %9104  ;;  %v2601_v34 = vmul.f32 1.442695, %v2590_v17  ;;  %v3304_v37 = vadd.f32 %v3303_v49, %v3302_v24  ;;  %v3346_v1 = vadd.f32 %v3345_v2, %v3344_v35  ;;  %v3470_v6 = vadd.f32 %v9103_v7, %v9101_v43  ;;  %v15443_v43 = vld [vmem:[#allocation164_spill] sm:$0xff]  ;;  %v15444_v35 = vld [vmem:[#allocation242_spill] sm:$0xff] }
 0x2ec   :  { %5636 = vmatprep.subr.bf16.mxu0 %v8364_v0  ;;  %5765 = vmatprep.subr.bf16.mxu1 %v8367_v32  ;;  %9118 = vpow2.f32 %v15440_v12  ;;  %v1834_v18 = vadd.f32 %v1833_v11, %v1832_v47  ;;  %v3388_v31 = vadd.f32 %v3387_v29, %v3386_v21  ;;  %v3429_v41 = vrot.slane %v3428_v57, 4  ;;  %v15445_v0 = vld [vmem:[#allocation195_spill] sm:$0xff] }
 0x2ed   :  { %v13275_v17 = vmul.f32 0.0, %v13166_v44  ;;  %v3305_v38 = vrot.slane %v3304_v37, 2  ;;  %v3347_v46 = vrot.slane %v3346_v1, 2  ;;  %v3471_v27 = vrot.slane %v3470_v6, 4  ;;  %v15441_v44 = vld [vmem:[#allocation240_spill] sm:$0xff] }
 0x2ee   :  { %v13278_v53 = vsel %vm768_vm6, %v1834_v18, %v1923_v39  ;;  %v3389_v42 = vrot.slane %v3388_v31, 2  ;;  %v3430_v55 = vadd.f32 %v3429_v41, %v3428_v57  ;;  %v1287_v23 = vsub.f32 %v15442_v16, %v15441_v44  ;;  %v9107_v15 = vpop.eup %9106  ;;  %v8374_v49 = vld [vmem:[%s14184_s4 + $0x6c0] ss:$24 sps:$4 sm:$0xff]   ;;  %v8394_v16 = vld [vmem:[%s14184_s4 + $0x754] ss:$24 sps:$4 sm:$0xff]  }
 0x2ef   :  { %5637 = vmatpush1.bf16.msra.mxu0 %v8362_v50  ;;  %5766 = vmatpush1.bf16.msra.mxu1 %v8365_v36  ;;  %9120 = vpow2.f32 %v2601_v34  ;;  %v3306_v4 = vadd.f32 %v3305_v38, %v3304_v37  ;;  %v3348_v25 = vadd.f32 %v3347_v46, %v3346_v1  ;;  %v3472_v60 = vadd.f32 %v3471_v27, %v3470_v6  ;;  %v8377_v2 = vld [vmem:[%s14184_s4 + $0x6c8] ss:$24 sps:$4 sm:$0xff]   ;;  %v8382_v50 = vld [vmem:[%s14184_s4 + $0x6f4] ss:$24 sps:$4 sm:$0xff]   ;;  %v15449_v27 = vld [vmem:[#allocation186_spill] sm:$0xff] }
 0x2f0   :  { %5638 = vmatprep.subr.bf16.mxu0 %v8370_v40  ;;  %5767 = vmatprep.subr.bf16.mxu1 %v8373_v30  ;;  %v9109_v47 = vpop.eup %9108  ;;  %v3390_v33 = vadd.f32 %v3389_v42, %v3388_v31  ;;  %v3431_v10 = vrot.slane %v3430_v55, 2  ;;  %v3512_v5 = vadd.f32 %v9107_v15, %v9105_v48  ;;  %v1293_v9 = vsub.f32 %v15443_v43, %v15441_v44  ;;  %v8385_v36 = vld [vmem:[%s14184_s4 + $0x6fc] ss:$24 sps:$4 sm:$0xff]   ;;  %v8380_v46 = vld [vmem:[%s14184_s4 + $0x6f0] ss:$24 sps:$4 sm:$0xff]  }
 0x2f1   :  { %v9111_v19 = vpop.eup %9110  ;;  %v3307_v13 = vrot.slane %v3306_v4, 1  ;;  %v3349_v24 = vrot.slane %v3348_v25, 1  ;;  %v3473_v20 = vrot.slane %v3472_v60, 2  ;;  %v1299_v32 = vsub.f32 %v15445_v0, %v15444_v35  ;;  %v15446_v48 = vld [vmem:[#allocation142_spill] sm:$0xff]  ;;  %v15447_v34 = vld [vmem:[#allocation237_spill] sm:$0xff] }
 0x2f2   :  { %v9113_v3 = vpop.eup %9112  ;;  %v3391_v11 = vrot.slane %v3390_v33, 1  ;;  %v3432_v21 = vadd.f32 %v3431_v10, %v3430_v55  ;;  %v3513_v7 = vrot.slane %v3512_v5, 4  ;;  %v3554_v52 = vadd.f32 %v9111_v19, %v9109_v47  ;;  %v8391_v47 = vld [vmem:[%s14184_s4 + $0x72c] ss:$24 sps:$4 sm:$0xff]   ;;  %v8389_v44 = vld [vmem:[%s14184_s4 + $0x728] ss:$24 sps:$4 sm:$0xff]  }
 0x2f3   :  { %5639 = vmatpush1.bf16.msra.mxu0 %v8368_v8  ;;  %5768 = vmatpush1.bf16.msra.mxu1 %v8371_v45  ;;  %v9115_v62 = vpop.eup %9114  ;;  %v3308_v39 = vadd.f32 %v3307_v13, %v3306_v4  ;;  %v3350_v29 = vadd.f32 %v3349_v24, %v3348_v25  ;;  %v3474_v57 = vadd.f32 %v3473_v20, %v3472_v60  ;;  %v8383_v25 = vld [vmem:[%s14184_s4 + $0x6f8] ss:$24 sps:$4 sm:$0xff]   ;;  %v8388_v60 = vld [vmem:[%s14184_s4 + $0x724] ss:$24 sps:$4 sm:$0xff]   ;;  %v1459_v24 = vmul.f32 1.442695, %v1287_v23 }
 0x2f4   :  { %5640 = vmatprep.subr.bf16.mxu0 %v8376_v59  ;;  %5769 = vmatprep.subr.bf16.mxu1 %v8379_v54  ;;  %v15448_v37 = vsub.f32 %v15446_v48, %v15447_v34  ;;  %v13313_v6 = vpop.eup %9116  ;;  %v3392_v40 = vadd.f32 %v3391_v11, %v3390_v33  ;;  %v3433_v30 = vrot.slane %v3432_v21, 1  ;;  %v3514_v12 = vadd.f32 %v3513_v7, %v3512_v5  ;;  %v15450_v33 = vld [vmem:[#allocation139_spill] sm:$0xff]  ;;  %v8395_v0 = vld [vmem:[%s14184_s4 + $0x758] ss:$24 sps:$4 sm:$0xff]  }
 0x2f5   :  { %v3555_v18 = vrot.slane %v3554_v52, 4  ;;  %v3475_v31 = vrot.slane %v3474_v57, 1  ;;  %v3596_v41 = vadd.f32 %v9115_v62, %v9113_v3  ;;  %v3686_v38 = vsel %vm756_vm0, %v3350_v29, %v3308_v39  ;;  %v15454_v62 = vld [vmem:[#allocation213_spill] sm:$0xff] }
 0x2f6   :  { %v1435_v1 = vmul.f32 1.442695, %v15448_v37  ;;  %v1305_v42 = vsub.f32 %v15449_v27, %v15444_v35  ;;  %v13321_v55 = vpop.eup %9118  ;;  %v3434_v8 = vadd.f32 %v3433_v30, %v3432_v21  ;;  %v3515_v45 = vrot.slane %v3514_v12, 2  ;;  %v8386_v21 = vld [vmem:[%s14184_s4 + $0x720] ss:$24 sps:$4 sm:$0xff]  }
 0x2f7   :  { %v3556_v15 = vadd.f32 %v3555_v18, %v3554_v52  ;;  %v3687_v4 = vsel %vm758_vm1, %v3392_v40, %v3686_v38  ;;  %5641 = vmatpush1.bf16.msra.mxu0 %v8374_v49  ;;  %5770 = vmatpush1.bf16.msra.mxu1 %v8377_v2  ;;  %v3476_v59 = vadd.f32 %v3475_v31, %v3474_v57  ;;  %v3597_v54 = vrot.slane %v3596_v41, 4  ;;  %v15452_v52 = vld [vmem:[#allocation84_spill] sm:$0xff]  ;;  %v15453_v49 = vld [vmem:[#allocation153_spill] sm:$0xff]  ;;  %v15458_v30 = vld [vmem:[#allocation15_spill] sm:$0xff] }
 0x2f8   :  { %5642 = vmatprep.subr.bf16.mxu0 %v8382_v50  ;;  %5771 = vmatprep.subr.bf16.mxu1 %v8385_v36  ;;  %9122 = vpow2.f32 %v1435_v1  ;;  %v15451_v10 = vsub.f32 %v15450_v33, %v15447_v34  ;;  %v3516_v43 = vadd.f32 %v3515_v45, %v3514_v12  ;;  %v3688_v13 = vsel %vm760_vm2, %v3434_v8, %v3687_v4  ;;  %v8397_v57 = vld [vmem:[%s14184_s4 + $0x75c] ss:$24 sps:$4 sm:$0xff]   ;;  %v15455_v1 = vld [vmem:[#allocation28_spill] sm:$0xff] }
 0x2f9   :  { %v3557_v19 = vrot.slane %v3556_v15, 2  ;;  %v9121_v20 = vpop.eup %9120  ;;  %v3598_v3 = vadd.f32 %v3597_v54, %v3596_v41  ;;  %v3689_v11 = vsel %vm762_vm3, %v3476_v59, %v3688_v13  ;;  %v1471_v7 = vmul.f32 1.442695, %v1293_v9  ;;  %v15457_v40 = vld [vmem:[#allocation133_spill] sm:$0xff]  ;;  %v15459_v41 = vld [vmem:[#allocation20_spill] sm:$0xff] }
 0x2fa   :  { %v1447_v5 = vmul.f32 1.442695, %v15451_v10  ;;  %v3049_v2 = vsub.f32 %v15453_v49, %v15452_v52  ;;  %v3517_v39 = vrot.slane %v3516_v43, 1  ;;  %v1936_v23 = vadd.f32 %v13278_v53, %v13275_v17  ;;  %v15456_v17 = vld [vmem:[#allocation9_spill] sm:$0xff]  ;;  %v15460_v38 = vld [vmem:[#allocation56_spill] sm:$0xff] }
 0x2fb   :  { %v3558_v29 = vadd.f32 %v3557_v19, %v3556_v15  ;;  %5643 = vmatpush1.bf16.msra.mxu0 %v8380_v46  ;;  %5772 = vmatpush1.bf16.msra.mxu1 %v8383_v25  ;;  %v3599_v9 = vrot.slane %v3598_v3, 2  ;;  %v1483_v50 = vmul.f32 1.442695, %v1299_v32  ;;  %v1495_v34 = vmul.f32 1.442695, %v1305_v42  ;;  %v15461_v15 = vld [vmem:[#allocation61_spill] sm:$0xff] }
 0x2fc   :  { %9124 = vpow2.f32 %v1447_v5  ;;  %5644 = vmatprep.subr.bf16.mxu0 %v8388_v60  ;;  %5773 = vmatprep.subr.bf16.mxu1 %v8391_v47  ;;  %v3518_v36 = vadd.f32 %v3517_v39, %v3516_v43  ;;  %v1527_v53 = vadd.f32 %v15456_v17, %v15455_v1  ;;  %v1569_v12 = vadd.f32 %v15458_v30, %v15457_v40  ;;  %v8392_v35 = vld [vmem:[%s14184_s4 + $0x750] ss:$24 sps:$4 sm:$0xff]   ;;  %v8400_v32 = vld [vmem:[%s14184_s4 + $0x784] ss:$24 sps:$4 sm:$0xff]  }
 0x2fd   :  { %9126 = vpow2.f32 %v15454_v62  ;;  %v3559_v48 = vrot.slane %v3558_v29, 1  ;;  %v3600_v37 = vadd.f32 %v3599_v9, %v3598_v3  ;;  %v1611_v46 = vadd.f32 %v15460_v38, %v15459_v41  ;;  %v8403_v42 = vld [vmem:[%s14184_s4 + $0x78c] ss:$24 sps:$4 sm:$0xff]   ;;  %v15462_v4 = vld [vmem:[#allocation85_spill] sm:$0xff]  ;;  %v15464_v47 = vld [vmem:[#allocation86_spill] sm:$0xff] }
 0x2fe   :  { %9128 = vpow2.f32 %v1459_v24  ;;  %v3690_v31 = vsel %vm764_vm4, %v3518_v36, %v3689_v11  ;;  %v1528_v8 = vrot.slane %v1527_v53, 4  ;;  %v1570_v45 = vrot.slane %v1569_v12, 4  ;;  %v15463_v54 = vld [vmem:[#allocation89_spill] sm:$0xff]  ;;  %v15465_v24 = vld [vmem:[#allocation38_spill] sm:$0xff]  ;;  %v15466_v1 = vld [vmem:[#allocation39_spill] sm:$0xff] }
 0x2ff   :  { %9130 = vpow2.f32 %v1471_v7  ;;  %v3560_v18 = vadd.f32 %v3559_v48, %v3558_v29  ;;  %5645 = vmatpush1.bf16.msra.mxu0 %v8386_v21  ;;  %5774 = vmatpush1.bf16.msra.mxu1 %v8389_v44  ;;  %v3601_v27 = vrot.slane %v3600_v37, 1  ;;  %v1653_v25 = vadd.f32 %v15462_v4, %v15461_v15  ;;  %v8398_v11 = vld [vmem:[%s14184_s4 + $0x780] ss:$24 sps:$4 sm:$0xff]   ;;  %v8409_v44 = vld [vmem:[%s14184_s4 + $0x7bc] ss:$24 sps:$4 sm:$0xff]  }
 0x300   :  { %9132 = vpow2.f32 %v1483_v50  ;;  %5646 = vmatprep.subr.bf16.mxu0 %v8394_v16  ;;  %5775 = vmatprep.subr.bf16.mxu1 %v8397_v57  ;;  %v1612_v59 = vrot.slane %v1611_v46, 4  ;;  %v1695_v33 = vadd.f32 %v15464_v47, %v15463_v54  ;;  %v1529_v43 = vadd.f32 %v1528_v8, %v1527_v53  ;;  %v8401_v21 = vld [vmem:[%s14184_s4 + $0x788] ss:$24 sps:$4 sm:$0xff]   ;;  %v8412_v41 = vld [vmem:[%s14184_s4 + $0x7e4] ss:$24 sps:$4 sm:$0xff]  }
 0x301   :  { %9134 = vpow2.f32 %v1495_v34  ;;  %v3691_v60 = vsel %vm766_vm5, %v3560_v18, %v3690_v31  ;;  %v3602_v5 = vadd.f32 %v3601_v27, %v3600_v37  ;;  %v1571_v19 = vadd.f32 %v1570_v45, %v1569_v12  ;;  %v8404_v12 = vld [vmem:[%s14184_s4 + $0x7b0] ss:$24 sps:$4 sm:$0xff]   ;;  %v8415_v38 = vld [vmem:[%s14184_s4 + $0x7ec] ss:$24 sps:$4 sm:$0xff]  }
 0x302   :  { %9136 = vlog2.f32 %v1936_v23  ;;  %v9123_v10 = vpop.eup %9122  ;;  %v1654_v13 = vrot.slane %v1653_v25, 4  ;;  %v2614_v3 = vmul.f32 0.0, %v9121_v20  ;;  %v1613_v7 = vadd.f32 %v1612_v59, %v1611_v46  ;;  %v8406_v20 = vld [vmem:[%s14184_s4 + $0x7b4] ss:$24 sps:$4 sm:$0xff]   ;;  %v8407_v18 = vld [vmem:[%s14184_s4 + $0x7b8] ss:$24 sps:$4 sm:$0xff]  }
 0x303   :  { %9138 = vpow2.f32 %v15465_v24  ;;  %5647 = vmatpush1.bf16.msra.mxu0 %v8392_v35  ;;  %5776 = vmatpush1.bf16.msra.mxu1 %v8395_v0  ;;  %v1696_v62 = vrot.slane %v1695_v33, 4  ;;  %v3692_v29 = vsel %vm768_vm6, %v3602_v5, %v3691_v60  ;;  %v1530_v16 = vrot.slane %v1529_v43, 2  ;;  %v15468_v60 = vld [vmem:[#allocation180_spill] sm:$0xff]  ;;  %v8410_v5 = vld [vmem:[%s14184_s4 + $0x7e0] ss:$24 sps:$4 sm:$0xff]  }
 0x304   :  { %5648 = vmatprep.subr.bf16.mxu0 %v8400_v32  ;;  %5777 = vmatprep.subr.bf16.mxu1 %v8403_v42  ;;  %v1572_v23 = vrot.slane %v1571_v19, 2  ;;  %v1655_v9 = vadd.f32 %v1654_v13, %v1653_v25  ;;  %v3704_v50 = vadd.f32 %v3692_v29, %v2614_v3  ;;  %v1614_v36 = vrot.slane %v1613_v7, 2  ;;  %v15467_v25 = vld [vmem:[#allocation112_spill] sm:$0xff] }
 0x305   :  { %v1697_v48 = vadd.f32 %v1696_v62, %v1695_v33  ;;  %9140 = vpow2.f32 %v15466_v1  ;;  %v1531_v17 = vadd.f32 %v1530_v16, %v1529_v43  ;;  %v8413_v43 = vld [vmem:[%s14184_s4 + $0x7e8] ss:$24 sps:$4 sm:$0xff]  }
 0x306   :  { %v9125_v39 = vpop.eup %9124  ;;  %v1573_v53 = vadd.f32 %v1572_v23, %v1571_v19  ;;  %v1656_v40 = vrot.slane %v1655_v9, 2  ;;  %9142 = vlog2.f32 %v3704_v50  ;;  %v1615_v31 = vadd.f32 %v1614_v36, %v1613_v7  ;;  %v8425_v49 = vld [vmem:[%s14184_s4 + $0x848] ss:$24 sps:$4 sm:$0xff]  }
 0x307   :  { %v13399_v57 = vpop.eup %9126  ;;  %v1737_v34 = vadd.f32 %v9125_v39, %v9123_v10  ;;  %5649 = vmatpush1.bf16.msra.mxu0 %v8398_v11  ;;  %5778 = vmatpush1.bf16.msra.mxu1 %v8401_v21  ;;  %v1698_v35 = vrot.slane %v1697_v48, 2  ;;  %9144 = vpow2.f32 %v13181_v56  ;;  %v1532_v46 = vrot.slane %v1531_v17, 1  ;;  %v8418_v11 = vld [vmem:[%s14184_s4 + $0x814] ss:$24 sps:$4 sm:$0xff]   ;;  %v15469_v39 = vld [vmem:[#allocation178_spill] sm:$0xff] }
 0x308   :  { %v9129_v37 = vpop.eup %9128  ;;  %5650 = vmatprep.subr.bf16.mxu0 %v8406_v20  ;;  %5779 = vmatprep.subr.bf16.mxu1 %v8409_v44  ;;  %v1574_v27 = vrot.slane %v1573_v53, 1  ;;  %v1657_v42 = vadd.f32 %v1656_v40, %v1655_v9  ;;  %v1616_v45 = vrot.slane %v1615_v31, 1  ;;  %v3055_v56 = vsub.f32 %v15468_v60, %v15467_v25  ;;  %v8421_v21 = vld [vmem:[%s14184_s4 + $0x81c] ss:$24 sps:$4 sm:$0xff]   ;;  %v15470_v20 = vld [vmem:[#allocation155_spill] sm:$0xff] }
 0x309   :  { %v9131_v30 = vpop.eup %9130  ;;  %v1738_v0 = vrot.slane %v1737_v34, 4  ;;  %v1699_v15 = vadd.f32 %v1698_v35, %v1697_v48  ;;  %v1533_v59 = vadd.f32 %v1532_v46, %v1531_v17  ;;  %v3061_v29 = vsub.f32 %v15469_v39, %v15467_v25  ;;  %v8416_v9 = vld [vmem:[%s14184_s4 + $0x810] ss:$24 sps:$4 sm:$0xff]   ;;  %v8427_v35 = vld [vmem:[%s14184_s4 + $0x84c] ss:$24 sps:$4 sm:$0xff]  }
 0x30a   :  { %v9133_v32 = vpop.eup %9132  ;;  %v1575_v54 = vadd.f32 %v1574_v27, %v1573_v53  ;;  %v1658_v47 = vrot.slane %v1657_v42, 1  ;;  %v1779_v33 = vadd.f32 %v9131_v30, %v9129_v37  ;;  %v1617_v19 = vadd.f32 %v1616_v45, %v1615_v31  ;;  %v8424_v37 = vld [vmem:[%s14184_s4 + $0x844] ss:$24 sps:$4 sm:$0xff]   ;;  %v15472_v53 = vld [vmem:[#allocation108_spill] sm:$0xff]  ;;  %v15473_v40 = vld [vmem:[#allocation205_spill] sm:$0xff] }
 0x30b   :  { %v9135_v8 = vpop.eup %9134  ;;  %v1739_v4 = vadd.f32 %v1738_v0, %v1737_v34  ;;  %5651 = vmatpush1.bf16.msra.mxu0 %v8404_v12  ;;  %5780 = vmatpush1.bf16.msra.mxu1 %v8407_v18  ;;  %v1700_v13 = vrot.slane %v1699_v15, 1  ;;  %v15471_v44 = vsub.f32 %v15470_v20, %v15452_v52  ;;  %v8419_v34 = vld [vmem:[%s14184_s4 + $0x818] ss:$24 sps:$4 sm:$0xff]   ;;  %v3067_v30 = vsub.f32 %v15473_v40, %v15472_v53  ;;  %v15475_v45 = vld [vmem:[#allocation207_spill] sm:$0xff] }
 0x30c   :  { %v9137_v10 = vpop.eup %9136  ;;  %v1821_v3 = vadd.f32 %v9135_v8, %v9133_v32  ;;  %5652 = vmatprep.subr.bf16.mxu0 %v8412_v41  ;;  %5781 = vmatprep.subr.bf16.mxu1 %v8415_v38  ;;  %v1659_v7 = vadd.f32 %v1658_v47, %v1657_v42  ;;  %v1911_v62 = vsel %vm756_vm0, %v1575_v54, %v1533_v59  ;;  %v1780_v1 = vrot.slane %v1779_v33, 4  ;;  %v15474_v12 = vld [vmem:[#allocation202_spill] sm:$0xff] }
 0x30d   :  { %v1740_v24 = vrot.slane %v1739_v4, 2  ;;  %v3203_v16 = vmul.f32 1.442695, %v15471_v44  ;;  %v13435_v23 = vpop.eup %9138  ;;  %v1701_v50 = vadd.f32 %v1700_v13, %v1699_v15  ;;  %v1912_v48 = vsel %vm758_vm1, %v1617_v19, %v1911_v62  ;;  %v8422_v52 = vld [vmem:[%s14184_s4 + $0x840] ss:$24 sps:$4 sm:$0xff]  }
 0x30e   :  { %v1913_v17 = vsel %vm760_vm2, %v1659_v7, %v1912_v48  ;;  %v3073_v18 = vsub.f32 %v15474_v12, %v15472_v53  ;;  %v3755_v31 = vmul.f32 0.6931472, %v9137_v10  ;;  %v1822_v32 = vrot.slane %v1821_v3, 4  ;;  %v15478_v19 = vld [vmem:[#allocation71_spill] sm:$0xff]  ;;  %v15479_v13 = vld [vmem:[#allocation102_spill] sm:$0xff]  ;;  %v15480_v7 = vld [vmem:[#allocation216_spill] sm:$0xff] }
 0x30f   :  { %v1741_v36 = vadd.f32 %v1740_v24, %v1739_v4  ;;  %5653 = vmatpush1.bf16.msra.mxu0 %v8410_v5  ;;  %5782 = vmatpush1.bf16.msra.mxu1 %v8413_v43  ;;  %v1914_v41 = vsel %vm762_vm3, %v1701_v50, %v1913_v17  ;;  %v9141_v38 = vpop.eup %9140  ;;  %9146 = vpow2.f32 %v3203_v16  ;;  %v3215_v46 = vmul.f32 1.442695, %v3049_v2  ;;  %v8431_v16 = vld [vmem:[%s14184_s4 + $0x878] ss:$24 sps:$4 sm:$0xff]   ;;  %v8439_v48 = vld [vmem:[%s14184_s4 + $0x8ac] ss:$24 sps:$4 sm:$0xff]  }
 0x310   :  { %5654 = vmatprep.subr.bf16.mxu0 %v8418_v11  ;;  %5783 = vmatprep.subr.bf16.mxu1 %v8421_v21  ;;  %v3227_v27 = vmul.f32 1.442695, %v3055_v56  ;;  %v3239_v42 = vmul.f32 1.442695, %v3061_v29  ;;  %v9143_v8 = vpop.eup %9142  ;;  %v821_v15 = vsub.f32 -inf, %v15475_v45  ;;  %v1781_v54 = vadd.f32 %v1780_v1, %v1779_v33  ;;  %v15476_v56 = vld [vmem:[#allocation225_spill] sm:$0xff] }
 0x311   :  { %v1742_v0 = vrot.slane %v1741_v36, 1  ;;  %v3251_v25 = vmul.f32 1.442695, %v3067_v30  ;;  %v9145_v60 = vpop.eup %9144  ;;  %v3767_v59 = vmul.f32 0.6931472, %v9143_v8  ;;  %9148 = vpow2.f32 %v3215_v46  ;;  %v15477_v33 = vld [vmem:[#allocation44_spill] sm:$0xff] }
 0x312   :  { %v3263_v47 = vmul.f32 1.442695, %v3073_v18  ;;  %v3773_v10 = vadd.f32 %v3755_v31, %v15396_v58  ;;  %9150 = vpow2.f32 %v3227_v27  ;;  %v3295_v5 = vadd.f32 %v15477_v33, %v15476_v56  ;;  %v8430_v11 = vld [vmem:[%s14184_s4 + $0x874] ss:$24 sps:$4 sm:$0xff]   ;;  %v8428_v29 = vld [vmem:[%s14184_s4 + $0x870] ss:$24 sps:$4 sm:$0xff]  }
 0x313   :  { %v1743_v4 = vadd.f32 %v1742_v0, %v1741_v36  ;;  %5655 = vmatpush1.bf16.msra.mxu0 %v8416_v9  ;;  %5784 = vmatpush1.bf16.msra.mxu1 %v8419_v34  ;;  %v3779_v43 = vadd.f32 %v3767_v59, %v15423_v61  ;;  %v1823_v58 = vadd.f32 %v1822_v32, %v1821_v3  ;;  %9152 = vpow2.f32 %v3239_v42  ;;  %v8433_v21 = vld [vmem:[%s14184_s4 + $0x87c] ss:$24 sps:$4 sm:$0xff]   ;;  %v8434_v31 = vld [vmem:[%s14184_s4 + $0x8a0] ss:$24 sps:$4 sm:$0xff]   ;;  %v8440_v33 = vld [vmem:[%s14184_s4 + $0x8d0] ss:$24 sps:$4 sm:$0xff]  }
 0x314   :  { %5656 = vmatprep.subr.bf16.mxu0 %v8424_v37  ;;  %5785 = vmatprep.subr.bf16.mxu1 %v8427_v35  ;;  %v3337_v24 = vadd.f32 %v15479_v13, %v15478_v19  ;;  %v2589_v62 = vsub.f32 -inf, %v15480_v7  ;;  %9154 = vpow2.f32 %v3251_v25  ;;  %v3296_v39 = vrot.slane %v3295_v5, 4  ;;  %v8437_v35 = vld [vmem:[%s14184_s4 + $0x8a8] ss:$24 sps:$4 sm:$0xff]   ;;  %v8442_v46 = vld [vmem:[%s14184_s4 + $0x8d4] ss:$24 sps:$4 sm:$0xff]  }
 0x315   :  { %v13468_v2 = vsel %vm764_vm4, %v1743_v4, %v1914_v41  ;;  %v3379_v61 = vadd.f32 %v13321_v55, %v13313_v6  ;;  %v13484_v3 = vpack.c.bf16 %v3779_v43, %v3773_v10  ;;  %v1782_v20 = vrot.slane %v1781_v54, 2  ;;  %v8436_v55 = vld [vmem:[%s14184_s4 + $0x8a4] ss:$24 sps:$4 sm:$0xff]  }
 0x316   :  { %9156 = vpow2.f32 %v3263_v47  ;;  %v3338_v44 = vrot.slane %v3337_v24, 4  ;;  %v831_v9 = vmul.f32 1.442695, %v821_v15  ;;  %v3297_v50 = vadd.f32 %v3296_v39, %v3295_v5  ;;  %v8445_v27 = vld [vmem:[%s14184_s4 + $0x8dc] ss:$24 sps:$4 sm:$0xff]  }
 0x317   :  { %5657 = vmatpush1.bf16.msra.mxu0 %v8422_v52  ;;  %5786 = vmatpush1.bf16.msra.mxu1 %v8425_v49  ;;  %v3380_v36 = vrot.slane %v3379_v61, 4  ;;  %v3421_v6 = vadd.f32 %v13435_v23, %v13399_v57  ;;  %v1824_v34 = vrot.slane %v1823_v58, 2  ;;  %v3463_v1 = vadd.f32 %v9145_v60, %v9141_v38  ;;  %v8443_v5 = vld [vmem:[%s14184_s4 + $0x8d8] ss:$24 sps:$4 sm:$0xff]  }
 0x318   :  { %5664 = vmatprep.mubr.bf16.mxu0 %v13484_v3  ;;  %5793 = vmatprep.mubr.bf16.mxu1 %v13484_v3  ;;  %v3339_v37 = vadd.f32 %v3338_v44, %v3337_v24  ;;  %v3298_v17 = vrot.slane %v3297_v50, 2  ;;  %v1783_v40 = vadd.f32 %v1782_v20, %v1781_v54  ;;  %v2599_v30 = vmul.f32 1.442695, %v2589_v62 }
 0x319   :  { %5658 = vmatprep.subr.bf16.mxu0 %v8430_v11  ;;  %5787 = vmatprep.subr.bf16.mxu1 %v8433_v21  ;;  %v3381_v53 = vadd.f32 %v3380_v36, %v3379_v61  ;;  %v3422_v57 = vrot.slane %v3421_v6, 4  ;;  %v9147_v23 = vpop.eup %9146  ;;  %v3464_v18 = vrot.slane %v3463_v1, 4  ;;  %9158 = vpow2.f32 %v831_v9  ;;  %v8448_v61 = vld [vmem:[%s14184_s4 + $0x14] ss:$24 sps:$4 sm:$0xff]  }
 0x31a   :  { %v3340_v12 = vrot.slane %v3339_v37, 2  ;;  %v3299_v0 = vadd.f32 %v3298_v17, %v3297_v50  ;;  %v1825_v42 = vadd.f32 %v1824_v34, %v1823_v58  ;;  %v1784_v10 = vrot.slane %v1783_v40, 1 }
 0x31b   :  { %5659 = vmatpush1.bf16.msra.mxu0 %v8428_v29  ;;  %5788 = vmatpush1.bf16.msra.mxu1 %v8431_v16  ;;  %v3382_v32 = vrot.slane %v3381_v53, 2  ;;  %v3423_v41 = vadd.f32 %v3422_v57, %v3421_v6  ;;  %v9149_v38 = vpop.eup %9148  ;;  %v3465_v15 = vadd.f32 %v3464_v18, %v3463_v1  ;;  %9160 = vpow2.f32 %v2599_v30 }
 0x31c   :  { %5660 = vmatprep.subr.bf16.mxu0 %v8436_v55  ;;  %5789 = vmatprep.subr.bf16.mxu1 %v8439_v48  ;;  %v3341_v8 = vadd.f32 %v3340_v12, %v3339_v37  ;;  %v9151_v4 = vpop.eup %9150  ;;  %v3300_v25 = vrot.slane %v3299_v0, 1  ;;  %v3505_v54 = vadd.f32 %v9149_v38, %v9147_v23  ;;  %v1826_v11 = vrot.slane %v1825_v42, 1 }
 0x31d   :  { %v3383_v60 = vadd.f32 %v3382_v32, %v3381_v53  ;;  %v3424_v59 = vrot.slane %v3423_v41, 2  ;;  %v9153_v47 = vpop.eup %9152  ;;  %v3466_v49 = vrot.slane %v3465_v15, 2  ;;  %v1785_v9 = vadd.f32 %v1784_v10, %v1783_v40 }
 0x31e   :  { %v3342_v52 = vrot.slane %v3341_v8, 1  ;;  %v9155_v56 = vpop.eup %9154  ;;  %v3301_v43 = vadd.f32 %v3300_v25, %v3299_v0  ;;  %v3506_v13 = vrot.slane %v3505_v54, 4  ;;  %v3547_v39 = vadd.f32 %v9153_v47, %v9151_v4 }
 0x31f   :  { %5661 = vmatpush1.bf16.msra.mxu0 %v8434_v31  ;;  %5790 = vmatpush1.bf16.msra.mxu1 %v8437_v35  ;;  %v3384_v58 = vrot.slane %v3383_v60, 1  ;;  %v3425_v19 = vadd.f32 %v3424_v59, %v3423_v41  ;;  %v3467_v62 = vadd.f32 %v3466_v49, %v3465_v15  ;;  %v1916_v1 = vsel %vm766_vm5, %v1785_v9, %v13468_v2  ;;  %v8472_v9 = vld [vmem:[%s14184_s4 + $0x194] ss:$24 sps:$4 sm:$0xff]  }
 0x320   :  { %v9157_v24 = vpop.eup %9156  ;;  %5662 = vmatprep.subr.bf16.mxu0 %v8442_v46  ;;  %5791 = vmatprep.subr.bf16.mxu1 %v8445_v27  ;;  %v3343_v21 = vadd.f32 %v3342_v52, %v3341_v8  ;;  %v3507_v44 = vadd.f32 %v3506_v13, %v3505_v54  ;;  %v3548_v36 = vrot.slane %v3547_v39, 4  ;;  %v1827_v23 = vadd.f32 %v1826_v11, %v1825_v42  ;;  %v8451_v13 = vld [vmem:[%s14184_s4 + $0x44] ss:$24 sps:$4 sm:$0xff]  }
 0x321   :  { %v3385_v29 = vadd.f32 %v3384_v58, %v3383_v60  ;;  %v3426_v20 = vrot.slane %v3425_v19, 1  ;;  %v3589_v16 = vadd.f32 %v9157_v24, %v9155_v56  ;;  %v3468_v50 = vrot.slane %v3467_v62, 1  ;;  %v8446_v58 = vld [vmem:[%s14184_s4 + $0x10] ss:$24 sps:$4 sm:$0xff]   ;;  %v8457_v11 = vld [vmem:[%s14184_s4 + $0xa4] ss:$24 sps:$4 sm:$0xff]  }
 0x322   :  { %v3679_v6 = vsel %vm756_vm0, %v3343_v21, %v3301_v43  ;;  %v3508_v48 = vrot.slane %v3507_v44, 2  ;;  %v3549_v53 = vadd.f32 %v3548_v36, %v3547_v39  ;;  %v1917_v35 = vsel %vm768_vm6, %v1827_v23, %v1916_v1  ;;  %v8452_v24 = vld [vmem:[%s14184_s4 + $0x70] ss:$24 sps:$4 sm:$0xff]   ;;  %v8460_v21 = vld [vmem:[%s14184_s4 + $0xd4] ss:$24 sps:$4 sm:$0xff]  }
 0x323   :  { %5663 = vmatpush1.bf16.msra.mxu0 %v8440_v33  ;;  %5792 = vmatpush1.bf16.msra.mxu1 %v8443_v5  ;;  %v3427_v55 = vadd.f32 %v3426_v20, %v3425_v19  ;;  %v3590_v34 = vrot.slane %v3589_v16, 4  ;;  %v3680_v37 = vsel %vm758_vm1, %v3385_v29, %v3679_v6  ;;  %v3469_v17 = vadd.f32 %v3468_v50, %v3467_v62  ;;  %v9159_v57 = vpop.eup %9158  ;;  %v8458_v62 = vld [vmem:[%s14184_s4 + $0xd0] ss:$24 sps:$4 sm:$0xff]   ;;  %v8463_v39 = vld [vmem:[%s14184_s4 + $0x104] ss:$24 sps:$4 sm:$0xff]  }
 0x324   :  { %5804 = vmatprep.subr.bf16.mxu0 %v8448_v61  ;;  %v3509_v40 = vadd.f32 %v3508_v48, %v3507_v44  ;;  %v3550_v18 = vrot.slane %v3549_v53, 2  ;;  %v845_v38 = vmul.f32 0.0, %v9159_v57  ;;  %v8461_v61 = vld [vmem:[%s14184_s4 + $0x100] ss:$24 sps:$4 sm:$0xff]   ;;  %v8466_v29 = vld [vmem:[%s14184_s4 + $0x134] ss:$24 sps:$4 sm:$0xff]  }
 0x325   :  { %v3591_v30 = vadd.f32 %v3590_v34, %v3589_v16  ;;  %v3681_v12 = vsel %vm760_vm2, %v3427_v55, %v3680_v37  ;;  %v9161_v41 = vpop.eup %9160  ;;  %v8464_v20 = vld [vmem:[%s14184_s4 + $0x130] ss:$24 sps:$4 sm:$0xff]   ;;  %v8469_v44 = vld [vmem:[%s14184_s4 + $0x164] ss:$24 sps:$4 sm:$0xff]   ;;  %v8467_v16 = vld [vmem:[%s14184_s4 + $0x160] ss:$24 sps:$4 sm:$0xff]  }
 0x326   :  { %v3682_v31 = vsel %vm762_vm3, %v3469_v17, %v3681_v12  ;;  %v3510_v0 = vrot.slane %v3509_v40, 1  ;;  %v3551_v46 = vadd.f32 %v3550_v18, %v3549_v53  ;;  %v1935_v8 = vadd.f32 %v1917_v35, %v845_v38  ;;  %v8470_v50 = vld [vmem:[%s14184_s4 + $0x190] ss:$24 sps:$4 sm:$0xff]   ;;  %v8475_v36 = vld [vmem:[%s14184_s4 + $0x1c4] ss:$24 sps:$4 sm:$0xff]  }
 0x327   :  { %v3592_v32 = vrot.slane %v3591_v30, 2  ;;  %v2613_v59 = vmul.f32 0.0, %v9161_v41  ;;  %v8473_v6 = vld [vmem:[%s14184_s4 + $0x1c0] ss:$24 sps:$4 sm:$0xff]   ;;  %v8478_v55 = vld [vmem:[%s14184_s4 + $0x1f4] ss:$24 sps:$4 sm:$0xff]  }
 0x328   :  { %v3511_v2 = vadd.f32 %v3510_v0, %v3509_v40  ;;  %v3552_v15 = vrot.slane %v3551_v46, 1  ;;  %9162 = vlog2.f32 %v1935_v8  ;;  %v8476_v48 = vld [vmem:[%s14184_s4 + $0x1f0] ss:$24 sps:$4 sm:$0xff]   ;;  %v8481_v34 = vld [vmem:[%s14184_s4 + $0x224] ss:$24 sps:$4 sm:$0xff]  }
 0x329   :  { %v3593_v27 = vadd.f32 %v3592_v32, %v3591_v30  ;;  %v8479_v37 = vld [vmem:[%s14184_s4 + $0x220] ss:$24 sps:$4 sm:$0xff]   ;;  %v8484_v1 = vld [vmem:[%s14184_s4 + $0x254] ss:$24 sps:$4 sm:$0xff]   ;;  %v8482_v17 = vld [vmem:[%s14184_s4 + $0x250] ss:$24 sps:$4 sm:$0xff]  }
 0x32a   :  { %v3683_v42 = vsel %vm764_vm4, %v3511_v2, %v3682_v31  ;;  %v3553_v25 = vadd.f32 %v3552_v15, %v3551_v46  ;;  %v8487_v53 = vld [vmem:[%s14184_s4 + $0x284] ss:$24 sps:$4 sm:$0xff]   ;;  %v8485_v57 = vld [vmem:[%s14184_s4 + $0x280] ss:$24 sps:$4 sm:$0xff]   ;;  %v8490_v23 = vld [vmem:[%s14184_s4 + $0x2b4] ss:$24 sps:$4 sm:$0xff]  }
 0x32b   :  { %v3594_v4 = vrot.slane %v3593_v27, 1  ;;  %v8488_v40 = vld [vmem:[%s14184_s4 + $0x2b0] ss:$24 sps:$4 sm:$0xff]   ;;  %v8493_v30 = vld [vmem:[%s14184_s4 + $0x2e4] ss:$24 sps:$4 sm:$0xff]  }
 0x32c   :  { %v3684_v54 = vsel %vm766_vm5, %v3553_v25, %v3683_v42  ;;  %v8491_v12 = vld [vmem:[%s14184_s4 + $0x2e0] ss:$24 sps:$4 sm:$0xff]   ;;  %v8496_v35 = vld [vmem:[%s14184_s4 + $0x314] ss:$24 sps:$4 sm:$0xff]   ;;  %v8494_v0 = vld [vmem:[%s14184_s4 + $0x310] ss:$24 sps:$4 sm:$0xff]  }
 0x32d   :  { %v3595_v60 = vadd.f32 %v3594_v4, %v3593_v27  ;;  %v8587_v18 = vld [vmem:[%s14187_s7 + $0x40] sm:$0xff]   ;;  %v8592_v32 = vld [vmem:[%s14187_s7 + $0x48] sm:$0xff]   ;;  %v8595_v46 = vld [vmem:[%s14187_s7 + $0x50] sm:$0xff]  }
 0x32e   :  { %v8588_v31 = vld [vmem:[%s14187_s7] sm:$0xff]   ;;  %7917 = vmatprep.subr.bf16.mxu1 %v8587_v18  ;;  %v8593_v41 = vld [vmem:[%s14187_s7 + $0x8] sm:$0xff]   ;;  %v8597_v27 = vld [vmem:[%s14187_s7 + $0x10] sm:$0xff]  }
 0x32f   :  { %v3685_v47 = vsel %vm768_vm6, %v3595_v60, %v3684_v54  ;;  %v8499_v38 = vld [vmem:[%s14184_s4 + $0x344] ss:$24 sps:$4 sm:$0xff]   ;;  %v8497_v2 = vld [vmem:[%s14184_s4 + $0x340] ss:$24 sps:$4 sm:$0xff]   ;;  %v8607_v54 = vld [vmem:[%s14187_s7 + $0x68] sm:$0xff]  }
 0x330   :  { %v3703_v10 = vadd.f32 %v3685_v47, %v2613_v59  ;;  %v8599_v8 = vld [vmem:[%s14187_s7 + $0x58] sm:$0xff]   ;;  %v8603_v42 = vld [vmem:[%s14187_s7 + $0x60] sm:$0xff]   ;;  %v8508_v59 = vld [vmem:[%s14184_s4 + $0x3d4] ss:$24 sps:$4 sm:$0xff]  }
 0x331   :  { %v8601_v15 = vld [vmem:[%s14187_s7 + $0x18] sm:$0xff]   ;;  %v8605_v60 = vld [vmem:[%s14187_s7 + $0x20] sm:$0xff]   ;;  %v8506_v47 = vld [vmem:[%s14184_s4 + $0x3d0] ss:$24 sps:$4 sm:$0xff]  }
 0x332   :  { %9164 = vlog2.f32 %v3703_v10  ;;  %v9163_v52 = vpop.eup %9162  ;;  %v8505_v4 = vld [vmem:[%s14184_s4 + $0x3a4] ss:$24 sps:$4 sm:$0xff]   ;;  %v8503_v25 = vld [vmem:[%s14184_s4 + $0x3a0] ss:$24 sps:$4 sm:$0xff]   ;;  %v8609_v10 = vld [vmem:[%s14187_s7 + $0x28] sm:$0xff]  }
 0x333   :  { %v3753_v49 = vmul.f32 0.6931472, %v9163_v52  ;;  %v8511_v52 = vld [vmem:[%s14184_s4 + $0x404] ss:$24 sps:$4 sm:$0xff]   ;;  %v8562_v18 = vld [vmem:[%s14184_s4 + $0x734] ss:$24 sps:$4 sm:$0xff]  }
 0x335   :  { %v3772_v5 = vadd.f32 %v3753_v49, %v15475_v45  ;;  %v8449_v45 = vld [vmem:[%s14184_s4 + $0x40] ss:$24 sps:$4 sm:$0xff]   ;;  %v8611_v49 = vld [vmem:[%s14187_s7 + $0x70] sm:$0xff]  }
 0x33c   :  { %v9165_v56 = vpop.eup %9164 }
 0x33d   :  { %v3765_v33 = vmul.f32 0.6931472, %v9165_v56  ;;  %v8509_v56 = vld [vmem:[%s14184_s4 + $0x400] ss:$24 sps:$4 sm:$0xff]  }
 0x33f   :  { %v3778_v43 = vadd.f32 %v3765_v33, %v15480_v7  ;;  %v8454_v7 = vld [vmem:[%s14184_s4 + $0x74] ss:$24 sps:$4 sm:$0xff]  }
 0x340   :  { %v8613_v33 = vld [vmem:[%s14187_s7 + $0x30] sm:$0xff]  }
 0x341   :  { %v13538_v19 = vpack.c.bf16 %v3778_v43, %v3772_v5  ;;  %v8514_v5 = vld [vmem:[%s14184_s4 + $0x434] ss:$24 sps:$4 sm:$0xff]   ;;  %v8512_v43 = vld [vmem:[%s14184_s4 + $0x430] ss:$24 sps:$4 sm:$0xff]  }
 0x343   :  { %5665 = vmatmul.mubr.bf16.vlgmr.msra.gmra.mrb[0].mxu0 %v13538_v19  ;;  %5794 = vmatmul.mubr.bf16.vlgmr.msra.gmra.mrb[0].mxu1 %v13538_v19 }
 0x344   :  { %5805 = vmatpush1.bf16.msra.mxu0 %v8446_v58  ;;  %5836 = vmatprep.mubr.bf16.mxu0 %v12792_v14  ;;  %v8455_v14 = vld [vmem:[%s14184_s4 + $0xa0] ss:$24 sps:$4 sm:$0xff]   ;;  %v8517_v58 = vld [vmem:[%s14184_s4 + $0x464] ss:$24 sps:$4 sm:$0xff]  }
 0x345   :  { %5806 = vmatprep.subr.bf16.mxu0 %v8451_v13  ;;  %7918 = vmatpush3.bf16.msra.mxu1 %v8588_v31  ;;  %v8615_v13 = vld [vmem:[%s14187_s7 + $0x78] sm:$0xff]   ;;  %v8560_v31 = vld [vmem:[%s14184_s4 + $0x730] ss:$24 sps:$4 sm:$0xff]  }
 0x346   :  { %7919 = vmatprep.subr.bf16.mxu1 %v8592_v32  ;;  %v8568_v32 = vld [vmem:[%s14184_s4 + $0x794] ss:$24 sps:$4 sm:$0xff]  }
 0x348   :  { %5807 = vmatpush1.bf16.msra.mxu0 %v8449_v45  ;;  %v8515_v45 = vld [vmem:[%s14184_s4 + $0x460] ss:$24 sps:$4 sm:$0xff]  }
 0x349   :  { %5808 = vmatprep.subr.bf16.mxu0 %v8454_v7  ;;  %7920 = vmatpush3.bf16.msra.mxu1 %v8593_v41  ;;  %v8617_v7 = vld [vmem:[%s14187_s7 + $0x38] sm:$0xff]   ;;  %v8566_v41 = vld [vmem:[%s14184_s4 + $0x790] ss:$24 sps:$4 sm:$0xff]  }
 0x34a   :  { %7921 = vmatprep.subr.bf16.mxu1 %v8595_v46  ;;  %v8569_v46 = vld [vmem:[%s14184_s4 + $0x7c0] ss:$24 sps:$4 sm:$0xff]  }
 0x34c   :  { %5809 = vmatpush1.bf16.msra.mxu0 %v8452_v24  ;;  %v8619_v24 = vld [vmem:[%s14187_s7 + $0xc0] sm:$0xff]  }
 0x34d   :  { %5810 = vmatprep.subr.bf16.mxu0 %v8457_v11  ;;  %7922 = vmatpush3.bf16.msra.mxu1 %v8597_v27  ;;  %v8520_v11 = vld [vmem:[%s14184_s4 + $0x494] ss:$24 sps:$4 sm:$0xff]   ;;  %v8572_v27 = vld [vmem:[%s14184_s4 + $0x7f0] ss:$24 sps:$4 sm:$0xff]  }
 0x34e   :  { %7923 = vmatprep.subr.bf16.mxu1 %v8599_v8  ;;  %v8575_v8 = vld [vmem:[%s14184_s4 + $0x820] ss:$24 sps:$4 sm:$0xff]  }
 0x350   :  { %5811 = vmatpush1.bf16.msra.mxu0 %v8455_v14  ;;  %v8518_v14 = vld [vmem:[%s14184_s4 + $0x490] ss:$24 sps:$4 sm:$0xff]  }
 0x351   :  { %5812 = vmatprep.subr.bf16.mxu0 %v8460_v21  ;;  %7924 = vmatpush3.bf16.msra.mxu1 %v8601_v15  ;;  %v8523_v21 = vld [vmem:[%s14184_s4 + $0x4c4] ss:$24 sps:$4 sm:$0xff]   ;;  %v8578_v15 = vld [vmem:[%s14184_s4 + $0x850] ss:$24 sps:$4 sm:$0xff]  }
 0x352   :  { %7925 = vmatprep.subr.bf16.mxu1 %v8603_v42  ;;  %v8581_v42 = vld [vmem:[%s14184_s4 + $0x880] ss:$24 sps:$4 sm:$0xff]  }
 0x354   :  { %5813 = vmatpush1.bf16.msra.mxu0 %v8458_v62  ;;  %v8521_v62 = vld [vmem:[%s14184_s4 + $0x4c0] ss:$24 sps:$4 sm:$0xff]  }
 0x355   :  { %5814 = vmatprep.subr.bf16.mxu0 %v8463_v39  ;;  %7926 = vmatpush3.bf16.msra.mxu1 %v8605_v60  ;;  %v8526_v39 = vld [vmem:[%s14184_s4 + $0x4f4] ss:$24 sps:$4 sm:$0xff]   ;;  %v8584_v60 = vld [vmem:[%s14184_s4 + $0x8b0] ss:$24 sps:$4 sm:$0xff]  }
 0x356   :  { %7927 = vmatprep.subr.bf16.mxu1 %v8607_v54  ;;  %v8589_v54 = vld [vmem:[%s14184_s4 + $0x8e0] ss:$24 sps:$4 sm:$0xff]  }
 0x358   :  { %5815 = vmatpush1.bf16.msra.mxu0 %v8461_v61  ;;  %v8524_v61 = vld [vmem:[%s14184_s4 + $0x4f0] ss:$24 sps:$4 sm:$0xff]  }
 0x359   :  { %5816 = vmatprep.subr.bf16.mxu0 %v8466_v29  ;;  %7928 = vmatpush3.bf16.msra.mxu1 %v8609_v10  ;;  %v8529_v29 = vld [vmem:[%s14184_s4 + $0x524] ss:$24 sps:$4 sm:$0xff]  }
 0x35a   :  { %7929 = vmatprep.subr.bf16.mxu1 %v8611_v49  ;;  %v8596_v10 = vld [vmem:[#allocation4] sm:$0xff]   ;;  %v8600_v49 = vld [vmem:[#allocation4 + $0x8] sm:$0xff]  }
 0x35c   :  { %5817 = vmatpush1.bf16.msra.mxu0 %v8464_v20  ;;  %v8527_v20 = vld [vmem:[%s14184_s4 + $0x520] ss:$24 sps:$4 sm:$0xff]  }
 0x35d   :  { %5818 = vmatprep.subr.bf16.mxu0 %v8469_v44  ;;  %7930 = vmatpush3.bf16.msra.mxu1 %v8613_v33  ;;  %v8532_v44 = vld [vmem:[%s14184_s4 + $0x554] ss:$24 sps:$4 sm:$0xff]  }
 0x35e   :  { %7931 = vmatprep.subr.bf16.mxu1 %v8615_v13  ;;  %v8604_v33 = vld [vmem:[#allocation4 + $0x10] sm:$0xff]   ;;  %v8612_v13 = vld [vmem:[#allocation4 + $0x20] sm:$0xff]  }
 0x360   :  { %5819 = vmatpush1.bf16.msra.mxu0 %v8467_v16  ;;  %v8530_v16 = vld [vmem:[%s14184_s4 + $0x550] ss:$24 sps:$4 sm:$0xff]  }
 0x361   :  { %5820 = vmatprep.subr.bf16.mxu0 %v8472_v9  ;;  %7932 = vmatpush3.bf16.msra.mxu1 %v8617_v7  ;;  %v8535_v9 = vld [vmem:[%s14184_s4 + $0x584] ss:$24 sps:$4 sm:$0xff]  }
 0x362   :  { %7939 = vmatprep.subr.bf16.mxu1 %v8619_v24  ;;  %v15481_v7 = vld [vmem:[#allocation219_spill] sm:$0xff] }
 0x364   :  { %5821 = vmatpush1.bf16.msra.mxu0 %v8470_v50  ;;  %v8533_v50 = vld [vmem:[%s14184_s4 + $0x580] ss:$24 sps:$4 sm:$0xff]  }
 0x365   :  { %5822 = vmatprep.subr.bf16.mxu0 %v8475_v36  ;;  %v8538_v36 = vld [vmem:[%s14184_s4 + $0x5b4] ss:$24 sps:$4 sm:$0xff]  }
 0x368   :  { %5823 = vmatpush1.bf16.msra.mxu0 %v8473_v6  ;;  %v8536_v6 = vld [vmem:[%s14184_s4 + $0x5b0] ss:$24 sps:$4 sm:$0xff]  }
 0x369   :  { %5824 = vmatprep.subr.bf16.mxu0 %v8478_v55  ;;  %v8541_v55 = vld [vmem:[%s14184_s4 + $0x5e4] ss:$24 sps:$4 sm:$0xff]  }
 0x36c   :  { %5825 = vmatpush1.bf16.msra.mxu0 %v8476_v48  ;;  %v8539_v48 = vld [vmem:[%s14184_s4 + $0x5e0] ss:$24 sps:$4 sm:$0xff]  }
 0x36d   :  { %5826 = vmatprep.subr.bf16.mxu0 %v8481_v34  ;;  %v8544_v34 = vld [vmem:[%s14184_s4 + $0x614] ss:$24 sps:$4 sm:$0xff]  }
 0x370   :  { %5827 = vmatpush1.bf16.msra.mxu0 %v8479_v37  ;;  %v8542_v37 = vld [vmem:[%s14184_s4 + $0x610] ss:$24 sps:$4 sm:$0xff]  }
 0x371   :  { %5828 = vmatprep.subr.bf16.mxu0 %v8484_v1  ;;  %v8547_v1 = vld [vmem:[%s14184_s4 + $0x644] ss:$24 sps:$4 sm:$0xff]  }
 0x374   :  { %5829 = vmatpush1.bf16.msra.mxu0 %v8482_v17  ;;  %v8545_v17 = vld [vmem:[%s14184_s4 + $0x640] ss:$24 sps:$4 sm:$0xff]  }
 0x375   :  { %5830 = vmatprep.subr.bf16.mxu0 %v8487_v53  ;;  %v8550_v53 = vld [vmem:[%s14184_s4 + $0x674] ss:$24 sps:$4 sm:$0xff]  }
 0x378   :  { %5831 = vmatpush1.bf16.msra.mxu0 %v8485_v57  ;;  %v8548_v57 = vld [vmem:[%s14184_s4 + $0x670] ss:$24 sps:$4 sm:$0xff]  }
 0x379   :  { %5832 = vmatprep.subr.bf16.mxu0 %v8490_v23  ;;  %v8556_v23 = vld [vmem:[%s14184_s4 + $0x6d4] ss:$24 sps:$4 sm:$0xff]  }
 0x37c   :  { %5833 = vmatpush1.bf16.msra.mxu0 %v8488_v40  ;;  %v8554_v40 = vld [vmem:[%s14184_s4 + $0x6d0] ss:$24 sps:$4 sm:$0xff]  }
 0x37d   :  { %5834 = vmatprep.subr.bf16.mxu0 %v8493_v30  ;;  %v8559_v30 = vld [vmem:[%s14184_s4 + $0x704] ss:$24 sps:$4 sm:$0xff]  }
 0x380   :  { %5835 = vmatpush1.bf16.msra.mxu0 %v8491_v12  ;;  %v8557_v12 = vld [vmem:[%s14184_s4 + $0x700] ss:$24 sps:$4 sm:$0xff]  }
 0x381   :  { %5847 = vmatprep.subr.bf16.mxu0 %v8496_v35  ;;  %v8565_v35 = vld [vmem:[%s14184_s4 + $0x764] ss:$24 sps:$4 sm:$0xff]  }
 0x383   :  { %5837 = vmatmul.mubr.bf16.vlgmr.msra.gmra.mrb[4].mxu0 %v12854_v26  ;;  %v8502_v26 = vld [vmem:[%s14184_s4 + $0x374] ss:$24 sps:$4 sm:$0xff]  }
 0x384   :  { %5848 = vmatpush1.bf16.msra.mxu0 %v8494_v0  ;;  %5879 = vmatprep.mubr.bf16.mxu0 %v13062_v28  ;;  %v8500_v28 = vld [vmem:[%s14184_s4 + $0x370] ss:$24 sps:$4 sm:$0xff]   ;;  %v8563_v0 = vld [vmem:[%s14184_s4 + $0x760] ss:$24 sps:$4 sm:$0xff]  }
 0x385   :  { %5849 = vmatprep.subr.bf16.mxu0 %v8499_v38  ;;  %v8571_v38 = vld [vmem:[%s14184_s4 + $0x7c4] ss:$24 sps:$4 sm:$0xff]  }
 0x388   :  { %5850 = vmatpush1.bf16.msra.mxu0 %v8497_v2  ;;  %v8574_v2 = vld [vmem:[%s14184_s4 + $0x7f4] ss:$24 sps:$4 sm:$0xff]  }
 0x389   :  { %5851 = vmatprep.subr.bf16.mxu0 %v8502_v26  ;;  %v8577_v26 = vld [vmem:[%s14184_s4 + $0x824] ss:$24 sps:$4 sm:$0xff]  }
 0x38c   :  { %5852 = vmatpush1.bf16.msra.mxu0 %v8500_v28  ;;  %v8580_v28 = vld [vmem:[%s14184_s4 + $0x854] ss:$24 sps:$4 sm:$0xff]  }
 0x38d   :  { %5853 = vmatprep.subr.bf16.mxu0 %v8505_v4  ;;  %v8583_v4 = vld [vmem:[%s14184_s4 + $0x884] ss:$24 sps:$4 sm:$0xff]  }
 0x390   :  { %5854 = vmatpush1.bf16.msra.mxu0 %v8503_v25  ;;  %v8586_v25 = vld [vmem:[%s14184_s4 + $0x8b4] ss:$24 sps:$4 sm:$0xff]  }
 0x391   :  { %5855 = vmatprep.subr.bf16.mxu0 %v8508_v59  ;;  %v8591_v59 = vld [vmem:[%s14184_s4 + $0x8e4] ss:$24 sps:$4 sm:$0xff]  }
 0x394   :  { %5856 = vmatpush1.bf16.msra.mxu0 %v8506_v47  ;;  %v8594_v47 = vld [vmem:[#allocation4 + $0x40] sm:$0xff]  }
 0x395   :  { %5857 = vmatprep.subr.bf16.mxu0 %v8511_v52  ;;  %v8598_v52 = vld [vmem:[#allocation4 + $0x48] sm:$0xff]  }
 0x398   :  { %5858 = vmatpush1.bf16.msra.mxu0 %v8509_v56  ;;  %v8602_v56 = vld [vmem:[#allocation4 + $0x50] sm:$0xff]  }
 0x399   :  { %5859 = vmatprep.subr.bf16.mxu0 %v8514_v5  ;;  %v8606_v5 = vld [vmem:[#allocation4 + $0x58] sm:$0xff]  }
 0x39c   :  { %5860 = vmatpush1.bf16.msra.mxu0 %v8512_v43  ;;  %v8608_v43 = vld [vmem:[#allocation4 + $0x18] sm:$0xff]  }
 0x39d   :  { %5861 = vmatprep.subr.bf16.mxu0 %v8517_v58  ;;  %v8610_v58 = vld [vmem:[#allocation4 + $0x60] sm:$0xff]  }
 0x3a0   :  { %5862 = vmatpush1.bf16.msra.mxu0 %v8515_v45  ;;  %v13884_v45 = vld [vmem:[%s14185_s5] sm:$0x3f] }
 0x3a1   :  { %5863 = vmatprep.subr.bf16.mxu0 %v8520_v11  ;;  %v4079_v24 = vrot.slane %v13884_v45, %v15481_v7  ;;  %v15482_v11 = vld [vmem:[#allocation220_spill] sm:$0xff] }
 0x3a4   :  { %5864 = vmatpush1.bf16.msra.mxu0 %v8518_v14  ;;  %v4083_v14 = vrot.slane %v13884_v45, %v15482_v11  ;;  %v8643_v11 = vld [vmem:[%s14187_s7 + $0x108] sm:$0xff]  }
 0x3a5   :  { %5865 = vmatprep.subr.bf16.mxu0 %v8523_v21  ;;  %v4091_v21 = vrot.slane %v13884_v45, %v15310_v22 }
 0x3a8   :  { %5866 = vmatpush1.bf16.msra.mxu0 %v8521_v62  ;;  %v8616_v62 = vld [vmem:[#allocation4 + $0x28] sm:$0xff]  }
 0x3a9   :  { %5867 = vmatprep.subr.bf16.mxu0 %v8526_v39  ;;  %v8618_v39 = vld [vmem:[#allocation4 + $0x70] sm:$0xff]  }
 0x3ac   :  { %5868 = vmatpush1.bf16.msra.mxu0 %v8524_v61 }
 0x3ad   :  { %5869 = vmatprep.subr.bf16.mxu0 %v8529_v29 }
 0x3b0   :  { %5870 = vmatpush1.bf16.msra.mxu0 %v8527_v20 }
 0x3b1   :  { %5871 = vmatprep.subr.bf16.mxu0 %v8532_v44  ;;  %v15483_v44 = vld [vmem:[#allocation221_spill] sm:$0xff] }
 0x3b4   :  { %5872 = vmatpush1.bf16.msra.mxu0 %v8530_v16  ;;  %v13896_v16 = vrot.slane %v13884_v45, %v15483_v44  ;;  %v8659_v44 = vld [vmem:[%s14187_s7 + $0x128] sm:$0xff]  }
 0x3b5   :  { %5873 = vmatprep.subr.bf16.mxu0 %v8535_v9 }
 0x3b8   :  { %5874 = vmatpush1.bf16.msra.mxu0 %v8533_v50 }
 0x3b9   :  { %5875 = vmatprep.subr.bf16.mxu0 %v8538_v36 }
 0x3bc   :  { %5876 = vmatpush1.bf16.msra.mxu0 %v8536_v6 }
 0x3bd   :  { %5877 = vmatprep.subr.bf16.mxu0 %v8541_v55 }
 0x3c0   :  { %5878 = vmatpush1.bf16.msra.mxu0 %v8539_v48 }
 0x3c1   :  { %5890 = vmatprep.subr.bf16.mxu0 %v8544_v34  ;;  %v8620_v34 = vld [vmem:[#allocation4 + $0x30] sm:$0xff]  }
 0x3c3   :  { %5880 = vmatmul.mubr.bf16.vlgmr.msra.gmra.mrb[4].mxu0 %v13230_v51  ;;  %v8553_v51 = vld [vmem:[%s14184_s4 + $0x6a4] ss:$24 sps:$4 sm:$0xff]  }
 0x3c4   :  { %5891 = vmatpush1.bf16.msra.mxu0 %v8542_v37  ;;  %5922 = vmatprep.mubr.bf16.mxu0 %v13484_v3  ;;  %v8551_v3 = vld [vmem:[%s14184_s4 + $0x6a0] ss:$24 sps:$4 sm:$0xff]  }
 0x3c5   :  { %5892 = vmatprep.subr.bf16.mxu0 %v8547_v1 }
 0x3c8   :  { %5893 = vmatpush1.bf16.msra.mxu0 %v8545_v17  ;;  %v8622_v17 = vld [vmem:[#allocation4 + $0x78] sm:$0xff]  }
 0x3c9   :  { %5894 = vmatprep.subr.bf16.mxu0 %v8550_v53 }
 0x3cc   :  { %5895 = vmatpush1.bf16.msra.mxu0 %v8548_v57 }
 0x3cd   :  { %5896 = vmatprep.subr.bf16.mxu0 %v8553_v51 }
 0x3d0   :  { %5897 = vmatpush1.bf16.msra.mxu0 %v8551_v3  ;;  %v8621_v3 = vld [vmem:[%s14187_s7 + $0x80] sm:$0xff]  }
 0x3d1   :  { %5898 = vmatprep.subr.bf16.mxu0 %v8556_v23 }
 0x3d4   :  { %5899 = vmatpush1.bf16.msra.mxu0 %v8554_v40  ;;  %v8623_v40 = vld [vmem:[%s14187_s7 + $0xc8] sm:$0xff]  }
 0x3d5   :  { %5900 = vmatprep.subr.bf16.mxu0 %v8559_v30 }
 0x3d8   :  { %5901 = vmatpush1.bf16.msra.mxu0 %v8557_v12 }
 0x3d9   :  { %5902 = vmatprep.subr.bf16.mxu0 %v8562_v18  ;;  %v8624_v18 = vld [vmem:[#allocation4 + $0x38] sm:$0xff]  }
 0x3dc   :  { %5903 = vmatpush1.bf16.msra.mxu0 %v8560_v31 }
 0x3dd   :  { %5904 = vmatprep.subr.bf16.mxu0 %v8565_v35  ;;  %v8640_v35 = vld [vmem:[#allocation4 + $0x140] sm:$0xff]  }
 0x3e0   :  { %5905 = vmatpush1.bf16.msra.mxu0 %v8563_v0  ;;  %v8625_v0 = vld [vmem:[%s14187_s7 + $0x88] sm:$0xff]  }
 0x3e1   :  { %5906 = vmatprep.subr.bf16.mxu0 %v8568_v32  ;;  %v8626_v32 = vld [vmem:[%s14187_s7 + $0xd0] sm:$0xff]  }
 0x3e4   :  { %5907 = vmatpush1.bf16.msra.mxu0 %v8566_v41  ;;  %v8642_v41 = vld [vmem:[#allocation4 + $0x100] sm:$0xff]  }
 0x3e5   :  { %5908 = vmatprep.subr.bf16.mxu0 %v8571_v38 }
 0x3e8   :  { %5909 = vmatpush1.bf16.msra.mxu0 %v8569_v46  ;;  %v8644_v46 = vld [vmem:[#allocation4 + $0x148] sm:$0xff]  }
 0x3e9   :  { %5910 = vmatprep.subr.bf16.mxu0 %v8574_v2  ;;  %v8627_v2 = vld [vmem:[%s14187_s7 + $0x90] sm:$0xff]  }
 0x3ec   :  { %5911 = vmatpush1.bf16.msra.mxu0 %v8572_v27  ;;  %v8628_v27 = vld [vmem:[%s14187_s7 + $0xd8] sm:$0xff]  }
 0x3ed   :  { %5912 = vmatprep.subr.bf16.mxu0 %v8577_v26  ;;  %v8646_v26 = vld [vmem:[#allocation4 + $0x108] sm:$0xff]  }
 0x3f0   :  { %5913 = vmatpush1.bf16.msra.mxu0 %v8575_v8  ;;  %v8648_v8 = vld [vmem:[#allocation4 + $0x150] sm:$0xff]  }
 0x3f1   :  { %5914 = vmatprep.subr.bf16.mxu0 %v8580_v28  ;;  %v8629_v28 = vld [vmem:[%s14187_s7 + $0x98] sm:$0xff]  }
 0x3f4   :  { %5915 = vmatpush1.bf16.msra.mxu0 %v8578_v15  ;;  %v8630_v15 = vld [vmem:[%s14187_s7 + $0xe0] sm:$0xff]  }
 0x3f5   :  { %5916 = vmatprep.subr.bf16.mxu0 %v8583_v4  ;;  %v8650_v4 = vld [vmem:[#allocation4 + $0x110] sm:$0xff]  }
 0x3f8   :  { %5917 = vmatpush1.bf16.msra.mxu0 %v8581_v42  ;;  %v8652_v42 = vld [vmem:[#allocation4 + $0x158] sm:$0xff]  }
 0x3f9   :  { %5918 = vmatprep.subr.bf16.mxu0 %v8586_v25  ;;  %v8631_v25 = vld [vmem:[%s14187_s7 + $0xa0] sm:$0xff]  }
 0x3fc   :  { %5919 = vmatpush1.bf16.msra.mxu0 %v8584_v60  ;;  %v8632_v60 = vld [vmem:[%s14187_s7 + $0xe8] sm:$0xff]  }
 0x3fd   :  { %5920 = vmatprep.subr.bf16.mxu0 %v8591_v59  ;;  %v8654_v59 = vld [vmem:[#allocation4 + $0x118] sm:$0xff]  }
 0x400   :  { %5921 = vmatpush1.bf16.msra.mxu0 %v8589_v54  ;;  %v8656_v54 = vld [vmem:[#allocation4 + $0x160] sm:$0xff]  }
 0x401   :  { %8049 = vmatprep.subr.bf16.mxu0 %v8594_v47  ;;  %v8633_v47 = vld [vmem:[%s14187_s7 + $0xa8] sm:$0xff]  }
 0x403   :  { %5923 = vmatmul.mubr.bf16.vlgmr.msra.gmra.mrb[4].mxu0 %v13538_v19  ;;  %v8614_v19 = vld [vmem:[#allocation4 + $0x68] sm:$0xff]  }
 0x404   :  { %8050 = vmatpush3.bf16.msra.mxu0 %v8596_v10  ;;  %v8634_v10 = vld [vmem:[%s14187_s7 + $0xf0] sm:$0xff]  }
 0x405   :  { %8051 = vmatprep.subr.bf16.mxu0 %v8598_v52  ;;  %v8658_v52 = vld [vmem:[#allocation4 + $0x120] sm:$0xff]  }
 0x408   :  { %8052 = vmatpush3.bf16.msra.mxu0 %v8600_v49  ;;  %v8660_v49 = vld [vmem:[#allocation4 + $0x168] sm:$0xff]  }
 0x409   :  { %8053 = vmatprep.subr.bf16.mxu0 %v8602_v56  ;;  %v8635_v56 = vld [vmem:[%s14187_s7 + $0xb0] sm:$0xff]  }
 0x40c   :  { %8054 = vmatpush3.bf16.msra.mxu0 %v8604_v33  ;;  %v8636_v33 = vld [vmem:[%s14187_s7 + $0xf8] sm:$0xff]  }
 0x40d   :  { %8055 = vmatprep.subr.bf16.mxu0 %v8606_v5  ;;  %v8662_v5 = vld [vmem:[#allocation4 + $0x128] sm:$0xff]  }
 0x410   :  { %8056 = vmatpush3.bf16.msra.mxu0 %v8608_v43  ;;  %v8637_v43 = vld [vmem:[%s14187_s7 + $0xb8] sm:$0xff]  }
 0x411   :  { %8057 = vmatprep.subr.bf16.mxu0 %v8610_v58 }
 0x414   :  { %8058 = vmatpush3.bf16.msra.mxu0 %v8612_v13  ;;  %v8638_v13 = vld [vmem:[%s14187_s7 + $0x140] sm:$0xff]  }
 0x415   :  { %8059 = vmatprep.subr.bf16.mxu0 %v8614_v19  ;;  %v8639_v19 = vld [vmem:[%s14187_s7 + $0x100] sm:$0xff]  }
 0x416   :  { %v5666_v61 = vpop.f32.mrb[0].mxu0  ;;  %v13892_v29 = vpop.f32.mrb[0].mxu1 }
 0x417   :  { %v8115_v20 = vadd.f32 %v5666_v61, %v4079_v24  ;;  %v5668_v9 = vpop.f32.mrb[1].mxu0  ;;  %v5797_v50 = vpop.f32.mrb[1].mxu1  ;;  %v8119_v58 = vadd.f32 %v13892_v29, %v13896_v16  ;;  %v8653_v61 = vld [vmem:[%s14187_s7 + $0x160] sm:$0xff]  }
 0x418   :  { %v8116_v36 = vadd.f32 %v5668_v9, %v4083_v14  ;;  %v8120_v6 = vadd.f32 %v5797_v50, %v4091_v21  ;;  %v5670_v55 = vpop.f32.mrb[2].mxu0  ;;  %v5799_v48 = vpop.f32.mrb[2].mxu1  ;;  %8060 = vmatpush3.bf16.msra.mxu0 %v8616_v62  ;;  %v8649_v62 = vld [vmem:[%s14187_s7 + $0x158] sm:$0xff]   ;;  %v8655_v29 = vld [vmem:[%s14187_s7 + $0x120] sm:$0xff]   ;;  %v8663_v9 = vld [vmem:[%s14187_s7 + $0x130] sm:$0xff]  }
 0x419   :  { %v13899_v22 = vadd.f32 %v5799_v48, %v13896_v16  ;;  %v5672_v37 = vpop.f32.mrb[3].mxu0  ;;  %v5801_v1 = vpop.f32.mrb[3].mxu1  ;;  %8061 = vmatprep.subr.bf16.mxu0 %v8618_v39  ;;  %v5933_v23 = vpack.c.bf16 %v8115_v20, %v8115_v20  ;;  %v8117_v31 = vadd.f32 %v5670_v55, %v4079_v24  ;;  %v5935_v7 = vpack.c.bf16 %v8119_v58, %v8119_v58  ;;  %v8641_v24 = vld [vmem:[%s14187_s7 + $0x148] sm:$0xff]   ;;  %v8651_v39 = vld [vmem:[%s14187_s7 + $0x118] sm:$0xff]   ;;  %v8661_v16 = vld [vmem:[%s14187_s7 + $0x170] sm:$0xff]  }
 0x41a   :  { %v5934_v53 = vpack.c.bf16 %v8116_v36, %v8116_v36  ;;  %v8118_v57 = vadd.f32 %v5672_v37, %v4083_v14  ;;  %v13901_v51 = vadd.f32 %v5801_v1, %v4091_v21  ;;  %v5936_v30 = vpack.c.bf16 %v8120_v6, %v8120_v6  ;;  %v8645_v14 = vld [vmem:[%s14187_s7 + $0x150] sm:$0xff]   ;;  %v8657_v20 = vld [vmem:[%s14187_s7 + $0x168] sm:$0xff]   ;;  %v8665_v36 = vld [vmem:[%s14187_s7 + $0x178] sm:$0xff]  }
 0x41b   :  { %v5939_v38 = vpack.c.bf16 %v8117_v31, %v8117_v31  ;;  %v8647_v21 = vld [vmem:[%s14187_s7 + $0x110] sm:$0xff]   ;;  %v8667_v55 = vld [vmem:[%s14187_s7 + $0x138] sm:$0xff]   ;;  %v15484_v1 = vld [vmem:[#allocation223_spill] sm:$0xff] }
 0x41c   :  { %v5940_v12 = vpack.c.bf16 %v8118_v57, %v8118_v57  ;;  %6469 = vmatprep.mubr.bf16.mxu1 %v5934_v53  ;;  %8062 = vmatpush3.bf16.msra.mxu0 %v8620_v34  ;;  %v8664_v50 = vld [vmem:[#allocation4 + $0x170] sm:$0xff]   ;;  %v8668_v48 = vld [vmem:[#allocation4 + $0x178] sm:$0xff]   ;;  %v8669_v34 = vld [vmem:[%s14186_s6 + $0x40] sm:$0xff]   ;;  %v4099_v53 = vrot.slane %v13884_v45, %v15400_v63 }
 0x41d   :  { %6470 = vmatmul.mubr.bf16.vlgmr.msra.gmra.mrb[4].mxu1 %v5933_v23  ;;  %8063 = vmatprep.subr.bf16.mxu0 %v8622_v17  ;;  %v8666_v6 = vld [vmem:[#allocation4 + $0x130] sm:$0xff]   ;;  %v8670_v37 = vld [vmem:[#allocation4 + $0x138] sm:$0xff]   ;;  %v4095_v17 = vrot.slane %v13884_v45, %v15484_v1  ;;  %v5946_v31 = vld [vmem:[%s14183_s3 + $0x8] sm:$0xff] }
 0x41e   :  { %7940 = vmatpush3.bf16.msra.mxu1 %v8621_v3  ;;  %6509 = vmatprep.mubr.bf16.mxu1 %v5936_v30  ;;  %v8672_v63 = vld [vmem:[%s14186_s6 + $0x48] sm:$0xff]  }
 0x41f   :  { %7381 = vmatprep.mubr.bf16.mxu0 %v5940_v12  ;;  %7941 = vmatprep.subr.bf16.mxu1 %v8623_v40 }
 0x420   :  { %8064 = vmatpush3.bf16.msra.mxu0 %v8624_v18 }
 0x421   :  { %8093 = vmatprep.subr.bf16.mxu0 %v8640_v35 }
 0x422   :  { %7942 = vmatpush3.bf16.msra.mxu1 %v8625_v0 }
 0x423   :  { %7382 = vmatmul.mubr.bf16.vlgmr.msra.gmra.mrb[8].mxu0 %v5939_v38  ;;  %7943 = vmatprep.subr.bf16.mxu1 %v8626_v32  ;;  %v8671_v32 = vld [vmem:[%s14186_s6] sm:$0xff]   ;;  %v5952_v38 = vpack.c.bf16 %v5946_v31, %v5946_v31 }
 0x424   :  { %8094 = vmatpush3.bf16.msra.mxu0 %v8642_v41  ;;  %v8703_v31 = vld [vmem:[%s14186_s6 + $0x100] sm:$0xff]  }
 0x425   :  { %8095 = vmatprep.subr.bf16.mxu0 %v8644_v46 }
 0x426   :  { %7944 = vmatpush3.bf16.msra.mxu1 %v8627_v2  ;;  %v8673_v2 = vld [vmem:[%s14186_s6 + $0x8] sm:$0xff]  }
 0x427   :  { %7945 = vmatprep.subr.bf16.mxu1 %v8628_v27  ;;  %v8674_v27 = vld [vmem:[%s14186_s6 + $0x50] sm:$0xff]  }
 0x428   :  { %8096 = vmatpush3.bf16.msra.mxu0 %v8646_v26  ;;  %v8675_v26 = vld [vmem:[%s14186_s6 + $0x10] sm:$0xff]  }
 0x429   :  { %8097 = vmatprep.subr.bf16.mxu0 %v8648_v8  ;;  %v8676_v8 = vld [vmem:[%s14186_s6 + $0x58] sm:$0xff]  }
 0x42a   :  { %7946 = vmatpush3.bf16.msra.mxu1 %v8629_v28  ;;  %v8677_v28 = vld [vmem:[%s14186_s6 + $0x18] sm:$0xff]  }
 0x42b   :  { %7947 = vmatprep.subr.bf16.mxu1 %v8630_v15  ;;  %v8678_v15 = vld [vmem:[%s14186_s6 + $0x60] sm:$0xff]  }
 0x42c   :  { %8098 = vmatpush3.bf16.msra.mxu0 %v8650_v4  ;;  %v8679_v4 = vld [vmem:[%s14186_s6 + $0x20] sm:$0xff]  }
 0x42d   :  { %8099 = vmatprep.subr.bf16.mxu0 %v8652_v42  ;;  %v8680_v42 = vld [vmem:[%s14186_s6 + $0x68] sm:$0xff]  }
 0x42e   :  { %7948 = vmatpush3.bf16.msra.mxu1 %v8631_v25  ;;  %v8681_v25 = vld [vmem:[%s14186_s6 + $0x28] sm:$0xff]  }
 0x42f   :  { %7949 = vmatprep.subr.bf16.mxu1 %v8632_v60  ;;  %v8682_v60 = vld [vmem:[%s14186_s6 + $0x70] sm:$0xff]  }
 0x430   :  { %8100 = vmatpush3.bf16.msra.mxu0 %v8654_v59 }
 0x431   :  { %8101 = vmatprep.subr.bf16.mxu0 %v8656_v54 }
 0x432   :  { %7950 = vmatpush3.bf16.msra.mxu1 %v8633_v47 }
 0x433   :  { %7951 = vmatprep.subr.bf16.mxu1 %v8634_v10 }
 0x434   :  { %8102 = vmatpush3.bf16.msra.mxu0 %v8658_v52  ;;  %v8683_v52 = vld [vmem:[%s14186_s6 + $0x30] sm:$0xff]  }
 0x435   :  { %8103 = vmatprep.subr.bf16.mxu0 %v8660_v49 }
 0x436   :  { %7952 = vmatpush3.bf16.msra.mxu1 %v8635_v56  ;;  %v8684_v56 = vld [vmem:[%s14186_s6 + $0x78] sm:$0xff]  }
 0x437   :  { %7953 = vmatprep.subr.bf16.mxu1 %v8636_v33 }
 0x438   :  { %8104 = vmatpush3.bf16.msra.mxu0 %v8662_v5  ;;  %v8685_v5 = vld [vmem:[%s14186_s6 + $0x38] sm:$0xff]  }
 0x439   :  { %8105 = vmatprep.subr.bf16.mxu0 %v8664_v50  ;;  %v8695_v50 = vld [vmem:[%s14186_s6 + $0xa0] sm:$0xff]  }
 0x43a   :  { %7954 = vmatpush3.bf16.msra.mxu1 %v8637_v43  ;;  %v5945_v43 = vld [vmem:[%s14183_s3] sm:$0xff] }
 0x43b   :  { %7961 = vmatprep.subr.bf16.mxu1 %v8638_v13  ;;  %v8686_v13 = vld [vmem:[%s14186_s6 + $0xc0] sm:$0xff]  }
 0x43c   :  { %8106 = vmatpush3.bf16.msra.mxu0 %v8666_v6  ;;  %v8697_v6 = vld [vmem:[%s14186_s6 + $0xa8] sm:$0xff]  }
 0x43d   :  { %6510 = vmatmul.mubr.bf16.vlgmr.msra.gmra.mrb[8].mxu1 %v5935_v7  ;;  %8107 = vmatprep.subr.bf16.mxu0 %v8668_v48 }
 0x43e   :  { %7962 = vmatpush3.bf16.msra.mxu1 %v8639_v19  ;;  %v5948_v19 = vld [vmem:[%s14183_s3 + $0x18] sm:$0xff] }
 0x43f   :  { %7963 = vmatprep.subr.bf16.mxu1 %v8641_v24 }
 0x440   :  { %8108 = vmatpush3.bf16.msra.mxu0 %v8670_v37 }
 0x442   :  { %7964 = vmatpush3.bf16.msra.mxu1 %v8643_v11 }
 0x443   :  { %7965 = vmatprep.subr.bf16.mxu1 %v8645_v14  ;;  %v5951_v14 = vpack.c.bf16 %v5945_v43, %v5945_v43  ;;  %v8727_v43 = vld [vmem:[#allocation4 + $0xa0] sm:$0xff]  }
 0x446   :  { %7966 = vmatpush3.bf16.msra.mxu1 %v8647_v21  ;;  %v8687_v21 = vld [vmem:[%s14186_s6 + $0x80] sm:$0xff]  }
 0x447   :  { %7967 = vmatprep.subr.bf16.mxu1 %v8649_v62  ;;  %v5954_v62 = vpack.c.bf16 %v5948_v19, %v5948_v19  ;;  %v8731_v19 = vld [vmem:[#allocation4 + $0xb0] sm:$0xff]  }
 0x44a   :  { %7968 = vmatpush3.bf16.msra.mxu1 %v8651_v39  ;;  %v8688_v39 = vld [vmem:[%s14186_s6 + $0xc8] sm:$0xff]  }
 0x44b   :  { %7969 = vmatprep.subr.bf16.mxu1 %v8653_v61  ;;  %v8689_v61 = vld [vmem:[%s14186_s6 + $0x88] sm:$0xff]  }
 0x44e   :  { %7970 = vmatpush3.bf16.msra.mxu1 %v8655_v29  ;;  %v8690_v29 = vld [vmem:[%s14186_s6 + $0xd0] sm:$0xff]  }
 0x44f   :  { %7971 = vmatprep.subr.bf16.mxu1 %v8657_v20  ;;  %v8691_v20 = vld [vmem:[%s14186_s6 + $0x90] sm:$0xff]  }
 0x452   :  { %7972 = vmatpush3.bf16.msra.mxu1 %v8659_v44  ;;  %v8692_v44 = vld [vmem:[%s14186_s6 + $0xd8] sm:$0xff]  }
 0x453   :  { %7973 = vmatprep.subr.bf16.mxu1 %v8661_v16  ;;  %v8693_v16 = vld [vmem:[%s14186_s6 + $0x98] sm:$0xff]  }
 0x456   :  { %7974 = vmatpush3.bf16.msra.mxu1 %v8663_v9  ;;  %v8694_v9 = vld [vmem:[%s14186_s6 + $0xe0] sm:$0xff]  }
 0x457   :  { %7975 = vmatprep.subr.bf16.mxu1 %v8665_v36  ;;  %v8696_v36 = vld [vmem:[%s14186_s6 + $0xe8] sm:$0xff]  }
 0x45a   :  { %7976 = vmatpush3.bf16.msra.mxu1 %v8667_v55  ;;  %v8698_v55 = vld [vmem:[%s14186_s6 + $0xf0] sm:$0xff]  }
 0x45b   :  { %7983 = vmatprep.subr.bf16.mxu1 %v8669_v34 }
 0x4d6   :  { %v5924_v57 = vpop.f32.mrb[4].mxu0 }
 0x4d7   :  { %v8123_v3 = vadd.f32 %v5924_v57, %v4095_v17  ;;  %v5926_v23 = vpop.f32.mrb[5].mxu0  ;;  %v8700_v57 = vld [vmem:[%s14186_s6 + $0xf8] sm:$0xff]  }
 0x4d8   :  { %v8124_v40 = vadd.f32 %v5926_v23, %v4099_v53  ;;  %v5928_v30 = vpop.f32.mrb[6].mxu0  ;;  %v8701_v23 = vld [vmem:[%s14186_s6 + $0xb8] sm:$0xff]  }
 0x4d9   :  { %v8125_v12 = vadd.f32 %v5928_v30, %v4095_v17  ;;  %v5930_v18 = vpop.f32.mrb[7].mxu0  ;;  %v5937_v41 = vpack.c.bf16 %v8123_v3, %v8123_v3  ;;  %v8699_v17 = vld [vmem:[%s14186_s6 + $0xb0] sm:$0xff]   ;;  %v8702_v30 = vld [vmem:[%s14186_s6 + $0x140] sm:$0xff]  }
 0x4da   :  { %v5938_v35 = vpack.c.bf16 %v8124_v40, %v8124_v40  ;;  %v8126_v0 = vadd.f32 %v5930_v18, %v4099_v53  ;;  %v5947_v40 = vld [vmem:[%s14183_s3 + $0x10] sm:$0xff] }
 0x4db   :  { %v5943_v46 = vpack.c.bf16 %v8125_v12, %v8125_v12  ;;  %v5950_v12 = vld [vmem:[%s14183_s3 + $0x28] sm:$0xff]  ;;  %v5953_v18 = vpack.c.bf16 %v5947_v40, %v5947_v40 }
 0x4dc   :  { %v5944_v45 = vpack.c.bf16 %v8126_v0, %v8126_v0  ;;  %6549 = vmatprep.mubr.bf16.mxu1 %v5938_v35  ;;  %v5956_v35 = vpack.c.bf16 %v5950_v12, %v5950_v12  ;;  %v8704_v0 = vld [vmem:[%s14186_s6 + $0x148] sm:$0xff]  }
 0x4dd   :  { %6550 = vmatmul.mubr.bf16.vlgmr.msra.gmra.mrb[12].mxu1 %v5937_v41  ;;  %v8706_v41 = vld [vmem:[%s14186_s6 + $0x150] sm:$0xff]  }
 0x4de   :  { %7984 = vmatpush3.bf16.msra.mxu1 %v8671_v32  ;;  %7461 = vmatprep.mubr.bf16.mxu0 %v5944_v45  ;;  %v8705_v32 = vld [vmem:[%s14186_s6 + $0x108] sm:$0xff]   ;;  %v8708_v45 = vld [vmem:[%s14186_s6 + $0x158] sm:$0xff]  }
 0x4df   :  { %7462 = vmatmul.mubr.bf16.vlgmr.msra.gmra.mrb[12].mxu0 %v5943_v46  ;;  %7985 = vmatprep.subr.bf16.mxu1 %v8672_v63  ;;  %v8707_v63 = vld [vmem:[%s14186_s6 + $0x110] sm:$0xff]   ;;  %v8710_v46 = vld [vmem:[%s14186_s6 + $0x160] sm:$0xff]  }
 0x4e0   :  { %6877 = vmatprep.mubr.bf16.mxu1 %v5952_v38  ;;  %v8709_v38 = vld [vmem:[%s14186_s6 + $0x118] sm:$0xff]  }
 0x4e2   :  { %7986 = vmatpush3.bf16.msra.mxu1 %v8673_v2  ;;  %v8711_v2 = vld [vmem:[%s14186_s6 + $0x120] sm:$0xff]  }
 0x4e3   :  { %7987 = vmatprep.subr.bf16.mxu1 %v8674_v27  ;;  %v8712_v27 = vld [vmem:[%s14186_s6 + $0x168] sm:$0xff]  }
 0x4e6   :  { %7988 = vmatpush3.bf16.msra.mxu1 %v8675_v26  ;;  %v8713_v26 = vld [vmem:[%s14186_s6 + $0x128] sm:$0xff]  }
 0x4e7   :  { %7989 = vmatprep.subr.bf16.mxu1 %v8676_v8  ;;  %v8714_v8 = vld [vmem:[%s14186_s6 + $0x170] sm:$0xff]  }
 0x4ea   :  { %7990 = vmatpush3.bf16.msra.mxu1 %v8677_v28  ;;  %v8715_v28 = vld [vmem:[%s14186_s6 + $0x130] sm:$0xff]  }
 0x4eb   :  { %7991 = vmatprep.subr.bf16.mxu1 %v8678_v15  ;;  %v8716_v15 = vld [vmem:[%s14186_s6 + $0x178] sm:$0xff]  }
 0x4ee   :  { %7992 = vmatpush3.bf16.msra.mxu1 %v8679_v4  ;;  %v8717_v4 = vld [vmem:[%s14186_s6 + $0x138] sm:$0xff]  }
 0x4ef   :  { %7993 = vmatprep.subr.bf16.mxu1 %v8680_v42  ;;  %v5949_v42 = vld [vmem:[%s14183_s3 + $0x20] sm:$0xff] }
 0x4f0   :  { %v7933_v59 = vpop.f32.mrb[4].mxu1 }
 0x4f1   :  { %v7934_v54 = vpop.f32.mrb[5].mxu1 }
 0x4f2   :  { %v7935_v47 = vadd.f32 %v7934_v54, %v7933_v59  ;;  %7994 = vmatpush3.bf16.msra.mxu1 %v8681_v25  ;;  %v7936_v10 = vpop.f32.mrb[6].mxu1  ;;  %v8718_v25 = vld [vmem:[#allocation4 + $0xc0] sm:$0xff]   ;;  %v8720_v54 = vld [vmem:[#allocation4 + $0xc8] sm:$0xff]  }
 0x4f3   :  { %v7937_v49 = vpop.f32.mrb[7].mxu1  ;;  %7995 = vmatprep.subr.bf16.mxu1 %v8682_v60  ;;  %v5955_v60 = vpack.c.bf16 %v5949_v42, %v5949_v42  ;;  %v8719_v59 = vld [vmem:[#allocation4 + $0x80] sm:$0xff]   ;;  %v8721_v10 = vld [vmem:[#allocation4 + $0x88] sm:$0xff]  }
 0x4f4   :  { %v8723_v49 = vld [vmem:[#allocation4 + $0x90] sm:$0xff]  }
 0x4f6   :  { %7996 = vmatpush3.bf16.msra.mxu1 %v8683_v52  ;;  %v8065_v33 = vpop.f32.mrb[8].mxu0  ;;  %v8722_v52 = vld [vmem:[#allocation4 + $0xd0] sm:$0xff]  }
 0x4f7   :  { %v8066_v58 = vpop.f32.mrb[9].mxu0  ;;  %7997 = vmatprep.subr.bf16.mxu1 %v8684_v56  ;;  %v8724_v56 = vld [vmem:[#allocation4 + $0xd8] sm:$0xff]  }
 0x4f8   :  { %v14062_v7 = vadd.f32 %v8066_v58, %v8065_v33  ;;  %v8068_v24 = vpop.f32.mrb[10].mxu0  ;;  %v8725_v33 = vld [vmem:[#allocation4 + $0x98] sm:$0xff]   ;;  %v8728_v58 = vld [vmem:[#allocation4 + $0xe8] sm:$0xff]  }
 0x4f9   :  { %v8069_v11 = vpop.f32.mrb[11].mxu0  ;;  %v8732_v24 = vld [vmem:[#allocation4 + $0xf8] sm:$0xff]  }
 0x4fa   :  { %7998 = vmatpush3.bf16.msra.mxu1 %v8685_v5  ;;  %v8726_v5 = vld [vmem:[#allocation4 + $0xe0] sm:$0xff]   ;;  %v8733_v11 = vld [vmem:[#allocation4 + $0xb8] sm:$0xff]  }
 0x4fb   :  { %8005 = vmatprep.subr.bf16.mxu1 %v8686_v13  ;;  %v8730_v13 = vld [vmem:[#allocation4 + $0xf0] sm:$0xff]  }
 0x4fd   :  { %6878 = vmatmul.mubr.bf16.vlgmr.msra.gmra.mrb[16].mxu1 %v5951_v14  ;;  %v5941_v14 = vpack.c.bf16 %v13899_v22, %v13899_v22 }
 0x4fe   :  { %8006 = vmatpush3.bf16.msra.mxu1 %v8687_v21  ;;  %6917 = vmatprep.mubr.bf16.mxu1 %v5954_v62 }
 0x4ff   :  { %8007 = vmatprep.subr.bf16.mxu1 %v8688_v39 }
 0x502   :  { %8008 = vmatpush3.bf16.msra.mxu1 %v8689_v61 }
 0x503   :  { %8009 = vmatprep.subr.bf16.mxu1 %v8690_v29 }
 0x506   :  { %8010 = vmatpush3.bf16.msra.mxu1 %v8691_v20 }
 0x507   :  { %8011 = vmatprep.subr.bf16.mxu1 %v8692_v44 }
 0x50a   :  { %8012 = vmatpush3.bf16.msra.mxu1 %v8693_v16 }
 0x50b   :  { %8013 = vmatprep.subr.bf16.mxu1 %v8694_v9 }
 0x50e   :  { %8014 = vmatpush3.bf16.msra.mxu1 %v8695_v50 }
 0x50f   :  { %8015 = vmatprep.subr.bf16.mxu1 %v8696_v36 }
 0x510   :  { %v7955_v48 = vpop.f32.mrb[8].mxu1 }
 0x511   :  { %v7956_v34 = vpop.f32.mrb[9].mxu1 }
 0x512   :  { %v7957_v37 = vadd.f32 %v7956_v34, %v7955_v48  ;;  %v7958_v1 = vpop.f32.mrb[10].mxu1  ;;  %8016 = vmatpush3.bf16.msra.mxu1 %v8697_v6 }
 0x513   :  { %v7959_v53 = vpop.f32.mrb[11].mxu1  ;;  %8017 = vmatprep.subr.bf16.mxu1 %v8698_v55 }
 0x514   :  { %v14106_v3 = vadd.f32 %v7957_v37, %v7935_v47  ;;  %v5942_v47 = vpack.c.bf16 %v13901_v51, %v13901_v51  ;;  %v8729_v51 = vld [vmem:[#allocation4 + $0xa8] sm:$0xff]  }
 0x516   :  { %8018 = vmatpush3.bf16.msra.mxu1 %v8699_v17 }
 0x517   :  { %8019 = vmatprep.subr.bf16.mxu1 %v8700_v57 }
 0x51a   :  { %8020 = vmatpush3.bf16.msra.mxu1 %v8701_v23 }
 0x51b   :  { %8027 = vmatprep.subr.bf16.mxu1 %v8702_v30 }
 0x51d   :  { %6918 = vmatmul.mubr.bf16.vlgmr.msra.gmra.mrb[20].mxu1 %v5953_v18 }
 0x51e   :  { %8028 = vmatpush3.bf16.msra.mxu1 %v8703_v31  ;;  %6957 = vmatprep.mubr.bf16.mxu1 %v5956_v35 }
 0x51f   :  { %8029 = vmatprep.subr.bf16.mxu1 %v8704_v0 }
 0x522   :  { %8030 = vmatpush3.bf16.msra.mxu1 %v8705_v32 }
 0x523   :  { %8031 = vmatprep.subr.bf16.mxu1 %v8706_v41 }
 0x526   :  { %8032 = vmatpush3.bf16.msra.mxu1 %v8707_v63 }
 0x527   :  { %8033 = vmatprep.subr.bf16.mxu1 %v8708_v45 }
 0x52a   :  { %8034 = vmatpush3.bf16.msra.mxu1 %v8709_v38 }
 0x52b   :  { %8035 = vmatprep.subr.bf16.mxu1 %v8710_v46 }
 0x52e   :  { %8036 = vmatpush3.bf16.msra.mxu1 %v8711_v2  ;;  %v7916_v2 = vld [vmem:[%s14189_s9] ss:$0 sm:$0xff] }
 0x52f   :  { %8037 = vmatprep.subr.bf16.mxu1 %v8712_v27 }
 0x532   :  { %8038 = vmatpush3.bf16.msra.mxu1 %v8713_v26 }
 0x533   :  { %8039 = vmatprep.subr.bf16.mxu1 %v8714_v8 }
 0x536   :  { %8040 = vmatpush3.bf16.msra.mxu1 %v8715_v28 }
 0x537   :  { %8041 = vmatprep.subr.bf16.mxu1 %v8716_v15 }
 0x53a   :  { %8042 = vmatpush3.bf16.msra.mxu1 %v8717_v4 }
 0x53b   :  { %8071 = vmatprep.subr.bf16.mxu1 %v8718_v25 }
 0x53d   :  { %6958 = vmatmul.mubr.bf16.vlgmr.msra.gmra.mrb[24].mxu1 %v5955_v60 }
 0x53e   :  { %8072 = vmatpush3.bf16.msra.mxu1 %v8719_v59  ;;  %7421 = vmatprep.mubr.bf16.mxu1 %v5942_v47 }
 0x53f   :  { %8073 = vmatprep.subr.bf16.mxu1 %v8720_v54 }
 0x542   :  { %8074 = vmatpush3.bf16.msra.mxu1 %v8721_v10 }
 0x543   :  { %8075 = vmatprep.subr.bf16.mxu1 %v8722_v52 }
 0x546   :  { %8076 = vmatpush3.bf16.msra.mxu1 %v8723_v49 }
 0x547   :  { %8077 = vmatprep.subr.bf16.mxu1 %v8724_v56 }
 0x54a   :  { %8078 = vmatpush3.bf16.msra.mxu1 %v8725_v33 }
 0x54b   :  { %8079 = vmatprep.subr.bf16.mxu1 %v8726_v5 }
 0x54e   :  { %8080 = vmatpush3.bf16.msra.mxu1 %v8727_v43 }
 0x54f   :  { %8081 = vmatprep.subr.bf16.mxu1 %v8728_v58 }
 0x552   :  { %8082 = vmatpush3.bf16.msra.mxu1 %v8729_v51 }
 0x553   :  { %8083 = vmatprep.subr.bf16.mxu1 %v8730_v13 }
 0x556   :  { %8084 = vmatpush3.bf16.msra.mxu1 %v8731_v19 }
 0x557   :  { %8085 = vmatprep.subr.bf16.mxu1 %v8732_v24 }
 0x55a   :  { %8086 = vmatpush3.bf16.msra.mxu1 %v8733_v11 }
 0x55d   :  { %7422 = vmatmul.mubr.bf16.vlgmr.msra.gmra.mrb[28].mxu1 %v5941_v14 }
 0x5b0   :  { %v7977_v21 = vpop.f32.mrb[12].mxu1 }
 0x5b1   :  { %v7978_v62 = vpop.f32.mrb[13].mxu1 }
 0x5b2   :  { %v7979_v39 = vadd.f32 %v7978_v62, %v7977_v21  ;;  %v7980_v61 = vpop.f32.mrb[14].mxu1  ;;  %v8109_v29 = vpop.f32.mrb[12].mxu0 }
 0x5b3   :  { %v7981_v20 = vpop.f32.mrb[15].mxu1  ;;  %v8110_v44 = vpop.f32.mrb[13].mxu0 }
 0x5b4   :  { %v6552_v16 = vadd.f32 %v7979_v39, %v14106_v3  ;;  %v8111_v9 = vadd.f32 %v8110_v44, %v8109_v29  ;;  %v8112_v50 = vpop.f32.mrb[14].mxu0 }
 0x5b5   :  { %v8113_v36 = vpop.f32.mrb[15].mxu0 }
 0x5d0   :  { %v7999_v6 = vpop.f32.mrb[16].mxu1 }
 0x5d1   :  { %v8000_v55 = vpop.f32.mrb[17].mxu1 }
 0x5d2   :  { %v8001_v48 = vadd.f32 %v8000_v55, %v7999_v6  ;;  %v8002_v34 = vpop.f32.mrb[18].mxu1 }
 0x5d3   :  { %v8003_v37 = vpop.f32.mrb[19].mxu1 }
 0x5d4   :  { %v6880_v1 = vadd.f32 %v8001_v48, %v6552_v16 }
 0x5f0   :  { %v8021_v22 = vpop.f32.mrb[20].mxu1 }
 0x5f1   :  { %v8022_v17 = vpop.f32.mrb[21].mxu1 }
 0x5f2   :  { %v8023_v53 = vadd.f32 %v8022_v17, %v8021_v22  ;;  %v8024_v57 = vpop.f32.mrb[22].mxu1 }
 0x5f3   :  { %v8025_v23 = vpop.f32.mrb[23].mxu1 }
 0x5f4   :  { %v6920_v40 = vadd.f32 %v8023_v53, %v6880_v1 }
 0x610   :  { %v8043_v30 = vpop.f32.mrb[24].mxu1 }
 0x611   :  { %v8044_v12 = vpop.f32.mrb[25].mxu1 }
 0x612   :  { %v8045_v18 = vadd.f32 %v8044_v12, %v8043_v30  ;;  %v8046_v31 = vpop.f32.mrb[26].mxu1 }
 0x613   :  { %v8047_v3 = vpop.f32.mrb[27].mxu1 }
 0x614   :  { %v6960_v35 = vadd.f32 %v8045_v18, %v6920_v40 }
 0x630   :  { %v8087_v0 = vpop.f32.mrb[28].mxu1 }
 0x631   :  { %v8088_v32 = vpop.f32.mrb[29].mxu1 }
 0x632   :  { %v8089_v41 = vadd.f32 %v8088_v32, %v8087_v0  ;;  %v8090_v63 = vpop.f32.mrb[30].mxu1 }
 0x633   :  { %v8091_v45 = vpop.f32.mrb[31].mxu1 }
 0x634   :  { %v7424_v38 = vadd.f32 %v8089_v41, %v14062_v7 }
 0x636   :  { %v7464_v46 = vadd.f32 %v8111_v9, %v7424_v38 }
 0x638   :  { %v7469_v27 = vadd.f32 %v7464_v46, %v6960_v35 }
 0x63a   :  { %v7477_v26 = vadd.f32 %v7916_v2, %v7469_v27 }
 0x63c   :  { %7478 = vst [vmem:[%s14190_s10] sm:$0xff] %v7477_v26 }
 0x63d   :  { %7483 = vsyncpa [#allocation5], 1 }

</bundles_post_ra>
